<compile_context>
chip_gen: v6e
topology: v6e:2x2x1
jax: 0.10.0
libtpu: 0.0.40
codegen_flags: <defaults>
</compile_context>

<pallas_src>
import jax
import jax.numpy as jnp
from jax.experimental import pallas as pl
from jax.experimental.pallas import tpu as pltpu


_LAYER_DIMS = (2048, 1024, 512, 256, 1)


def _leaky_relu(y):
    return jnp.where(y > 0, y, 0.2 * y)   # LeakyReLU(0.2)


def _choose_k_tiling(K):
    """Lane-aligned layer-1 K tile with >=2 pipeline steps, capped at 1024."""
    target_steps = max(2, pl.cdiv(K, 1024))
    tk = ((pl.cdiv(K, target_steps) + 127) // 128) * 128
    tk = max(tk, 128)
    k_steps = pl.cdiv(K, tk)
    return tk, k_steps, tk * k_steps


def _fused_disc_kernel(x_ref, w1_ref, b1_ref, w2_hbm, b2_ref, w3_hbm, b3_ref,
                       w4_hbm, b4_ref, w5_ref, b5_ref, o_ref,
                       acc_ref, w2_buf, w3_buf, w4_buf, dma_sem):
    k = pl.program_id(0)
    last = pl.num_programs(0) - 1

    @pl.when(k == 0)
    def _():
        acc_ref[...] = jnp.zeros_like(acc_ref)
        # Start pulling the resident tail-layer weights into VMEM now; they
        # are only needed in the final-K epilogue, so this DMA is hidden
        # behind the layer-1 K loop.
        pltpu.make_async_copy(w2_hbm, w2_buf, dma_sem.at[0]).start()
        pltpu.make_async_copy(w3_hbm, w3_buf, dma_sem.at[1]).start()
        pltpu.make_async_copy(w4_hbm, w4_buf, dma_sem.at[2]).start()

    # Layer 1: K-tiled bf16 weight streaming, f32 accumulation on the MXU.
    acc_ref[...] += jnp.dot(
        x_ref[...], w1_ref[...], preferred_element_type=jnp.float32
    )

    # Final-K epilogue: layer-1 bias + LeakyReLU, the small tail layers from
    # VMEM scratch, a VPU reduction for the 256->1 layer, sigmoid, one store.
    @pl.when(k == last)
    def _():
        pltpu.make_async_copy(w2_hbm, w2_buf, dma_sem.at[0]).wait()
        pltpu.make_async_copy(w3_hbm, w3_buf, dma_sem.at[1]).wait()
        pltpu.make_async_copy(w4_hbm, w4_buf, dma_sem.at[2]).wait()

        h = _leaky_relu(acc_ref[...] + b1_ref[...])           # f32 VPU math
        for w_buf, b_ref in ((w2_buf, b2_ref),
                             (w3_buf, b3_ref),
                             (w4_buf, b4_ref)):
            h = jnp.dot(h.astype(jnp.bfloat16), w_buf[...],
                        preferred_element_type=jnp.float32) + b_ref[...]
            h = _leaky_relu(h)
        # Layer 5 (256 -> 1): lane-wise multiply + reduce in f32 (no N=1 MXU
        # pass, no non-lane-aligned weight block).
        logits = jnp.sum(h * w5_ref[...], axis=-1, keepdims=True) + b5_ref[...]
        o_ref[...] = jax.nn.sigmoid(logits).astype(o_ref.dtype)


def _discriminator_pallas(h, prepared):
    """h: (B, K) f32 activations; prepared: dict from prepare_discriminator_params."""
    B, K = h.shape
    N1, N2, N3, N4, N5 = _LAYER_DIMS

    tk, k_steps, K_pad = _choose_k_tiling(K)
    w1 = prepared["w1"]
    assert w1.shape == (K_pad, N1), (w1.shape, K_pad, N1)

    # Only the (tiny) activations are cast/padded per call; weights were
    # pre-cast / pre-padded once in prepare_discriminator_params.
    h = h.astype(jnp.bfloat16)
    if K_pad != K:                                   # zero-pad -> exact
        h = jnp.pad(h, ((0, 0), (0, K_pad - K)))

    const = lambda k: (0, 0)                         # loaded once, resident

    return pl.pallas_call(
        _fused_disc_kernel,
        out_shape=jax.ShapeDtypeStruct((B, N5), jnp.float32),
        grid_spec=pltpu.PrefetchScalarGridSpec(
            num_scalar_prefetch=0,
            grid=(k_steps,),
            in_specs=[
                pl.BlockSpec((B, tk), lambda k: (0, k)),    # x (K-streamed)
                pl.BlockSpec((tk, N1), lambda k: (k, 0)),   # w1 (K-streamed)
                pl.BlockSpec((1, N1), const),               # b1
                pl.BlockSpec(memory_space=pl.ANY),          # w2 (manual DMA)
                pl.BlockSpec((1, N2), const),               # b2
                pl.BlockSpec(memory_space=pl.ANY),          # w3 (manual DMA)
                pl.BlockSpec((1, N3), const),               # b3
                pl.BlockSpec(memory_space=pl.ANY),          # w4 (manual DMA)
                pl.BlockSpec((1, N4), const),               # b4
                pl.BlockSpec((1, N4), const),               # w5 row (f32)
                pl.BlockSpec((1, 1), const),                # b5
            ],
            out_specs=pl.BlockSpec((B, N5), const),
            scratch_shapes=[
                pltpu.VMEM((B, N1), jnp.float32),           # layer-1 accumulator
                pltpu.VMEM((N1, N2), jnp.bfloat16),         # w2 resident copy
                pltpu.VMEM((N2, N3), jnp.bfloat16),         # w3 resident copy
                pltpu.VMEM((N3, N4), jnp.bfloat16),         # w4 resident copy
                pltpu.SemaphoreType.DMA((3,)),
            ],
        ),
        compiler_params=pltpu.CompilerParams(
            dimension_semantics=("arbitrary",),             # K is a reduction
            vmem_limit_bytes=40 * 1024 * 1024,
        ),
    )(h, prepared["w1"], prepared["b1"],
      prepared["w2"], prepared["b2"],
      prepared["w3"], prepared["b3"],
      prepared["w4"], prepared["b4"],
      prepared["w5row"], prepared["b5"])


def init_discriminator_params(key, in_dim):
    """Deterministic init mimicking PyTorch Linear default U[-1/sqrt(fan_in), +]."""
    dims = [in_dim, *_LAYER_DIMS]
    params = []
    for i in range(len(dims) - 1):
        fan_in, fan_out = dims[i], dims[i + 1]
        key, kw, kb = jax.random.split(key, 3)
        bound = 1.0 / jnp.sqrt(jnp.float32(fan_in))
        w = jax.random.uniform(kw, (fan_in, fan_out), jnp.float32,
                               minval=-bound, maxval=bound)
        b = jax.random.uniform(kb, (1, fan_out), jnp.float32,
                               minval=-bound, maxval=bound)
        params.append((w, b))
    return params


def prepare_discriminator_params(params):
    """One-time: cast streaming weights to bf16, pad w1's K dim to the tile grid."""
    (w1, b1), (w2, b2), (w3, b3), (w4, b4), (w5, b5) = params
    K = w1.shape[0]
    _, _, K_pad = _choose_k_tiling(K)
    w1b = w1.astype(jnp.bfloat16)
    if K_pad != K:
        w1b = jnp.pad(w1b, ((0, K_pad - K), (0, 0)))
    return {
        "w1": w1b, "b1": b1,
        "w2": w2.astype(jnp.bfloat16), "b2": b2,
        "w3": w3.astype(jnp.bfloat16), "b3": b3,
        "w4": w4.astype(jnp.bfloat16), "b4": b4,
        "w5row": jnp.transpose(w5).astype(jnp.float32),   # (1, 256), f32
        "b5": b5,                                         # (1, 1), f32
    }


@jax.jit
def discriminator_forward(x, prepared):
    # x: (B, C, H, W) -> flatten exactly like torch's x.view(B, -1).
    # Note: concatenating real+fake batches into a single call amortizes the
    # weight stream (runtime is ~flat in B up to the MXU row count).
    B = x.shape[0]
    h = x.reshape(B, -1)
    return _discriminator_pallas(h, prepared)   # (B, 1)


def _reference_forward_bf16(x, params):
    """Pure-JAX reference with the kernel's numerics (bf16 MXU, f32 elsewhere)."""
    B = x.shape[0]
    h = x.reshape(B, -1).astype(jnp.bfloat16)
    n = len(params)
    for i, (w, b) in enumerate(params):
        if i < n - 1:
            y = jnp.dot(h, w.astype(jnp.bfloat16),
                        preferred_element_type=jnp.float32) + b
            h = _leaky_relu(y).astype(jnp.bfloat16)
        else:
            y = jnp.dot(h.astype(jnp.float32), w) + b      # final layer in f32
            h = jax.nn.sigmoid(y)
    return h


def _reference_forward_f32(x, params):
    B = x.shape[0]
    h = x.reshape(B, -1)
    for i, (w, b) in enumerate(params):
        h = h @ w + b
        h = _leaky_relu(h) if i < len(params) - 1 else jax.nn.sigmoid(h)
    return h


if __name__ == "__main__":
    key = jax.random.PRNGKey(0)
    kx, kp = jax.random.split(key)

    # Small but consistent shapes: batch=2, 3x16x16 image -> in_dim=768.
    B, C, H, W = 2, 3, 16, 16
    in_dim = C * H * W
    x = jax.random.normal(kx, (B, C, H, W), jnp.float32)

    params = init_discriminator_params(kp, in_dim)
    prepared = prepare_discriminator_params(params)   # one-time bf16 cast / pad

    out = jax.block_until_ready(discriminator_forward(x, prepared))

    ref_bf16 = _reference_forward_bf16(x, params)   # same-precision reference
    ref_f32 = _reference_forward_f32(x, params)     # full-f32 sanity reference

    assert out.shape == (B, 1), out.shape
    assert jnp.allclose(out, ref_bf16, atol=2e-2, rtol=2e-2), (out, ref_bf16)
    assert jnp.allclose(out, ref_f32, atol=5e-2, rtol=0.0), (out, ref_f32)

    print("KERNEL_OK")
</pallas_src>

<mosaic_0001>
module attributes {stable_mosaic.version = 11 : i64} {
  func.func @_fused_disc_kernel(%arg0: i32, %arg1: memref<2x384xbf16, #tpu.memory_space<vmem>>, %arg2: memref<384x2048xbf16, #tpu.memory_space<vmem>>, %arg3: memref<1x2048xf32, #tpu.memory_space<vmem>>, %arg4: memref<2048x1024xbf16, #tpu.memory_space<any>>, %arg5: memref<1x1024xf32, #tpu.memory_space<vmem>>, %arg6: memref<1024x512xbf16, #tpu.memory_space<any>>, %arg7: memref<1x512xf32, #tpu.memory_space<vmem>>, %arg8: memref<512x256xbf16, #tpu.memory_space<any>>, %arg9: memref<1x256xf32, #tpu.memory_space<vmem>>, %arg10: memref<1x256xf32, #tpu.memory_space<vmem>>, %arg11: memref<1x1xf32, #tpu.memory_space<vmem>>, %arg12: memref<2x1xf32, #tpu.memory_space<vmem>>, %arg13: memref<2x2048xf32, #tpu.memory_space<vmem>>, %arg14: memref<2048x1024xbf16, #tpu.memory_space<vmem>>, %arg15: memref<1024x512xbf16, #tpu.memory_space<vmem>>, %arg16: memref<512x256xbf16, #tpu.memory_space<vmem>>, %arg17: memref<3x!tpu.dma_semaphore, #tpu.memory_space<semaphore_mem>>) attributes {dimension_semantics = [#tpu.dimension_semantics<arbitrary>], iteration_bounds = array<i64: 2>, scalar_prefetch = 0 : i64, scratch_operands = 5 : i64, tpu.core_type = #tpu.core_type<tc>, window_params = [{transform_indices = @transform_0, window_bounds = array<i64: 2, 384>}, {transform_indices = @transform_1, window_bounds = array<i64: 384, 2048>}, {pipeline_mode = #tpu.pipeline_mode<synchronous>, transform_indices = @transform_2, window_bounds = array<i64: 1, 2048>}, {}, {pipeline_mode = #tpu.pipeline_mode<synchronous>, transform_indices = @transform_4, window_bounds = array<i64: 1, 1024>}, {}, {pipeline_mode = #tpu.pipeline_mode<synchronous>, transform_indices = @transform_6, window_bounds = array<i64: 1, 512>}, {}, {pipeline_mode = #tpu.pipeline_mode<synchronous>, transform_indices = @transform_8, window_bounds = array<i64: 1, 256>}, {pipeline_mode = #tpu.pipeline_mode<synchronous>, transform_indices = @transform_9, window_bounds = array<i64: 1, 256>}, {pipeline_mode = #tpu.pipeline_mode<synchronous>, transform_indices = @transform_10, window_bounds = array<i64: 1, 1>}, {pipeline_mode = #tpu.pipeline_mode<synchronous>, transform_indices = @transform_11, window_bounds = array<i64: 2, 1>}]} {
    %c0_i32 = arith.constant 0 : i32
    %0 = arith.cmpi eq, %arg0, %c0_i32 : i32
    %1 = arith.extui %0 : i1 to i32
    %c0_i32_0 = arith.constant 0 : i32
    %2 = arith.cmpi ne, %1, %c0_i32_0 : i32
    scf.if %2 {
      %cst_9 = arith.constant 0.000000e+00 : f32
      %12 = vector.broadcast %cst_9 : f32 to vector<2x2048xf32>
      %c0_10 = arith.constant 0 : index
      %c0_11 = arith.constant 0 : index
      %13 = vector.load %arg13[%c0_10, %c0_11] : memref<2x2048xf32, #tpu.memory_space<vmem>>, vector<2x2048xf32>
      tpu.vector_store %arg13[%c0_10, %c0_11], %12 {strides = array<i32>} : memref<2x2048xf32, #tpu.memory_space<vmem>>, vector<2x2048xf32>,
      %c0_i32_12 = arith.constant 0 : i32
      %14 = tpu.memref_slice %arg17[%c0_i32_12] : memref<3x!tpu.dma_semaphore, #tpu.memory_space<semaphore_mem>> -> memref<1x!tpu.dma_semaphore, #tpu.memory_space<semaphore_mem>>
      %15 = tpu.memref_squeeze %14 : memref<1x!tpu.dma_semaphore, #tpu.memory_space<semaphore_mem>> -> memref<!tpu.dma_semaphore, #tpu.memory_space<semaphore_mem>>
      tpu.enqueue_dma source(%arg4 : memref<2048x1024xbf16, #tpu.memory_space<any>>) target(%arg14 : memref<2048x1024xbf16, #tpu.memory_space<vmem>>) target_semaphore(%15 : memref<!tpu.dma_semaphore, #tpu.memory_space<semaphore_mem>>)
      %c1_i32_13 = arith.constant 1 : i32
      %16 = tpu.memref_slice %arg17[%c1_i32_13] : memref<3x!tpu.dma_semaphore, #tpu.memory_space<semaphore_mem>> -> memref<1x!tpu.dma_semaphore, #tpu.memory_space<semaphore_mem>>
      %17 = tpu.memref_squeeze %16 : memref<1x!tpu.dma_semaphore, #tpu.memory_space<semaphore_mem>> -> memref<!tpu.dma_semaphore, #tpu.memory_space<semaphore_mem>>
      tpu.enqueue_dma source(%arg6 : memref<1024x512xbf16, #tpu.memory_space<any>>) target(%arg15 : memref<1024x512xbf16, #tpu.memory_space<vmem>>) target_semaphore(%17 : memref<!tpu.dma_semaphore, #tpu.memory_space<semaphore_mem>>)
      %c2_i32 = arith.constant 2 : i32
      %18 = tpu.memref_slice %arg17[%c2_i32] : memref<3x!tpu.dma_semaphore, #tpu.memory_space<semaphore_mem>> -> memref<1x!tpu.dma_semaphore, #tpu.memory_space<semaphore_mem>>
      %19 = tpu.memref_squeeze %18 : memref<1x!tpu.dma_semaphore, #tpu.memory_space<semaphore_mem>> -> memref<!tpu.dma_semaphore, #tpu.memory_space<semaphore_mem>>
      tpu.enqueue_dma source(%arg8 : memref<512x256xbf16, #tpu.memory_space<any>>) target(%arg16 : memref<512x256xbf16, #tpu.memory_space<vmem>>) target_semaphore(%19 : memref<!tpu.dma_semaphore, #tpu.memory_space<semaphore_mem>>)
    } else {
    }
    %c0 = arith.constant 0 : index
    %c0_1 = arith.constant 0 : index
    %3 = vector.load %arg13[%c0, %c0_1] : memref<2x2048xf32, #tpu.memory_space<vmem>>, vector<2x2048xf32>
    %c0_2 = arith.constant 0 : index
    %c0_3 = arith.constant 0 : index
    %4 = vector.load %arg1[%c0_2, %c0_3] : memref<2x384xbf16, #tpu.memory_space<vmem>>, vector<2x384xbf16>
    %c0_4 = arith.constant 0 : index
    %c0_5 = arith.constant 0 : index
    %5 = vector.load %arg2[%c0_4, %c0_5] : memref<384x2048xbf16, #tpu.memory_space<vmem>>, vector<384x2048xbf16>
    %cst = arith.constant dense<0.000000e+00> : vector<2x2048xf32>
    %6 = tpu.matmul %4, %5, %cst {dimension_numbers = #tpu.dot_dimension_numbers<[1], [0], [0], [1], [0, 0, 1, 1], [], []>} : vector<2x384xbf16>, vector<384x2048xbf16>, vector<2x2048xf32> -> vector<2x2048xf32>
    %7 = arith.addf %3, %6 : vector<2x2048xf32>
    %c0_6 = arith.constant 0 : index
    %c0_7 = arith.constant 0 : index
    %8 = vector.load %arg13[%c0_6, %c0_7] : memref<2x2048xf32, #tpu.memory_space<vmem>>, vector<2x2048xf32>
    tpu.vector_store %arg13[%c0_6, %c0_7], %7 {strides = array<i32>} : memref<2x2048xf32, #tpu.memory_space<vmem>>, vector<2x2048xf32>,
    %c1_i32 = arith.constant 1 : i32
    %9 = arith.cmpi eq, %arg0, %c1_i32 : i32
    %10 = arith.extui %9 : i1 to i32
    %c0_i32_8 = arith.constant 0 : i32
    %11 = arith.cmpi ne, %10, %c0_i32_8 : i32
    scf.if %11 {
      %c0_i32_9 = arith.constant 0 : i32
      %12 = tpu.memref_slice %arg17[%c0_i32_9] : memref<3x!tpu.dma_semaphore, #tpu.memory_space<semaphore_mem>> -> memref<1x!tpu.dma_semaphore, #tpu.memory_space<semaphore_mem>>
      %13 = tpu.memref_squeeze %12 : memref<1x!tpu.dma_semaphore, #tpu.memory_space<semaphore_mem>> -> memref<!tpu.dma_semaphore, #tpu.memory_space<semaphore_mem>>
      tpu.wait_dma2 semaphore(%13 : memref<!tpu.dma_semaphore, #tpu.memory_space<semaphore_mem>>) src(%arg4 : memref<2048x1024xbf16, #tpu.memory_space<any>>) dst(%arg14 : memref<2048x1024xbf16, #tpu.memory_space<vmem>>)
      %c1_i32_10 = arith.constant 1 : i32
      %14 = tpu.memref_slice %arg17[%c1_i32_10] : memref<3x!tpu.dma_semaphore, #tpu.memory_space<semaphore_mem>> -> memref<1x!tpu.dma_semaphore, #tpu.memory_space<semaphore_mem>>
      %15 = tpu.memref_squeeze %14 : memref<1x!tpu.dma_semaphore, #tpu.memory_space<semaphore_mem>> -> memref<!tpu.dma_semaphore, #tpu.memory_space<semaphore_mem>>
      tpu.wait_dma2 semaphore(%15 : memref<!tpu.dma_semaphore, #tpu.memory_space<semaphore_mem>>) src(%arg6 : memref<1024x512xbf16, #tpu.memory_space<any>>) dst(%arg15 : memref<1024x512xbf16, #tpu.memory_space<vmem>>)
      %c2_i32 = arith.constant 2 : i32
      %16 = tpu.memref_slice %arg17[%c2_i32] : memref<3x!tpu.dma_semaphore, #tpu.memory_space<semaphore_mem>> -> memref<1x!tpu.dma_semaphore, #tpu.memory_space<semaphore_mem>>
      %17 = tpu.memref_squeeze %16 : memref<1x!tpu.dma_semaphore, #tpu.memory_space<semaphore_mem>> -> memref<!tpu.dma_semaphore, #tpu.memory_space<semaphore_mem>>
      tpu.wait_dma2 semaphore(%17 : memref<!tpu.dma_semaphore, #tpu.memory_space<semaphore_mem>>) src(%arg8 : memref<512x256xbf16, #tpu.memory_space<any>>) dst(%arg16 : memref<512x256xbf16, #tpu.memory_space<vmem>>)
      %c0_11 = arith.constant 0 : index
      %c0_12 = arith.constant 0 : index
      %18 = vector.load %arg13[%c0_11, %c0_12] : memref<2x2048xf32, #tpu.memory_space<vmem>>, vector<2x2048xf32>
      %c0_13 = arith.constant 0 : index
      %c0_14 = arith.constant 0 : index
      %19 = vector.load %arg3[%c0_13, %c0_14] : memref<1x2048xf32, #tpu.memory_space<vmem>>, vector<1x2048xf32>
      %20 = vector.broadcast %19 : vector<1x2048xf32> to vector<2x2048xf32>
      %21 = arith.addf %18, %20 : vector<2x2048xf32>
      %cst_15 = arith.constant 0.000000e+00 : f32
      %22 = vector.broadcast %cst_15 : f32 to vector<2x2048xf32>
      %23 = arith.cmpf ogt, %21, %22 : vector<2x2048xf32>
      %cst_16 = arith.constant 2.000000e-01 : f32
      %24 = vector.broadcast %cst_16 : f32 to vector<2x2048xf32>
      %25 = arith.mulf %24, %21 : vector<2x2048xf32>
      %26 = arith.select %23, %21, %25 : vector<2x2048xi1>, vector<2x2048xf32>
      %27 = arith.truncf %26 : vector<2x2048xf32> to vector<2x2048xbf16>
      %c0_17 = arith.constant 0 : index
      %c0_18 = arith.constant 0 : index
      %28 = vector.load %arg14[%c0_17, %c0_18] : memref<2048x1024xbf16, #tpu.memory_space<vmem>>, vector<2048x1024xbf16>
      %cst_19 = arith.constant dense<0.000000e+00> : vector<2x1024xf32>
      %29 = tpu.matmul %27, %28, %cst_19 {dimension_numbers = #tpu.dot_dimension_numbers<[1], [0], [0], [1], [0, 0, 1, 1], [], []>} : vector<2x2048xbf16>, vector<2048x1024xbf16>, vector<2x1024xf32> -> vector<2x1024xf32>
      %c0_20 = arith.constant 0 : index
      %c0_21 = arith.constant 0 : index
      %30 = vector.load %arg5[%c0_20, %c0_21] : memref<1x1024xf32, #tpu.memory_space<vmem>>, vector<1x1024xf32>
      %31 = vector.broadcast %30 : vector<1x1024xf32> to vector<2x1024xf32>
      %32 = arith.addf %29, %31 : vector<2x1024xf32>
      %cst_22 = arith.constant 0.000000e+00 : f32
      %33 = vector.broadcast %cst_22 : f32 to vector<2x1024xf32>
      %34 = arith.cmpf ogt, %32, %33 : vector<2x1024xf32>
      %cst_23 = arith.constant 2.000000e-01 : f32
      %35 = vector.broadcast %cst_23 : f32 to vector<2x1024xf32>
      %36 = arith.mulf %35, %32 : vector<2x1024xf32>
      %37 = arith.select %34, %32, %36 : vector<2x1024xi1>, vector<2x1024xf32>
      %38 = arith.truncf %37 : vector<2x1024xf32> to vector<2x1024xbf16>
      %c0_24 = arith.constant 0 : index
      %c0_25 = arith.constant 0 : index
      %39 = vector.load %arg15[%c0_24, %c0_25] : memref<1024x512xbf16, #tpu.memory_space<vmem>>, vector<1024x512xbf16>
      %cst_26 = arith.constant dense<0.000000e+00> : vector<2x512xf32>
      %40 = tpu.matmul %38, %39, %cst_26 {dimension_numbers = #tpu.dot_dimension_numbers<[1], [0], [0], [1], [0, 0, 1, 1], [], []>} : vector<2x1024xbf16>, vector<1024x512xbf16>, vector<2x512xf32> -> vector<2x512xf32>
      %c0_27 = arith.constant 0 : index
      %c0_28 = arith.constant 0 : index
      %41 = vector.load %arg7[%c0_27, %c0_28] : memref<1x512xf32, #tpu.memory_space<vmem>>, vector<1x512xf32>
      %42 = vector.broadcast %41 : vector<1x512xf32> to vector<2x512xf32>
      %43 = arith.addf %40, %42 : vector<2x512xf32>
      %cst_29 = arith.constant 0.000000e+00 : f32
      %44 = vector.broadcast %cst_29 : f32 to vector<2x512xf32>
      %45 = arith.cmpf ogt, %43, %44 : vector<2x512xf32>
      %cst_30 = arith.constant 2.000000e-01 : f32
      %46 = vector.broadcast %cst_30 : f32 to vector<2x512xf32>
      %47 = arith.mulf %46, %43 : vector<2x512xf32>
      %48 = arith.select %45, %43, %47 : vector<2x512xi1>, vector<2x512xf32>
      %49 = arith.truncf %48 : vector<2x512xf32> to vector<2x512xbf16>
      %c0_31 = arith.constant 0 : index
      %c0_32 = arith.constant 0 : index
      %50 = vector.load %arg16[%c0_31, %c0_32] : memref<512x256xbf16, #tpu.memory_space<vmem>>, vector<512x256xbf16>
      %cst_33 = arith.constant dense<0.000000e+00> : vector<2x256xf32>
      %51 = tpu.matmul %49, %50, %cst_33 {dimension_numbers = #tpu.dot_dimension_numbers<[1], [0], [0], [1], [0, 0, 1, 1], [], []>} : vector<2x512xbf16>, vector<512x256xbf16>, vector<2x256xf32> -> vector<2x256xf32>
      %c0_34 = arith.constant 0 : index
      %c0_35 = arith.constant 0 : index
      %52 = vector.load %arg9[%c0_34, %c0_35] : memref<1x256xf32, #tpu.memory_space<vmem>>, vector<1x256xf32>
      %53 = vector.broadcast %52 : vector<1x256xf32> to vector<2x256xf32>
      %54 = arith.addf %51, %53 : vector<2x256xf32>
      %cst_36 = arith.constant 0.000000e+00 : f32
      %55 = vector.broadcast %cst_36 : f32 to vector<2x256xf32>
      %56 = arith.cmpf ogt, %54, %55 : vector<2x256xf32>
      %cst_37 = arith.constant 2.000000e-01 : f32
      %57 = vector.broadcast %cst_37 : f32 to vector<2x256xf32>
      %58 = arith.mulf %57, %54 : vector<2x256xf32>
      %59 = arith.select %56, %54, %58 : vector<2x256xi1>, vector<2x256xf32>
      %c0_38 = arith.constant 0 : index
      %c0_39 = arith.constant 0 : index
      %60 = vector.load %arg10[%c0_38, %c0_39] : memref<1x256xf32, #tpu.memory_space<vmem>>, vector<1x256xf32>
      %61 = vector.broadcast %60 : vector<1x256xf32> to vector<2x256xf32>
      %62 = arith.mulf %59, %61 : vector<2x256xf32>
      %cst_40 = arith.constant dense<0.000000e+00> : vector<2xf32>
      %63 = vector.multi_reduction <add>, %62, %cst_40 [1] : vector<2x256xf32> to vector<2xf32>
      %64 = vector.shape_cast %63 : vector<2xf32> to vector<2x1xf32>
      %c0_41 = arith.constant 0 : index
      %c0_42 = arith.constant 0 : index
      %65 = vector.load %arg11[%c0_41, %c0_42] : memref<1x1xf32, #tpu.memory_space<vmem>>, vector<1x1xf32>
      %66 = vector.broadcast %65 : vector<1x1xf32> to vector<2x1xf32>
      %67 = arith.addf %64, %66 : vector<2x1xf32>
      %68 = arith.negf %67 : vector<2x1xf32>
      %69 = math.exp %68 : vector<2x1xf32>
      %cst_43 = arith.constant 1.000000e+00 : f32
      %70 = vector.broadcast %cst_43 : f32 to vector<2x1xf32>
      %71 = arith.addf %70, %69 : vector<2x1xf32>
      %72 = arith.divf %70, %71 : vector<2x1xf32>
      %c0_44 = arith.constant 0 : index
      %c0_45 = arith.constant 0 : index
      %73 = vector.load %arg12[%c0_44, %c0_45] : memref<2x1xf32, #tpu.memory_space<vmem>>, vector<2x1xf32>
      tpu.vector_store %arg12[%c0_44, %c0_45], %72 {strides = array<i32>} : memref<2x1xf32, #tpu.memory_space<vmem>>, vector<2x1xf32>,
    } else {
    }
    return
  }
  func.func @transform_0(%arg0: i32) -> (i32, i32) {
    %c0_i32 = arith.constant 0 : i32
    %c0_i32_0 = arith.constant 0 : i32
    return %c0_i32, %arg0 : i32, i32
  }
  func.func @transform_1(%arg0: i32) -> (i32, i32) {
    %c0_i32 = arith.constant 0 : i32
    %c0_i32_0 = arith.constant 0 : i32
    return %arg0, %c0_i32 : i32, i32
  }
  func.func @transform_2(%arg0: i32) -> (i32, i32) {
    %c0_i32 = arith.constant 0 : i32
    %c0_i32_0 = arith.constant 0 : i32
    %c0_i32_1 = arith.constant 0 : i32
    return %c0_i32, %c0_i32_0 : i32, i32
  }
  func.func @transform_4(%arg0: i32) -> (i32, i32) {
    %c0_i32 = arith.constant 0 : i32
    %c0_i32_0 = arith.constant 0 : i32
    %c0_i32_1 = arith.constant 0 : i32
    return %c0_i32, %c0_i32_0 : i32, i32
  }
  func.func @transform_6(%arg0: i32) -> (i32, i32) {
    %c0_i32 = arith.constant 0 : i32
    %c0_i32_0 = arith.constant 0 : i32
    %c0_i32_1 = arith.constant 0 : i32
    return %c0_i32, %c0_i32_0 : i32, i32
  }
  func.func @transform_8(%arg0: i32) -> (i32, i32) {
    %c0_i32 = arith.constant 0 : i32
    %c0_i32_0 = arith.constant 0 : i32
    %c0_i32_1 = arith.constant 0 : i32
    return %c0_i32, %c0_i32_0 : i32, i32
  }
  func.func @transform_9(%arg0: i32) -> (i32, i32) {
    %c0_i32 = arith.constant 0 : i32
    %c0_i32_0 = arith.constant 0 : i32
    %c0_i32_1 = arith.constant 0 : i32
    return %c0_i32, %c0_i32_0 : i32, i32
  }
  func.func @transform_10(%arg0: i32) -> (i32, i32) {
    %c0_i32 = arith.constant 0 : i32
    %c0_i32_0 = arith.constant 0 : i32
    %c0_i32_1 = arith.constant 0 : i32
    return %c0_i32, %c0_i32_0 : i32, i32
  }
  func.func @transform_11(%arg0: i32) -> (i32, i32) {
    %c0_i32 = arith.constant 0 : i32
    %c0_i32_0 = arith.constant 0 : i32
    %c0_i32_1 = arith.constant 0 : i32
    return %c0_i32, %c0_i32_0 : i32, i32
  }
}

</mosaic_0001>

<bundles_post_ra>
// kernel: discriminator_forward.1
= control target key start
LH: loop header
LB: loop body
LE: loop exit
PB: predicated region body
PF: predicated region fallthrough
CT: control target
= control target key end

     0   :  { %s17642_s0 = inlined_call_operand.vmem [shape: bf16[2,768], index: 0, kind: input, shape index: {}]   ;;  %s17643_s1 = inlined_call_operand.hbm [shape: bf16[768,2048], index: 1, kind: input, shape index: {}]   ;;  %s17644_s2 = inlined_call_operand.hbm [shape: f32[1,2048], index: 2, kind: input, shape index: {}]   ;;  %s17645_s3 = inlined_call_operand.hbm [shape: bf16[2048,1024], index: 3, kind: input, shape index: {}]   ;;  %s17646_s4 = inlined_call_operand.hbm [shape: f32[1,1024], index: 4, kind: input, shape index: {}]   ;;  %s17647_s5 = inlined_call_operand.hbm [shape: bf16[1024,512], index: 5, kind: input, shape index: {}]   ;;  %s17648_s6 = inlined_call_operand.hbm [shape: f32[1,512], index: 6, kind: input, shape index: {}]   ;;  %s17649_s7 = inlined_call_operand.hbm [shape: bf16[512,256], index: 7, kind: input, shape index: {}]   ;;  %s17650_s8 = inlined_call_operand.hbm [shape: f32[1,256], index: 8, kind: input, shape index: {}]   ;;  %s17651_s9 = inlined_call_operand.hbm [shape: f32[1,256], index: 9, kind: input, shape index: {}]   ;;  %s17652_s10 = inlined_call_operand.<no memory space> [shape: f32[1,1], index: 10, kind: input, shape index: {}]   ;;  %s17653_s11 = inlined_call_operand.vmem [shape: f32[2,1], index: 11, kind: output, shape index: {}]  }
   0x1   :  { %v16_v0 = vstv %s17652_s10 }
   0x2   :  { %17 = vst [vmem:[#allocation7] sm:$0x1] %v16_v0 }
   0x3   :  { %18 = vsyncpa [#allocation9], 0 }
   0x4   :  { %20 = vsyncpa [#allocation9 + $0x1], 0 }
   0x5   :  { %21 = vsyncpa [#allocation11], 0 }
   0x6   :  { %22 = vsyncpa [#allocation14], 0 }
   0x7   :  { %23 = vsyncpa [#allocation17], 0  ;;  %s16577_s19 = smov 0   ;;  %s16579_s20 = smov 0  }
   0x8   :  { %s16581_s21 = smov 0   ;;  %s16583_s22 = smov 0  }
   0x9 LB: > { %s16499_s10 = smov [#allocation10]   ;;  %s16598_s24 = sadd.s32 4294967295, %s16497_s22   ;;  %s16497_s22 = sphi %s16583_s22, %s17675_s22   ;;  %s16493_s21 = sphi %s16581_s21, %s17674_s21   ;;  %s16489_s20 = sphi %s16579_s20, %s17673_s20   ;;  %s16485_s19 = sphi %s16577_s19, %s17672_s19  }
   0xa   : > { %s246_s23 = sshll.u32 %s16499_s10, 4  ;;  %p13883_p0 = scmp.ge.s32.totalorder %s16497_s22, 1  ;;  %s247_s23 = int_to_ptr.vmem [resolvable:$true] %s246_s23 }
   0xb   : > { %p17654_p1 = scmp.eq.s32.totalorder %s16598_s24, 0  ;;  %p233_p2 = scmp.lt.s32.totalorder %s16497_s22, 3 }
   0xc   : > { %s16500_s26 = smov [#allocation13]   ;;  %s16501_s28 = smov [#allocation12]  }
   0xd   : > { %p16604_p4 = pnand %p13883_p0, %p233_p2  ;;  %s268_s27 = sshll.u32 %s16500_s26, 4  ;;  %s269_s27 = int_to_ptr.vmem [resolvable:$true] %s268_s27 }
   0xe   : > { %s257_s29 = sshll.u32 %s16501_s28, 4  ;;  %s16502_s12 = smov [#allocation15]   ;;  %s16616_s29 = int_to_ptr.vmem [resolvable:$true] %s257_s29 }
   0xf   : > { %s17657_s25 = scalar_select %p16604_p4, 1, 0 }
  0x10   : > { %p15663_p5 = pneg %p16604_p4  ;;  %s16618_s13 = sshll.u32 %s16502_s12, 4  ;;  %s280_s13 = int_to_ptr.vmem [resolvable:$true] %s16618_s13 }
  0x11   : > { %s16238_s15 = scalar_lea.vmem %s247_s23, 256  ;;  %p16246_p11 = scmp.lt.s32.totalorder %s247_s23, %s247_s23 }
  0x12   : > { %p16612_p6 = pnand %p15663_p5, %p17654_p1  ;;  %p16239_p8 = scmp.ne.s32.totalorder %s247_s23, %s16238_s15 }
  0x13   : > { %p16247_p12 = scmp.lt.s32.totalorder %s16238_s15, %s16238_s15 }
  0x14   : > { %p16622_p7 = pneg %p16612_p6 }
  0x15   : > { %p16248_p13 = por %p16247_p12, %p16246_p11 }
  0x16   : > { %p16241_p9 = pnand %p16239_p8, %p16622_p7 }
  0x18   : > { %p16242_p10 = pneg %p16241_p9 }
  0x1a   : > { %p16249_p0 = pnand %p16248_p13, %p16242_p10 }
  0x1c   : > { %16252 = shalt.err (!%p16249_p0)
}
  0x1d   : > { %15666 = dma.hbm_to_vmem [thread:$0]  (!%p16612_p6), %s17644_s2, 256, %s247_s23, [#allocation11]  }
  0x1e   : > { %s16264_s18 = scalar_lea.vmem %s269_s27, 64  ;;  %p16272_p1 = scmp.lt.s32.totalorder %s269_s27, %s269_s27 }
  0x1f   : > { %p16265_p2 = scmp.ne.s32.totalorder %s269_s27, %s16264_s18  ;;  %p16273_p8 = scmp.lt.s32.totalorder %s16264_s18, %s16264_s18 }
  0x21   : > { %p16267_p5 = pnand %p16265_p2, %p16622_p7  ;;  %p16274_p9 = por %p16273_p8, %p16272_p1 }
  0x23   : > { %p16268_p3 = pneg %p16267_p5 }
  0x25   : > { %p16275_p4 = pnand %p16274_p9, %p16268_p3 }
  0x27   : > { %16278 = shalt.err (!%p16275_p4)
}
  0x28   : > { %15672 = dma.hbm_to_vmem [thread:$0]  (!%p16612_p6), %s17648_s6, 64, %s269_s27, [#allocation14]  }
  0x29   : > { %s16290_s23 = scalar_lea.vmem %s16616_s29, 128  ;;  %p16298_p13 = scmp.lt.s32.totalorder %s16616_s29, %s16616_s29 }
  0x2a   : > { %p16291_p10 = scmp.ne.s32.totalorder %s16616_s29, %s16290_s23  ;;  %p16299_p1 = scmp.lt.s32.totalorder %s16290_s23, %s16290_s23 }
  0x2c   : > { %p16293_p11 = pnand %p16291_p10, %p16622_p7  ;;  %p16300_p3 = por %p16299_p1, %p16298_p13 }
  0x2e   : > { %p16294_p12 = pneg %p16293_p11 }
  0x30   : > { %p16301_p4 = pnand %p16300_p3, %p16294_p12 }
  0x32   : > { %16304 = shalt.err (!%p16301_p4)
}
  0x33   : > { %15669 = dma.hbm_to_vmem [thread:$0]  (!%p16612_p6), %s17646_s4, 128, %s16616_s29, [#allocation11]  }
  0x34   : > { %s16503_s27 = smov [#allocation16]   ;;  %s16316_s16 = scalar_lea.vmem %s280_s13, 32 }
  0x35   : > { %s290_s15 = sshll.u32 %s16503_s27, 4  ;;  %p16317_p0 = scmp.ne.s32.totalorder %s280_s13, %s16316_s16  ;;  %s291_s15 = int_to_ptr.vmem [resolvable:$true] %s290_s15 }
  0x36   : > { %p16324_p8 = scmp.lt.s32.totalorder %s280_s13, %s280_s13  ;;  %p16325_p9 = scmp.lt.s32.totalorder %s16316_s16, %s16316_s16 }
  0x37   : > { %p16319_p2 = pnand %p16317_p0, %p16622_p7 }
  0x38   : > { %p16326_p10 = por %p16325_p9, %p16324_p8 }
  0x39   : > { %p16320_p5 = pneg %p16319_p2 }
  0x3b   : > { %p16327_p11 = pnand %p16326_p10, %p16320_p5 }
  0x3d   : > { %16330 = shalt.err (!%p16327_p11)
}
  0x3e   : > { %15675 = dma.hbm_to_vmem [thread:$0]  (!%p16612_p6), %s17650_s8, 32, %s280_s13, [#allocation14]  }
  0x3f   : > { %s16342_s29 = scalar_lea.vmem %s291_s15, 32  ;;  %p16350_p3 = scmp.lt.s32.totalorder %s291_s15, %s291_s15 }
  0x40   : > { %p16343_p12 = scmp.ne.s32.totalorder %s291_s15, %s16342_s29  ;;  %p16351_p4 = scmp.lt.s32.totalorder %s16342_s29, %s16342_s29 }
  0x42   : > { %p16345_p13 = pnand %p16343_p12, %p16622_p7  ;;  %p16352_p0 = por %p16351_p4, %p16350_p3 }
  0x44   : > { %p16346_p1 = pneg %p16345_p13 }
  0x46   : > { %p16353_p2 = pnand %p16352_p0, %p16346_p1 }
  0x48   : > { %16356 = shalt.err (!%p16353_p2)
}
  0x49   : > { %15678 = dma.hbm_to_vmem [thread:$0]  (!%p16612_p6), %s17651_s9, 32, %s291_s15, [#allocation17]  }
  0x4a   : > { %s16668_s13 = sadd.s32 1, %s16497_s22   ;;  %s62_s14 = sadd.s32 1, %s16493_s21 }
  0x4b   : > { %s59_s30 = ssub.s32 %s16497_s22, %s16668_s13  ;;  %p69_p5 = scmp.ne.s32.totalorder %s16493_s21, %s16489_s20 }
  0x4c   : > { %p60_p7 = scmp.eq.s32.totalorder %s59_s30, 0  ;;  %p70_p8 = scmp.eq.s32.totalorder %s16497_s22, 0 }
  0x4d   : > { %p75_p9 = scmp.ne.s32.totalorder %s16489_s20, %s16485_s19  ;;  %p17660_p11 = scmp.eq.s32.totalorder %s16598_s24, 0 }
  0x4e   : > { %s16679_s23 = scalar_select %p60_p7, %s16493_s21, %s62_s14  }
  0x4f   : > { %p71_p10 = por %p70_p8, %p69_p5  ;;  %p16683_p12 = por %p17660_p11, %p75_p9 }
  0x50   : > { %p15688_p13 = scmp.lt.s32.totalorder %s16497_s22, 2  ;;  %s312_s12 = sand.u32 1, %s16493_s21  }
  0x51   : > { %s17661_s28 = scalar_select %p16683_p12, 1, 0 }
  0x52   : > { %s15639_s27 = smul.u32 3072, %s312_s12  ;;  %p16690_p6 = pnand %p15688_p13, %p71_p10 }
  0x53   : > { %s15638_s15 = smul.u32 49152, %s16497_s22  ;;  %s16701_s26 = scalar_lea.sflag [#allocation9], %s312_s12 }
  0x54   : > { %s316_s29 = scalar_lea.vmem [#allocation8], %s15639_s27  ;;  %p16359_p3 = pneg %p16690_p6 }
  0x55   : > { %s16697_s19 = scalar_lea.hbm %s17643_s1, %s15638_s15  ;;  %s324_s10 = sshll.u32 %s316_s29, 4  ;;  %s16699_s10 = int_to_ptr.vmem [resolvable:$true] %s324_s10 }
  0x56   : > { %s16357_s22 = scalar_lea.hbm %s16697_s19, 49152  ;;  %s16362_s15 = scalar_lea.hbm %s17643_s1, 98304 }
  0x57   : > { %p16358_p1 = scmp.ne.s32.totalorder %s16697_s19, %s16357_s22  ;;  %p16363_p2 = scmp.lt.s32.totalorder %s16697_s19, %s17643_s1 }
  0x58   : > { %p16364_p7 = scmp.lt.s32.totalorder %s16362_s15, %s16357_s22 }
  0x59   : > { %p16360_p4 = pnand %p16359_p3, %p16358_p1 }
  0x5a   : > { %p16365_p5 = por %p16364_p7, %p16363_p2 }
  0x5b   : > { %p16361_p0 = pneg %p16360_p4 }
  0x5d   : > { %p16366_p8 = pnand %p16365_p5, %p16361_p0 }
  0x5f   : > { %16369 = shalt.err (!%p16366_p8)
}
  0x60   : > { %s16370_s12 = scalar_lea.vmem %s16699_s10, 49152  ;;  %s16504_s27 = smov [#allocation8]  }
  0x61   : > { %p16371_p9 = scmp.ne.s32.totalorder %s16699_s10, %s16370_s12  ;;  %s16375_s29 = sshll.u32 %s16504_s27, 4  ;;  %s16376_s29 = int_to_ptr.vmem [resolvable:$false] %s16375_s29 }
  0x62   : > { %s16377_s30 = scalar_lea.vmem %s16376_s29, 98304  ;;  %p16378_p13 = scmp.lt.s32.totalorder %s16699_s10, %s16376_s29 }
  0x63   : > { %p16373_p10 = pnand %p16371_p9, %p16359_p3  ;;  %p16379_p1 = scmp.lt.s32.totalorder %s16377_s30, %s16370_s12 }
  0x65   : > { %p16374_p11 = pneg %p16373_p10  ;;  %p16380_p4 = por %p16379_p1, %p16378_p13 }
  0x67   : > { %p16381_p12 = pnand %p16380_p4, %p16374_p11 }
  0x69   : > { %16384 = shalt.err (!%p16381_p12)
}
  0x6a   : > { %s16505_s22 = smov 1024   ;;  %s16506_s14 = smov 64  }
  0x6b   : > { %15682 = dma.hbm_to_vmem [thread:$0]  (!%p16690_p6), %s16697_s19, 49152, %s16699_s10, %s16701_s26, %s16505_s22, %s16505_s22, %s16506_s14  }
  0x6c   : > { %p17663_p3 = scmp.ne.s32.totalorder %s17657_s25, 0 }
  0x6d   : > { %s338_s15 = sand.u32 (!%p17663_p3), 1, %s16489_s20   ;;  %p17664_p0 = scmp.ne.s32.totalorder (!%p17663_p3), %s17661_s28, 0 }
  0x6e   : > { %336 = sbr.rel (%p17663_p3) target bundleno = 2706 (0xa92), region = 52  ;;  %s339_s18 = scalar_lea.sflag (!%p17663_p3), [#allocation9], %s338_s15 }
  0x6f   : > { %s15640_s17 = smul.u32 (!%p17663_p3), 3072, %s338_s15 }
  0x71   : > { %s16725_s12 = scalar_lea.vmem (!%p17663_p3), [#allocation8], %s15640_s17 }
  0x73   : > { %16462 = dma.done.wait (%p17664_p0), %s339_s18, 49152  }
  0x74   : > { %16464 = vsyncadd (%p17664_p0), %s339_s18, 4294918144  ;;  %p17665_p12 = scmp.eq.s32.totalorder %s16598_s24, 0 }
  0x76   : > { %16466 = dma.done.wait (%p17665_p12), [#allocation11], 384   ;;  %p17666_p6 = pmov %p17665_p12 }
  0x78   : > { %16468 = vsyncadd (%p17666_p6), [#allocation11], 4294966912  ;;  %p17667_p2 = pmov %p17666_p6 }
  0x7a   : > { %16470 = dma.done.wait (%p17667_p2), [#allocation14], 96   ;;  %p17668_p7 = pmov %p17667_p2 }
  0x7b   : > { %p17669_p5 = pmov %p17667_p2 }
  0x7c   : > { %16472 = vsyncadd (%p17668_p7), [#allocation14], 4294967200 }
  0x7d   : > { %16474 = dma.done.wait (%p17669_p5), [#allocation17], 32   ;;  %p17670_p8 = pmov %p17667_p2 }
  0x7e   : > { %s394_s25 = smul.u32 3, %s16598_s24  ;;  %p17671_p10 = scmp.ne.s32.totalorder %s16598_s24, 0 }
  0x7f   : > { %16476 = vsyncadd (%p17670_p8), [#allocation17], 4294967264  ;;  %s16507_s10 = smov (!%p17671_p10), [#allocation3]   ;;  %s16508_s27 = smov (!%p17671_p10), [#allocation4]  }
  0x80   : > { %p395_p9 = scmp.lt.s32.totalorder %s394_s25, 5  ;;  %404 = sbr.rel (%p17671_p10) target bundleno = 160 (0xa0), region = 80 }
  0x81   : > { %s416_s26 = sshll.u32 (!%p17671_p10), %s16507_s10, 4  ;;  %s428_s29 = sshll.u32 (!%p17671_p10), %s16508_s27, 4  ;;  %s417_s26 = int_to_ptr.vmem [resolvable:$true] %s416_s26  ;;  %s429_s29 = int_to_ptr.vmem [resolvable:$true] %s428_s29 }
  0x82   : > { %s17677_s25 = smov (!%p395_p9, %s394_s25), 5  ;;  %s16393_s30 = scalar_lea.vmem (!%p17671_p10), %s417_s26, 131072 }
  0x83   : > { %s397_s19 = scalar_lea.vmem %s17642_s0, %s17677_s25  ;;  %p16394_p11 = scmp.ne.s32.totalorder (!%p17671_p10), %s417_s26, %s16393_s30 }
  0x84   : > { %p16398_p13 = scmp.lt.s32.totalorder (!%p17671_p10), %s417_s26, %s417_s26  ;;  %p16399_p1 = scmp.lt.s32.totalorder (!%p17671_p10), %s16393_s30, %s16393_s30 }
  0x85   : > { %v16509_v1 = vmov 0.0  }
  0x86   : > { %405 = vst [vmem:[#allocation2 + $0x10] sm:$0xff] %v16509_v1  ;;  %406 = vst [vmem:[#allocation2] sm:$0xff] %v16509_v1  ;;  %p16400_p4 = por %p16399_p1, %p16398_p13 }
  0x87   : > { %407 = vst [vmem:[#allocation2 + $0x18] sm:$0xff] %v16509_v1  ;;  %408 = vst [vmem:[#allocation2 + $0x8] sm:$0xff] %v16509_v1 }
  0x88   : > { %p16401_p3 = pnand %p16400_p4, %p16394_p11 }
  0x8a   : > { %16404 = shalt.err (!%p16401_p3)  }
  0x8b   : > { %419 = dma.hbm_to_vmem [thread:$0]  %s17645_s3, 131072, %s417_s26, [#allocation6] }
  0x8c   : > { %s16413_s15 = scalar_lea.vmem %s429_s29, 32768  ;;  %p16418_p12 = scmp.lt.s32.totalorder %s429_s29, %s429_s29 }
  0x8d   : > { %p16414_p0 = scmp.ne.s32.totalorder %s429_s29, %s16413_s15  ;;  %p16419_p6 = scmp.lt.s32.totalorder %s16413_s15, %s16413_s15 }
  0x8f   : > { %p16420_p2 = por %p16419_p6, %p16418_p12 }
  0x91   : > { %p16421_p7 = pnand %p16420_p2, %p16414_p0 }
  0x93   : > { %16424 = shalt.err (!%p16421_p7)  }
  0x94   : > { %431 = dma.hbm_to_vmem [thread:$0]  %s17647_s5, 32768, %s429_s29, [#allocation6 + $0x1] }
  0x95   : > { %s16510_s28 = smov [#allocation5]  }
  0x96   : > { %s440_s16 = sshll.u32 %s16510_s28, 4  ;;  %s441_s16 = int_to_ptr.vmem [resolvable:$true] %s440_s16 }
  0x97   : > { %s16433_s10 = scalar_lea.vmem %s441_s16, 8192  ;;  %p16438_p8 = scmp.lt.s32.totalorder %s441_s16, %s441_s16 }
  0x98   : > { %p16434_p5 = scmp.ne.s32.totalorder %s441_s16, %s16433_s10  ;;  %p16439_p9 = scmp.lt.s32.totalorder %s16433_s10, %s16433_s10 }
  0x9a   : > { %p16440_p10 = por %p16439_p9, %p16438_p8 }
  0x9c   : > { %p16441_p11 = pnand %p16440_p10, %p16434_p5 }
  0x9e   : > { %16444 = shalt.err (!%p16441_p11)  }
  0x9f   : > { %443 = dma.hbm_to_vmem [thread:$0]  %s17649_s7, 8192, %s441_s16, [#allocation6 + $0x2] }
  0xa0 PF: > { %v561_v2 = vld [vmem:[%s16725_s12 + $0x380] sm:$0xff]  ;;  %v16511_v10 = vmov 0   ;;  %v16512_v27 = vmov 1966171168   ;;  %v845_v29 = vlaneseq  ;;  %p14284_p13 = scmp.ne.s32.totalorder %s16598_s24, 1 }
  0xa1   : > { %v569_v3 = vld [vmem:[%s16725_s12 + $0x3c0] sm:$0xff]  ;;  %2853 = vmatprep.mubr.bf16.mxu1 %v16511_v10  ;;  %v843_v28 = vunpack.c.l.s4 %v16512_v27 }
  0xa2   : > { %v817_v4 = vld [vmem:[%s16725_s12 + $0xb80] sm:$0xff]  ;;  %v14013_v5 = vcombine.high %v561_v2, %v569_v3  ;;  %v14012_v7 = vcombine.low %v561_v2, %v569_v3  ;;  %v16780_v39 = vshrl.u32 %v845_v29, 7 }
  0xa3   : > { %v825_v6 = vld [vmem:[%s16725_s12 + $0xbc0] sm:$0xff]  ;;  %v844_v38 = vunpack.c.0.s8 %v843_v28 }
  0xa4   : > { %v545_v8 = vld [vmem:[%s16725_s12 + $0x300] sm:$0xff]  ;;  %v14269_v11 = vcombine.high %v817_v4, %v825_v6  ;;  %v14268_v12 = vcombine.low %v817_v4, %v825_v6  ;;  %2780 = vmatprep.subr.bf16.mxu0 %v14013_v5 }
  0xa5   : > { %v553_v9 = vld [vmem:[%s16725_s12 + $0x340] sm:$0xff]  ;;  %2781 = vmatpush1.bf16.msra.mxu0 %v14012_v7  ;;  %v847_v50 = vsub.s32 %v844_v38, %v16780_v39 }
  0xa6   : > { %v13997_v13 = vcombine.high %v545_v8, %v553_v9  ;;  %v801_v14 = vld [vmem:[%s16725_s12 + $0xb00] sm:$0xff]  ;;  %2821 = vmatprep.subr.bf16.mxu1 %v14269_v11  ;;  %v13996_v21 = vcombine.low %v545_v8, %v553_v9 }
  0xa7   : > { %v809_v15 = vld [vmem:[%s16725_s12 + $0xb40] sm:$0xff]  ;;  %2822 = vmatpush1.bf16.msra.mxu1 %v14268_v12 }
  0xa8   : > { %v529_v16 = vld [vmem:[%s16725_s12 + $0x280] sm:$0xff]  ;;  %v14253_v17 = vcombine.high %v801_v14, %v809_v15  ;;  %2782 = vmatprep.subr.bf16.mxu0 %v13997_v13  ;;  %v14252_v22 = vcombine.low %v801_v14, %v809_v15  ;;  %v562_v13 = vld [vmem:[%s16725_s12 + $0x388] sm:$0xff] }
  0xa9   : > { %v537_v18 = vld [vmem:[%s16725_s12 + $0x2c0] sm:$0xff]  ;;  %2783 = vmatpush1.bf16.msra.mxu0 %v13996_v21  ;;  %v570_v14 = vld [vmem:[%s16725_s12 + $0x3c8] sm:$0xff] }
  0xaa   : > { %v785_v19 = vld [vmem:[%s16725_s12 + $0xa80] sm:$0xff]  ;;  %v13981_v23 = vcombine.high %v529_v16, %v537_v18  ;;  %2823 = vmatprep.subr.bf16.mxu1 %v14253_v17  ;;  %v13980_v32 = vcombine.low %v529_v16, %v537_v18 }
  0xab   : > { %v793_v20 = vld [vmem:[%s16725_s12 + $0xac0] sm:$0xff]  ;;  %2824 = vmatpush1.bf16.msra.mxu1 %v14252_v22  ;;  %v546_v22 = vld [vmem:[%s16725_s12 + $0x308] sm:$0xff] }
  0xac   : > { %v14237_v24 = vcombine.high %v785_v19, %v793_v20  ;;  %v513_v25 = vld [vmem:[%s16725_s12 + $0x200] sm:$0xff]  ;;  %2784 = vmatprep.subr.bf16.mxu0 %v13981_v23  ;;  %v14236_v33 = vcombine.low %v785_v19, %v793_v20  ;;  %v14015_v19 = vcombine.high %v562_v13, %v570_v14  ;;  %v554_v23 = vld [vmem:[%s16725_s12 + $0x348] sm:$0xff] }
  0xad   : > { %v521_v26 = vld [vmem:[%s16725_s12 + $0x240] sm:$0xff]  ;;  %2785 = vmatpush1.bf16.msra.mxu0 %v13980_v32  ;;  %v13999_v28 = vcombine.high %v546_v22, %v554_v23  ;;  %v538_v32 = vld [vmem:[%s16725_s12 + $0x2c8] sm:$0xff] }
  0xae   : > { %v769_v30 = vld [vmem:[%s16725_s12 + $0xa00] sm:$0xff]  ;;  %v13965_v34 = vcombine.high %v513_v25, %v521_v26  ;;  %2825 = vmatprep.subr.bf16.mxu1 %v14237_v24  ;;  %v13964_v43 = vcombine.low %v513_v25, %v521_v26  ;;  %v14014_v26 = vcombine.low %v562_v13, %v570_v14 }
  0xaf   : > { %v777_v31 = vld [vmem:[%s16725_s12 + $0xa40] sm:$0xff]  ;;  %2826 = vmatpush1.bf16.msra.mxu1 %v14236_v33 }
  0xb0   : > { %v14221_v35 = vcombine.high %v769_v30, %v777_v31  ;;  %v497_v36 = vld [vmem:[%s16725_s12 + $0x180] sm:$0xff]  ;;  %2786 = vmatprep.subr.bf16.mxu0 %v13965_v34  ;;  %v14220_v45 = vcombine.low %v769_v30, %v777_v31  ;;  %v530_v31 = vld [vmem:[%s16725_s12 + $0x288] sm:$0xff]  ;;  %v13998_v34 = vcombine.low %v546_v22, %v554_v23 }
  0xb1   : > { %v505_v37 = vld [vmem:[%s16725_s12 + $0x1c0] sm:$0xff]  ;;  %2787 = vmatpush1.bf16.msra.mxu0 %v13964_v43  ;;  %v13982_v43 = vcombine.low %v530_v31, %v538_v32 }
  0xb2   : > { %v753_v40 = vld [vmem:[%s16725_s12 + $0x980] sm:$0xff]  ;;  %v13949_v46 = vcombine.high %v497_v36, %v505_v37  ;;  %2827 = vmatprep.subr.bf16.mxu1 %v14221_v35  ;;  %v13948_v53 = vcombine.low %v497_v36, %v505_v37  ;;  %v13983_v36 = vcombine.high %v530_v31, %v538_v32 }
  0xb3   : > { %v761_v41 = vld [vmem:[%s16725_s12 + $0x9c0] sm:$0xff]  ;;  %2828 = vmatpush1.bf16.msra.mxu1 %v14220_v45 }
  0xb4   : > { %v13899_v42 = vld.sshfl [vmem:[%s397_s19] sm:$0x13 pattern:$0x75316420]  ;;  %v14205_v47 = vcombine.high %v753_v40, %v761_v41  ;;  %2788 = vmatprep.subr.bf16.mxu0 %v13949_v46  ;;  %v14204_v55 = vcombine.low %v753_v40, %v761_v41  ;;  %v514_v40 = vld [vmem:[%s16725_s12 + $0x208] sm:$0xff] }
  0xb5   : > { %v841_v44 = vcombine.high %v13899_v42, %v13899_v42  ;;  %v481_v48 = vld [vmem:[%s16725_s12 + $0x100] sm:$0xff]  ;;  %2789 = vmatpush1.bf16.msra.mxu0 %v13948_v53  ;;  %v16809_v16 = vrot.slane %v13899_v42, %v847_v50  ;;  %v522_v41 = vld [vmem:[%s16725_s12 + $0x248] sm:$0xff] }
  0xb6   : > { %v489_v49 = vld [vmem:[%s16725_s12 + $0x140] sm:$0xff]  ;;  %2829 = vmatprep.subr.bf16.mxu1 %v14205_v47  ;;  %v13967_v45 = vcombine.high %v514_v40, %v522_v41 }
  0xb7   : > { %v737_v51 = vld [vmem:[%s16725_s12 + $0x900] sm:$0xff]  ;;  %v16794_v54 = vrot.slane %v841_v44, %v847_v50  ;;  %v13933_v56 = vcombine.high %v481_v48, %v489_v49  ;;  %v13932_v62 = vcombine.low %v481_v48, %v489_v49  ;;  %2830 = vmatpush1.bf16.msra.mxu1 %v14204_v55  ;;  %v16817_v24 = vcombine.high %v16809_v16, %v16809_v16  ;;  %v498_v48 = vld [vmem:[%s16725_s12 + $0x188] sm:$0xff] }
  0xb8   : > { %v745_v52 = vld [vmem:[%s16725_s12 + $0x940] sm:$0xff]  ;;  %v506_v49 = vld [vmem:[%s16725_s12 + $0x1c8] sm:$0xff] }
  0xb9   : > { %v14189_v57 = vcombine.high %v737_v51, %v745_v52  ;;  %v465_v58 = vld [vmem:[%s16725_s12 + $0x80] sm:$0xff]  ;;  %2812 = vmatprep.mubr.bf16.mxu0 %v16794_v54  ;;  %2790 = vmatprep.subr.bf16.mxu0 %v13933_v56  ;;  %v14188_v63 = vcombine.low %v737_v51, %v745_v52  ;;  %v13966_v51 = vcombine.low %v514_v40, %v522_v41 }
  0xba   : > { %v473_v59 = vld [vmem:[%s16725_s12 + $0xc0] sm:$0xff]  ;;  %2791 = vmatpush1.bf16.msra.mxu0 %v13932_v62  ;;  %v13951_v53 = vcombine.high %v498_v48, %v506_v49 }
  0xbb   : > { %v721_v60 = vld [vmem:[%s16725_s12 + $0x880] sm:$0xff]  ;;  %v13917_v0 = vcombine.high %v465_v58, %v473_v59  ;;  %2831 = vmatprep.subr.bf16.mxu1 %v14189_v57  ;;  %v13916_v6 = vcombine.low %v465_v58, %v473_v59  ;;  %v482_v57 = vld [vmem:[%s16725_s12 + $0x108] sm:$0xff] }
  0xbc   : > { %v729_v61 = vld [vmem:[%s16725_s12 + $0x8c0] sm:$0xff]  ;;  %2832 = vmatpush1.bf16.msra.mxu1 %v14188_v63  ;;  %v490_v58 = vld [vmem:[%s16725_s12 + $0x148] sm:$0xff] }
  0xbd   : > { %v14173_v1 = vcombine.high %v721_v60, %v729_v61  ;;  %v449_v2 = vld [vmem:[%s16725_s12] sm:$0xff]  ;;  %2792 = vmatprep.subr.bf16.mxu0 %v13917_v0  ;;  %v14172_v7 = vcombine.low %v721_v60, %v729_v61  ;;  %v13950_v60 = vcombine.low %v498_v48, %v506_v49  ;;  %v13935_v62 = vcombine.high %v482_v57, %v490_v58 }
  0xbe   : > { %v457_v3 = vld [vmem:[%s16725_s12 + $0x40] sm:$0xff]  ;;  %2793 = vmatpush1.bf16.msra.mxu0 %v13916_v6 }
  0xbf   : > { %v705_v4 = vld [vmem:[%s16725_s12 + $0x800] sm:$0xff]  ;;  %v13901_v8 = vcombine.high %v449_v2, %v457_v3  ;;  %2833 = vmatprep.subr.bf16.mxu1 %v14173_v1  ;;  %v13900_v15 = vcombine.low %v449_v2, %v457_v3  ;;  %v466_v1 = vld [vmem:[%s16725_s12 + $0x88] sm:$0xff] }
  0xc0   : > { %v713_v5 = vld [vmem:[%s16725_s12 + $0x840] sm:$0xff]  ;;  %2834 = vmatpush1.bf16.msra.mxu1 %v14172_v7  ;;  %v474_v2 = vld [vmem:[%s16725_s12 + $0xc8] sm:$0xff] }
  0xc1   : > { %v14157_v9 = vcombine.high %v705_v4, %v713_v5  ;;  %v689_v11 = vld [vmem:[%s16725_s12 + $0x780] sm:$0xff]  ;;  %2794 = vmatprep.subr.bf16.mxu0 %v13901_v8  ;;  %v14156_v17 = vcombine.low %v705_v4, %v713_v5  ;;  %v13934_v4 = vcombine.low %v482_v57, %v490_v58  ;;  %v13919_v6 = vcombine.high %v466_v1, %v474_v2 }
  0xc2   : > { %v697_v12 = vld [vmem:[%s16725_s12 + $0x7c0] sm:$0xff]  ;;  %2795 = vmatpush1.bf16.msra.mxu0 %v13900_v15  ;;  %v13918_v13 = vcombine.low %v466_v1, %v474_v2 }
  0xc3   : > { %v14141_v18 = vcombine.high %v689_v11, %v697_v12  ;;  %2835 = vmatprep.subr.bf16.mxu1 %v14157_v9  ;;  %v673_v20 = vld [vmem:[%s16725_s12 + $0x700] sm:$0xff]  ;;  %v14140_v25 = vcombine.low %v689_v11, %v697_v12  ;;  %v450_v9 = vld [vmem:[%s16725_s12 + $0x8] sm:$0xff] }
  0xc4   : > { %v681_v21 = vld [vmem:[%s16725_s12 + $0x740] sm:$0xff]  ;;  %2836 = vmatpush1.bf16.msra.mxu1 %v14156_v17  ;;  %v458_v11 = vld [vmem:[%s16725_s12 + $0x48] sm:$0xff] }
  0xc5   : > { %2796 = vmatprep.subr.bf16.mxu0 %v14141_v18  ;;  %v14125_v27 = vcombine.high %v673_v20, %v681_v21  ;;  %2862 = vmatprep.subr.bf16.mxu1 %v14015_v19  ;;  %v657_v29 = vld [vmem:[%s16725_s12 + $0x680] sm:$0xff]  ;;  %v14124_v33 = vcombine.low %v673_v20, %v681_v21  ;;  %v13903_v15 = vcombine.high %v450_v9, %v458_v11  ;;  %v818_v17 = vld [vmem:[%s16725_s12 + $0xb88] sm:$0xff] }
  0xc6   : > { %v665_v30 = vld [vmem:[%s16725_s12 + $0x6c0] sm:$0xff]  ;;  %2797 = vmatpush2.bf16.msra.mxu0 %v14140_v25  ;;  %v826_v18 = vld [vmem:[%s16725_s12 + $0xbc8] sm:$0xff]  ;;  %v13902_v22 = vcombine.low %v450_v9, %v458_v11 }
  0xc7   : > { %2854 = vmatmul.mubr.bf16.vlgmr.msra.gmra.mxu1 %v16817_v24  ;;  %2798 = vmatprep.subr.bf16.mxu0 %v14125_v27  ;;  %v14109_v35 = vcombine.high %v657_v29, %v665_v30  ;;  %v641_v37 = vld [vmem:[%s16725_s12 + $0x600] sm:$0xff]  ;;  %v14108_v42 = vcombine.low %v657_v29, %v665_v30  ;;  %v690_v19 = vld [vmem:[%s16725_s12 + $0x788] sm:$0xff]  ;;  %v14271_v23 = vcombine.high %v818_v17, %v826_v18 }
  0xc8   : > { %2863 = vmatpush1.bf16.msra.mxu1 %v14014_v26  ;;  %v649_v38 = vld [vmem:[%s16725_s12 + $0x640] sm:$0xff]  ;;  %2894 = vmatprep.mubr.bf16.mxu1 %v16794_v54  ;;  %v698_v20 = vld [vmem:[%s16725_s12 + $0x7c8] sm:$0xff]  ;;  %v14270_v30 = vcombine.low %v818_v17, %v826_v18 }
  0xc9   : > { %2864 = vmatprep.subr.bf16.mxu1 %v13999_v28  ;;  %v14093_v44 = vcombine.high %v641_v37, %v649_v38  ;;  %v625_v46 = vld [vmem:[%s16725_s12 + $0x580] sm:$0xff]  ;;  %v14092_v50 = vcombine.low %v641_v37, %v649_v38  ;;  %v14143_v25 = vcombine.high %v690_v19, %v698_v20  ;;  %v802_v26 = vld [vmem:[%s16725_s12 + $0xb08] sm:$0xff]  ;;  %v14142_v31 = vcombine.low %v690_v19, %v698_v20 }
  0xca   : > { %2799 = vmatpush2.bf16.msra.mxu0 %v14124_v33  ;;  %v633_v47 = vld [vmem:[%s16725_s12 + $0x5c0] sm:$0xff]  ;;  %v810_v27 = vld [vmem:[%s16725_s12 + $0xb48] sm:$0xff] }
  0xcb   : > { %2800 = vmatprep.subr.bf16.mxu0 %v14109_v35  ;;  %v14077_v52 = vcombine.high %v625_v46, %v633_v47  ;;  %v609_v55 = vld [vmem:[%s16725_s12 + $0x500] sm:$0xff]  ;;  %v14076_v59 = vcombine.low %v625_v46, %v633_v47  ;;  %v674_v28 = vld [vmem:[%s16725_s12 + $0x708] sm:$0xff]  ;;  %v14255_v32 = vcombine.high %v802_v26, %v810_v27  ;;  %v14254_v38 = vcombine.low %v802_v26, %v810_v27  ;;  %v827_v26 = vld [vmem:[%s16725_s12 + $0xbd0] sm:$0xff] }
  0xcc   : > { %2865 = vmatpush1.bf16.msra.mxu1 %v13998_v34  ;;  %v617_v56 = vld [vmem:[%s16725_s12 + $0x540] sm:$0xff]  ;;  %v682_v29 = vld [vmem:[%s16725_s12 + $0x748] sm:$0xff] }
  0xcd   : > { %2866 = vmatprep.subr.bf16.mxu1 %v13983_v36  ;;  %v14061_v61 = vcombine.high %v609_v55, %v617_v56  ;;  %v593_v63 = vld [vmem:[%s16725_s12 + $0x480] sm:$0xff]  ;;  %v14060_v3 = vcombine.low %v609_v55, %v617_v56  ;;  %v14127_v33 = vcombine.high %v674_v28, %v682_v29  ;;  %v786_v34 = vld [vmem:[%s16725_s12 + $0xa88] sm:$0xff]  ;;  %v14126_v40 = vcombine.low %v674_v28, %v682_v29 }
  0xce   : > { %2801 = vmatpush2.bf16.msra.mxu0 %v14108_v42  ;;  %v601_v0 = vld [vmem:[%s16725_s12 + $0x4c0] sm:$0xff]  ;;  %v794_v35 = vld [vmem:[%s16725_s12 + $0xac8] sm:$0xff] }
  0xcf   : > { %2802 = vmatprep.subr.bf16.mxu0 %v14093_v44  ;;  %v14045_v5 = vcombine.high %v593_v63, %v601_v0  ;;  %v577_v7 = vld [vmem:[%s16725_s12 + $0x400] sm:$0xff]  ;;  %v14044_v12 = vcombine.low %v593_v63, %v601_v0  ;;  %v658_v36 = vld [vmem:[%s16725_s12 + $0x688] sm:$0xff]  ;;  %v14239_v41 = vcombine.high %v786_v34, %v794_v35  ;;  %v14238_v47 = vcombine.low %v786_v34, %v794_v35  ;;  %v811_v34 = vld [vmem:[%s16725_s12 + $0xb50] sm:$0xff] }
  0xd0   : > { %2867 = vmatpush1.bf16.msra.mxu1 %v13982_v43  ;;  %v585_v8 = vld [vmem:[%s16725_s12 + $0x440] sm:$0xff]  ;;  %v666_v37 = vld [vmem:[%s16725_s12 + $0x6c8] sm:$0xff] }
  0xd1   : > { %2868 = vmatprep.subr.bf16.mxu1 %v13967_v45  ;;  %v14029_v14 = vcombine.high %v577_v7, %v585_v8  ;;  %v14028_v21 = vcombine.low %v577_v7, %v585_v8  ;;  %v14111_v42 = vcombine.high %v658_v36, %v666_v37  ;;  %v770_v43 = vld [vmem:[%s16725_s12 + $0xa08] sm:$0xff]  ;;  %v14110_v48 = vcombine.low %v658_v36, %v666_v37 }
  0xd2   : > { %2803 = vmatpush2.bf16.msra.mxu0 %v14092_v50  ;;  %v778_v44 = vld [vmem:[%s16725_s12 + $0xa48] sm:$0xff] }
  0xd3   : > { %2804 = vmatprep.subr.bf16.mxu0 %v14077_v52  ;;  %v642_v45 = vld [vmem:[%s16725_s12 + $0x608] sm:$0xff]  ;;  %v14223_v49 = vcombine.high %v770_v43, %v778_v44  ;;  %v14222_v56 = vcombine.low %v770_v43, %v778_v44  ;;  %v795_v43 = vld [vmem:[%s16725_s12 + $0xad0] sm:$0xff] }
  0xd4   : > { %2869 = vmatpush1.bf16.msra.mxu1 %v13966_v51  ;;  %v650_v46 = vld [vmem:[%s16725_s12 + $0x648] sm:$0xff] }
  0xd5   : > { %2870 = vmatprep.subr.bf16.mxu1 %v13951_v53  ;;  %v14095_v50 = vcombine.high %v642_v45, %v650_v46  ;;  %v754_v51 = vld [vmem:[%s16725_s12 + $0x988] sm:$0xff]  ;;  %v14094_v57 = vcombine.low %v642_v45, %v650_v46 }
  0xd6   : > { %2805 = vmatpush2.bf16.msra.mxu0 %v14076_v59  ;;  %v762_v52 = vld [vmem:[%s16725_s12 + $0x9c8] sm:$0xff] }
  0xd7   : > { %2806 = vmatprep.subr.bf16.mxu0 %v14061_v61  ;;  %v626_v53 = vld [vmem:[%s16725_s12 + $0x588] sm:$0xff]  ;;  %v14207_v58 = vcombine.high %v754_v51, %v762_v52  ;;  %v14206_v0 = vcombine.low %v754_v51, %v762_v52  ;;  %v779_v51 = vld [vmem:[%s16725_s12 + $0xa50] sm:$0xff] }
  0xd8   : > { %2871 = vmatpush1.bf16.msra.mxu1 %v13950_v60  ;;  %v634_v55 = vld [vmem:[%s16725_s12 + $0x5c8] sm:$0xff] }
  0xd9   : > { %2872 = vmatprep.subr.bf16.mxu1 %v13935_v62  ;;  %v14079_v59 = vcombine.high %v626_v53, %v634_v55  ;;  %v738_v60 = vld [vmem:[%s16725_s12 + $0x908] sm:$0xff]  ;;  %v14078_v1 = vcombine.low %v626_v53, %v634_v55 }
  0xda   : > { %2807 = vmatpush2.bf16.msra.mxu0 %v14060_v3  ;;  %v746_v61 = vld [vmem:[%s16725_s12 + $0x948] sm:$0xff] }
  0xdb   : > { %2808 = vmatprep.subr.bf16.mxu0 %v14045_v5  ;;  %v610_v62 = vld [vmem:[%s16725_s12 + $0x508] sm:$0xff]  ;;  %v14191_v2 = vcombine.high %v738_v60, %v746_v61  ;;  %v14190_v8 = vcombine.low %v738_v60, %v746_v61  ;;  %v763_v60 = vld [vmem:[%s16725_s12 + $0x9d0] sm:$0xff] }
  0xdc   : > { %2873 = vmatpush1.bf16.msra.mxu1 %v13934_v4  ;;  %v618_v63 = vld [vmem:[%s16725_s12 + $0x548] sm:$0xff] }
  0xdd   : > { %2874 = vmatprep.subr.bf16.mxu1 %v13919_v6  ;;  %v14063_v3 = vcombine.high %v610_v62, %v618_v63  ;;  %v722_v4 = vld [vmem:[%s16725_s12 + $0x888] sm:$0xff]  ;;  %v14062_v9 = vcombine.low %v610_v62, %v618_v63 }
  0xde   : > { %2809 = vmatpush2.bf16.msra.mxu0 %v14044_v12  ;;  %v730_v5 = vld [vmem:[%s16725_s12 + $0x8c8] sm:$0xff] }
  0xdf   : > { %2810 = vmatprep.subr.bf16.mxu0 %v14029_v14  ;;  %v594_v6 = vld [vmem:[%s16725_s12 + $0x488] sm:$0xff]  ;;  %v14175_v11 = vcombine.high %v722_v4, %v730_v5  ;;  %v14174_v18 = vcombine.low %v722_v4, %v730_v5  ;;  %v747_v4 = vld [vmem:[%s16725_s12 + $0x950] sm:$0xff] }
  0xe0   : > { %2875 = vmatpush1.bf16.msra.mxu1 %v13918_v13  ;;  %v602_v7 = vld [vmem:[%s16725_s12 + $0x4c8] sm:$0xff] }
  0xe1   : > { %2876 = vmatprep.subr.bf16.mxu1 %v13903_v15  ;;  %v14047_v12 = vcombine.high %v594_v6, %v602_v7  ;;  %v706_v13 = vld [vmem:[%s16725_s12 + $0x808] sm:$0xff]  ;;  %v14046_v19 = vcombine.low %v594_v6, %v602_v7 }
  0xe2   : > { %2811 = vmatpush2.bf16.msra.mxu0 %v14028_v21  ;;  %v714_v14 = vld [vmem:[%s16725_s12 + $0x848] sm:$0xff] }
  0xe3   : > { %2903 = vmatprep.subr.bf16.mxu0 %v14271_v23  ;;  %v578_v15 = vld [vmem:[%s16725_s12 + $0x408] sm:$0xff]  ;;  %v14159_v20 = vcombine.high %v706_v13, %v714_v14  ;;  %v571_v23 = vld [vmem:[%s16725_s12 + $0x3d0] sm:$0xff]  ;;  %v14158_v27 = vcombine.low %v706_v13, %v714_v14 }
  0xe4   : > { %2877 = vmatpush1.bf16.msra.mxu1 %v13902_v22  ;;  %v586_v17 = vld [vmem:[%s16725_s12 + $0x448] sm:$0xff]  ;;  %v563_v22 = vld [vmem:[%s16725_s12 + $0x390] sm:$0xff] }
  0xe5   : > { %2878 = vmatprep.subr.bf16.mxu1 %v14143_v25  ;;  %2813 = vmatmul.mubr.bf16.vlgmr.msra.gmra.mxu0 %v16809_v16  ;;  %v14031_v21 = vcombine.high %v578_v15, %v586_v17  ;;  %v819_v25 = vld [vmem:[%s16725_s12 + $0xb90] sm:$0xff]  ;;  %v14030_v28 = vcombine.low %v578_v15, %v586_v17  ;;  %v14017_v29 = vcombine.high %v563_v22, %v571_v23 }
  0xe6   : > { %2904 = vmatpush1.bf16.msra.mxu0 %v14270_v30  ;;  %2935 = vmatprep.mubr.bf16.mxu0 %v16511_v10  ;;  %v14273_v30 = vcombine.high %v819_v25, %v827_v26  ;;  %v14016_v35 = vcombine.low %v563_v22, %v571_v23  ;;  %v14272_v36 = vcombine.low %v819_v25, %v827_v26  ;;  %v731_v13 = vld [vmem:[%s16725_s12 + $0x8d0] sm:$0xff] }
  0xe7   : > { %2905 = vmatprep.subr.bf16.mxu0 %v14255_v32  ;;  %v555_v32 = vld [vmem:[%s16725_s12 + $0x350] sm:$0xff] }
  0xe8   : > { %2879 = vmatpush2.bf16.msra.mxu1 %v14142_v31  ;;  %v547_v31 = vld [vmem:[%s16725_s12 + $0x310] sm:$0xff] }
  0xe9   : > { %2880 = vmatprep.subr.bf16.mxu1 %v14127_v33  ;;  %v803_v33 = vld [vmem:[%s16725_s12 + $0xb10] sm:$0xff]  ;;  %v14001_v37 = vcombine.high %v547_v31, %v555_v32  ;;  %v14000_v44 = vcombine.low %v547_v31, %v555_v32  ;;  %v572_v31 = vld [vmem:[%s16725_s12 + $0x3d8] sm:$0xff] }
  0xea   : > { %2906 = vmatpush1.bf16.msra.mxu0 %v14254_v38  ;;  %v14257_v38 = vcombine.high %v803_v33, %v811_v34  ;;  %v14256_v45 = vcombine.low %v803_v33, %v811_v34  ;;  %v715_v22 = vld [vmem:[%s16725_s12 + $0x850] sm:$0xff] }
  0xeb   : > { %2907 = vmatprep.subr.bf16.mxu0 %v14239_v41  ;;  %v539_v41 = vld [vmem:[%s16725_s12 + $0x2d0] sm:$0xff] }
  0xec   : > { %2881 = vmatpush2.bf16.msra.mxu1 %v14126_v40  ;;  %v531_v40 = vld [vmem:[%s16725_s12 + $0x290] sm:$0xff] }
  0xed   : > { %2882 = vmatprep.subr.bf16.mxu1 %v14111_v42  ;;  %v787_v42 = vld [vmem:[%s16725_s12 + $0xa90] sm:$0xff]  ;;  %v13985_v46 = vcombine.high %v531_v40, %v539_v41  ;;  %v13984_v52 = vcombine.low %v531_v40, %v539_v41  ;;  %v556_v40 = vld [vmem:[%s16725_s12 + $0x358] sm:$0xff] }
  0xee   : > { %2908 = vmatpush1.bf16.msra.mxu0 %v14238_v47  ;;  %v14241_v47 = vcombine.high %v787_v42, %v795_v43  ;;  %v14240_v53 = vcombine.low %v787_v42, %v795_v43 }
  0xef   : > { %2909 = vmatprep.subr.bf16.mxu0 %v14223_v49  ;;  %v523_v49 = vld [vmem:[%s16725_s12 + $0x250] sm:$0xff] }
  0xf0   : > { %2883 = vmatpush2.bf16.msra.mxu1 %v14110_v48  ;;  %v515_v48 = vld [vmem:[%s16725_s12 + $0x210] sm:$0xff] }
  0xf1   : > { %2884 = vmatprep.subr.bf16.mxu1 %v14095_v50  ;;  %v771_v50 = vld [vmem:[%s16725_s12 + $0xa10] sm:$0xff]  ;;  %v13969_v55 = vcombine.high %v515_v48, %v523_v49  ;;  %v13968_v61 = vcombine.low %v515_v48, %v523_v49  ;;  %v540_v48 = vld [vmem:[%s16725_s12 + $0x2d8] sm:$0xff] }
  0xf2   : > { %2910 = vmatpush1.bf16.msra.mxu0 %v14222_v56  ;;  %v14225_v56 = vcombine.high %v771_v50, %v779_v51  ;;  %v14224_v62 = vcombine.low %v771_v50, %v779_v51 }
  0xf3   : > { %2911 = vmatprep.subr.bf16.mxu0 %v14207_v58  ;;  %v507_v58 = vld [vmem:[%s16725_s12 + $0x1d0] sm:$0xff] }
  0xf4   : > { %2885 = vmatpush2.bf16.msra.mxu1 %v14094_v57  ;;  %v499_v57 = vld [vmem:[%s16725_s12 + $0x190] sm:$0xff] }
  0xf5   : > { %2886 = vmatprep.subr.bf16.mxu1 %v14079_v59  ;;  %v755_v59 = vld [vmem:[%s16725_s12 + $0x990] sm:$0xff]  ;;  %v13953_v63 = vcombine.high %v499_v57, %v507_v58  ;;  %v13952_v5 = vcombine.low %v499_v57, %v507_v58  ;;  %v524_v57 = vld [vmem:[%s16725_s12 + $0x258] sm:$0xff] }
  0xf6   : > { %2912 = vmatpush1.bf16.msra.mxu0 %v14206_v0  ;;  %v14209_v0 = vcombine.high %v755_v59, %v763_v60  ;;  %v14208_v6 = vcombine.low %v755_v59, %v763_v60 }
  0xf7   : > { %2913 = vmatprep.subr.bf16.mxu0 %v14191_v2  ;;  %v491_v2 = vld [vmem:[%s16725_s12 + $0x150] sm:$0xff] }
  0xf8   : > { %2887 = vmatpush2.bf16.msra.mxu1 %v14078_v1  ;;  %v483_v1 = vld [vmem:[%s16725_s12 + $0x110] sm:$0xff] }
  0xf9   : > { %2888 = vmatprep.subr.bf16.mxu1 %v14063_v3  ;;  %v739_v3 = vld [vmem:[%s16725_s12 + $0x910] sm:$0xff]  ;;  %v13937_v7 = vcombine.high %v483_v1, %v491_v2  ;;  %v13936_v14 = vcombine.low %v483_v1, %v491_v2  ;;  %v508_v1 = vld [vmem:[%s16725_s12 + $0x1d8] sm:$0xff] }
  0xfa   : > { %2914 = vmatpush1.bf16.msra.mxu0 %v14190_v8  ;;  %v14193_v8 = vcombine.high %v739_v3, %v747_v4  ;;  %v14192_v15 = vcombine.low %v739_v3, %v747_v4 }
  0xfb   : > { %2915 = vmatprep.subr.bf16.mxu0 %v14175_v11  ;;  %v475_v11 = vld [vmem:[%s16725_s12 + $0xd0] sm:$0xff] }
  0xfc   : > { %2889 = vmatpush2.bf16.msra.mxu1 %v14062_v9  ;;  %v467_v9 = vld [vmem:[%s16725_s12 + $0x90] sm:$0xff] }
  0xfd   : > { %2890 = vmatprep.subr.bf16.mxu1 %v14047_v12  ;;  %v723_v12 = vld [vmem:[%s16725_s12 + $0x890] sm:$0xff]  ;;  %v13921_v17 = vcombine.high %v467_v9, %v475_v11  ;;  %v13920_v23 = vcombine.low %v467_v9, %v475_v11  ;;  %v492_v9 = vld [vmem:[%s16725_s12 + $0x158] sm:$0xff] }
  0xfe   : > { %2916 = vmatpush1.bf16.msra.mxu0 %v14174_v18  ;;  %v14177_v18 = vcombine.high %v723_v12, %v731_v13  ;;  %v14176_v25 = vcombine.low %v723_v12, %v731_v13 }
  0xff   : > { %2917 = vmatprep.subr.bf16.mxu0 %v14159_v20  ;;  %v459_v20 = vld [vmem:[%s16725_s12 + $0x50] sm:$0xff] }
 0x100   : > { %2891 = vmatpush2.bf16.msra.mxu1 %v14046_v19  ;;  %v451_v19 = vld [vmem:[%s16725_s12 + $0x10] sm:$0xff] }
 0x101   : > { %2892 = vmatprep.subr.bf16.mxu1 %v14031_v21  ;;  %v707_v21 = vld [vmem:[%s16725_s12 + $0x810] sm:$0xff]  ;;  %v13905_v26 = vcombine.high %v451_v19, %v459_v20  ;;  %v13904_v32 = vcombine.low %v451_v19, %v459_v20  ;;  %v476_v19 = vld [vmem:[%s16725_s12 + $0xd8] sm:$0xff] }
 0x102   : > { %2918 = vmatpush1.bf16.msra.mxu0 %v14158_v27  ;;  %v14161_v27 = vcombine.high %v707_v21, %v715_v22  ;;  %v14160_v33 = vcombine.low %v707_v21, %v715_v22 }
 0x103   : > { %2944 = vmatprep.subr.bf16.mxu0 %v14017_v29  ;;  %v699_v29 = vld [vmem:[%s16725_s12 + $0x7d0] sm:$0xff] }
 0x104   : > { %2893 = vmatpush2.bf16.msra.mxu1 %v14030_v28  ;;  %v691_v28 = vld [vmem:[%s16725_s12 + $0x790] sm:$0xff] }
 0x105   : > { %2985 = vmatprep.subr.bf16.mxu1 %v14273_v30  ;;  %2936 = vmatmul.mubr.bf16.vlgmr.msra.gmra.mxu0 %v16817_v24  ;;  %v564_v30 = vld [vmem:[%s16725_s12 + $0x398] sm:$0xff]  ;;  %v14145_v34 = vcombine.high %v691_v28, %v699_v29  ;;  %v14144_v41 = vcombine.low %v691_v28, %v699_v29 }
 0x106   : > { %2945 = vmatpush1.bf16.msra.mxu0 %v14016_v35  ;;  %2976 = vmatprep.mubr.bf16.mxu0 %v16794_v54  ;;  %v14019_v35 = vcombine.high %v564_v30, %v572_v31  ;;  %v14018_v42 = vcombine.low %v564_v30, %v572_v31  ;;  %v460_v28 = vld [vmem:[%s16725_s12 + $0x58] sm:$0xff] }
 0x107   : > { %2895 = vmatmul.mubr.bf16.vlgmr.msra.gmra.mxu1 %v16809_v16  ;;  %2946 = vmatprep.subr.bf16.mxu0 %v14001_v37  ;;  %v683_v37 = vld [vmem:[%s16725_s12 + $0x750] sm:$0xff] }
 0x108   : > { %2986 = vmatpush1.bf16.msra.mxu1 %v14272_v36  ;;  %3017 = vmatprep.mubr.bf16.mxu1 %v16511_v10  ;;  %v675_v36 = vld [vmem:[%s16725_s12 + $0x710] sm:$0xff] }
 0x109   : > { %2987 = vmatprep.subr.bf16.mxu1 %v14257_v38  ;;  %v548_v38 = vld [vmem:[%s16725_s12 + $0x318] sm:$0xff]  ;;  %v14129_v43 = vcombine.high %v675_v36, %v683_v37  ;;  %v14128_v49 = vcombine.low %v675_v36, %v683_v37 }
 0x10a   : > { %2947 = vmatpush1.bf16.msra.mxu0 %v14000_v44  ;;  %v14003_v44 = vcombine.high %v548_v38, %v556_v40  ;;  %v14002_v50 = vcombine.low %v548_v38, %v556_v40  ;;  %v700_v36 = vld [vmem:[%s16725_s12 + $0x7d8] sm:$0xff] }
 0x10b   : > { %2948 = vmatprep.subr.bf16.mxu0 %v13985_v46  ;;  %v667_v46 = vld [vmem:[%s16725_s12 + $0x6d0] sm:$0xff] }
 0x10c   : > { %2988 = vmatpush1.bf16.msra.mxu1 %v14256_v45  ;;  %v659_v45 = vld [vmem:[%s16725_s12 + $0x690] sm:$0xff] }
 0x10d   : > { %2989 = vmatprep.subr.bf16.mxu1 %v14241_v47  ;;  %v532_v47 = vld [vmem:[%s16725_s12 + $0x298] sm:$0xff]  ;;  %v14113_v51 = vcombine.high %v659_v45, %v667_v46  ;;  %v14112_v58 = vcombine.low %v659_v45, %v667_v46 }
 0x10e   : > { %2949 = vmatpush1.bf16.msra.mxu0 %v13984_v52  ;;  %v13987_v52 = vcombine.high %v532_v47, %v540_v48  ;;  %v13986_v59 = vcombine.low %v532_v47, %v540_v48  ;;  %v684_v45 = vld [vmem:[%s16725_s12 + $0x758] sm:$0xff] }
 0x10f   : > { %2950 = vmatprep.subr.bf16.mxu0 %v13969_v55  ;;  %v651_v55 = vld [vmem:[%s16725_s12 + $0x650] sm:$0xff] }
 0x110   : > { %2990 = vmatpush1.bf16.msra.mxu1 %v14240_v53  ;;  %v643_v53 = vld [vmem:[%s16725_s12 + $0x610] sm:$0xff] }
 0x111   : > { %2991 = vmatprep.subr.bf16.mxu1 %v14225_v56  ;;  %v516_v56 = vld [vmem:[%s16725_s12 + $0x218] sm:$0xff]  ;;  %v14097_v60 = vcombine.high %v643_v53, %v651_v55  ;;  %v14096_v2 = vcombine.low %v643_v53, %v651_v55 }
 0x112   : > { %2951 = vmatpush1.bf16.msra.mxu0 %v13968_v61  ;;  %v13971_v61 = vcombine.high %v516_v56, %v524_v57  ;;  %v13970_v3 = vcombine.low %v516_v56, %v524_v57  ;;  %v668_v53 = vld [vmem:[%s16725_s12 + $0x6d8] sm:$0xff] }
 0x113   : > { %2952 = vmatprep.subr.bf16.mxu0 %v13953_v63  ;;  %v635_v63 = vld [vmem:[%s16725_s12 + $0x5d0] sm:$0xff] }
 0x114   : > { %2992 = vmatpush1.bf16.msra.mxu1 %v14224_v62  ;;  %v627_v62 = vld [vmem:[%s16725_s12 + $0x590] sm:$0xff] }
 0x115   : > { %2993 = vmatprep.subr.bf16.mxu1 %v14209_v0  ;;  %v500_v0 = vld [vmem:[%s16725_s12 + $0x198] sm:$0xff]  ;;  %v14081_v4 = vcombine.high %v627_v62, %v635_v63  ;;  %v14080_v11 = vcombine.low %v627_v62, %v635_v63 }
 0x116   : > { %2953 = vmatpush1.bf16.msra.mxu0 %v13952_v5  ;;  %v13955_v5 = vcombine.high %v500_v0, %v508_v1  ;;  %v13954_v12 = vcombine.low %v500_v0, %v508_v1  ;;  %v652_v62 = vld [vmem:[%s16725_s12 + $0x658] sm:$0xff] }
 0x117   : > { %2954 = vmatprep.subr.bf16.mxu0 %v13937_v7  ;;  %v619_v7 = vld [vmem:[%s16725_s12 + $0x550] sm:$0xff] }
 0x118   : > { %2994 = vmatpush1.bf16.msra.mxu1 %v14208_v6  ;;  %v611_v6 = vld [vmem:[%s16725_s12 + $0x510] sm:$0xff] }
 0x119   : > { %2995 = vmatprep.subr.bf16.mxu1 %v14193_v8  ;;  %v484_v8 = vld [vmem:[%s16725_s12 + $0x118] sm:$0xff]  ;;  %v14065_v13 = vcombine.high %v611_v6, %v619_v7  ;;  %v14064_v20 = vcombine.low %v611_v6, %v619_v7 }
 0x11a   : > { %2955 = vmatpush1.bf16.msra.mxu0 %v13936_v14  ;;  %v13939_v14 = vcombine.high %v484_v8, %v492_v9  ;;  %v13938_v21 = vcombine.low %v484_v8, %v492_v9  ;;  %v636_v6 = vld [vmem:[%s16725_s12 + $0x5d8] sm:$0xff] }
 0x11b   : > { %2956 = vmatprep.subr.bf16.mxu0 %v13921_v17  ;;  %v603_v17 = vld [vmem:[%s16725_s12 + $0x4d0] sm:$0xff] }
 0x11c   : > { %2996 = vmatpush1.bf16.msra.mxu1 %v14192_v15  ;;  %v595_v15 = vld [vmem:[%s16725_s12 + $0x490] sm:$0xff] }
 0x11d   : > { %2997 = vmatprep.subr.bf16.mxu1 %v14177_v18  ;;  %v468_v18 = vld [vmem:[%s16725_s12 + $0x98] sm:$0xff]  ;;  %v14049_v22 = vcombine.high %v595_v15, %v603_v17  ;;  %v14048_v29 = vcombine.low %v595_v15, %v603_v17 }
 0x11e   : > { %2957 = vmatpush1.bf16.msra.mxu0 %v13920_v23  ;;  %v13923_v23 = vcombine.high %v468_v18, %v476_v19  ;;  %v13922_v30 = vcombine.low %v468_v18, %v476_v19  ;;  %v620_v15 = vld [vmem:[%s16725_s12 + $0x558] sm:$0xff] }
 0x11f   : > { %2958 = vmatprep.subr.bf16.mxu0 %v13905_v26  ;;  %v587_v26 = vld [vmem:[%s16725_s12 + $0x450] sm:$0xff] }
 0x120   : > { %2998 = vmatpush1.bf16.msra.mxu1 %v14176_v25  ;;  %v579_v25 = vld [vmem:[%s16725_s12 + $0x410] sm:$0xff] }
 0x121   : > { %2999 = vmatprep.subr.bf16.mxu1 %v14161_v27  ;;  %v452_v27 = vld [vmem:[%s16725_s12 + $0x18] sm:$0xff]  ;;  %v14033_v31 = vcombine.high %v579_v25, %v587_v26  ;;  %v14032_v37 = vcombine.low %v579_v25, %v587_v26 }
 0x122   : > { %2959 = vmatpush1.bf16.msra.mxu0 %v13904_v32  ;;  %v13907_v32 = vcombine.high %v452_v27, %v460_v28  ;;  %v13906_v38 = vcombine.low %v452_v27, %v460_v28  ;;  %v604_v25 = vld [vmem:[%s16725_s12 + $0x4d8] sm:$0xff] }
 0x123   : > { %2960 = vmatprep.subr.bf16.mxu0 %v14145_v34  ;;  %v828_v34 = vld [vmem:[%s16725_s12 + $0xbd8] sm:$0xff] }
 0x124   : > { %3000 = vmatpush1.bf16.msra.mxu1 %v14160_v33  ;;  %v820_v33 = vld [vmem:[%s16725_s12 + $0xb98] sm:$0xff] }
 0x125   : > { %3026 = vmatprep.subr.bf16.mxu1 %v14019_v35  ;;  %v692_v35 = vld [vmem:[%s16725_s12 + $0x798] sm:$0xff]  ;;  %v14275_v40 = vcombine.high %v820_v33, %v828_v34  ;;  %v14274_v46 = vcombine.low %v820_v33, %v828_v34 }
 0x126   : > { %2961 = vmatpush2.bf16.msra.mxu0 %v14144_v41  ;;  %v14147_v41 = vcombine.high %v692_v35, %v700_v36  ;;  %v14146_v47 = vcombine.low %v692_v35, %v700_v36  ;;  %v588_v33 = vld [vmem:[%s16725_s12 + $0x458] sm:$0xff] }
 0x127   : > { %3018 = vmatmul.mubr.bf16.vlgmr.msra.gmra.mxu1 %v16817_v24  ;;  %2962 = vmatprep.subr.bf16.mxu0 %v14129_v43  ;;  %v812_v43 = vld [vmem:[%s16725_s12 + $0xb58] sm:$0xff] }
 0x128   : > { %3027 = vmatpush1.bf16.msra.mxu1 %v14018_v42  ;;  %3058 = vmatprep.mubr.bf16.mxu1 %v16794_v54  ;;  %v804_v42 = vld [vmem:[%s16725_s12 + $0xb18] sm:$0xff] }
 0x129   : > { %3028 = vmatprep.subr.bf16.mxu1 %v14003_v44  ;;  %v676_v44 = vld [vmem:[%s16725_s12 + $0x718] sm:$0xff]  ;;  %v14259_v48 = vcombine.high %v804_v42, %v812_v43  ;;  %v14258_v55 = vcombine.low %v804_v42, %v812_v43  ;;  %v829_v42 = vld [vmem:[%s16725_s12 + $0xbe0] sm:$0xff] }
 0x12a   : > { %2963 = vmatpush2.bf16.msra.mxu0 %v14128_v49  ;;  %v14131_v49 = vcombine.high %v676_v44, %v684_v45  ;;  %v14130_v56 = vcombine.low %v676_v44, %v684_v45 }
 0x12b   : > { %2964 = vmatprep.subr.bf16.mxu0 %v14113_v51  ;;  %v796_v51 = vld [vmem:[%s16725_s12 + $0xad8] sm:$0xff] }
 0x12c   : > { %3029 = vmatpush1.bf16.msra.mxu1 %v14002_v50  ;;  %v788_v50 = vld [vmem:[%s16725_s12 + $0xa98] sm:$0xff] }
 0x12d   : > { %3030 = vmatprep.subr.bf16.mxu1 %v13987_v52  ;;  %v660_v52 = vld [vmem:[%s16725_s12 + $0x698] sm:$0xff]  ;;  %v14243_v57 = vcombine.high %v788_v50, %v796_v51  ;;  %v14242_v63 = vcombine.low %v788_v50, %v796_v51  ;;  %v813_v50 = vld [vmem:[%s16725_s12 + $0xb60] sm:$0xff] }
 0x12e   : > { %2965 = vmatpush2.bf16.msra.mxu0 %v14112_v58  ;;  %v14115_v58 = vcombine.high %v660_v52, %v668_v53  ;;  %v14114_v0 = vcombine.low %v660_v52, %v668_v53 }
 0x12f   : > { %2966 = vmatprep.subr.bf16.mxu0 %v14097_v60  ;;  %v780_v60 = vld [vmem:[%s16725_s12 + $0xa58] sm:$0xff] }
 0x130   : > { %3031 = vmatpush1.bf16.msra.mxu1 %v13986_v59  ;;  %v772_v59 = vld [vmem:[%s16725_s12 + $0xa18] sm:$0xff] }
 0x131   : > { %3032 = vmatprep.subr.bf16.mxu1 %v13971_v61  ;;  %v644_v61 = vld [vmem:[%s16725_s12 + $0x618] sm:$0xff]  ;;  %v14227_v1 = vcombine.high %v772_v59, %v780_v60  ;;  %v14226_v7 = vcombine.low %v772_v59, %v780_v60  ;;  %v797_v59 = vld [vmem:[%s16725_s12 + $0xae0] sm:$0xff] }
 0x132   : > { %2967 = vmatpush2.bf16.msra.mxu0 %v14096_v2  ;;  %v14099_v2 = vcombine.high %v644_v61, %v652_v62  ;;  %v14098_v8 = vcombine.low %v644_v61, %v652_v62 }
 0x133   : > { %2968 = vmatprep.subr.bf16.mxu0 %v14081_v4  ;;  %v764_v4 = vld [vmem:[%s16725_s12 + $0x9d8] sm:$0xff] }
 0x134   : > { %3033 = vmatpush1.bf16.msra.mxu1 %v13970_v3  ;;  %v756_v3 = vld [vmem:[%s16725_s12 + $0x998] sm:$0xff] }
 0x135   : > { %3034 = vmatprep.subr.bf16.mxu1 %v13955_v5  ;;  %v628_v5 = vld [vmem:[%s16725_s12 + $0x598] sm:$0xff]  ;;  %v14211_v9 = vcombine.high %v756_v3, %v764_v4  ;;  %v14210_v17 = vcombine.low %v756_v3, %v764_v4  ;;  %v781_v3 = vld [vmem:[%s16725_s12 + $0xa60] sm:$0xff] }
 0x136   : > { %2969 = vmatpush2.bf16.msra.mxu0 %v14080_v11  ;;  %v14083_v11 = vcombine.high %v628_v5, %v636_v6  ;;  %v14082_v18 = vcombine.low %v628_v5, %v636_v6 }
 0x137   : > { %2970 = vmatprep.subr.bf16.mxu0 %v14065_v13  ;;  %v748_v13 = vld [vmem:[%s16725_s12 + $0x958] sm:$0xff] }
 0x138   : > { %3035 = vmatpush1.bf16.msra.mxu1 %v13954_v12  ;;  %v740_v12 = vld [vmem:[%s16725_s12 + $0x918] sm:$0xff] }
 0x139   : > { %3036 = vmatprep.subr.bf16.mxu1 %v13939_v14  ;;  %v612_v14 = vld [vmem:[%s16725_s12 + $0x518] sm:$0xff]  ;;  %v14195_v19 = vcombine.high %v740_v12, %v748_v13  ;;  %v14194_v26 = vcombine.low %v740_v12, %v748_v13  ;;  %v765_v12 = vld [vmem:[%s16725_s12 + $0x9e0] sm:$0xff] }
 0x13a   : > { %2971 = vmatpush2.bf16.msra.mxu0 %v14064_v20  ;;  %v14067_v20 = vcombine.high %v612_v14, %v620_v15  ;;  %v14066_v27 = vcombine.low %v612_v14, %v620_v15 }
 0x13b   : > { %2972 = vmatprep.subr.bf16.mxu0 %v14049_v22  ;;  %v732_v22 = vld [vmem:[%s16725_s12 + $0x8d8] sm:$0xff] }
 0x13c   : > { %3037 = vmatpush1.bf16.msra.mxu1 %v13938_v21  ;;  %v724_v21 = vld [vmem:[%s16725_s12 + $0x898] sm:$0xff] }
 0x13d   : > { %3038 = vmatprep.subr.bf16.mxu1 %v13923_v23  ;;  %v596_v23 = vld [vmem:[%s16725_s12 + $0x498] sm:$0xff]  ;;  %v14179_v28 = vcombine.high %v724_v21, %v732_v22  ;;  %v14178_v34 = vcombine.low %v724_v21, %v732_v22  ;;  %v749_v21 = vld [vmem:[%s16725_s12 + $0x960] sm:$0xff] }
 0x13e   : > { %2973 = vmatpush2.bf16.msra.mxu0 %v14048_v29  ;;  %v14051_v29 = vcombine.high %v596_v23, %v604_v25  ;;  %v14050_v35 = vcombine.low %v596_v23, %v604_v25 }
 0x13f   : > { %2974 = vmatprep.subr.bf16.mxu0 %v14033_v31  ;;  %v716_v31 = vld [vmem:[%s16725_s12 + $0x858] sm:$0xff] }
 0x140   : > { %3039 = vmatpush1.bf16.msra.mxu1 %v13922_v30  ;;  %v708_v30 = vld [vmem:[%s16725_s12 + $0x818] sm:$0xff] }
 0x141   : > { %3040 = vmatprep.subr.bf16.mxu1 %v13907_v32  ;;  %v580_v32 = vld [vmem:[%s16725_s12 + $0x418] sm:$0xff]  ;;  %v14163_v36 = vcombine.high %v708_v30, %v716_v31  ;;  %v14162_v43 = vcombine.low %v708_v30, %v716_v31  ;;  %v733_v30 = vld [vmem:[%s16725_s12 + $0x8e0] sm:$0xff] }
 0x142   : > { %2975 = vmatpush2.bf16.msra.mxu0 %v14032_v37  ;;  %v14035_v37 = vcombine.high %v580_v32, %v588_v33  ;;  %v14034_v44 = vcombine.low %v580_v32, %v588_v33 }
 0x143   : > { %3067 = vmatprep.subr.bf16.mxu0 %v14275_v40  ;;  %v573_v40 = vld [vmem:[%s16725_s12 + $0x3e0] sm:$0xff] }
 0x144   : > { %3041 = vmatpush1.bf16.msra.mxu1 %v13906_v38  ;;  %v565_v38 = vld [vmem:[%s16725_s12 + $0x3a0] sm:$0xff] }
 0x145   : > { %3042 = vmatprep.subr.bf16.mxu1 %v14147_v41  ;;  %2977 = vmatmul.mubr.bf16.vlgmr.msra.gmra.mxu0 %v16809_v16  ;;  %v821_v41 = vld [vmem:[%s16725_s12 + $0xba0] sm:$0xff]  ;;  %v14021_v45 = vcombine.high %v565_v38, %v573_v40  ;;  %v14020_v51 = vcombine.low %v565_v38, %v573_v40 }
 0x146   : > { %3068 = vmatpush1.bf16.msra.mxu0 %v14274_v46  ;;  %3099 = vmatprep.mubr.bf16.mxu0 %v16511_v10  ;;  %v14277_v46 = vcombine.high %v821_v41, %v829_v42  ;;  %v14276_v52 = vcombine.low %v821_v41, %v829_v42  ;;  %v717_v38 = vld [vmem:[%s16725_s12 + $0x860] sm:$0xff] }
 0x147   : > { %3069 = vmatprep.subr.bf16.mxu0 %v14259_v48  ;;  %v557_v48 = vld [vmem:[%s16725_s12 + $0x360] sm:$0xff] }
 0x148   : > { %3043 = vmatpush2.bf16.msra.mxu1 %v14146_v47  ;;  %v549_v47 = vld [vmem:[%s16725_s12 + $0x320] sm:$0xff] }
 0x149   : > { %3044 = vmatprep.subr.bf16.mxu1 %v14131_v49  ;;  %v805_v49 = vld [vmem:[%s16725_s12 + $0xb20] sm:$0xff]  ;;  %v14005_v53 = vcombine.high %v549_v47, %v557_v48  ;;  %v14004_v60 = vcombine.low %v549_v47, %v557_v48  ;;  %v574_v47 = vld [vmem:[%s16725_s12 + $0x3e8] sm:$0xff] }
 0x14a   : > { %3070 = vmatpush1.bf16.msra.mxu0 %v14258_v55  ;;  %v14261_v55 = vcombine.high %v805_v49, %v813_v50  ;;  %v14260_v61 = vcombine.low %v805_v49, %v813_v50 }
 0x14b   : > { %3071 = vmatprep.subr.bf16.mxu0 %v14243_v57  ;;  %v541_v57 = vld [vmem:[%s16725_s12 + $0x2e0] sm:$0xff] }
 0x14c   : > { %3045 = vmatpush2.bf16.msra.mxu1 %v14130_v56  ;;  %v533_v56 = vld [vmem:[%s16725_s12 + $0x2a0] sm:$0xff] }
 0x14d   : > { %3046 = vmatprep.subr.bf16.mxu1 %v14115_v58  ;;  %v789_v58 = vld [vmem:[%s16725_s12 + $0xaa0] sm:$0xff]  ;;  %v13989_v62 = vcombine.high %v533_v56, %v541_v57  ;;  %v13988_v4 = vcombine.low %v533_v56, %v541_v57  ;;  %v558_v56 = vld [vmem:[%s16725_s12 + $0x368] sm:$0xff] }
 0x14e   : > { %3072 = vmatpush1.bf16.msra.mxu0 %v14242_v63  ;;  %v14245_v63 = vcombine.high %v789_v58, %v797_v59  ;;  %v14244_v5 = vcombine.low %v789_v58, %v797_v59 }
 0x14f   : > { %3073 = vmatprep.subr.bf16.mxu0 %v14227_v1  ;;  %v525_v1 = vld [vmem:[%s16725_s12 + $0x260] sm:$0xff] }
 0x150   : > { %3047 = vmatpush2.bf16.msra.mxu1 %v14114_v0  ;;  %v517_v0 = vld [vmem:[%s16725_s12 + $0x220] sm:$0xff] }
 0x151   : > { %3048 = vmatprep.subr.bf16.mxu1 %v14099_v2  ;;  %v773_v2 = vld [vmem:[%s16725_s12 + $0xa20] sm:$0xff]  ;;  %v13973_v6 = vcombine.high %v517_v0, %v525_v1  ;;  %v13972_v13 = vcombine.low %v517_v0, %v525_v1  ;;  %v542_v0 = vld [vmem:[%s16725_s12 + $0x2e8] sm:$0xff] }
 0x152   : > { %3074 = vmatpush1.bf16.msra.mxu0 %v14226_v7  ;;  %v14229_v7 = vcombine.high %v773_v2, %v781_v3  ;;  %v14228_v14 = vcombine.low %v773_v2, %v781_v3 }
 0x153   : > { %3075 = vmatprep.subr.bf16.mxu0 %v14211_v9  ;;  %v509_v9 = vld [vmem:[%s16725_s12 + $0x1e0] sm:$0xff] }
 0x154   : > { %3049 = vmatpush2.bf16.msra.mxu1 %v14098_v8  ;;  %v501_v8 = vld [vmem:[%s16725_s12 + $0x1a0] sm:$0xff] }
 0x155   : > { %3050 = vmatprep.subr.bf16.mxu1 %v14083_v11  ;;  %v757_v11 = vld [vmem:[%s16725_s12 + $0x9a0] sm:$0xff]  ;;  %v13957_v15 = vcombine.high %v501_v8, %v509_v9  ;;  %v13956_v22 = vcombine.low %v501_v8, %v509_v9  ;;  %v518_v9 = vld [vmem:[%s16725_s12 + $0x228] sm:$0xff] }
 0x156   : > { %3076 = vmatpush1.bf16.msra.mxu0 %v14210_v17  ;;  %v14213_v17 = vcombine.high %v757_v11, %v765_v12  ;;  %v14212_v23 = vcombine.low %v757_v11, %v765_v12  ;;  %v653_v8 = vld [vmem:[%s16725_s12 + $0x660] sm:$0xff]  ;;  %v526_v11 = vld [vmem:[%s16725_s12 + $0x268] sm:$0xff] }
 0x157   : > { %3077 = vmatprep.subr.bf16.mxu0 %v14195_v19  ;;  %v493_v19 = vld [vmem:[%s16725_s12 + $0x160] sm:$0xff] }
 0x158   : > { %3051 = vmatpush2.bf16.msra.mxu1 %v14082_v18  ;;  %v485_v18 = vld [vmem:[%s16725_s12 + $0x120] sm:$0xff] }
 0x159   : > { %3052 = vmatprep.subr.bf16.mxu1 %v14067_v20  ;;  %v741_v20 = vld [vmem:[%s16725_s12 + $0x920] sm:$0xff]  ;;  %v13941_v25 = vcombine.high %v485_v18, %v493_v19  ;;  %v13940_v31 = vcombine.low %v485_v18, %v493_v19  ;;  %v13975_v18 = vcombine.high %v518_v9, %v526_v11 }
 0x15a   : > { %3078 = vmatpush1.bf16.msra.mxu0 %v14194_v26  ;;  %v14197_v26 = vcombine.high %v741_v20, %v749_v21  ;;  %v14196_v32 = vcombine.low %v741_v20, %v749_v21  ;;  %v629_v19 = vld [vmem:[%s16725_s12 + $0x5a0] sm:$0xff]  ;;  %v502_v21 = vld [vmem:[%s16725_s12 + $0x1a8] sm:$0xff] }
 0x15b   : > { %3079 = vmatprep.subr.bf16.mxu0 %v14179_v28  ;;  %v477_v28 = vld [vmem:[%s16725_s12 + $0xe0] sm:$0xff] }
 0x15c   : > { %3053 = vmatpush2.bf16.msra.mxu1 %v14066_v27  ;;  %v469_v27 = vld [vmem:[%s16725_s12 + $0xa0] sm:$0xff] }
 0x15d   : > { %3054 = vmatprep.subr.bf16.mxu1 %v14051_v29  ;;  %v725_v29 = vld [vmem:[%s16725_s12 + $0x8a0] sm:$0xff]  ;;  %v13925_v33 = vcombine.high %v469_v27, %v477_v28  ;;  %v13924_v40 = vcombine.low %v469_v27, %v477_v28 }
 0x15e   : > { %3080 = vmatpush1.bf16.msra.mxu0 %v14178_v34  ;;  %v14181_v34 = vcombine.high %v725_v29, %v733_v30  ;;  %v14180_v41 = vcombine.low %v725_v29, %v733_v30  ;;  %v637_v20 = vld [vmem:[%s16725_s12 + $0x5e0] sm:$0xff]  ;;  %v486_v30 = vld [vmem:[%s16725_s12 + $0x128] sm:$0xff] }
 0x15f   : > { %3081 = vmatprep.subr.bf16.mxu0 %v14163_v36  ;;  %v461_v36 = vld [vmem:[%s16725_s12 + $0x60] sm:$0xff] }
 0x160   : > { %3055 = vmatpush2.bf16.msra.mxu1 %v14050_v35  ;;  %v453_v35 = vld [vmem:[%s16725_s12 + $0x20] sm:$0xff] }
 0x161   : > { %3056 = vmatprep.subr.bf16.mxu1 %v14035_v37  ;;  %v709_v37 = vld [vmem:[%s16725_s12 + $0x820] sm:$0xff]  ;;  %v13909_v42 = vcombine.high %v453_v35, %v461_v36  ;;  %v13908_v48 = vcombine.low %v453_v35, %v461_v36 }
 0x162   : > { %3082 = vmatpush1.bf16.msra.mxu0 %v14162_v43  ;;  %v14165_v43 = vcombine.high %v709_v37, %v717_v38  ;;  %v14164_v49 = vcombine.low %v709_v37, %v717_v38  ;;  %v613_v28 = vld [vmem:[%s16725_s12 + $0x520] sm:$0xff]  ;;  %v470_v38 = vld [vmem:[%s16725_s12 + $0xa8] sm:$0xff] }
 0x163   : > { %3108 = vmatprep.subr.bf16.mxu0 %v14021_v45  ;;  %v701_v45 = vld [vmem:[%s16725_s12 + $0x7e0] sm:$0xff] }
 0x164   : > { %3057 = vmatpush2.bf16.msra.mxu1 %v14034_v44  ;;  %v693_v44 = vld [vmem:[%s16725_s12 + $0x7a0] sm:$0xff] }
 0x165   : > { %3149 = vmatprep.subr.bf16.mxu1 %v14277_v46  ;;  %3100 = vmatmul.mubr.bf16.vlgmr.msra.gmra.mxu0 %v16817_v24  ;;  %v566_v46 = vld [vmem:[%s16725_s12 + $0x3a8] sm:$0xff]  ;;  %v14149_v50 = vcombine.high %v693_v44, %v701_v45  ;;  %v14148_v57 = vcombine.low %v693_v44, %v701_v45  ;;  %v621_v29 = vld [vmem:[%s16725_s12 + $0x560] sm:$0xff] }
 0x166   : > { %3109 = vmatpush1.bf16.msra.mxu0 %v14020_v51  ;;  %3140 = vmatprep.mubr.bf16.mxu0 %v16794_v54  ;;  %v14023_v51 = vcombine.high %v566_v46, %v574_v47  ;;  %v14022_v58 = vcombine.low %v566_v46, %v574_v47  ;;  %v597_v36 = vld [vmem:[%s16725_s12 + $0x4a0] sm:$0xff]  ;;  %v454_v47 = vld [vmem:[%s16725_s12 + $0x28] sm:$0xff] }
 0x167   : > { %3059 = vmatmul.mubr.bf16.vlgmr.msra.gmra.mxu1 %v16809_v16  ;;  %3110 = vmatprep.subr.bf16.mxu0 %v14005_v53  ;;  %v685_v53 = vld [vmem:[%s16725_s12 + $0x760] sm:$0xff] }
 0x168   : > { %3150 = vmatpush1.bf16.msra.mxu1 %v14276_v52  ;;  %3181 = vmatprep.mubr.bf16.mxu1 %v16511_v10  ;;  %v677_v52 = vld [vmem:[%s16725_s12 + $0x720] sm:$0xff] }
 0x169   : > { %3151 = vmatprep.subr.bf16.mxu1 %v14261_v55  ;;  %v550_v55 = vld [vmem:[%s16725_s12 + $0x328] sm:$0xff]  ;;  %v14133_v59 = vcombine.high %v677_v52, %v685_v53  ;;  %v14132_v2 = vcombine.low %v677_v52, %v685_v53  ;;  %v605_v37 = vld [vmem:[%s16725_s12 + $0x4e0] sm:$0xff] }
 0x16a   : > { %3111 = vmatpush1.bf16.msra.mxu0 %v14004_v60  ;;  %v14007_v60 = vcombine.high %v550_v55, %v558_v56  ;;  %v14006_v3 = vcombine.low %v550_v55, %v558_v56  ;;  %v581_v45 = vld [vmem:[%s16725_s12 + $0x420] sm:$0xff]  ;;  %v822_v53 = vld [vmem:[%s16725_s12 + $0xba8] sm:$0xff] }
 0x16b   : > { %3112 = vmatprep.subr.bf16.mxu0 %v13989_v62  ;;  %v669_v62 = vld [vmem:[%s16725_s12 + $0x6e0] sm:$0xff]  ;;  %v830_v55 = vld [vmem:[%s16725_s12 + $0xbe8] sm:$0xff] }
 0x16c   : > { %3152 = vmatpush1.bf16.msra.mxu1 %v14260_v61  ;;  %v661_v61 = vld [vmem:[%s16725_s12 + $0x6a0] sm:$0xff]  ;;  %v694_v56 = vld [vmem:[%s16725_s12 + $0x7a8] sm:$0xff] }
 0x16d   : > { %3153 = vmatprep.subr.bf16.mxu1 %v14245_v63  ;;  %v534_v63 = vld [vmem:[%s16725_s12 + $0x2a8] sm:$0xff]  ;;  %v589_v46 = vld [vmem:[%s16725_s12 + $0x460] sm:$0xff] }
 0x16e   : > { %3113 = vmatpush1.bf16.msra.mxu0 %v13988_v4  ;;  %v14117_v4 = vcombine.high %v661_v61, %v669_v62 }
 0x16f   : > { %3114 = vmatprep.subr.bf16.mxu0 %v13973_v6  ;;  %v13991_v6 = vcombine.high %v534_v63, %v542_v0 }
 0x170   : > { %3154 = vmatpush1.bf16.msra.mxu1 %v14244_v5 }
 0x171   : > { %3155 = vmatprep.subr.bf16.mxu1 %v14229_v7  ;;  %v645_v7 = vld [vmem:[%s16725_s12 + $0x620] sm:$0xff] }
 0x172   : > { %3115 = vmatpush1.bf16.msra.mxu0 %v13972_v13  ;;  %v14116_v13 = vcombine.low %v661_v61, %v669_v62  ;;  %v806_v62 = vld [vmem:[%s16725_s12 + $0xb28] sm:$0xff] }
 0x173   : > { %3116 = vmatprep.subr.bf16.mxu0 %v13957_v15  ;;  %v14101_v15 = vcombine.high %v645_v7, %v653_v8 }
 0x174   : > { %3156 = vmatpush1.bf16.msra.mxu1 %v14228_v14  ;;  %v13990_v14 = vcombine.low %v534_v63, %v542_v0  ;;  %v814_v63 = vld [vmem:[%s16725_s12 + $0xb68] sm:$0xff] }
 0x175   : > { %3157 = vmatprep.subr.bf16.mxu1 %v14213_v17  ;;  %v678_v0 = vld [vmem:[%s16725_s12 + $0x728] sm:$0xff] }
 0x176   : > { %3117 = vmatpush1.bf16.msra.mxu0 %v13956_v22  ;;  %v510_v22 = vld [vmem:[%s16725_s12 + $0x1e8] sm:$0xff] }
 0x177   : > { %3118 = vmatprep.subr.bf16.mxu0 %v13941_v25  ;;  %v13974_v25 = vcombine.low %v518_v9, %v526_v11  ;;  %v13959_v27 = vcombine.high %v502_v21, %v510_v22  ;;  %v798_v9 = vld [vmem:[%s16725_s12 + $0xae8] sm:$0xff] }
 0x178   : > { %3158 = vmatpush1.bf16.msra.mxu1 %v14212_v23  ;;  %v14100_v23 = vcombine.low %v645_v7, %v653_v8  ;;  %v790_v8 = vld [vmem:[%s16725_s12 + $0xaa8] sm:$0xff] }
 0x179   : > { %3159 = vmatprep.subr.bf16.mxu1 %v14197_v26  ;;  %v14085_v26 = vcombine.high %v629_v19, %v637_v20 }
 0x17a   : > { %3119 = vmatpush1.bf16.msra.mxu0 %v13940_v31  ;;  %v494_v31 = vld [vmem:[%s16725_s12 + $0x168] sm:$0xff] }
 0x17b   : > { %3120 = vmatprep.subr.bf16.mxu0 %v13925_v33  ;;  %v13958_v33 = vcombine.low %v502_v21, %v510_v22  ;;  %v13943_v35 = vcombine.high %v486_v30, %v494_v31  ;;  %v774_v22 = vld [vmem:[%s16725_s12 + $0xa28] sm:$0xff] }
 0x17c   : > { %3160 = vmatpush1.bf16.msra.mxu1 %v14196_v32  ;;  %v14084_v32 = vcombine.low %v629_v19, %v637_v20 }
 0x17d   : > { %3161 = vmatprep.subr.bf16.mxu1 %v14181_v34  ;;  %v14069_v34 = vcombine.high %v613_v28, %v621_v29 }
 0x17e   : > { %3121 = vmatpush1.bf16.msra.mxu0 %v13924_v40  ;;  %v478_v40 = vld [vmem:[%s16725_s12 + $0xe8] sm:$0xff] }
 0x17f   : > { %3122 = vmatprep.subr.bf16.mxu0 %v13909_v42  ;;  %v13942_v42 = vcombine.low %v486_v30, %v494_v31  ;;  %v13927_v44 = vcombine.high %v470_v38, %v478_v40 }
 0x180   : > { %3162 = vmatpush1.bf16.msra.mxu1 %v14180_v41  ;;  %v14068_v41 = vcombine.low %v613_v28, %v621_v29 }
 0x181   : > { %3163 = vmatprep.subr.bf16.mxu1 %v14165_v43  ;;  %v14053_v43 = vcombine.high %v597_v36, %v605_v37 }
 0x182   : > { %3123 = vmatpush1.bf16.msra.mxu0 %v13908_v48  ;;  %v462_v48 = vld [vmem:[%s16725_s12 + $0x68] sm:$0xff] }
 0x183   : > { %3124 = vmatprep.subr.bf16.mxu0 %v14149_v50  ;;  %v13926_v50 = vcombine.low %v470_v38, %v478_v40  ;;  %v13911_v52 = vcombine.high %v454_v47, %v462_v48 }
 0x184   : > { %3164 = vmatpush1.bf16.msra.mxu1 %v14164_v49  ;;  %v14052_v49 = vcombine.low %v597_v36, %v605_v37 }
 0x185   : > { %3190 = vmatprep.subr.bf16.mxu1 %v14023_v51  ;;  %v14037_v51 = vcombine.high %v581_v45, %v589_v46 }
 0x186   : > { %3125 = vmatpush2.bf16.msra.mxu0 %v14148_v57  ;;  %v702_v57 = vld [vmem:[%s16725_s12 + $0x7e8] sm:$0xff] }
 0x187   : > { %v17031_v1 = vpop.f32.mrf.mxu1  ;;  %3182 = vmatmul.mubr.bf16.vlgmr.msra.gmra.mxu1 %v16817_v24  ;;  %3126 = vmatprep.subr.bf16.mxu0 %v14133_v59  ;;  %v13910_v59 = vcombine.low %v454_v47, %v462_v48  ;;  %v14151_v61 = vcombine.high %v694_v56, %v702_v57 }
 0x188   : > { %3191 = vmatpush1.bf16.msra.mxu1 %v14022_v58  ;;  %3222 = vmatprep.mubr.bf16.mxu1 %v16794_v54  ;;  %v14036_v58 = vcombine.low %v581_v45, %v589_v46 }
 0x189   : > { %v17034_v5 = vpop.f32.mrf.mxu1  ;;  %3192 = vmatprep.subr.bf16.mxu1 %v14007_v60  ;;  %v14279_v60 = vcombine.high %v822_v53, %v830_v55 }
 0x18a   : > { %3127 = vmatpush2.bf16.msra.mxu0 %v14132_v2  ;;  %v686_v2 = vld [vmem:[%s16725_s12 + $0x768] sm:$0xff] }
 0x18b   : > { %v2859_v12 = vpop.f32.mrf.mxu1  ;;  %3128 = vmatprep.subr.bf16.mxu0 %v14117_v4  ;;  %v14150_v4 = vcombine.low %v694_v56, %v702_v57  ;;  %v14135_v7 = vcombine.high %v678_v0, %v686_v2 }
 0x18c   : > { %3193 = vmatpush1.bf16.msra.mxu1 %v14006_v3  ;;  %v14278_v3 = vcombine.low %v822_v53, %v830_v55  ;;  %v662_v12 = vld [vmem:[%s16725_s12 + $0x6a8] sm:$0xff] }
 0x18d   : > { %v2860_v17 = vpop.f32.mrf.mxu1  ;;  %3194 = vmatprep.subr.bf16.mxu1 %v13991_v6  ;;  %v14263_v6 = vcombine.high %v806_v62, %v814_v63 }
 0x18e   : > { %3129 = vmatpush2.bf16.msra.mxu0 %v14116_v13  ;;  %v670_v13 = vld [vmem:[%s16725_s12 + $0x6e8] sm:$0xff]  ;;  %v14134_v17 = vcombine.low %v678_v0, %v686_v2 }
 0x18f   : > { %3130 = vmatprep.subr.bf16.mxu0 %v14101_v15  ;;  %v14119_v21 = vcombine.high %v662_v12, %v670_v13 }
 0x190   : > { %3195 = vmatpush1.bf16.msra.mxu1 %v13990_v14  ;;  %v14262_v14 = vcombine.low %v806_v62, %v814_v63 }
 0x191   : > { %3196 = vmatprep.subr.bf16.mxu1 %v13975_v18  ;;  %v14247_v18 = vcombine.high %v790_v8, %v798_v9 }
 0x192   : > { %3131 = vmatpush2.bf16.msra.mxu0 %v14100_v23  ;;  %v782_v23 = vld [vmem:[%s16725_s12 + $0xa68] sm:$0xff] }
 0x193   : > { %3132 = vmatprep.subr.bf16.mxu0 %v14085_v26  ;;  %v646_v26 = vld [vmem:[%s16725_s12 + $0x628] sm:$0xff]  ;;  %v14231_v30 = vcombine.high %v774_v22, %v782_v23  ;;  %v14230_v36 = vcombine.low %v774_v22, %v782_v23 }
 0x194   : > { %3197 = vmatpush1.bf16.msra.mxu1 %v13974_v25 }
 0x195   : > { %3198 = vmatprep.subr.bf16.mxu1 %v13959_v27  ;;  %v654_v27 = vld [vmem:[%s16725_s12 + $0x668] sm:$0xff] }
 0x196   : > { %3133 = vmatpush2.bf16.msra.mxu0 %v14084_v32  ;;  %v14103_v31 = vcombine.high %v646_v26, %v654_v27  ;;  %v758_v32 = vld [vmem:[%s16725_s12 + $0x9a8] sm:$0xff]  ;;  %v14102_v37 = vcombine.low %v646_v26, %v654_v27  ;;  %v535_v27 = vld [vmem:[%s16725_s12 + $0x2b0] sm:$0xff] }
 0x197   : > { %3134 = vmatprep.subr.bf16.mxu0 %v14069_v34  ;;  %v630_v34 = vld [vmem:[%s16725_s12 + $0x5a8] sm:$0xff] }
 0x198   : > { %3199 = vmatpush1.bf16.msra.mxu1 %v13958_v33  ;;  %v766_v33 = vld [vmem:[%s16725_s12 + $0x9e8] sm:$0xff] }
 0x199   : > { %3200 = vmatprep.subr.bf16.mxu1 %v13943_v35  ;;  %v638_v35 = vld [vmem:[%s16725_s12 + $0x5e8] sm:$0xff]  ;;  %v14215_v38 = vcombine.high %v758_v32, %v766_v33  ;;  %v14214_v45 = vcombine.low %v758_v32, %v766_v33 }
 0x19a   : > { %3135 = vmatpush2.bf16.msra.mxu0 %v14068_v41  ;;  %v14087_v40 = vcombine.high %v630_v34, %v638_v35  ;;  %v742_v41 = vld [vmem:[%s16725_s12 + $0x928] sm:$0xff]  ;;  %v14086_v46 = vcombine.low %v630_v34, %v638_v35 }
 0x19b   : > { %3136 = vmatprep.subr.bf16.mxu0 %v14053_v43  ;;  %v614_v43 = vld [vmem:[%s16725_s12 + $0x528] sm:$0xff] }
 0x19c   : > { %3201 = vmatpush1.bf16.msra.mxu1 %v13942_v42  ;;  %v750_v42 = vld [vmem:[%s16725_s12 + $0x968] sm:$0xff] }
 0x19d   : > { %3202 = vmatprep.subr.bf16.mxu1 %v13927_v44  ;;  %v622_v44 = vld [vmem:[%s16725_s12 + $0x568] sm:$0xff]  ;;  %v14199_v47 = vcombine.high %v742_v41, %v750_v42  ;;  %v14198_v53 = vcombine.low %v742_v41, %v750_v42  ;;  %v519_v41 = vld [vmem:[%s16725_s12 + $0x230] sm:$0xff] }
 0x19e   : > { %3137 = vmatpush2.bf16.msra.mxu0 %v14052_v49  ;;  %v14071_v48 = vcombine.high %v614_v43, %v622_v44  ;;  %v726_v49 = vld [vmem:[%s16725_s12 + $0x8a8] sm:$0xff]  ;;  %v14070_v55 = vcombine.low %v614_v43, %v622_v44  ;;  %v527_v42 = vld [vmem:[%s16725_s12 + $0x270] sm:$0xff] }
 0x19f   : > { %3138 = vmatprep.subr.bf16.mxu0 %v14037_v51  ;;  %v598_v51 = vld [vmem:[%s16725_s12 + $0x4a8] sm:$0xff] }
 0x1a0   : > { %3203 = vmatpush1.bf16.msra.mxu1 %v13926_v50  ;;  %v734_v50 = vld [vmem:[%s16725_s12 + $0x8e8] sm:$0xff] }
 0x1a1   : > { %3204 = vmatprep.subr.bf16.mxu1 %v13911_v52  ;;  %v606_v52 = vld [vmem:[%s16725_s12 + $0x4e8] sm:$0xff]  ;;  %v14183_v56 = vcombine.high %v726_v49, %v734_v50  ;;  %v14182_v62 = vcombine.low %v726_v49, %v734_v50 }
 0x1a2   : > { %3139 = vmatpush2.bf16.msra.mxu0 %v14036_v58  ;;  %v14055_v57 = vcombine.high %v598_v51, %v606_v52  ;;  %v710_v58 = vld [vmem:[%s16725_s12 + $0x828] sm:$0xff]  ;;  %v14054_v63 = vcombine.low %v598_v51, %v606_v52 }
 0x1a3   : > { %3231 = vmatprep.subr.bf16.mxu0 %v14279_v60  ;;  %v582_v60 = vld [vmem:[%s16725_s12 + $0x428] sm:$0xff] }
 0x1a4   : > { %3205 = vmatpush1.bf16.msra.mxu1 %v13910_v59  ;;  %v718_v59 = vld [vmem:[%s16725_s12 + $0x868] sm:$0xff] }
 0x1a5   : > { %3206 = vmatprep.subr.bf16.mxu1 %v14151_v61  ;;  %v2814_v11 = vpop.f32.mrf.mxu0  ;;  %3141 = vmatmul.mubr.bf16.vlgmr.msra.gmra.mxu0 %v16809_v16  ;;  %v590_v61 = vld [vmem:[%s16725_s12 + $0x468] sm:$0xff]  ;;  %v14167_v0 = vcombine.high %v710_v58, %v718_v59 }
 0x1a6   : > { %3232 = vmatpush1.bf16.msra.mxu0 %v14278_v3  ;;  %3263 = vmatprep.mubr.bf16.mxu0 %v16511_v10  ;;  %v17072_v19 = vadd.f32 %v17031_v1, %v2814_v11  ;;  %v14246_v1 = vcombine.low %v790_v8, %v798_v9  ;;  %v14039_v2 = vcombine.high %v582_v60, %v590_v61  ;;  %v567_v3 = vld [vmem:[%s16725_s12 + $0x3b0] sm:$0xff] }
 0x1a7   : > { %v2816_v15 = vpop.f32.mrf.mxu0  ;;  %3233 = vmatprep.subr.bf16.mxu0 %v14263_v6  ;;  %v823_v6 = vld [vmem:[%s16725_s12 + $0xbb0] sm:$0xff]  ;;  %v14166_v8 = vcombine.low %v710_v58, %v718_v59  ;;  %v14038_v9 = vcombine.low %v582_v60, %v590_v61 }
 0x1a8   : > { %3207 = vmatpush2.bf16.msra.mxu1 %v14150_v4  ;;  %v17075_v20 = vadd.f32 %v17034_v5, %v2816_v15  ;;  %v14118_v5 = vcombine.low %v662_v12, %v670_v13  ;;  %v575_v4 = vld [vmem:[%s16725_s12 + $0x3f0] sm:$0xff]  ;;  %v16513_v15 = vmov 1983009808  }
 0x1a9   : > { %3208 = vmatprep.subr.bf16.mxu1 %v14135_v7  ;;  %v2818_v25 = vpop.f32.mrf.mxu0  ;;  %v831_v7 = vld [vmem:[%s16725_s12 + $0xbf0] sm:$0xff]  ;;  %v14025_v11 = vcombine.high %v567_v3, %v575_v4  ;;  %v14024_v22 = vcombine.low %v567_v3, %v575_v4 }
 0x1aa   : > { %v3452_v28 = vcombine.low %v17072_v19, %v17075_v20  ;;  %3234 = vmatpush1.bf16.msra.mxu0 %v14262_v14  ;;  %v14281_v12 = vcombine.high %v823_v6, %v831_v7  ;;  %v551_v13 = vld [vmem:[%s16725_s12 + $0x330] sm:$0xff]  ;;  %v14280_v23 = vcombine.low %v823_v6, %v831_v7 }
 0x1ab   : > { %v2819_v29 = vpop.f32.mrf.mxu0  ;;  %3235 = vmatprep.subr.bf16.mxu0 %v14247_v18  ;;  %v559_v14 = vld [vmem:[%s16725_s12 + $0x370] sm:$0xff] }
 0x1ac   : > { %3209 = vmatpush2.bf16.msra.mxu1 %v14134_v17  ;;  %v3455_v17 = vunpack.c.l.s4 %v16513_v15  ;;  %v807_v18 = vld [vmem:[%s16725_s12 + $0xb30] sm:$0xff]  ;;  %v14009_v25 = vcombine.high %v551_v13, %v559_v14  ;;  %v14008_v33 = vcombine.low %v551_v13, %v559_v14 }
 0x1ad   : > { %3210 = vmatprep.subr.bf16.mxu1 %v14119_v21  ;;  %v815_v21 = vld [vmem:[%s16725_s12 + $0xb70] sm:$0xff] }
 0x1ae   : > { %3236 = vmatpush1.bf16.msra.mxu0 %v14246_v1  ;;  %v14265_v26 = vcombine.high %v807_v18, %v815_v21  ;;  %v543_v1 = vld [vmem:[%s16725_s12 + $0x2f0] sm:$0xff]  ;;  %v3456_v29 = vunpack.c.0.s8 %v3455_v17 }
 0x1af   : > { %3237 = vmatprep.subr.bf16.mxu0 %v14231_v30  ;;  %v791_v30 = vld [vmem:[%s16725_s12 + $0xab0] sm:$0xff]  ;;  %v13992_v49 = vcombine.low %v535_v27, %v543_v1 }
 0x1b0   : > { %3211 = vmatpush2.bf16.msra.mxu1 %v14118_v5  ;;  %v17117_v43 = vsub.s32 %v3456_v29, %v16780_v39  ;;  %v511_v58 = vld [vmem:[%s16725_s12 + $0x1f0] sm:$0xff] }
 0x1b1   : > { %3212 = vmatprep.subr.bf16.mxu1 %v14103_v31  ;;  %v799_v31 = vld [vmem:[%s16725_s12 + $0xaf0] sm:$0xff] }
 0x1b2   : > { %3238 = vmatpush1.bf16.msra.mxu0 %v14230_v36  ;;  %v14264_v36 = vcombine.low %v807_v18, %v815_v21  ;;  %v14248_v52 = vcombine.low %v791_v30, %v799_v31  ;;  %v3460_v59 = vrot.slane %v3452_v28, %v17117_v43  ;;  %v759_v61 = vld [vmem:[%s16725_s12 + $0x9b0] sm:$0xff] }
 0x1b3   : > { %3239 = vmatprep.subr.bf16.mxu0 %v14215_v38  ;;  %v487_v19 = vld [vmem:[%s16725_s12 + $0x130] sm:$0xff] }
 0x1b4   : > { %3213 = vmatpush2.bf16.msra.mxu1 %v14102_v37  ;;  %v13993_v37 = vcombine.high %v535_v27, %v543_v1  ;;  %v495_v20 = vld [vmem:[%s16725_s12 + $0x170] sm:$0xff] }
 0x1b5   : > { %3214 = vmatprep.subr.bf16.mxu1 %v14087_v40  ;;  %v14249_v40 = vcombine.high %v791_v30, %v799_v31  ;;  %v743_v7 = vld [vmem:[%s16725_s12 + $0x930] sm:$0xff]  ;;  %v13944_v21 = vcombine.low %v487_v19, %v495_v20 }
 0x1b6   : > { %3240 = vmatpush1.bf16.msra.mxu0 %v14214_v45  ;;  %v471_v14 = vld [vmem:[%s16725_s12 + $0xb0] sm:$0xff] }
 0x1b7   : > { %3241 = vmatprep.subr.bf16.mxu0 %v14199_v47  ;;  %v783_v47 = vld [vmem:[%s16725_s12 + $0xa70] sm:$0xff] }
 0x1b8   : > { %3215 = vmatpush2.bf16.msra.mxu1 %v14086_v46  ;;  %v775_v46 = vld [vmem:[%s16725_s12 + $0xa30] sm:$0xff] }
 0x1b9   : > { %3216 = vmatprep.subr.bf16.mxu1 %v14071_v48  ;;  %v14232_v3 = vcombine.low %v775_v46, %v783_v47  ;;  %v479_v15 = vld [vmem:[%s16725_s12 + $0xf0] sm:$0xff] }
 0x1ba   : > { %3242 = vmatpush1.bf16.msra.mxu0 %v14198_v53  ;;  %v13977_v53 = vcombine.high %v519_v41, %v527_v42  ;;  %v727_v17 = vld [vmem:[%s16725_s12 + $0x8b0] sm:$0xff] }
 0x1bb   : > { %3243 = vmatprep.subr.bf16.mxu0 %v14183_v56  ;;  %v14233_v56 = vcombine.high %v775_v46, %v783_v47  ;;  %v735_v18 = vld [vmem:[%s16725_s12 + $0x8f0] sm:$0xff]  ;;  %v560_v46 = vld [vmem:[%s16725_s12 + $0x378] sm:$0xff] }
 0x1bc   : > { %3217 = vmatpush2.bf16.msra.mxu1 %v14070_v55  ;;  %v463_v27 = vld [vmem:[%s16725_s12 + $0x70] sm:$0xff]  ;;  %v14184_v30 = vcombine.low %v727_v17, %v735_v18 }
 0x1bd   : > { %3218 = vmatprep.subr.bf16.mxu1 %v14055_v57  ;;  %v503_v57 = vld [vmem:[%s16725_s12 + $0x1b0] sm:$0xff] }
 0x1be   : > { %3244 = vmatpush1.bf16.msra.mxu0 %v14182_v62  ;;  %v767_v62 = vld [vmem:[%s16725_s12 + $0x9f0] sm:$0xff]  ;;  %v13961_v4 = vcombine.high %v503_v57, %v511_v58 }
 0x1bf   : > { %3245 = vmatprep.subr.bf16.mxu0 %v14167_v0  ;;  %v13976_v0 = vcombine.low %v519_v41, %v527_v42  ;;  %v14217_v6 = vcombine.high %v759_v61, %v767_v62  ;;  %v711_v1 = vld [vmem:[%s16725_s12 + $0x830] sm:$0xff] }
 0x1c0   : > { %3219 = vmatpush2.bf16.msra.mxu1 %v14054_v63  ;;  %v444_v63 = vld [vmem:[#allocation2 + $0x10] sm:$0xff] }
 0x1c1   : > { %3220 = vmatprep.subr.bf16.mxu1 %v14039_v2  ;;  %v719_v29 = vld [vmem:[%s16725_s12 + $0x870] sm:$0xff] }
 0x1c2   : > { %3246 = vmatpush1.bf16.msra.mxu0 %v14166_v8  ;;  %v751_v8 = vld [vmem:[%s16725_s12 + $0x970] sm:$0xff] }
 0x1c3   : > { %3272 = vmatprep.subr.bf16.mxu0 %v14025_v11  ;;  %v14216_v11 = vcombine.low %v759_v61, %v767_v62  ;;  %v14201_v13 = vcombine.high %v743_v7, %v751_v8  ;;  %v679_v42 = vld [vmem:[%s16725_s12 + $0x730] sm:$0xff] }
 0x1c4   : > { %3221 = vmatpush2.bf16.msra.mxu1 %v14038_v9  ;;  %v13960_v9 = vcombine.low %v503_v57, %v511_v58  ;;  %v647_v62 = vld [vmem:[%s16725_s12 + $0x630] sm:$0xff] }
 0x1c5   : > { %3313 = vmatprep.subr.bf16.mxu1 %v14281_v12  ;;  %v2937_v5 = vpop.f32.mrf.mxu0  ;;  %3264 = vmatmul.mubr.bf16.vlgmr.msra.gmra.mxu0 %v16817_v24  ;;  %v13945_v12 = vcombine.high %v487_v19, %v495_v20 }
 0x1c6   : > { %3273 = vmatpush1.bf16.msra.mxu0 %v14024_v22  ;;  %3304 = vmatprep.mubr.bf16.mxu0 %v16794_v54  ;;  %v14200_v22 = vcombine.low %v743_v7, %v751_v8  ;;  %v631_v7 = vld [vmem:[%s16725_s12 + $0x5b0] sm:$0xff] }
 0x1c7   : > { %v2896_v32 = vpop.f32.mrf.mxu1  ;;  %3223 = vmatmul.mubr.bf16.vlgmr.msra.gmra.mxu1 %v16809_v16  ;;  %v2939_v35 = vpop.f32.mrf.mxu0  ;;  %3274 = vmatprep.subr.bf16.mxu0 %v14009_v25  ;;  %v14185_v25 = vcombine.high %v727_v17, %v735_v18  ;;  %v639_v8 = vld [vmem:[%s16725_s12 + $0x5f0] sm:$0xff]  ;;  %v488_v18 = vld [vmem:[%s16725_s12 + $0x138] sm:$0xff] }
 0x1c8   : > { %v2938_v34 = vadd.f32 %v2937_v5, %v2896_v32  ;;  %3314 = vmatpush1.bf16.msra.mxu1 %v14280_v23  ;;  %3345 = vmatprep.mubr.bf16.mxu1 %v16511_v10  ;;  %v13929_v23 = vcombine.high %v471_v14, %v479_v15  ;;  %v13928_v5 = vcombine.low %v471_v14, %v479_v15  ;;  %v615_v15 = vld [vmem:[%s16725_s12 + $0x530] sm:$0xff] }
 0x1c9   : > { %v2898_v38 = vpop.f32.mrf.mxu1  ;;  %3315 = vmatprep.subr.bf16.mxu1 %v14265_v26  ;;  %v2941_v45 = vpop.f32.mrf.mxu0  ;;  %v455_v26 = vld [vmem:[%s16725_s12 + $0x30] sm:$0xff]  ;;  %v14169_v32 = vcombine.high %v711_v1, %v719_v29 }
 0x1ca   : > { %v2940_v44 = vadd.f32 %v2939_v35, %v2898_v38  ;;  %3275 = vmatpush1.bf16.msra.mxu0 %v14008_v33  ;;  %v13913_v31 = vcombine.high %v455_v26, %v463_v27  ;;  %v695_v33 = vld [vmem:[%s16725_s12 + $0x7b0] sm:$0xff]  ;;  %v568_v35 = vld [vmem:[%s16725_s12 + $0x3b8] sm:$0xff]  ;;  %v14168_v38 = vcombine.low %v711_v1, %v719_v29 }
 0x1cb   : > { %v2900_v48 = vpop.f32.mrf.mxu1  ;;  %v2942_v51 = vpop.f32.mrf.mxu0  ;;  %3276 = vmatprep.subr.bf16.mxu0 %v13993_v37  ;;  %v13912_v37 = vcombine.low %v455_v26, %v463_v27  ;;  %v552_v45 = vld [vmem:[%s16725_s12 + $0x338] sm:$0xff]  ;;  %v623_v17 = vld [vmem:[%s16725_s12 + $0x570] sm:$0xff] }
 0x1cc   : > { %v3453_v50 = vcombine.low %v2938_v34, %v2940_v44  ;;  %3316 = vmatpush1.bf16.msra.mxu1 %v14264_v36  ;;  %v703_v34 = vld [vmem:[%s16725_s12 + $0x7f0] sm:$0xff]  ;;  %v576_v36 = vld [vmem:[%s16725_s12 + $0x3f8] sm:$0xff]  ;;  %v14010_v58 = vcombine.low %v552_v45, %v560_v46 }
 0x1cd   : > { %v2901_v55 = vpop.f32.mrf.mxu1  ;;  %3317 = vmatprep.subr.bf16.mxu1 %v14249_v40  ;;  %v14153_v40 = vcombine.high %v695_v33, %v703_v34  ;;  %v14027_v41 = vcombine.high %v568_v35, %v576_v36  ;;  %v687_v44 = vld [vmem:[%s16725_s12 + $0x770] sm:$0xff]  ;;  %v14152_v47 = vcombine.low %v695_v33, %v703_v34  ;;  %v14026_v48 = vcombine.low %v568_v35, %v576_v36  ;;  %v472_v29 = vld [vmem:[%s16725_s12 + $0xb8] sm:$0xff] }
 0x1ce   : > { %v3467_v60 = vrot.slane %v3453_v50, %v17117_v43  ;;  %3277 = vmatpush1.bf16.msra.mxu0 %v13992_v49  ;;  %v14137_v49 = vcombine.high %v679_v42, %v687_v44  ;;  %v14011_v50 = vcombine.high %v552_v45, %v560_v46  ;;  %v663_v51 = vld [vmem:[%s16725_s12 + $0x6b0] sm:$0xff]  ;;  %v544_v55 = vld [vmem:[%s16725_s12 + $0x2f8] sm:$0xff]  ;;  %v14136_v57 = vcombine.low %v679_v42, %v687_v44 }
 0x1cf   : > { %3278 = vmatprep.subr.bf16.mxu0 %v13977_v53  ;;  %v536_v53 = vld [vmem:[%s16725_s12 + $0x2b8] sm:$0xff]  ;;  %v599_v27 = vld [vmem:[%s16725_s12 + $0x4b0] sm:$0xff] }
 0x1d0   : > { %v3468_v2 = vcombine.low %v3460_v59, %v3467_v60  ;;  %3318 = vmatpush1.bf16.msra.mxu1 %v14248_v52  ;;  %v671_v52 = vld [vmem:[%s16725_s12 + $0x6f0] sm:$0xff]  ;;  %v13995_v61 = vcombine.high %v536_v53, %v544_v55  ;;  %v456_v36 = vld [vmem:[%s16725_s12 + $0x38] sm:$0xff] }
 0x1d1   : > { %3319 = vmatprep.subr.bf16.mxu1 %v14233_v56  ;;  %v14121_v59 = vcombine.high %v663_v51, %v671_v52  ;;  %v607_v1 = vld [vmem:[%s16725_s12 + $0x4f0] sm:$0xff]  ;;  %v824_v44 = vld [vmem:[%s16725_s12 + $0xbb8] sm:$0xff] }
 0x1d2   : > { %v3524_v28 = vadd.f32 %v3468_v2, %v444_v63  ;;  %3279 = vmatpush1.bf16.msra.mxu0 %v13976_v0  ;;  %v655_v63 = vld [vmem:[%s16725_s12 + $0x670] sm:$0xff]  ;;  %v520_v0 = vld [vmem:[%s16725_s12 + $0x238] sm:$0xff] }
 0x1d3   : > { %3280 = vmatprep.subr.bf16.mxu0 %v13961_v4  ;;  %v528_v2 = vld [vmem:[%s16725_s12 + $0x278] sm:$0xff]  ;;  %v14120_v4 = vcombine.low %v663_v51, %v671_v52  ;;  %v14105_v19 = vcombine.high %v647_v62, %v655_v63  ;;  %v583_v34 = vld [vmem:[%s16725_s12 + $0x430] sm:$0xff] }
 0x1d4   : > { %3528 = vst [vmem:[#allocation2 + $0x10] sm:$0xff] %v3524_v28  ;;  %3320 = vmatpush1.bf16.msra.mxu1 %v14232_v3  ;;  %v13979_v28 = vcombine.high %v520_v0, %v528_v2  ;;  %v591_v35 = vld [vmem:[%s16725_s12 + $0x470] sm:$0xff]  ;;  %v832_v45 = vld [vmem:[%s16725_s12 + $0xbf8] sm:$0xff] }
 0x1d5   : > { %3321 = vmatprep.subr.bf16.mxu1 %v14217_v6  ;;  %v13994_v6 = vcombine.low %v536_v53, %v544_v55  ;;  %v696_v46 = vld [vmem:[%s16725_s12 + $0x7b8] sm:$0xff] }
 0x1d6   : > { %3281 = vmatpush1.bf16.msra.mxu0 %v13960_v9  ;;  %v512_v9 = vld [vmem:[%s16725_s12 + $0x1f8] sm:$0xff] }
 0x1d7   : > { %3282 = vmatprep.subr.bf16.mxu0 %v13945_v12  ;;  %v13978_v12 = vcombine.low %v520_v0, %v528_v2  ;;  %v808_v52 = vld [vmem:[%s16725_s12 + $0xb38] sm:$0xff] }
 0x1d8   : > { %3322 = vmatpush1.bf16.msra.mxu1 %v14216_v11  ;;  %v14104_v11 = vcombine.low %v647_v62, %v655_v63  ;;  %v816_v53 = vld [vmem:[%s16725_s12 + $0xb78] sm:$0xff] }
 0x1d9   : > { %3323 = vmatprep.subr.bf16.mxu1 %v14201_v13  ;;  %v14089_v13 = vcombine.high %v631_v7, %v639_v8  ;;  %v680_v55 = vld [vmem:[%s16725_s12 + $0x738] sm:$0xff] }
 0x1da   : > { %3283 = vmatpush1.bf16.msra.mxu0 %v13944_v21  ;;  %v496_v21 = vld [vmem:[%s16725_s12 + $0x178] sm:$0xff] }
 0x1db   : > { %3284 = vmatprep.subr.bf16.mxu0 %v13929_v23  ;;  %v13947_v26 = vcombine.high %v488_v18, %v496_v21  ;;  %v792_v63 = vld [vmem:[%s16725_s12 + $0xab8] sm:$0xff] }
 0x1dc   : > { %3324 = vmatpush1.bf16.msra.mxu1 %v14200_v22  ;;  %v14088_v22 = vcombine.low %v631_v7, %v639_v8  ;;  %v800_v0 = vld [vmem:[%s16725_s12 + $0xaf8] sm:$0xff] }
 0x1dd   : > { %3325 = vmatprep.subr.bf16.mxu1 %v14185_v25  ;;  %v14073_v25 = vcombine.high %v615_v15, %v623_v17 }
 0x1de   : > { %3285 = vmatpush1.bf16.msra.mxu0 %v13928_v5  ;;  %v480_v5 = vld [vmem:[%s16725_s12 + $0xf8] sm:$0xff] }
 0x1df   : > { %3286 = vmatprep.subr.bf16.mxu0 %v13913_v31  ;;  %v13946_v31 = vcombine.low %v488_v18, %v496_v21  ;;  %v13931_v33 = vcombine.high %v472_v29, %v480_v5  ;;  %v760_v21 = vld [vmem:[%s16725_s12 + $0x9b8] sm:$0xff] }
 0x1e0   : > { %3326 = vmatpush1.bf16.msra.mxu1 %v14184_v30  ;;  %v14072_v30 = vcombine.low %v615_v15, %v623_v17 }
 0x1e1   : > { %3327 = vmatprep.subr.bf16.mxu1 %v14169_v32  ;;  %v14057_v32 = vcombine.high %v599_v27, %v607_v1 }
 0x1e2   : > { %3287 = vmatpush1.bf16.msra.mxu0 %v13912_v37  ;;  %v464_v37 = vld [vmem:[%s16725_s12 + $0x78] sm:$0xff] }
 0x1e3   : > { %3288 = vmatprep.subr.bf16.mxu0 %v14153_v40  ;;  %v13930_v40 = vcombine.low %v472_v29, %v480_v5  ;;  %v13915_v42 = vcombine.high %v456_v36, %v464_v37  ;;  %v744_v5 = vld [vmem:[%s16725_s12 + $0x938] sm:$0xff] }
 0x1e4   : > { %3328 = vmatpush1.bf16.msra.mxu1 %v14168_v38  ;;  %v14056_v38 = vcombine.low %v599_v27, %v607_v1 }
 0x1e5   : > { %3354 = vmatprep.subr.bf16.mxu1 %v14027_v41  ;;  %v14041_v41 = vcombine.high %v583_v34, %v591_v35 }
 0x1e6   : > { %3289 = vmatpush2.bf16.msra.mxu0 %v14152_v47  ;;  %v704_v47 = vld [vmem:[%s16725_s12 + $0x7f8] sm:$0xff] }
 0x1e7   : > { %v17155_v56 = vpop.f32.mrf.mxu1  ;;  %3346 = vmatmul.mubr.bf16.vlgmr.msra.gmra.mxu1 %v16817_v24  ;;  %3290 = vmatprep.subr.bf16.mxu0 %v14137_v49  ;;  %v13914_v49 = vcombine.low %v456_v36, %v464_v37  ;;  %v14155_v51 = vcombine.high %v696_v46, %v704_v47  ;;  %v728_v37 = vld [vmem:[%s16725_s12 + $0x8b8] sm:$0xff] }
 0x1e8   : > { %3355 = vmatpush1.bf16.msra.mxu1 %v14026_v48  ;;  %3386 = vmatprep.mubr.bf16.mxu1 %v16794_v54  ;;  %v504_v54 = vld [vmem:[%s16725_s12 + $0x1b8] sm:$0xff]  ;;  %v14040_v48 = vcombine.low %v583_v34, %v591_v35 }
 0x1e9   : > { %v17158_v60 = vpop.f32.mrf.mxu1  ;;  %3356 = vmatprep.subr.bf16.mxu1 %v14011_v50  ;;  %v13963_v14 = vcombine.high %v504_v54, %v512_v9  ;;  %v13962_v23 = vcombine.low %v504_v54, %v512_v9  ;;  %v14283_v50 = vcombine.high %v824_v44, %v832_v45  ;;  %v776_v9 = vld [vmem:[%s16725_s12 + $0xa38] sm:$0xff] }
 0x1ea   : > { %3291 = vmatpush2.bf16.msra.mxu0 %v14136_v57  ;;  %v688_v57 = vld [vmem:[%s16725_s12 + $0x778] sm:$0xff] }
 0x1eb   : > { %v3023_v3 = vpop.f32.mrf.mxu1  ;;  %3292 = vmatprep.subr.bf16.mxu0 %v14121_v59  ;;  %v14154_v59 = vcombine.low %v696_v46, %v704_v47  ;;  %v14139_v62 = vcombine.high %v680_v55, %v688_v57  ;;  %v712_v47 = vld [vmem:[%s16725_s12 + $0x838] sm:$0xff] }
 0x1ec   : > { %3357 = vmatpush1.bf16.msra.mxu1 %v14010_v58  ;;  %v14282_v58 = vcombine.low %v824_v44, %v832_v45  ;;  %v664_v3 = vld [vmem:[%s16725_s12 + $0x6b8] sm:$0xff] }
 0x1ed   : > { %v3024_v20 = vpop.f32.mrf.mxu1  ;;  %3358 = vmatprep.subr.bf16.mxu1 %v13995_v61  ;;  %v14267_v61 = vcombine.high %v808_v52, %v816_v53 }
 0x1ee   : > { %3293 = vmatpush2.bf16.msra.mxu0 %v14120_v4  ;;  %v672_v4 = vld [vmem:[%s16725_s12 + $0x6f8] sm:$0xff]  ;;  %v14138_v20 = vcombine.low %v680_v55, %v688_v57 }
 0x1ef   : > { %3294 = vmatprep.subr.bf16.mxu0 %v14105_v19  ;;  %v14123_v54 = vcombine.high %v664_v3, %v672_v4 }
 0x1f0   : > { %3359 = vmatpush1.bf16.msra.mxu1 %v13994_v6  ;;  %v14266_v6 = vcombine.low %v808_v52, %v816_v53 }
 0x1f1   : > { %3360 = vmatprep.subr.bf16.mxu1 %v13979_v28  ;;  %v14251_v28 = vcombine.high %v792_v63, %v800_v0 }
 0x1f2   : > { %3295 = vmatpush2.bf16.msra.mxu0 %v14104_v11  ;;  %v784_v11 = vld [vmem:[%s16725_s12 + $0xa78] sm:$0xff] }
 0x1f3   : > { %3296 = vmatprep.subr.bf16.mxu0 %v14089_v13  ;;  %v656_v13 = vld [vmem:[%s16725_s12 + $0x678] sm:$0xff]  ;;  %v14235_v17 = vcombine.high %v776_v9, %v784_v11 }
 0x1f4   : > { %3361 = vmatpush1.bf16.msra.mxu1 %v13978_v12 }
 0x1f5   : > { %3362 = vmatprep.subr.bf16.mxu1 %v13963_v14 }
 0x1f6   : > { %3297 = vmatpush2.bf16.msra.mxu0 %v14088_v22  ;;  %v768_v22 = vld [vmem:[%s16725_s12 + $0x9f8] sm:$0xff] }
 0x1f7   : > { %3298 = vmatprep.subr.bf16.mxu0 %v14073_v25  ;;  %v640_v25 = vld [vmem:[%s16725_s12 + $0x5f8] sm:$0xff]  ;;  %v14219_v1 = vcombine.high %v760_v21, %v768_v22 }
 0x1f8   : > { %3363 = vmatpush1.bf16.msra.mxu1 %v13962_v23  ;;  %v632_v23 = vld [vmem:[%s16725_s12 + $0x5b8] sm:$0xff] }
 0x1f9   : > { %3364 = vmatprep.subr.bf16.mxu1 %v13947_v26  ;;  %v14234_v26 = vcombine.low %v776_v9, %v784_v11  ;;  %v14091_v29 = vcombine.high %v632_v23, %v640_v25  ;;  %v14090_v34 = vcombine.low %v632_v23, %v640_v25 }
 0x1fa   : > { %3299 = vmatpush2.bf16.msra.mxu0 %v14072_v30  ;;  %v752_v30 = vld [vmem:[%s16725_s12 + $0x978] sm:$0xff] }
 0x1fb   : > { %3300 = vmatprep.subr.bf16.mxu0 %v14057_v32  ;;  %v624_v32 = vld [vmem:[%s16725_s12 + $0x578] sm:$0xff]  ;;  %v14203_v35 = vcombine.high %v744_v5, %v752_v30 }
 0x1fc   : > { %3365 = vmatpush1.bf16.msra.mxu1 %v13946_v31  ;;  %v616_v31 = vld [vmem:[%s16725_s12 + $0x538] sm:$0xff] }
 0x1fd   : > { %3366 = vmatprep.subr.bf16.mxu1 %v13931_v33  ;;  %v14218_v33 = vcombine.low %v760_v21, %v768_v22  ;;  %v14075_v36 = vcombine.high %v616_v31, %v624_v32  ;;  %v14074_v44 = vcombine.low %v616_v31, %v624_v32 }
 0x1fe   : > { %3301 = vmatpush2.bf16.msra.mxu0 %v14056_v38  ;;  %v736_v38 = vld [vmem:[%s16725_s12 + $0x8f8] sm:$0xff] }
 0x1ff   : > { %3302 = vmatprep.subr.bf16.mxu0 %v14041_v41  ;;  %v608_v41 = vld [vmem:[%s16725_s12 + $0x4f8] sm:$0xff]  ;;  %v14187_v45 = vcombine.high %v728_v37, %v736_v38 }
 0x200   : > { %3367 = vmatpush1.bf16.msra.mxu1 %v13930_v40  ;;  %v600_v40 = vld [vmem:[%s16725_s12 + $0x4b8] sm:$0xff] }
 0x201   : > { %3368 = vmatprep.subr.bf16.mxu1 %v13915_v42  ;;  %v14202_v42 = vcombine.low %v744_v5, %v752_v30  ;;  %v14059_v46 = vcombine.high %v600_v40, %v608_v41  ;;  %v14058_v52 = vcombine.low %v600_v40, %v608_v41 }
 0x202   : > { %3303 = vmatpush2.bf16.msra.mxu0 %v14040_v48  ;;  %v720_v48 = vld [vmem:[%s16725_s12 + $0x878] sm:$0xff] }
 0x203   : > { %3395 = vmatprep.subr.bf16.mxu0 %v14283_v50  ;;  %v592_v50 = vld [vmem:[%s16725_s12 + $0x478] sm:$0xff]  ;;  %v14171_v53 = vcombine.high %v712_v47, %v720_v48  ;;  %v14170_v57 = vcombine.low %v712_v47, %v720_v48 }
 0x204   : > { %3369 = vmatpush1.bf16.msra.mxu1 %v13914_v49  ;;  %v584_v49 = vld [vmem:[%s16725_s12 + $0x438] sm:$0xff] }
 0x205   : > { %3370 = vmatprep.subr.bf16.mxu1 %v14155_v51  ;;  %v2978_v2 = vpop.f32.mrf.mxu0  ;;  %3305 = vmatmul.mubr.bf16.vlgmr.msra.gmra.mxu0 %v16809_v16  ;;  %v14186_v51 = vcombine.low %v728_v37, %v736_v38  ;;  %v14043_v55 = vcombine.high %v584_v49, %v592_v50 }
 0x206   : > { %3396 = vmatpush1.bf16.msra.mxu0 %v14282_v58  ;;  %3427 = vmatprep.mubr.bf16.mxu0 %v16511_v10  ;;  %v17196_v7 = vadd.f32 %v17155_v56, %v2978_v2  ;;  %v648_v10 = vld [vmem:[%s16725_s12 + $0x638] sm:$0xff]  ;;  %v14250_v56 = vcombine.low %v792_v63, %v800_v0  ;;  %v14042_v58 = vcombine.low %v584_v49, %v592_v50 }
 0x207   : > { %v2980_v19 = vpop.f32.mrf.mxu0  ;;  %3397 = vmatprep.subr.bf16.mxu0 %v14267_v61  ;;  %v14107_v18 = vcombine.high %v648_v10, %v656_v13  ;;  %v14106_v27 = vcombine.low %v648_v10, %v656_v13 }
 0x208   : > { %3371 = vmatpush2.bf16.msra.mxu1 %v14154_v59  ;;  %v17199_v8 = vadd.f32 %v17158_v60, %v2980_v19  ;;  %v14122_v60 = vcombine.low %v664_v3, %v672_v4 }
 0x209   : > { %3372 = vmatprep.subr.bf16.mxu1 %v14139_v62  ;;  %v2982_v12 = vpop.f32.mrf.mxu0 }
 0x20a   : > { %v3469_v14 = vcombine.low %v17196_v7, %v17199_v8  ;;  %3398 = vmatpush1.bf16.msra.mxu0 %v14266_v6 }
 0x20b   : > { %v2983_v15 = vpop.f32.mrf.mxu0  ;;  %3399 = vmatprep.subr.bf16.mxu0 %v14251_v28 }
 0x20c   : > { %3373 = vmatpush2.bf16.msra.mxu1 %v14138_v20  ;;  %v3477_v28 = vrot.slane %v3469_v14, %v17117_v43 }
 0x20d   : > { %3374 = vmatprep.subr.bf16.mxu1 %v14123_v54 }
 0x20e   : > { %3400 = vmatpush1.bf16.msra.mxu0 %v14250_v56 }
 0x20f   : > { %3401 = vmatprep.subr.bf16.mxu0 %v14235_v17 }
 0x210   : > { %3375 = vmatpush2.bf16.msra.mxu1 %v14122_v60 }
 0x211   : > { %3376 = vmatprep.subr.bf16.mxu1 %v14107_v18 }
 0x212   : > { %3402 = vmatpush1.bf16.msra.mxu0 %v14234_v26 }
 0x213   : > { %3403 = vmatprep.subr.bf16.mxu0 %v14219_v1 }
 0x214   : > { %3377 = vmatpush2.bf16.msra.mxu1 %v14106_v27 }
 0x215   : > { %3378 = vmatprep.subr.bf16.mxu1 %v14091_v29 }
 0x216   : > { %3404 = vmatpush1.bf16.msra.mxu0 %v14218_v33  ;;  %v446_v33 = vld [vmem:[#allocation2 + $0x18] sm:$0xff] }
 0x217   : > { %3405 = vmatprep.subr.bf16.mxu0 %v14203_v35 }
 0x218   : > { %3379 = vmatpush2.bf16.msra.mxu1 %v14090_v34 }
 0x219   : > { %3380 = vmatprep.subr.bf16.mxu1 %v14075_v36 }
 0x21a   : > { %3406 = vmatpush1.bf16.msra.mxu0 %v14202_v42 }
 0x21b   : > { %3407 = vmatprep.subr.bf16.mxu0 %v14187_v45 }
 0x21c   : > { %3381 = vmatpush2.bf16.msra.mxu1 %v14074_v44 }
 0x21d   : > { %3382 = vmatprep.subr.bf16.mxu1 %v14059_v46 }
 0x21e   : > { %3408 = vmatpush1.bf16.msra.mxu0 %v14186_v51 }
 0x21f   : > { %3409 = vmatprep.subr.bf16.mxu0 %v14171_v53 }
 0x220   : > { %3383 = vmatpush2.bf16.msra.mxu1 %v14058_v52 }
 0x221   : > { %3384 = vmatprep.subr.bf16.mxu1 %v14043_v55 }
 0x222   : > { %3410 = vmatpush1.bf16.msra.mxu0 %v14170_v57 }
 0x224   : > { %3385 = vmatpush2.bf16.msra.mxu1 %v14042_v58 }
 0x225   : > { %v3101_v59 = vpop.f32.mrf.mxu0  ;;  %3428 = vmatmul.mubr.bf16.vlgmr.msra.gmra.mxu0 %v16817_v24  ;;  %v445_v24 = vld [vmem:[#allocation2] sm:$0xff] }
 0x227   : > { %v3060_v61 = vpop.f32.mrf.mxu1  ;;  %3387 = vmatmul.mubr.bf16.vlgmr.msra.gmra.mxu1 %v16809_v16  ;;  %v3103_v63 = vpop.f32.mrf.mxu0 }
 0x228   : > { %v3102_v62 = vadd.f32 %v3101_v59, %v3060_v61 }
 0x229   : > { %v3062_v0 = vpop.f32.mrf.mxu1  ;;  %v3105_v3 = vpop.f32.mrf.mxu0 }
 0x22a   : > { %v3104_v2 = vadd.f32 %v3103_v63, %v3062_v0 }
 0x22b   : > { %v3064_v4 = vpop.f32.mrf.mxu1  ;;  %v3106_v19 = vpop.f32.mrf.mxu0 }
 0x22c   : > { %v3470_v6 = vcombine.low %v3102_v62, %v3104_v2  ;;  %v447_v2 = vld [vmem:[#allocation2 + $0x8] sm:$0xff] }
 0x22d   : > { %v3065_v20 = vpop.f32.mrf.mxu1 }
 0x22e   : > { %v3484_v54 = vrot.slane %v3470_v6, %v17117_v43 }
 0x230   : > { %v3485_v9 = vcombine.low %v3477_v28, %v3484_v54 }
 0x232   : > { %v3525_v11 = vadd.f32 %v3485_v9, %v445_v24 }
 0x234   : > { %3529 = vst [vmem:[#allocation2] sm:$0xff] %v3525_v11 }
 0x247   : > { %v3183_v16 = vpop.f32.mrf.mxu1 }
 0x249   : > { %v3185_v12 = vpop.f32.mrf.mxu1 }
 0x24b   : > { %v3187_v10 = vpop.f32.mrf.mxu1 }
 0x24d   : > { %v3188_v13 = vpop.f32.mrf.mxu1 }
 0x265   : > { %v3142_v56 = vpop.f32.mrf.mxu0 }
 0x266   : > { %v3184_v60 = vadd.f32 %v3183_v16, %v3142_v56 }
 0x267   : > { %v3144_v15 = vpop.f32.mrf.mxu0 }
 0x268   : > { %v3186_v17 = vadd.f32 %v3185_v12, %v3144_v15 }
 0x269   : > { %v3146_v18 = vpop.f32.mrf.mxu0 }
 0x26a   : > { %v3486_v21 = vcombine.low %v3184_v60, %v3186_v17 }
 0x26b   : > { %v3147_v22 = vpop.f32.mrf.mxu0 }
 0x26c   : > { %v3494_v31 = vrot.slane %v3486_v21, %v17117_v43 }
 0x285   : > { %v3265_v23 = vpop.f32.mrf.mxu0 }
 0x287   : > { %v3224_v7 = vpop.f32.mrf.mxu1  ;;  %v3267_v14 = vpop.f32.mrf.mxu0 }
 0x288   : > { %v3266_v8 = vadd.f32 %v3265_v23, %v3224_v7 }
 0x289   : > { %v3226_v25 = vpop.f32.mrf.mxu1  ;;  %v3269_v27 = vpop.f32.mrf.mxu0 }
 0x28a   : > { %v3268_v26 = vadd.f32 %v3267_v14, %v3226_v25 }
 0x28b   : > { %v3228_v1 = vpop.f32.mrf.mxu1  ;;  %v3270_v5 = vpop.f32.mrf.mxu0 }
 0x28c   : > { %v3487_v29 = vcombine.low %v3266_v8, %v3268_v26 }
 0x28d   : > { %v3229_v30 = vpop.f32.mrf.mxu1 }
 0x28e   : > { %v3501_v32 = vrot.slane %v3487_v29, %v17117_v43 }
 0x290   : > { %v3502_v34 = vcombine.low %v3494_v31, %v3501_v32 }
 0x292   : > { %v3526_v35 = vadd.f32 %v3502_v34, %v446_v33 }
 0x294   : > { %3530 = vst [vmem:[#allocation2 + $0x18] sm:$0xff] %v3526_v35 }
 0x2a7   : > { %v3347_v36 = vpop.f32.mrf.mxu1 }
 0x2a9   : > { %v3349_v37 = vpop.f32.mrf.mxu1 }
 0x2ab   : > { %v3351_v38 = vpop.f32.mrf.mxu1 }
 0x2ad   : > { %v3352_v40 = vpop.f32.mrf.mxu1 }
 0x2c5   : > { %v3306_v41 = vpop.f32.mrf.mxu0 }
 0x2c6   : > { %v3348_v44 = vadd.f32 %v3347_v36, %v3306_v41 }
 0x2c7   : > { %v3308_v42 = vpop.f32.mrf.mxu0 }
 0x2c8   : > { %v3350_v45 = vadd.f32 %v3349_v37, %v3308_v42 }
 0x2c9   : > { %v3310_v46 = vpop.f32.mrf.mxu0 }
 0x2ca   : > { %v3503_v47 = vcombine.low %v3348_v44, %v3350_v45 }
 0x2cb   : > { %v3311_v48 = vpop.f32.mrf.mxu0 }
 0x2cc   : > { %v3511_v63 = vrot.slane %v3503_v47, %v17117_v43 }
 0x2e5   : > { %v3429_v49 = vpop.f32.mrf.mxu0 }
 0x2e7   : > { %v3388_v50 = vpop.f32.mrf.mxu1  ;;  %v3431_v51 = vpop.f32.mrf.mxu0 }
 0x2e8   : > { %v3430_v53 = vadd.f32 %v3429_v49, %v3388_v50 }
 0x2e9   : > { %v3390_v52 = vpop.f32.mrf.mxu1  ;;  %v3433_v57 = vpop.f32.mrf.mxu0 }
 0x2ea   : > { %v3432_v55 = vadd.f32 %v3431_v51, %v3390_v52 }
 0x2eb   : > { %v3392_v58 = vpop.f32.mrf.mxu1  ;;  %v3434_v61 = vpop.f32.mrf.mxu0 }
 0x2ec   : > { %v3504_v59 = vcombine.low %v3430_v53, %v3432_v55 }
 0x2ed   : > { %v3393_v62 = vpop.f32.mrf.mxu1 }
 0x2ee   : > { %v3518_v0 = vrot.slane %v3504_v59, %v17117_v43 }
 0x2f0   : > { %v3519_v3 = vcombine.low %v3511_v63, %v3518_v0  ;;  %3535 = sbr.rel (%p14284_p13) target bundleno = 2706 (0xa92), region = 96 }
 0x2f2   : > { %v3527_v4 = vadd.f32 %v3519_v3, %v447_v2 }
 0x2f4   : > { %3531 = vst [vmem:[#allocation2 + $0x8] sm:$0xff] %v3527_v4 }
 0x2f5   : > { %16477 = dma.done.wait [#allocation6], 131072 }
 0x2f6   : > { %16478 = vsyncadd [#allocation6], 4294836224 }
 0x2f7   : > { %16479 = dma.done.wait [#allocation6 + $0x1], 32768 }
 0x2f8   : > { %16480 = vsyncadd [#allocation6 + $0x1], 4294934528 }
 0x2f9   : > { %16481 = dma.done.wait [#allocation6 + $0x2], 8192 }
 0x2fa   : > { %16482 = vsyncadd [#allocation6 + $0x2], 4294959104  ;;  %v3870_v6 = vld [vmem:[#allocation3 + $0x1c0] sm:$0xff]  ;;  %v17236_v51 = vsub.s32 0, %v16780_v39  ;;  %v17239_v52 = vsub.s32 1, %v16780_v39  ;;  %v17242_v57 = vsub.s32 2, %v16780_v39 }
 0x2fb   : > { %v3874_v19 = vld [vmem:[#allocation3 + $0x1e0] sm:$0xff]  ;;  %v17245_v58 = vsub.s32 3, %v16780_v39 }
 0x2fc   : > { %v3998_v20 = vld [vmem:[#allocation3 + $0x5c0] sm:$0xff]  ;;  %v14342_v28 = vcombine.high %v3870_v6, %v3874_v19  ;;  %v14341_v24 = vcombine.low %v3870_v6, %v3874_v19 }
 0x2fd   : > { %v4002_v54 = vld [vmem:[#allocation3 + $0x5e0] sm:$0xff] }
 0x2fe   : > { %v3862_v9 = vld [vmem:[#allocation3 + $0x180] sm:$0xff]  ;;  %v14470_v16 = vcombine.high %v3998_v20, %v4002_v54  ;;  %v14469_v12 = vcombine.low %v3998_v20, %v4002_v54  ;;  %10000 = vmatprep.subr.bf16.mxu0 %v14342_v28 }
 0x2ff   : > { %v3866_v11 = vld [vmem:[#allocation3 + $0x1a0] sm:$0xff]  ;;  %10001 = vmatpush1.bf16.msra.mxu0 %v14341_v24 }
 0x300   : > { %v14334_v10 = vcombine.high %v3862_v9, %v3866_v11  ;;  %v3990_v13 = vld [vmem:[#allocation3 + $0x580] sm:$0xff]  ;;  %10041 = vmatprep.subr.bf16.mxu1 %v14470_v16  ;;  %v14333_v22 = vcombine.low %v3862_v9, %v3866_v11 }
 0x301   : > { %v3994_v56 = vld [vmem:[#allocation3 + $0x5a0] sm:$0xff]  ;;  %10042 = vmatpush1.bf16.msra.mxu1 %v14469_v12 }
 0x302   : > { %v3854_v15 = vld [vmem:[#allocation3 + $0x140] sm:$0xff]  ;;  %v14462_v60 = vcombine.high %v3990_v13, %v3994_v56  ;;  %10002 = vmatprep.subr.bf16.mxu0 %v14334_v10  ;;  %v14461_v23 = vcombine.low %v3990_v13, %v3994_v56 }
 0x303   : > { %v3858_v17 = vld [vmem:[#allocation3 + $0x160] sm:$0xff]  ;;  %10003 = vmatpush1.bf16.msra.mxu0 %v14333_v22  ;;  %v3550_v22 = vld [vmem:[#allocation2 + $0x10] sm:$0xff] }
 0x304   : > { %v3982_v18 = vld [vmem:[#allocation3 + $0x540] sm:$0xff]  ;;  %v14326_v7 = vcombine.high %v3854_v15, %v3858_v17  ;;  %10043 = vmatprep.subr.bf16.mxu1 %v14462_v60  ;;  %v14325_v1 = vcombine.low %v3854_v15, %v3858_v17 }
 0x305   : > { %v3986_v21 = vld [vmem:[#allocation3 + $0x560] sm:$0xff]  ;;  %10044 = vmatpush1.bf16.msra.mxu1 %v14461_v23 }
 0x306   : > { %v14454_v8 = vcombine.high %v3982_v18, %v3986_v21  ;;  %v3846_v14 = vld [vmem:[#allocation3 + $0x100] sm:$0xff]  ;;  %10004 = vmatprep.subr.bf16.mxu0 %v14326_v7  ;;  %v14453_v29 = vcombine.low %v3982_v18, %v3986_v21 }
 0x307   : > { %v3850_v25 = vld [vmem:[#allocation3 + $0x120] sm:$0xff]  ;;  %10005 = vmatpush1.bf16.msra.mxu0 %v14325_v1 }
 0x308   : > { %v3974_v26 = vld [vmem:[#allocation3 + $0x500] sm:$0xff]  ;;  %v14318_v5 = vcombine.high %v3846_v14, %v3850_v25  ;;  %10045 = vmatprep.subr.bf16.mxu1 %v14454_v8  ;;  %v14317_v35 = vcombine.low %v3846_v14, %v3850_v25 }
 0x309   : > { %v3978_v27 = vld [vmem:[#allocation3 + $0x520] sm:$0xff]  ;;  %10046 = vmatpush1.bf16.msra.mxu1 %v14453_v29 }
 0x30a   : > { %v14446_v30 = vcombine.high %v3974_v26, %v3978_v27  ;;  %v3838_v31 = vld [vmem:[#allocation3 + $0xc0] sm:$0xff]  ;;  %10006 = vmatprep.subr.bf16.mxu0 %v14318_v5  ;;  %v14445_v36 = vcombine.low %v3974_v26, %v3978_v27 }
 0x30b   : > { %v3842_v32 = vld [vmem:[#allocation3 + $0xe0] sm:$0xff]  ;;  %10007 = vmatpush1.bf16.msra.mxu0 %v14317_v35 }
 0x30c   : > { %v3966_v33 = vld [vmem:[#allocation3 + $0x4c0] sm:$0xff]  ;;  %v14310_v37 = vcombine.high %v3838_v31, %v3842_v32  ;;  %10047 = vmatprep.subr.bf16.mxu1 %v14446_v30  ;;  %v14309_v45 = vcombine.low %v3838_v31, %v3842_v32 }
 0x30d   : > { %v3970_v34 = vld [vmem:[#allocation3 + $0x4e0] sm:$0xff]  ;;  %10048 = vmatpush1.bf16.msra.mxu1 %v14445_v36 }
 0x30e   : > { %v14438_v38 = vcombine.high %v3966_v33, %v3970_v34  ;;  %v3830_v40 = vld [vmem:[#allocation3 + $0x80] sm:$0xff]  ;;  %10008 = vmatprep.subr.bf16.mxu0 %v14310_v37  ;;  %v14437_v46 = vcombine.low %v3966_v33, %v3970_v34 }
 0x30f   : > { %v3834_v41 = vld [vmem:[#allocation3 + $0xa0] sm:$0xff]  ;;  %10009 = vmatpush1.bf16.msra.mxu0 %v14309_v45 }
 0x310   : > { %v3958_v42 = vld [vmem:[#allocation3 + $0x480] sm:$0xff]  ;;  %v14302_v47 = vcombine.high %v3830_v40, %v3834_v41  ;;  %10049 = vmatprep.subr.bf16.mxu1 %v14438_v38  ;;  %v14301_v59 = vcombine.low %v3830_v40, %v3834_v41 }
 0x311   : > { %v3962_v44 = vld [vmem:[#allocation3 + $0x4a0] sm:$0xff]  ;;  %10050 = vmatpush1.bf16.msra.mxu1 %v14437_v46 }
 0x312   : > { %v14430_v48 = vcombine.high %v3958_v42, %v3962_v44  ;;  %v3822_v49 = vld [vmem:[#allocation3 + $0x40] sm:$0xff]  ;;  %10010 = vmatprep.subr.bf16.mxu0 %v14302_v47  ;;  %v14429_v61 = vcombine.low %v3958_v42, %v3962_v44 }
 0x313   : > { %v3826_v50 = vld [vmem:[#allocation3 + $0x60] sm:$0xff]  ;;  %10011 = vmatpush1.bf16.msra.mxu0 %v14301_v59 }
 0x314   : > { %v3950_v53 = vld [vmem:[#allocation3 + $0x440] sm:$0xff]  ;;  %v14294_v62 = vcombine.high %v3822_v49, %v3826_v50  ;;  %10051 = vmatprep.subr.bf16.mxu1 %v14430_v48  ;;  %v14293_v24 = vcombine.low %v3822_v49, %v3826_v50 }
 0x315   : > { %v3954_v55 = vld [vmem:[#allocation3 + $0x460] sm:$0xff]  ;;  %10052 = vmatpush1.bf16.msra.mxu1 %v14429_v61 }
 0x316   : > { %v17247_v63 = vld [vmem:[#allocation10] sm:$0xff]  ;;  %v14422_v0 = vcombine.high %v3950_v53, %v3954_v55  ;;  %10012 = vmatprep.subr.bf16.mxu0 %v14294_v62  ;;  %v14421_v11 = vcombine.low %v3950_v53, %v3954_v55 }
 0x317   : > { %v3814_v2 = vld [vmem:[#allocation3] sm:$0xff]  ;;  %v3561_v4 = vrot.slane %v17247_v63, %v17236_v51  ;;  %v3565_v6 = vrot.slane %v17247_v63, %v17239_v52  ;;  %v3569_v28 = vrot.slane %v17247_v63, %v17242_v57  ;;  %v3573_v54 = vrot.slane %v17247_v63, %v17245_v58  ;;  %10013 = vmatpush1.bf16.msra.mxu0 %v14293_v24 }
 0x318   : > { %v3818_v3 = vld [vmem:[#allocation3 + $0x20] sm:$0xff]  ;;  %10053 = vmatprep.subr.bf16.mxu1 %v14422_v0  ;;  %v17272_v0 = vsub.s32 4, %v16780_v39  ;;  %v17284_v24 = vsub.s32 7, %v16780_v39 }
 0x319   : > { %v3942_v19 = vld [vmem:[#allocation3 + $0x400] sm:$0xff]  ;;  %v3622_v9 = vcombine.low %v3561_v4, %v3565_v6  ;;  %v14286_v16 = vcombine.high %v3814_v2, %v3818_v3  ;;  %v3623_v12 = vcombine.low %v3569_v28, %v3573_v54  ;;  %v14285_v21 = vcombine.low %v3814_v2, %v3818_v3  ;;  %10054 = vmatpush1.bf16.msra.mxu1 %v14421_v11 }
 0x31a   : > { %v3946_v20 = vld [vmem:[#allocation3 + $0x420] sm:$0xff]  ;;  %v17275_v4 = vsub.s32 5, %v16780_v39  ;;  %v17281_v54 = vsub.s32 6, %v16780_v39 }
 0x31b   : > { %v14414_v10 = vcombine.high %v3942_v19, %v3946_v20  ;;  %v3934_v13 = vld [vmem:[#allocation3 + $0x3c0] sm:$0xff]  ;;  %v3630_v15 = vrot.slane %v3622_v9, %v17117_v43  ;;  %v3637_v18 = vrot.slane %v3623_v12, %v17117_v43  ;;  %10014 = vmatprep.subr.bf16.mxu0 %v14286_v16  ;;  %v14413_v23 = vcombine.low %v3942_v19, %v3946_v20 }
 0x31c   : > { %v3938_v56 = vld [vmem:[#allocation3 + $0x3e0] sm:$0xff]  ;;  %10015 = vmatpush1.bf16.msra.mxu0 %v14285_v21  ;;  %v3577_v12 = vrot.slane %v17247_v63, %v17272_v0  ;;  %v3581_v39 = vrot.slane %v17247_v63, %v17275_v4 }
 0x31d   : > { %v4062_v60 = vld [vmem:[#allocation3 + $0x7c0] sm:$0xff]  ;;  %v14406_v7 = vcombine.high %v3934_v13, %v3938_v56  ;;  %v3638_v8 = vcombine.low %v3630_v15, %v3637_v18  ;;  %10055 = vmatprep.subr.bf16.mxu1 %v14414_v10  ;;  %v14405_v5 = vcombine.low %v3934_v13, %v3938_v56  ;;  %v3589_v18 = vrot.slane %v17247_v63, %v17284_v24 }
 0x31e   : > { %v4066_v17 = vld [vmem:[#allocation3 + $0x7e0] sm:$0xff]  ;;  %10056 = vmatpush1.bf16.msra.mxu1 %v14413_v23 }
 0x31f   : > { %v14534_v14 = vcombine.high %v4062_v60, %v4066_v17  ;;  %v3926_v25 = vld [vmem:[#allocation3 + $0x380] sm:$0xff]  ;;  %v3694_v29 = vadd.f32 %v3638_v8, %v3550_v22  ;;  %10016 = vmatprep.subr.bf16.mxu0 %v14406_v7  ;;  %v14533_v30 = vcombine.low %v4062_v60, %v4066_v17  ;;  %v3585_v17 = vrot.slane %v17247_v63, %v17281_v54 }
 0x320   : > { %v3930_v26 = vld [vmem:[#allocation3 + $0x3a0] sm:$0xff]  ;;  %10017 = vmatpush2.bf16.msra.mxu0 %v14405_v5  ;;  %v3639_v7 = vcombine.low %v3577_v12, %v3581_v39 }
 0x321   : > { %v4054_v27 = vld [vmem:[#allocation3 + $0x780] sm:$0xff]  ;;  %v14398_v31 = vcombine.high %v3926_v25, %v3930_v26  ;;  %vm3698_vm0 = vcmp.gt.f32.partialorder %v3694_v29, 0.0  ;;  %v3702_v32 = vmul.f32 0.2, %v3694_v29  ;;  %10057 = vmatprep.subr.bf16.mxu1 %v14534_v14  ;;  %v14397_v40 = vcombine.low %v3926_v25, %v3930_v26 }
 0x322   : > { %v4058_v1 = vld [vmem:[#allocation3 + $0x7a0] sm:$0xff]  ;;  %10058 = vmatpush2.bf16.msra.mxu1 %v14533_v30  ;;  %v3640_v8 = vcombine.low %v3585_v17, %v3589_v18 }
 0x323   : > { %v14526_v33 = vcombine.high %v4054_v27, %v4058_v1  ;;  %v3918_v34 = vld [vmem:[#allocation3 + $0x340] sm:$0xff]  ;;  %v3706_v38 = vsel %vm3698_vm0, %v3694_v29, %v3702_v32  ;;  %10018 = vmatprep.subr.bf16.mxu0 %v14398_v31  ;;  %v14525_v44 = vcombine.low %v4054_v27, %v4058_v1  ;;  %v3647_v29 = vrot.slane %v3639_v7, %v17117_v43 }
 0x324   : > { %v3922_v35 = vld [vmem:[#allocation3 + $0x360] sm:$0xff]  ;;  %v17260_v41 = vrot.slane %v3706_v38, %v17117_v43  ;;  %v3714_v42 = vcombine.high %v3706_v38, %v3706_v38  ;;  %10019 = vmatpush2.bf16.msra.mxu0 %v14397_v40  ;;  %v3654_v5 = vrot.slane %v3640_v8, %v17117_v43 }
 0x325   : > { %v4046_v36 = vld [vmem:[#allocation3 + $0x740] sm:$0xff]  ;;  %v14390_v45 = vcombine.high %v3918_v34, %v3922_v35  ;;  %10059 = vmatprep.subr.bf16.mxu1 %v14526_v33  ;;  %v14389_v59 = vcombine.low %v3918_v34, %v3922_v35 }
 0x326   : > { %v4050_v37 = vld [vmem:[#allocation3 + $0x760] sm:$0xff]  ;;  %v3729_v49 = vcombine.high %v17260_v41, %v17260_v41  ;;  %v17265_v50 = vrot.slane %v3714_v42, %v17117_v43  ;;  %10060 = vmatpush2.bf16.msra.mxu1 %v14525_v44  ;;  %v3655_v33 = vcombine.low %v3647_v29, %v3654_v5 }
 0x327   : > { %v14518_v46 = vcombine.high %v4046_v36, %v4050_v37  ;;  %v3910_v47 = vld [vmem:[#allocation3 + $0x300] sm:$0xff]  ;;  %10020 = vmatprep.subr.bf16.mxu0 %v14390_v45  ;;  %v14517_v2 = vcombine.low %v4046_v36, %v4050_v37 }
 0x328   : > { %v3914_v48 = vld [vmem:[#allocation3 + $0x320] sm:$0xff]  ;;  %v17267_v61 = vpack.c.bf16 %v3729_v49, %v3729_v49  ;;  %v3730_v62 = vcombine.high %v17265_v50, %v17265_v50  ;;  %10021 = vmatpush2.bf16.msra.mxu0 %v14389_v59  ;;  %v17313_v17 = vpack.c.bf16 %v17265_v50, %v17265_v50 }
 0x329   : > { %v4038_v53 = vld [vmem:[#allocation3 + $0x700] sm:$0xff]  ;;  %v14382_v3 = vcombine.high %v3910_v47, %v3914_v48  ;;  %10061 = vmatprep.subr.bf16.mxu1 %v14518_v46  ;;  %v14381_v16 = vcombine.low %v3910_v47, %v3914_v48 }
 0x32a   : > { %v4042_v55 = vld [vmem:[#allocation3 + $0x720] sm:$0xff]  ;;  %10032 = vmatprep.mubr.bf16.mxu0 %v17267_v61  ;;  %v17278_v28 = vpack.c.bf16 %v3730_v62, %v3730_v62  ;;  %10062 = vmatpush2.bf16.msra.mxu1 %v14517_v2 }
 0x32b   : > { %v14510_v6 = vcombine.high %v4038_v53, %v4042_v55  ;;  %v3902_v19 = vld [vmem:[#allocation3 + $0x2c0] sm:$0xff]  ;;  %10022 = vmatprep.subr.bf16.mxu0 %v14382_v3  ;;  %v14509_v10 = vcombine.low %v4038_v53, %v4042_v55 }
 0x32c   : > { %v3906_v20 = vld [vmem:[#allocation3 + $0x2e0] sm:$0xff]  ;;  %10073 = vmatprep.mubr.bf16.mxu1 %v17278_v28  ;;  %10023 = vmatpush2.bf16.msra.mxu0 %v14381_v16 }
 0x32d   : > { %v4030_v9 = vld [vmem:[#allocation3 + $0x6c0] sm:$0xff]  ;;  %v14374_v13 = vcombine.high %v3902_v19, %v3906_v20  ;;  %10063 = vmatprep.subr.bf16.mxu1 %v14510_v6  ;;  %v14373_v23 = vcombine.low %v3902_v19, %v3906_v20 }
 0x32e   : > { %v4034_v11 = vld [vmem:[#allocation3 + $0x6e0] sm:$0xff]  ;;  %10064 = vmatpush2.bf16.msra.mxu1 %v14509_v10 }
 0x32f   : > { %v14502_v56 = vcombine.high %v4030_v9, %v4034_v11  ;;  %v3894_v15 = vld [vmem:[#allocation3 + $0x280] sm:$0xff]  ;;  %10024 = vmatprep.subr.bf16.mxu0 %v14374_v13  ;;  %v14501_v14 = vcombine.low %v4030_v9, %v4034_v11 }
 0x330   : > { %v3898_v60 = vld [vmem:[#allocation3 + $0x2a0] sm:$0xff]  ;;  %10025 = vmatpush2.bf16.msra.mxu0 %v14373_v23 }
 0x331   : > { %v4022_v21 = vld [vmem:[#allocation3 + $0x680] sm:$0xff]  ;;  %v14366_v25 = vcombine.high %v3894_v15, %v3898_v60  ;;  %10065 = vmatprep.subr.bf16.mxu1 %v14502_v56  ;;  %v14365_v32 = vcombine.low %v3894_v15, %v3898_v60  ;;  %v17307_v56 = vpack.c.bf16 %v17260_v41, %v17260_v41 }
 0x332   : > { %v4026_v22 = vld [vmem:[#allocation3 + $0x6a0] sm:$0xff]  ;;  %10066 = vmatpush2.bf16.msra.mxu1 %v14501_v14 }
 0x333   : > { %v14494_v26 = vcombine.high %v4022_v21, %v4026_v22  ;;  %v3886_v27 = vld [vmem:[#allocation3 + $0x240] sm:$0xff]  ;;  %10026 = vmatprep.subr.bf16.mxu0 %v14366_v25  ;;  %v14493_v34 = vcombine.low %v4022_v21, %v4026_v22 }
 0x334   : > { %v3890_v1 = vld [vmem:[#allocation3 + $0x260] sm:$0xff]  ;;  %10027 = vmatpush2.bf16.msra.mxu0 %v14365_v32 }
 0x335   : > { %v4014_v30 = vld [vmem:[#allocation3 + $0x640] sm:$0xff]  ;;  %v14358_v35 = vcombine.high %v3886_v27, %v3890_v1  ;;  %10067 = vmatprep.subr.bf16.mxu1 %v14494_v26  ;;  %v14357_v45 = vcombine.low %v3886_v27, %v3890_v1 }
 0x336   : > { %v4018_v63 = vld [vmem:[#allocation3 + $0x660] sm:$0xff]  ;;  %10068 = vmatpush2.bf16.msra.mxu1 %v14493_v34 }
 0x337   : > { %v3551_v31 = vld [vmem:[#allocation2] sm:$0xff]  ;;  %v14486_v36 = vcombine.high %v4014_v30, %v4018_v63  ;;  %10028 = vmatprep.subr.bf16.mxu0 %v14358_v35  ;;  %v14485_v47 = vcombine.low %v4014_v30, %v4018_v63 }
 0x338   : > { %v3878_v37 = vld [vmem:[#allocation3 + $0x200] sm:$0xff]  ;;  %v3695_v40 = vadd.f32 %v3655_v33, %v3551_v31  ;;  %10029 = vmatpush2.bf16.msra.mxu0 %v14357_v45 }
 0x339   : > { %v3882_v38 = vld [vmem:[#allocation3 + $0x220] sm:$0xff]  ;;  %10069 = vmatprep.subr.bf16.mxu1 %v14486_v36 }
 0x33a   : > { %v4006_v42 = vld [vmem:[#allocation3 + $0x600] sm:$0xff]  ;;  %vm3699_vm1 = vcmp.gt.f32.partialorder %v3695_v40, 0.0  ;;  %v3703_v46 = vmul.f32 0.2, %v3695_v40  ;;  %v14350_v48 = vcombine.high %v3878_v37, %v3882_v38  ;;  %v14349_v19 = vcombine.low %v3878_v37, %v3882_v38  ;;  %10070 = vmatpush2.bf16.msra.mxu1 %v14485_v47 }
 0x33b   : > { %v4010_v44 = vld [vmem:[#allocation3 + $0x620] sm:$0xff] }
 0x33c   : > { %v14478_v49 = vcombine.high %v4006_v42, %v4010_v44  ;;  %v4126_v53 = vld [vmem:[#allocation3 + $0x9c0] sm:$0xff]  ;;  %v3707_v59 = vsel %vm3699_vm1, %v3695_v40, %v3703_v46  ;;  %10030 = vmatprep.subr.bf16.mxu0 %v14350_v48  ;;  %v14477_v20 = vcombine.low %v4006_v42, %v4010_v44 }
 0x33d   : > { %v4130_v55 = vld [vmem:[#allocation3 + $0x9e0] sm:$0xff]  ;;  %v17298_v3 = vrot.slane %v3707_v59, %v17117_v43  ;;  %v3731_v6 = vcombine.high %v3707_v59, %v3707_v59  ;;  %10031 = vmatpush2.bf16.msra.mxu0 %v14349_v19 }
 0x33e   : > { %v4254_v62 = vld [vmem:[#allocation3 + $0xdc0] sm:$0xff]  ;;  %v14598_v9 = vcombine.high %v4126_v53, %v4130_v55  ;;  %10071 = vmatprep.subr.bf16.mxu1 %v14478_v49  ;;  %v14597_v18 = vcombine.low %v4126_v53, %v4130_v55 }
 0x33f   : > { %v4258_v2 = vld [vmem:[#allocation3 + $0xde0] sm:$0xff]  ;;  %v17301_v11 = vrot.slane %v3731_v6, %v17117_v43  ;;  %v3746_v13 = vcombine.high %v17298_v3, %v17298_v3  ;;  %10072 = vmatpush2.bf16.msra.mxu1 %v14477_v20 }
 0x340   : > { %v14726_v16 = vcombine.high %v4254_v62, %v4258_v2  ;;  %v4118_v12 = vld [vmem:[#allocation3 + $0x980] sm:$0xff]  ;;  %10082 = vmatprep.subr.bf16.mxu0 %v14598_v9  ;;  %v14725_v21 = vcombine.low %v4254_v62, %v4258_v2  ;;  %10033 = vmatmul.mubr.bf16.vlgmr.msra.gmra.mxu0 %v17307_v56 }
 0x341   : > { %v4122_v10 = vld [vmem:[#allocation3 + $0x9a0] sm:$0xff]  ;;  %v3747_v39 = vcombine.high %v17301_v11, %v17301_v11  ;;  %v17315_v25 = vpack.c.bf16 %v3746_v13, %v3746_v13  ;;  %10083 = vmatpush1.bf16.msra.mxu0 %v14597_v18 }
 0x342   : > { %v4246_v15 = vld [vmem:[#allocation3 + $0xd80] sm:$0xff]  ;;  %v14590_v22 = vcombine.high %v4118_v12, %v4122_v10  ;;  %10123 = vmatprep.subr.bf16.mxu1 %v14726_v16  ;;  %10074 = vmatmul.mubr.bf16.vlgmr.msra.gmra.mxu1 %v17313_v17  ;;  %v14589_v50 = vcombine.low %v4118_v12, %v4122_v10 }
 0x343   : > { %v4250_v60 = vld [vmem:[#allocation3 + $0xda0] sm:$0xff]  ;;  %v17318_v26 = vpack.c.bf16 %v3747_v39, %v3747_v39  ;;  %10124 = vmatpush1.bf16.msra.mxu1 %v14725_v21  ;;  %10114 = vmatprep.mubr.bf16.mxu0 %v17315_v25 }
 0x344   : > { %v4110_v23 = vld [vmem:[#allocation3 + $0x940] sm:$0xff]  ;;  %v14718_v7 = vcombine.high %v4246_v15, %v4250_v60  ;;  %10084 = vmatprep.subr.bf16.mxu0 %v14590_v22  ;;  %v14717_v27 = vcombine.low %v4246_v15, %v4250_v60 }
 0x345   : > { %v4114_v41 = vld [vmem:[#allocation3 + $0x960] sm:$0xff]  ;;  %10155 = vmatprep.mubr.bf16.mxu1 %v17318_v26  ;;  %10085 = vmatpush1.bf16.msra.mxu0 %v14589_v50 }
 0x346   : > { %v4238_v8 = vld [vmem:[#allocation3 + $0xd40] sm:$0xff]  ;;  %v14582_v1 = vcombine.high %v4110_v23, %v4114_v41  ;;  %10125 = vmatprep.subr.bf16.mxu1 %v14718_v7  ;;  %v14581_v32 = vcombine.low %v4110_v23, %v4114_v41 }
 0x347   : > { %v4242_v14 = vld [vmem:[#allocation3 + $0xd60] sm:$0xff]  ;;  %10126 = vmatpush1.bf16.msra.mxu1 %v14717_v27 }
 0x348   : > { %v4102_v29 = vld [vmem:[#allocation3 + $0x900] sm:$0xff]  ;;  %v14710_v63 = vcombine.high %v4238_v8, %v4242_v14  ;;  %10086 = vmatprep.subr.bf16.mxu0 %v14582_v1  ;;  %v14709_v33 = vcombine.low %v4238_v8, %v4242_v14  ;;  %v17323_v14 = vld [vmem:[#allocation10 + $0x8] sm:$0xff] }
 0x349   : > { %v4106_v5 = vld [vmem:[#allocation3 + $0x920] sm:$0xff]  ;;  %10087 = vmatpush1.bf16.msra.mxu0 %v14581_v32 }
 0x34a   : > { %v4230_v30 = vld [vmem:[#allocation3 + $0xd00] sm:$0xff]  ;;  %v14574_v34 = vcombine.high %v4102_v29, %v4106_v5  ;;  %10127 = vmatprep.subr.bf16.mxu1 %v14710_v63  ;;  %v14573_v42 = vcombine.low %v4102_v29, %v4106_v5  ;;  %v3593_v29 = vrot.slane %v17323_v14, %v17236_v51  ;;  %v3597_v5 = vrot.slane %v17323_v14, %v17239_v52 }
 0x34b   : > { %v4234_v31 = vld [vmem:[#allocation3 + $0xd20] sm:$0xff]  ;;  %10128 = vmatpush1.bf16.msra.mxu1 %v14709_v33  ;;  %v3605_v63 = vrot.slane %v17323_v14, %v17245_v58 }
 0x34c   : > { %v4094_v35 = vld [vmem:[#allocation3 + $0x8c0] sm:$0xff]  ;;  %v14702_v38 = vcombine.high %v4230_v30, %v4234_v31  ;;  %10088 = vmatprep.subr.bf16.mxu0 %v14574_v34  ;;  %v14701_v44 = vcombine.low %v4230_v30, %v4234_v31  ;;  %v3601_v30 = vrot.slane %v17323_v14, %v17242_v57 }
 0x34d   : > { %v4098_v36 = vld [vmem:[#allocation3 + $0x8e0] sm:$0xff]  ;;  %10089 = vmatpush1.bf16.msra.mxu0 %v14573_v42 }
 0x34e   : > { %v4222_v37 = vld [vmem:[#allocation3 + $0xcc0] sm:$0xff]  ;;  %v14566_v45 = vcombine.high %v4094_v35, %v4098_v36  ;;  %10129 = vmatprep.subr.bf16.mxu1 %v14702_v38  ;;  %v14565_v55 = vcombine.low %v4094_v35, %v4098_v36  ;;  %v3657_v42 = vcombine.low %v3601_v30, %v3605_v63 }
 0x34f   : > { %v4226_v40 = vld [vmem:[#allocation3 + $0xce0] sm:$0xff]  ;;  %10130 = vmatpush1.bf16.msra.mxu1 %v14701_v44 }
 0x350   : > { %v4086_v46 = vld [vmem:[#allocation3 + $0x880] sm:$0xff]  ;;  %v14694_v49 = vcombine.high %v4222_v37, %v4226_v40  ;;  %10090 = vmatprep.subr.bf16.mxu0 %v14566_v45  ;;  %v14693_v59 = vcombine.low %v4222_v37, %v4226_v40  ;;  %v3656_v40 = vcombine.low %v3593_v29, %v3597_v5 }
 0x351   : > { %v4090_v47 = vld [vmem:[#allocation3 + $0x8a0] sm:$0xff]  ;;  %10091 = vmatpush1.bf16.msra.mxu0 %v14565_v55 }
 0x352   : > { %v4214_v48 = vld [vmem:[#allocation3 + $0xc80] sm:$0xff]  ;;  %v14558_v62 = vcombine.high %v4086_v46, %v4090_v47  ;;  %10131 = vmatprep.subr.bf16.mxu1 %v14694_v49  ;;  %v14557_v16 = vcombine.low %v4086_v46, %v4090_v47 }
 0x353   : > { %v4218_v53 = vld [vmem:[#allocation3 + $0xca0] sm:$0xff]  ;;  %10132 = vmatpush1.bf16.msra.mxu1 %v14693_v59  ;;  %v3664_v59 = vrot.slane %v3656_v40, %v17117_v43 }
 0x354   : > { %v4078_v2 = vld [vmem:[#allocation3 + $0x840] sm:$0xff]  ;;  %v14686_v20 = vcombine.high %v4214_v48, %v4218_v53  ;;  %10092 = vmatprep.subr.bf16.mxu0 %v14558_v62  ;;  %v14685_v12 = vcombine.low %v4214_v48, %v4218_v53  ;;  %v3671_v62 = vrot.slane %v3657_v42, %v17117_v43 }
 0x355   : > { %v4082_v6 = vld [vmem:[#allocation3 + $0x860] sm:$0xff]  ;;  %10093 = vmatpush1.bf16.msra.mxu0 %v14557_v16 }
 0x356   : > { %v4206_v19 = vld [vmem:[#allocation3 + $0xc40] sm:$0xff]  ;;  %v14550_v10 = vcombine.high %v4078_v2, %v4082_v6  ;;  %10133 = vmatprep.subr.bf16.mxu1 %v14686_v20  ;;  %v14549_v21 = vcombine.low %v4078_v2, %v4082_v6 }
 0x357   : > { %v4210_v9 = vld [vmem:[#allocation3 + $0xc60] sm:$0xff]  ;;  %10134 = vmatpush1.bf16.msra.mxu1 %v14685_v12 }
 0x358   : > { %v4070_v13 = vld [vmem:[#allocation3 + $0x800] sm:$0xff]  ;;  %v14678_v39 = vcombine.high %v4206_v19, %v4210_v9  ;;  %10094 = vmatprep.subr.bf16.mxu0 %v14550_v10  ;;  %v14677_v23 = vcombine.low %v4206_v19, %v4210_v9 }
 0x359   : > { %v4074_v15 = vld [vmem:[#allocation3 + $0x820] sm:$0xff]  ;;  %10095 = vmatpush1.bf16.msra.mxu0 %v14549_v21 }
 0x35a   : > { %v4198_v60 = vld [vmem:[#allocation3 + $0xc00] sm:$0xff]  ;;  %v14542_v7 = vcombine.high %v4070_v13, %v4074_v15  ;;  %10135 = vmatprep.subr.bf16.mxu1 %v14678_v39  ;;  %v14541_v1 = vcombine.low %v4070_v13, %v4074_v15  ;;  %v3672_v15 = vcombine.low %v3664_v59, %v3671_v62 }
 0x35b   : > { %v4202_v18 = vld [vmem:[#allocation3 + $0xc20] sm:$0xff]  ;;  %10136 = vmatpush1.bf16.msra.mxu1 %v14677_v23 }
 0x35c   : > { %v4190_v22 = vld [vmem:[#allocation3 + $0xbc0] sm:$0xff]  ;;  %v14670_v50 = vcombine.high %v4198_v60, %v4202_v18  ;;  %10096 = vmatprep.subr.bf16.mxu0 %v14542_v7  ;;  %v14669_v31 = vcombine.low %v4198_v60, %v4202_v18 }
 0x35d   : > { %v4194_v41 = vld [vmem:[#allocation3 + $0xbe0] sm:$0xff]  ;;  %10097 = vmatpush1.bf16.msra.mxu0 %v14541_v1 }
 0x35e   : > { %v4318_v8 = vld [vmem:[#allocation3 + $0xfc0] sm:$0xff]  ;;  %v14662_v32 = vcombine.high %v4190_v22, %v4194_v41  ;;  %10137 = vmatprep.subr.bf16.mxu1 %v14670_v50  ;;  %v14661_v38 = vcombine.low %v4190_v22, %v4194_v41  ;;  %v3552_v22 = vld [vmem:[#allocation2 + $0x18] sm:$0xff] }
 0x35f   : > { %v4322_v27 = vld [vmem:[#allocation3 + $0xfe0] sm:$0xff]  ;;  %10138 = vmatpush1.bf16.msra.mxu1 %v14669_v31 }
 0x360   : > { %v4182_v33 = vld [vmem:[#allocation3 + $0xb80] sm:$0xff]  ;;  %v14790_v36 = vcombine.high %v4318_v8, %v4322_v27  ;;  %10098 = vmatprep.subr.bf16.mxu0 %v14662_v32  ;;  %v14789_v44 = vcombine.low %v4318_v8, %v4322_v27  ;;  %v3696_v8 = vadd.f32 %v3672_v15, %v3552_v22 }
 0x361   : > { %v4186_v34 = vld [vmem:[#allocation3 + $0xba0] sm:$0xff]  ;;  %10099 = vmatpush2.bf16.msra.mxu0 %v14661_v38 }
 0x362   : > { %v4310_v35 = vld [vmem:[#allocation3 + $0xf80] sm:$0xff]  ;;  %v14654_v45 = vcombine.high %v4182_v33, %v4186_v34  ;;  %10139 = vmatprep.subr.bf16.mxu1 %v14790_v36  ;;  %v14653_v55 = vcombine.low %v4182_v33, %v4186_v34  ;;  %v3704_v32 = vmul.f32 0.2, %v3696_v8  ;;  %vm3700_vm2 = vcmp.gt.f32.partialorder %v3696_v8, 0.0 }
 0x363   : > { %v4314_v37 = vld [vmem:[#allocation3 + $0xfa0] sm:$0xff]  ;;  %10140 = vmatpush2.bf16.msra.mxu1 %v14789_v44 }
 0x364   : > { %v4174_v46 = vld [vmem:[#allocation3 + $0xb40] sm:$0xff]  ;;  %v14782_v49 = vcombine.high %v4310_v35, %v4314_v37  ;;  %10100 = vmatprep.subr.bf16.mxu0 %v14654_v45  ;;  %v14781_v2 = vcombine.low %v4310_v35, %v4314_v37  ;;  %v3708_v44 = vsel %vm3700_vm2, %v3696_v8, %v3704_v32  ;;  %v17345_v8 = vpack.c.bf16 %v17298_v3, %v17298_v3 }
 0x365   : > { %v4178_v47 = vld [vmem:[#allocation3 + $0xb60] sm:$0xff]  ;;  %10101 = vmatpush2.bf16.msra.mxu0 %v14653_v55  ;;  %v3748_v59 = vcombine.high %v3708_v44, %v3708_v44  ;;  %vm13744_vm2 = vcmask 1041408  }
 0x366   : > { %v4302_v48 = vld [vmem:[#allocation3 + $0xf40] sm:$0xff]  ;;  %v14646_v6 = vcombine.high %v4174_v46, %v4178_v47  ;;  %10141 = vmatprep.subr.bf16.mxu1 %v14782_v49  ;;  %v14645_v10 = vcombine.low %v4174_v46, %v4178_v47 }
 0x367   : > { %v4306_v53 = vld [vmem:[#allocation3 + $0xf60] sm:$0xff]  ;;  %10142 = vmatpush2.bf16.msra.mxu1 %v14781_v2 }
 0x368   : > { %v4166_v19 = vld [vmem:[#allocation3 + $0xb00] sm:$0xff]  ;;  %v14774_v16 = vcombine.high %v4302_v48, %v4306_v53  ;;  %10102 = vmatprep.subr.bf16.mxu0 %v14646_v6  ;;  %v14773_v60 = vcombine.low %v4302_v48, %v4306_v53 }
 0x369   : > { %v4170_v20 = vld [vmem:[#allocation3 + $0xb20] sm:$0xff]  ;;  %10103 = vmatpush2.bf16.msra.mxu0 %v14645_v10  ;;  %v17336_v10 = vrot.slane %v3708_v44, %v17117_v43 }
 0x36a   : > { %v4294_v9 = vld [vmem:[#allocation3 + $0xf00] sm:$0xff]  ;;  %v14638_v39 = vcombine.high %v4166_v19, %v4170_v20  ;;  %10143 = vmatprep.subr.bf16.mxu1 %v14774_v16  ;;  %v14637_v41 = vcombine.low %v4166_v19, %v4170_v20 }
 0x36b   : > { %v4298_v12 = vld [vmem:[#allocation3 + $0xf20] sm:$0xff]  ;;  %10144 = vmatpush2.bf16.msra.mxu1 %v14773_v60 }
 0x36c   : > { %v4158_v13 = vld [vmem:[#allocation3 + $0xac0] sm:$0xff]  ;;  %v14766_v23 = vcombine.high %v4294_v9, %v4298_v12  ;;  %10104 = vmatprep.subr.bf16.mxu0 %v14638_v39  ;;  %v14765_v50 = vcombine.low %v4294_v9, %v4298_v12 }
 0x36d   : > { %v4162_v18 = vld [vmem:[#allocation3 + $0xae0] sm:$0xff]  ;;  %10105 = vmatpush2.bf16.msra.mxu0 %v14637_v41  ;;  %v3763_v41 = vcombine.high %v17336_v10, %v17336_v10 }
 0x36e   : > { %v4286_v21 = vld [vmem:[#allocation3 + $0xec0] sm:$0xff]  ;;  %v14630_v27 = vcombine.high %v4158_v13, %v4162_v18  ;;  %10145 = vmatprep.subr.bf16.mxu1 %v14766_v23  ;;  %v14629_v31 = vcombine.low %v4158_v13, %v4162_v18  ;;  %v17339_v13 = vrot.slane %v3748_v59, %v17117_v43 }
 0x36f   : > { %v4290_v7 = vld [vmem:[#allocation3 + $0xee0] sm:$0xff]  ;;  %10146 = vmatpush2.bf16.msra.mxu1 %v14765_v50 }
 0x370   : > { %v4150_v1 = vld [vmem:[#allocation3 + $0xa80] sm:$0xff]  ;;  %v14758_v30 = vcombine.high %v4286_v21, %v4290_v7  ;;  %10106 = vmatprep.subr.bf16.mxu0 %v14630_v27  ;;  %v14757_v33 = vcombine.low %v4286_v21, %v4290_v7  ;;  %v3764_v50 = vcombine.high %v17339_v13, %v17339_v13  ;;  %v17351_v27 = vpack.c.bf16 %v17301_v11, %v17301_v11 }
 0x371   : > { %v4154_v29 = vld [vmem:[#allocation3 + $0xaa0] sm:$0xff]  ;;  %10107 = vmatpush2.bf16.msra.mxu0 %v14629_v31 }
 0x372   : > { %v4278_v5 = vld [vmem:[#allocation3 + $0xe80] sm:$0xff]  ;;  %v14622_v34 = vcombine.high %v4150_v1, %v4154_v29  ;;  %10147 = vmatprep.subr.bf16.mxu1 %v14758_v30  ;;  %v14621_v42 = vcombine.low %v4150_v1, %v4154_v29 }
 0x373   : > { %v4282_v63 = vld [vmem:[#allocation3 + $0xea0] sm:$0xff]  ;;  %10148 = vmatpush2.bf16.msra.mxu1 %v14757_v33  ;;  %v17353_v33 = vpack.c.bf16 %v3763_v41, %v3763_v41 }
 0x374   : > { %v4142_v35 = vld [vmem:[#allocation3 + $0xa40] sm:$0xff]  ;;  %v14750_v38 = vcombine.high %v4278_v5, %v4282_v63  ;;  %10108 = vmatprep.subr.bf16.mxu0 %v14622_v34  ;;  %v14749_v45 = vcombine.low %v4278_v5, %v4282_v63  ;;  %v17356_v34 = vpack.c.bf16 %v3764_v50, %v3764_v50 }
 0x375   : > { %v4146_v36 = vld [vmem:[#allocation3 + $0xa60] sm:$0xff]  ;;  %10109 = vmatpush2.bf16.msra.mxu0 %v14621_v42 }
 0x376   : > { %v4270_v37 = vld [vmem:[#allocation3 + $0xe40] sm:$0xff]  ;;  %v14614_v46 = vcombine.high %v4142_v35, %v4146_v36  ;;  %10149 = vmatprep.subr.bf16.mxu1 %v14750_v38  ;;  %v14613_v62 = vcombine.low %v4142_v35, %v4146_v36 }
 0x377   : > { %v4274_v40 = vld [vmem:[#allocation3 + $0xe60] sm:$0xff]  ;;  %10150 = vmatpush2.bf16.msra.mxu1 %v14749_v45 }
 0x378   : > { %v4134_v47 = vld [vmem:[#allocation3 + $0xa00] sm:$0xff]  ;;  %v14742_v49 = vcombine.high %v4270_v37, %v4274_v40  ;;  %10110 = vmatprep.subr.bf16.mxu0 %v14614_v46  ;;  %v14741_v2 = vcombine.low %v4270_v37, %v4274_v40 }
 0x379   : > { %v4138_v48 = vld [vmem:[#allocation3 + $0xa20] sm:$0xff]  ;;  %10111 = vmatpush2.bf16.msra.mxu0 %v14613_v62 }
 0x37a   : > { %v4262_v53 = vld [vmem:[#allocation3 + $0xe00] sm:$0xff]  ;;  %v14606_v6 = vcombine.high %v4134_v47, %v4138_v48  ;;  %10151 = vmatprep.subr.bf16.mxu1 %v14742_v49  ;;  %v14605_v15 = vcombine.low %v4134_v47, %v4138_v48 }
 0x37b   : > { %v4266_v55 = vld [vmem:[#allocation3 + $0xe20] sm:$0xff]  ;;  %10152 = vmatpush2.bf16.msra.mxu1 %v14741_v2 }
 0x37c   : > { %v4382_v19 = vld [vmem:[#allocation3 + $0x11c0] sm:$0xff]  ;;  %v14734_v16 = vcombine.high %v4262_v53, %v4266_v55  ;;  %10112 = vmatprep.subr.bf16.mxu0 %v14606_v6  ;;  %v14733_v60 = vcombine.low %v4262_v53, %v4266_v55 }
 0x37d   : > { %v4386_v20 = vld [vmem:[#allocation3 + $0x11e0] sm:$0xff]  ;;  %10113 = vmatpush2.bf16.msra.mxu0 %v14605_v15 }
 0x37e   : > { %v4510_v9 = vld [vmem:[#allocation3 + $0x15c0] sm:$0xff]  ;;  %v14854_v39 = vcombine.high %v4382_v19, %v4386_v20  ;;  %10153 = vmatprep.subr.bf16.mxu1 %v14734_v16  ;;  %v14853_v1 = vcombine.low %v4382_v19, %v4386_v20 }
 0x37f   : > { %v4514_v12 = vld [vmem:[#allocation3 + $0x15e0] sm:$0xff]  ;;  %10154 = vmatpush2.bf16.msra.mxu1 %v14733_v60 }
 0x380   : > { %v4374_v18 = vld [vmem:[#allocation3 + $0x1180] sm:$0xff]  ;;  %v14982_v23 = vcombine.high %v4510_v9, %v4514_v12  ;;  %10164 = vmatprep.subr.bf16.mxu0 %v14854_v39  ;;  %v14981_v29 = vcombine.low %v4510_v9, %v4514_v12  ;;  %10115 = vmatmul.mubr.bf16.vlgmr.msra.gmra.mxu0 %v17345_v8 }
 0x381   : > { %v4378_v21 = vld [vmem:[#allocation3 + $0x11a0] sm:$0xff]  ;;  %10165 = vmatpush1.bf16.msra.mxu0 %v14853_v1  ;;  %10196 = vmatprep.mubr.bf16.mxu0 %v17353_v33 }
 0x382   : > { %v4502_v22 = vld [vmem:[#allocation3 + $0x1580] sm:$0xff]  ;;  %v14846_v5 = vcombine.high %v4374_v18, %v4378_v21  ;;  %10205 = vmatprep.subr.bf16.mxu1 %v14982_v23  ;;  %10156 = vmatmul.mubr.bf16.vlgmr.msra.gmra.mxu1 %v17351_v27  ;;  %v14845_v11 = vcombine.low %v4374_v18, %v4378_v21 }
 0x383   : > { %v4506_v7 = vld [vmem:[#allocation3 + $0x15a0] sm:$0xff]  ;;  %10206 = vmatpush1.bf16.msra.mxu1 %v14981_v29  ;;  %10237 = vmatprep.mubr.bf16.mxu1 %v17356_v34 }
 0x384   : > { %v4366_v30 = vld [vmem:[#allocation3 + $0x1140] sm:$0xff]  ;;  %v14974_v31 = vcombine.high %v4502_v22, %v4506_v7  ;;  %10166 = vmatprep.subr.bf16.mxu0 %v14846_v5  ;;  %v14973_v35 = vcombine.low %v4502_v22, %v4506_v7 }
 0x385   : > { %v4370_v63 = vld [vmem:[#allocation3 + $0x1160] sm:$0xff]  ;;  %10167 = vmatpush1.bf16.msra.mxu0 %v14845_v11 }
 0x386   : > { %v4494_v32 = vld [vmem:[#allocation3 + $0x1540] sm:$0xff]  ;;  %v14838_v36 = vcombine.high %v4366_v30, %v4370_v63  ;;  %10207 = vmatprep.subr.bf16.mxu1 %v14974_v31  ;;  %v14837_v45 = vcombine.low %v4366_v30, %v4370_v63 }
 0x387   : > { %v4498_v3 = vld [vmem:[#allocation3 + $0x1560] sm:$0xff]  ;;  %10208 = vmatpush1.bf16.msra.mxu1 %v14973_v35 }
 0x388   : > { %v4358_v37 = vld [vmem:[#allocation3 + $0x1100] sm:$0xff]  ;;  %v14966_v42 = vcombine.high %v4494_v32, %v4498_v3  ;;  %10168 = vmatprep.subr.bf16.mxu0 %v14838_v36  ;;  %v14965_v46 = vcombine.low %v4494_v32, %v4498_v3 }
 0x389   : > { %v4362_v38 = vld [vmem:[#allocation3 + $0x1120] sm:$0xff]  ;;  %10169 = vmatpush1.bf16.msra.mxu0 %v14837_v45  ;;  %v3613_v45 = vrot.slane %v17323_v14, %v17275_v4 }
 0x38a   : > { %v4486_v40 = vld [vmem:[#allocation3 + $0x1500] sm:$0xff]  ;;  %v14830_v47 = vcombine.high %v4358_v37, %v4362_v38  ;;  %10209 = vmatprep.subr.bf16.mxu1 %v14966_v42  ;;  %v14829_v62 = vcombine.low %v4358_v37, %v4362_v38 }
 0x38b   : > { %v4490_v44 = vld [vmem:[#allocation3 + $0x1520] sm:$0xff]  ;;  %10210 = vmatpush1.bf16.msra.mxu1 %v14965_v46  ;;  %v3617_v46 = vrot.slane %v17323_v14, %v17281_v54 }
 0x38c   : > { %v4350_v48 = vld [vmem:[#allocation3 + $0x10c0] sm:$0xff]  ;;  %v14958_v55 = vcombine.high %v4486_v40, %v4490_v44  ;;  %10170 = vmatprep.subr.bf16.mxu0 %v14830_v47  ;;  %v14957_v2 = vcombine.low %v4486_v40, %v4490_v44  ;;  %v3609_v44 = vrot.slane %v17323_v14, %v17272_v0  ;;  %v3621_v47 = vrot.slane %v17323_v14, %v17284_v24 }
 0x38d   : > { %v4354_v49 = vld [vmem:[#allocation3 + $0x10e0] sm:$0xff]  ;;  %10171 = vmatpush1.bf16.msra.mxu0 %v14829_v62 }
 0x38e   : > { %v4478_v53 = vld [vmem:[#allocation3 + $0x14c0] sm:$0xff]  ;;  %v14822_v6 = vcombine.high %v4350_v48, %v4354_v49  ;;  %10211 = vmatprep.subr.bf16.mxu1 %v14958_v55  ;;  %v14821_v15 = vcombine.low %v4350_v48, %v4354_v49 }
 0x38f   : > { %v4482_v59 = vld [vmem:[#allocation3 + $0x14e0] sm:$0xff]  ;;  %10212 = vmatpush1.bf16.msra.mxu1 %v14957_v2 }
 0x390   : > { %v4342_v19 = vld [vmem:[#allocation3 + $0x1080] sm:$0xff]  ;;  %v14950_v16 = vcombine.high %v4478_v53, %v4482_v59  ;;  %10172 = vmatprep.subr.bf16.mxu0 %v14822_v6  ;;  %v14949_v60 = vcombine.low %v4478_v53, %v4482_v59 }
 0x391   : > { %v4346_v20 = vld [vmem:[#allocation3 + $0x10a0] sm:$0xff]  ;;  %10173 = vmatpush1.bf16.msra.mxu0 %v14821_v15 }
 0x392   : > { %v4470_v9 = vld [vmem:[#allocation3 + $0x1480] sm:$0xff]  ;;  %v14814_v39 = vcombine.high %v4342_v19, %v4346_v20  ;;  %10213 = vmatprep.subr.bf16.mxu1 %v14950_v16  ;;  %v14813_v41 = vcombine.low %v4342_v19, %v4346_v20  ;;  %v3673_v19 = vcombine.low %v3609_v44, %v3613_v45  ;;  %v3674_v20 = vcombine.low %v3617_v46, %v3621_v47 }
 0x393   : > { %v4474_v12 = vld [vmem:[#allocation3 + $0x14a0] sm:$0xff]  ;;  %10214 = vmatpush1.bf16.msra.mxu1 %v14949_v60 }
 0x394   : > { %v4334_v18 = vld [vmem:[#allocation3 + $0x1040] sm:$0xff]  ;;  %v14942_v23 = vcombine.high %v4470_v9, %v4474_v12  ;;  %10174 = vmatprep.subr.bf16.mxu0 %v14814_v39  ;;  %v14941_v50 = vcombine.low %v4470_v9, %v4474_v12 }
 0x395   : > { %v4338_v21 = vld [vmem:[#allocation3 + $0x1060] sm:$0xff]  ;;  %10175 = vmatpush1.bf16.msra.mxu0 %v14813_v41 }
 0x396   : > { %v4462_v22 = vld [vmem:[#allocation3 + $0x1440] sm:$0xff]  ;;  %v14806_v1 = vcombine.high %v4334_v18, %v4338_v21  ;;  %10215 = vmatprep.subr.bf16.mxu1 %v14942_v23  ;;  %v14805_v32 = vcombine.low %v4334_v18, %v4338_v21  ;;  %v3681_v21 = vrot.slane %v3673_v19, %v17117_v43 }
 0x397   : > { %v4466_v7 = vld [vmem:[#allocation3 + $0x1460] sm:$0xff]  ;;  %10216 = vmatpush1.bf16.msra.mxu1 %v14941_v50 }
 0x398   : > { %v4326_v29 = vld [vmem:[#allocation3 + $0x1000] sm:$0xff]  ;;  %v14934_v63 = vcombine.high %v4462_v22, %v4466_v7  ;;  %10176 = vmatprep.subr.bf16.mxu0 %v14806_v1  ;;  %v14933_v3 = vcombine.low %v4462_v22, %v4466_v7  ;;  %v3688_v22 = vrot.slane %v3674_v20, %v17117_v43 }
 0x399   : > { %v4330_v5 = vld [vmem:[#allocation3 + $0x1020] sm:$0xff]  ;;  %10177 = vmatpush1.bf16.msra.mxu0 %v14805_v32 }
 0x39a   : > { %v4454_v30 = vld [vmem:[#allocation3 + $0x1400] sm:$0xff]  ;;  %v14798_v11 = vcombine.high %v4326_v29, %v4330_v5  ;;  %10217 = vmatprep.subr.bf16.mxu1 %v14934_v63  ;;  %v14797_v42 = vcombine.low %v4326_v29, %v4330_v5 }
 0x39b   : > { %v4458_v31 = vld [vmem:[#allocation3 + $0x1420] sm:$0xff]  ;;  %10218 = vmatpush1.bf16.msra.mxu1 %v14933_v3 }
 0x39c   : > { %v4446_v35 = vld [vmem:[#allocation3 + $0x13c0] sm:$0xff]  ;;  %v14926_v38 = vcombine.high %v4454_v30, %v4458_v31  ;;  %10178 = vmatprep.subr.bf16.mxu0 %v14798_v11  ;;  %v14925_v48 = vcombine.low %v4454_v30, %v4458_v31  ;;  %v3689_v31 = vcombine.low %v3681_v21, %v3688_v22 }
 0x39d   : > { %v4450_v36 = vld [vmem:[#allocation3 + $0x13e0] sm:$0xff]  ;;  %10179 = vmatpush1.bf16.msra.mxu0 %v14797_v42 }
 0x39e   : > { %v4574_v37 = vld [vmem:[#allocation3 + $0x17c0] sm:$0xff]  ;;  %v14918_v49 = vcombine.high %v4446_v35, %v4450_v36  ;;  %10219 = vmatprep.subr.bf16.mxu1 %v14926_v38  ;;  %v14917_v6 = vcombine.low %v4446_v35, %v4450_v36  ;;  %v3553_v36 = vld [vmem:[#allocation2 + $0x8] sm:$0xff] }
 0x39f   : > { %v4578_v40 = vld [vmem:[#allocation3 + $0x17e0] sm:$0xff]  ;;  %10220 = vmatpush1.bf16.msra.mxu1 %v14925_v48  ;;  %v3697_v42 = vadd.f32 %v3689_v31, %v3553_v36 }
 0x3a0   : > { %v4438_v53 = vld [vmem:[#allocation3 + $0x1380] sm:$0xff]  ;;  %v15046_v62 = vcombine.high %v4574_v37, %v4578_v40  ;;  %10180 = vmatprep.subr.bf16.mxu0 %v14918_v49  ;;  %v15045_v9 = vcombine.low %v4574_v37, %v4578_v40 }
 0x3a1   : > { %v4442_v55 = vld [vmem:[#allocation3 + $0x13a0] sm:$0xff]  ;;  %10181 = vmatpush2.bf16.msra.mxu0 %v14917_v6  ;;  %vm3701_vm3 = vcmp.gt.f32.partialorder %v3697_v42, 0.0 }
 0x3a2   : > { %v4566_v59 = vld [vmem:[#allocation3 + $0x1780] sm:$0xff]  ;;  %v14910_v16 = vcombine.high %v4438_v53, %v4442_v55  ;;  %10221 = vmatprep.subr.bf16.mxu1 %v15046_v62  ;;  %v14909_v18 = vcombine.low %v4438_v53, %v4442_v55 }
 0x3a3   : > { %v4570_v2 = vld [vmem:[#allocation3 + $0x17a0] sm:$0xff]  ;;  %10222 = vmatpush2.bf16.msra.mxu1 %v15045_v9 }
 0x3a4   : > { %v4430_v12 = vld [vmem:[#allocation3 + $0x1340] sm:$0xff]  ;;  %v15038_v60 = vcombine.high %v4566_v59, %v4570_v2  ;;  %10182 = vmatprep.subr.bf16.mxu0 %v14910_v16  ;;  %v15037_v23 = vcombine.low %v4566_v59, %v4570_v2  ;;  %v3705_v59 = vmul.f32 0.2, %v3697_v42 }
 0x3a5   : > { %v4434_v14 = vld [vmem:[#allocation3 + $0x1360] sm:$0xff]  ;;  %10183 = vmatpush2.bf16.msra.mxu0 %v14909_v18 }
 0x3a6   : > { %v4558_v15 = vld [vmem:[#allocation3 + $0x1740] sm:$0xff]  ;;  %v14902_v7 = vcombine.high %v4430_v12, %v4434_v14  ;;  %10223 = vmatprep.subr.bf16.mxu1 %v15038_v60  ;;  %v14901_v30 = vcombine.low %v4430_v12, %v4434_v14  ;;  %v3709_v14 = vsel %vm3701_vm3, %v3697_v42, %v3705_v59  ;;  %vm13764_vm3 = vcmask 1024  }
 0x3a7   : > { %v4562_v39 = vld [vmem:[#allocation3 + $0x1760] sm:$0xff]  ;;  %10224 = vmatpush2.bf16.msra.mxu1 %v15037_v23 }
 0x3a8   : > { %v4422_v41 = vld [vmem:[#allocation3 + $0x1300] sm:$0xff]  ;;  %v15030_v29 = vcombine.high %v4558_v15, %v4562_v39  ;;  %10184 = vmatprep.subr.bf16.mxu0 %v14902_v7  ;;  %v15029_v32 = vcombine.low %v4558_v15, %v4562_v39  ;;  %v3765_v7 = vcombine.high %v3709_v14, %v3709_v14 }
 0x3a9   : > { %v4426_v50 = vld [vmem:[#allocation3 + $0x1320] sm:$0xff]  ;;  %10185 = vmatpush2.bf16.msra.mxu0 %v14901_v30 }
 0x3aa   : > { %v4550_v1 = vld [vmem:[#allocation3 + $0x1700] sm:$0xff]  ;;  %v14894_v3 = vcombine.high %v4422_v41, %v4426_v50  ;;  %10225 = vmatprep.subr.bf16.mxu1 %v15030_v29  ;;  %v14893_v40 = vcombine.low %v4422_v41, %v4426_v50 }
 0x3ab   : > { %v4554_v5 = vld [vmem:[#allocation3 + $0x1720] sm:$0xff]  ;;  %10226 = vmatpush2.bf16.msra.mxu1 %v15029_v32  ;;  %v17372_v32 = vrot.slane %v3709_v14, %v17117_v43 }
 0x3ac   : > { %v4414_v63 = vld [vmem:[#allocation3 + $0x12c0] sm:$0xff]  ;;  %v15022_v37 = vcombine.high %v4550_v1, %v4554_v5  ;;  %10186 = vmatprep.subr.bf16.mxu0 %v14894_v3  ;;  %v15021_v44 = vcombine.low %v4550_v1, %v4554_v5  ;;  %v17375_v3 = vrot.slane %v3765_v7, %v17117_v43 }
 0x3ad   : > { %v4418_v11 = vld [vmem:[#allocation3 + $0x12e0] sm:$0xff]  ;;  %10187 = vmatpush2.bf16.msra.mxu0 %v14893_v40 }
 0x3ae   : > { %v4542_v35 = vld [vmem:[#allocation3 + $0x16c0] sm:$0xff]  ;;  %v14886_v45 = vcombine.high %v4414_v63, %v4418_v11  ;;  %10227 = vmatprep.subr.bf16.mxu1 %v15022_v37  ;;  %v14885_v55 = vcombine.low %v4414_v63, %v4418_v11  ;;  %v3781_v43 = vcombine.high %v17375_v3, %v17375_v3 }
 0x3af   : > { %v4546_v38 = vld [vmem:[#allocation3 + $0x16e0] sm:$0xff]  ;;  %10228 = vmatpush2.bf16.msra.mxu1 %v15021_v44 }
 0x3b0   : > { %v4406_v46 = vld [vmem:[#allocation3 + $0x1280] sm:$0xff]  ;;  %v15014_v49 = vcombine.high %v4542_v35, %v4546_v38  ;;  %10188 = vmatprep.subr.bf16.mxu0 %v14886_v45  ;;  %v15013_v62 = vcombine.low %v4542_v35, %v4546_v38  ;;  %v3780_v45 = vcombine.high %v17372_v32, %v17372_v32 }
 0x3b1   : > { %v4410_v47 = vld [vmem:[#allocation3 + $0x12a0] sm:$0xff]  ;;  %10189 = vmatpush2.bf16.msra.mxu0 %v14885_v55 }
 0x3b2   : > { %v4534_v48 = vld [vmem:[#allocation3 + $0x1680] sm:$0xff]  ;;  %v14878_v2 = vcombine.high %v4406_v46, %v4410_v47  ;;  %10229 = vmatprep.subr.bf16.mxu1 %v15014_v49  ;;  %v14877_v12 = vcombine.low %v4406_v46, %v4410_v47  ;;  %v17381_v46 = vpack.c.bf16 %v17336_v10, %v17336_v10  ;;  %v17387_v47 = vpack.c.bf16 %v17339_v13, %v17339_v13 }
 0x3b3   : > { %v4538_v53 = vld [vmem:[#allocation3 + $0x16a0] sm:$0xff]  ;;  %10230 = vmatpush2.bf16.msra.mxu1 %v15013_v62 }
 0x3b4   : > { %v4398_v6 = vld [vmem:[#allocation3 + $0x1240] sm:$0xff]  ;;  %v15006_v9 = vcombine.high %v4534_v48, %v4538_v53  ;;  %10190 = vmatprep.subr.bf16.mxu0 %v14878_v2  ;;  %v15005_v15 = vcombine.low %v4534_v48, %v4538_v53 }
 0x3b5   : > { %v4402_v19 = vld [vmem:[#allocation3 + $0x1260] sm:$0xff]  ;;  %10191 = vmatpush2.bf16.msra.mxu0 %v14877_v12 }
 0x3b6   : > { %v4526_v20 = vld [vmem:[#allocation3 + $0x1640] sm:$0xff]  ;;  %v14870_v60 = vcombine.high %v4398_v6, %v4402_v19  ;;  %10231 = vmatprep.subr.bf16.mxu1 %v15006_v9  ;;  %v14869_v41 = vcombine.low %v4398_v6, %v4402_v19  ;;  %v17389_v6 = vpack.c.bf16 %v3780_v45, %v3780_v45  ;;  %v17392_v19 = vpack.c.bf16 %v3781_v43, %v3781_v43 }
 0x3b7   : > { %v4530_v16 = vld [vmem:[#allocation3 + $0x1660] sm:$0xff]  ;;  %10232 = vmatpush2.bf16.msra.mxu1 %v15005_v15 }
 0x3b8   : > { %v4390_v39 = vld [vmem:[#allocation3 + $0x1200] sm:$0xff]  ;;  %v14998_v22 = vcombine.high %v4526_v20, %v4530_v16  ;;  %10192 = vmatprep.subr.bf16.mxu0 %v14870_v60  ;;  %v14997_v50 = vcombine.low %v4526_v20, %v4530_v16 }
 0x3b9   : > { %v4394_v18 = vld [vmem:[#allocation3 + $0x1220] sm:$0xff]  ;;  %10193 = vmatpush2.bf16.msra.mxu0 %v14869_v41 }
 0x3ba   : > { %v4518_v21 = vld [vmem:[#allocation3 + $0x1600] sm:$0xff]  ;;  %v14862_v1 = vcombine.high %v4390_v39, %v4394_v18  ;;  %10233 = vmatprep.subr.bf16.mxu1 %v14998_v22  ;;  %v14861_v11 = vcombine.low %v4390_v39, %v4394_v18 }
 0x3bb   : > { %v4522_v23 = vld [vmem:[#allocation3 + $0x1620] sm:$0xff]  ;;  %10234 = vmatpush2.bf16.msra.mxu1 %v14997_v50 }
 0x3bc   : > { %v4638_v29 = vld [vmem:[#allocation3 + $0x19c0] sm:$0xff]  ;;  %v14990_v63 = vcombine.high %v4518_v21, %v4522_v23  ;;  %10194 = vmatprep.subr.bf16.mxu0 %v14862_v1  ;;  %v14989_v35 = vcombine.low %v4518_v21, %v4522_v23 }
 0x3bd   : > { %v4642_v5 = vld [vmem:[#allocation3 + $0x19e0] sm:$0xff]  ;;  %10195 = vmatpush2.bf16.msra.mxu0 %v14861_v11 }
 0x3be   : > { %v4766_v30 = vld [vmem:[#allocation3 + $0x1dc0] sm:$0xff]  ;;  %v15110_v36 = vcombine.high %v4638_v29, %v4642_v5  ;;  %10235 = vmatprep.subr.bf16.mxu1 %v14990_v63  ;;  %v15109_v48 = vcombine.low %v4638_v29, %v4642_v5 }
 0x3bf   : > { %v4770_v31 = vld [vmem:[#allocation3 + $0x1de0] sm:$0xff]  ;;  %10236 = vmatpush2.bf16.msra.mxu1 %v14989_v35 }
 0x3c0   : > { %v4630_v37 = vld [vmem:[#allocation3 + $0x1980] sm:$0xff]  ;;  %v15238_v42 = vcombine.high %v4766_v30, %v4770_v31  ;;  %10246 = vmatprep.subr.bf16.mxu0 %v15110_v36  ;;  %v15237_v49 = vcombine.low %v4766_v30, %v4770_v31  ;;  %10197 = vmatmul.mubr.bf16.vlgmr.msra.gmra.mxu0 %v17381_v46 }
 0x3c1   : > { %v4634_v38 = vld [vmem:[#allocation3 + $0x19a0] sm:$0xff]  ;;  %10247 = vmatpush1.bf16.msra.mxu0 %v15109_v48  ;;  %10278 = vmatprep.mubr.bf16.mxu0 %v17389_v6 }
 0x3c2   : > { %v4758_v40 = vld [vmem:[#allocation3 + $0x1d80] sm:$0xff]  ;;  %v15102_v53 = vcombine.high %v4630_v37, %v4634_v38  ;;  %10287 = vmatprep.subr.bf16.mxu1 %v15238_v42  ;;  %10238 = vmatmul.mubr.bf16.vlgmr.msra.gmra.mxu1 %v17387_v47  ;;  %v15101_v13 = vcombine.low %v4630_v37, %v4634_v38 }
 0x3c3   : > { %v4762_v44 = vld [vmem:[#allocation3 + $0x1da0] sm:$0xff]  ;;  %10288 = vmatpush1.bf16.msra.mxu1 %v15237_v49  ;;  %10319 = vmatprep.mubr.bf16.mxu1 %v17392_v19 }
 0x3c4   : > { %v4622_v55 = vld [vmem:[#allocation3 + $0x1940] sm:$0xff]  ;;  %v15230_v2 = vcombine.high %v4758_v40, %v4762_v44  ;;  %10248 = vmatprep.subr.bf16.mxu0 %v15102_v53  ;;  %v15229_v20 = vcombine.low %v4758_v40, %v4762_v44 }
 0x3c5   : > { %v4626_v59 = vld [vmem:[#allocation3 + $0x1960] sm:$0xff]  ;;  %10249 = vmatpush1.bf16.msra.mxu0 %v15101_v13 }
 0x3c6   : > { %v4750_v62 = vld [vmem:[#allocation3 + $0x1d40] sm:$0xff]  ;;  %v15094_v9 = vcombine.high %v4622_v55, %v4626_v59  ;;  %10289 = vmatprep.subr.bf16.mxu1 %v15230_v2  ;;  %v15093_v39 = vcombine.low %v4622_v55, %v4626_v59 }
 0x3c7   : > { %v4754_v10 = vld [vmem:[#allocation3 + $0x1d60] sm:$0xff]  ;;  %10290 = vmatpush1.bf16.msra.mxu1 %v15229_v20 }
 0x3c8   : > { %v4614_v16 = vld [vmem:[#allocation3 + $0x1900] sm:$0xff]  ;;  %v15222_v15 = vcombine.high %v4750_v62, %v4754_v10  ;;  %10250 = vmatprep.subr.bf16.mxu0 %v15094_v9  ;;  %v15221_v18 = vcombine.low %v4750_v62, %v4754_v10 }
 0x3c9   : > { %v4618_v12 = vld [vmem:[#allocation3 + $0x1920] sm:$0xff]  ;;  %10251 = vmatpush1.bf16.msra.mxu0 %v15093_v39 }
 0x3ca   : > { %v4742_v14 = vld [vmem:[#allocation3 + $0x1d00] sm:$0xff]  ;;  %v15086_v21 = vcombine.high %v4614_v16, %v4618_v12  ;;  %10291 = vmatprep.subr.bf16.mxu1 %v15222_v15  ;;  %v15085_v1 = vcombine.low %v4614_v16, %v4618_v12 }
 0x3cb   : > { %v4746_v60 = vld [vmem:[#allocation3 + $0x1d20] sm:$0xff]  ;;  %10292 = vmatpush1.bf16.msra.mxu1 %v15221_v18 }
 0x3cc   : > { %v4606_v22 = vld [vmem:[#allocation3 + $0x18c0] sm:$0xff]  ;;  %v15214_v41 = vcombine.high %v4742_v14, %v4746_v60  ;;  %10252 = vmatprep.subr.bf16.mxu0 %v15086_v21  ;;  %v15213_v29 = vcombine.low %v4742_v14, %v4746_v60 }
 0x3cd   : > { %v4610_v23 = vld [vmem:[#allocation3 + $0x18e0] sm:$0xff]  ;;  %10253 = vmatpush1.bf16.msra.mxu0 %v15085_v1 }
 0x3ce   : > { %v4734_v7 = vld [vmem:[#allocation3 + $0x1cc0] sm:$0xff]  ;;  %v15078_v5 = vcombine.high %v4606_v22, %v4610_v23  ;;  %10293 = vmatprep.subr.bf16.mxu1 %v15214_v41  ;;  %v15077_v36 = vcombine.low %v4606_v22, %v4610_v23 }
 0x3cf   : > { %v4738_v50 = vld [vmem:[#allocation3 + $0x1ce0] sm:$0xff]  ;;  %10294 = vmatpush1.bf16.msra.mxu1 %v15213_v29 }
 0x3d0   : > { %v4598_v30 = vld [vmem:[#allocation3 + $0x1880] sm:$0xff]  ;;  %v15206_v11 = vcombine.high %v4734_v7, %v4738_v50  ;;  %10254 = vmatprep.subr.bf16.mxu0 %v15078_v5  ;;  %v15205_v37 = vcombine.low %v4734_v7, %v4738_v50 }
 0x3d1   : > { %v4602_v63 = vld [vmem:[#allocation3 + $0x18a0] sm:$0xff]  ;;  %10255 = vmatpush1.bf16.msra.mxu0 %v15077_v36 }
 0x3d2   : > { %v4726_v31 = vld [vmem:[#allocation3 + $0x1c80] sm:$0xff]  ;;  %v15070_v38 = vcombine.high %v4598_v30, %v4602_v63  ;;  %10295 = vmatprep.subr.bf16.mxu1 %v15206_v11  ;;  %v15069_v48 = vcombine.low %v4598_v30, %v4602_v63 }
 0x3d3   : > { %v4730_v35 = vld [vmem:[#allocation3 + $0x1ca0] sm:$0xff]  ;;  %10296 = vmatpush1.bf16.msra.mxu1 %v15205_v37 }
 0x3d4   : > { %v4590_v40 = vld [vmem:[#allocation3 + $0x1840] sm:$0xff]  ;;  %v15198_v45 = vcombine.high %v4726_v31, %v4730_v35  ;;  %10256 = vmatprep.subr.bf16.mxu0 %v15070_v38  ;;  %v15197_v49 = vcombine.low %v4726_v31, %v4730_v35 }
 0x3d5   : > { %v4594_v42 = vld [vmem:[#allocation3 + $0x1860] sm:$0xff]  ;;  %10257 = vmatpush1.bf16.msra.mxu0 %v15069_v48 }
 0x3d6   : > { %v4718_v44 = vld [vmem:[#allocation3 + $0x1c40] sm:$0xff]  ;;  %v15062_v53 = vcombine.high %v4590_v40, %v4594_v42  ;;  %10297 = vmatprep.subr.bf16.mxu1 %v15198_v45  ;;  %v15061_v13 = vcombine.low %v4590_v40, %v4594_v42 }
 0x3d7   : > { %v4722_v43 = vld [vmem:[#allocation3 + $0x1c60] sm:$0xff]  ;;  %10298 = vmatpush1.bf16.msra.mxu1 %v15197_v49 }
 0x3d8   : > { %v4582_v55 = vld [vmem:[#allocation3 + $0x1800] sm:$0xff]  ;;  %v15190_v2 = vcombine.high %v4718_v44, %v4722_v43  ;;  %10258 = vmatprep.subr.bf16.mxu0 %v15062_v53  ;;  %v15189_v20 = vcombine.low %v4718_v44, %v4722_v43 }
 0x3d9   : > { %v4586_v59 = vld [vmem:[#allocation3 + $0x1820] sm:$0xff]  ;;  %10259 = vmatpush1.bf16.msra.mxu0 %v15061_v13 }
 0x3da   : > { %v4710_v62 = vld [vmem:[#allocation3 + $0x1c00] sm:$0xff]  ;;  %v15054_v9 = vcombine.high %v4582_v55, %v4586_v59  ;;  %10299 = vmatprep.subr.bf16.mxu1 %v15190_v2  ;;  %v15053_v39 = vcombine.low %v4582_v55, %v4586_v59 }
 0x3db   : > { %v4714_v10 = vld [vmem:[#allocation3 + $0x1c20] sm:$0xff]  ;;  %10300 = vmatpush1.bf16.msra.mxu1 %v15189_v20 }
 0x3dc   : > { %v4702_v16 = vld [vmem:[#allocation3 + $0x1bc0] sm:$0xff]  ;;  %v15182_v15 = vcombine.high %v4710_v62, %v4714_v10  ;;  %10260 = vmatprep.subr.bf16.mxu0 %v15054_v9  ;;  %v15181_v18 = vcombine.low %v4710_v62, %v4714_v10 }
 0x3dd   : > { %v4706_v12 = vld [vmem:[#allocation3 + $0x1be0] sm:$0xff]  ;;  %10261 = vmatpush1.bf16.msra.mxu0 %v15053_v39 }
 0x3de   : > { %v4830_v14 = vld [vmem:[#allocation3 + $0x1fc0] sm:$0xff]  ;;  %v15174_v21 = vcombine.high %v4702_v16, %v4706_v12  ;;  %10301 = vmatprep.subr.bf16.mxu1 %v15182_v15  ;;  %v15173_v1 = vcombine.low %v4702_v16, %v4706_v12 }
 0x3df   : > { %v4834_v60 = vld [vmem:[#allocation3 + $0x1fe0] sm:$0xff]  ;;  %10302 = vmatpush1.bf16.msra.mxu1 %v15181_v18 }
 0x3e0   : > { %v4694_v22 = vld [vmem:[#allocation3 + $0x1b80] sm:$0xff]  ;;  %v15302_v41 = vcombine.high %v4830_v14, %v4834_v60  ;;  %10262 = vmatprep.subr.bf16.mxu0 %v15174_v21  ;;  %v15301_v29 = vcombine.low %v4830_v14, %v4834_v60 }
 0x3e1   : > { %v4698_v23 = vld [vmem:[#allocation3 + $0x1ba0] sm:$0xff]  ;;  %10263 = vmatpush2.bf16.msra.mxu0 %v15173_v1 }
 0x3e2   : > { %v4822_v7 = vld [vmem:[#allocation3 + $0x1f80] sm:$0xff]  ;;  %v15166_v5 = vcombine.high %v4694_v22, %v4698_v23  ;;  %10303 = vmatprep.subr.bf16.mxu1 %v15302_v41  ;;  %v15165_v36 = vcombine.low %v4694_v22, %v4698_v23 }
 0x3e3   : > { %v4826_v50 = vld [vmem:[#allocation3 + $0x1fa0] sm:$0xff]  ;;  %10304 = vmatpush2.bf16.msra.mxu1 %v15301_v29 }
 0x3e4   : > { %v4686_v30 = vld [vmem:[#allocation3 + $0x1b40] sm:$0xff]  ;;  %v15294_v31 = vcombine.high %v4822_v7, %v4826_v50  ;;  %10264 = vmatprep.subr.bf16.mxu0 %v15166_v5  ;;  %v15293_v37 = vcombine.low %v4822_v7, %v4826_v50 }
 0x3e5   : > { %v4690_v63 = vld [vmem:[#allocation3 + $0x1b60] sm:$0xff]  ;;  %10265 = vmatpush2.bf16.msra.mxu0 %v15165_v36 }
 0x3e6   : > { %v4814_v11 = vld [vmem:[#allocation3 + $0x1f40] sm:$0xff]  ;;  %v15158_v38 = vcombine.high %v4686_v30, %v4690_v63  ;;  %10305 = vmatprep.subr.bf16.mxu1 %v15294_v31  ;;  %v15157_v48 = vcombine.low %v4686_v30, %v4690_v63 }
 0x3e7   : > { %v4818_v35 = vld [vmem:[#allocation3 + $0x1f60] sm:$0xff]  ;;  %10306 = vmatpush2.bf16.msra.mxu1 %v15293_v37 }
 0x3e8   : > { %v15286_v40 = vcombine.high %v4814_v11, %v4818_v35  ;;  %v4678_v42 = vld [vmem:[#allocation3 + $0x1b00] sm:$0xff]  ;;  %10266 = vmatprep.subr.bf16.mxu0 %v15158_v38  ;;  %v15285_v49 = vcombine.low %v4814_v11, %v4818_v35 }
 0x3e9   : > { %v4682_v44 = vld [vmem:[#allocation3 + $0x1b20] sm:$0xff]  ;;  %10267 = vmatpush2.bf16.msra.mxu0 %v15157_v48 }
 0x3ea   : > { %v4806_v45 = vld [vmem:[#allocation3 + $0x1f00] sm:$0xff]  ;;  %v15150_v53 = vcombine.high %v4678_v42, %v4682_v44  ;;  %10307 = vmatprep.subr.bf16.mxu1 %v15286_v40  ;;  %v15149_v13 = vcombine.low %v4678_v42, %v4682_v44  ;;  %v3871_v42 = vld [vmem:[#allocation3 + $0x1c8] sm:$0xff] }
 0x3eb   : > { %v4810_v43 = vld [vmem:[#allocation3 + $0x1f20] sm:$0xff]  ;;  %10308 = vmatpush2.bf16.msra.mxu1 %v15285_v49  ;;  %v3875_v44 = vld [vmem:[#allocation3 + $0x1e8] sm:$0xff] }
 0x3ec   : > { %v15278_v55 = vcombine.high %v4806_v45, %v4810_v43  ;;  %v4670_v59 = vld [vmem:[#allocation3 + $0x1ac0] sm:$0xff]  ;;  %10268 = vmatprep.subr.bf16.mxu0 %v15150_v53  ;;  %v15277_v20 = vcombine.low %v4806_v45, %v4810_v43  ;;  %v3999_v45 = vld [vmem:[#allocation3 + $0x5c8] sm:$0xff]  ;;  %v4838_v53 = vld [vmem:[#allocation12] sm:$0xff] }
 0x3ed   : > { %v4674_v62 = vld [vmem:[#allocation3 + $0x1ae0] sm:$0xff]  ;;  %10269 = vmatpush2.bf16.msra.mxu0 %v15149_v13  ;;  %v4003_v43 = vld [vmem:[#allocation3 + $0x5e8] sm:$0xff] }
 0x3ee   : > { %v4798_v2 = vld [vmem:[#allocation3 + $0x1ec0] sm:$0xff]  ;;  %v15142_v9 = vcombine.high %v4670_v59, %v4674_v62  ;;  %10309 = vmatprep.subr.bf16.mxu1 %v15278_v55  ;;  %v15141_v39 = vcombine.low %v4670_v59, %v4674_v62  ;;  %v14344_v55 = vcombine.high %v3871_v42, %v3875_v44  ;;  %v14472_v59 = vcombine.high %v3999_v45, %v4003_v43  ;;  %v3863_v62 = vld [vmem:[#allocation3 + $0x188] sm:$0xff] }
 0x3ef   : > { %v4802_v10 = vld [vmem:[#allocation3 + $0x1ee0] sm:$0xff]  ;;  %10310 = vmatpush2.bf16.msra.mxu1 %v15277_v20  ;;  %v3991_v13 = vld [vmem:[#allocation3 + $0x588] sm:$0xff] }
 0x3f0   : > { %v15270_v16 = vcombine.high %v4798_v2, %v4802_v10  ;;  %v4662_v12 = vld [vmem:[#allocation3 + $0x1a80] sm:$0xff]  ;;  %10270 = vmatprep.subr.bf16.mxu0 %v15142_v9  ;;  %v15269_v18 = vcombine.low %v4798_v2, %v4802_v10  ;;  %v3867_v2 = vld [vmem:[#allocation3 + $0x1a8] sm:$0xff]  ;;  %v17399_v10 = vpack.c.bf16 %v17372_v32, %v17372_v32  ;;  %v4843_v9 = vrot.slane %v4838_v53, %v17236_v51 }
 0x3f1   : > { %v4666_v14 = vld [vmem:[#allocation3 + $0x1aa0] sm:$0xff]  ;;  %10271 = vmatpush2.bf16.msra.mxu0 %v15141_v39  ;;  %v3995_v20 = vld [vmem:[#allocation3 + $0x5a8] sm:$0xff] }
 0x3f2   : > { %v4790_v15 = vld [vmem:[#allocation3 + $0x1e80] sm:$0xff]  ;;  %v15134_v21 = vcombine.high %v4662_v12, %v4666_v14  ;;  %10311 = vmatprep.subr.bf16.mxu1 %v15270_v16  ;;  %v15133_v1 = vcombine.low %v4662_v12, %v4666_v14  ;;  %v17404_v16 = vpack.c.bf16 %v17375_v3, %v17375_v3  ;;  %v14343_v12 = vcombine.low %v3871_v42, %v3875_v44  ;;  %v3855_v32 = vld [vmem:[#allocation3 + $0x148] sm:$0xff] }
 0x3f3   : > { %v4794_v60 = vld [vmem:[#allocation3 + $0x1ea0] sm:$0xff]  ;;  %10312 = vmatpush2.bf16.msra.mxu1 %v15269_v18  ;;  %v14471_v14 = vcombine.low %v3999_v45, %v4003_v43  ;;  %v14464_v39 = vcombine.high %v3991_v13, %v3995_v20  ;;  %v3859_v18 = vld [vmem:[#allocation3 + $0x168] sm:$0xff]  ;;  %v14335_v3 = vcombine.low %v3863_v62, %v3867_v2 }
 0x3f4   : > { %v15262_v22 = vcombine.high %v4790_v15, %v4794_v60  ;;  %v4654_v23 = vld [vmem:[#allocation3 + $0x1a40] sm:$0xff]  ;;  %10272 = vmatprep.subr.bf16.mxu0 %v15134_v21  ;;  %v15261_v29 = vcombine.low %v4790_v15, %v4794_v60  ;;  %v14336_v15 = vcombine.high %v3863_v62, %v3867_v2  ;;  %v4847_v60 = vrot.slane %v4838_v53, %v17239_v52  ;;  %v3967_v62 = vld [vmem:[#allocation3 + $0x4c8] sm:$0xff] }
 0x3f5   : > { %v4658_v7 = vld [vmem:[#allocation3 + $0x1a60] sm:$0xff]  ;;  %10273 = vmatpush2.bf16.msra.mxu0 %v15133_v1  ;;  %v14463_v1 = vcombine.low %v3991_v13, %v3995_v20  ;;  %v14327_v44 = vcombine.low %v3855_v32, %v3859_v18  ;;  %v3971_v2 = vld [vmem:[#allocation3 + $0x4e8] sm:$0xff] }
 0x3f6   : > { %v4782_v41 = vld [vmem:[#allocation3 + $0x1e40] sm:$0xff]  ;;  %v15126_v5 = vcombine.high %v4654_v23, %v4658_v7  ;;  %10313 = vmatprep.subr.bf16.mxu1 %v15262_v22  ;;  %v15125_v36 = vcombine.low %v4654_v23, %v4658_v7  ;;  %v3983_v22 = vld [vmem:[#allocation3 + $0x548] sm:$0xff] }
 0x3f7   : > { %v4786_v50 = vld [vmem:[#allocation3 + $0x1e60] sm:$0xff]  ;;  %10314 = vmatpush2.bf16.msra.mxu1 %v15261_v29  ;;  %v3987_v23 = vld [vmem:[#allocation3 + $0x568] sm:$0xff]  ;;  %v14328_v29 = vcombine.high %v3855_v32, %v3859_v18  ;;  %v14439_v18 = vcombine.low %v3967_v62, %v3971_v2 }
 0x3f8   : > { %v15254_v30 = vcombine.high %v4782_v41, %v4786_v50  ;;  %v4646_v63 = vld [vmem:[#allocation3 + $0x1a00] sm:$0xff]  ;;  %10274 = vmatprep.subr.bf16.mxu0 %v15126_v5  ;;  %v15253_v37 = vcombine.low %v4782_v41, %v4786_v50  ;;  %v14455_v43 = vcombine.low %v3983_v22, %v3987_v23 }
 0x3f9   : > { %v4650_v31 = vld [vmem:[#allocation3 + $0x1a20] sm:$0xff]  ;;  %10275 = vmatpush2.bf16.msra.mxu0 %v15125_v36 }
 0x3fa   : > { %v4774_v11 = vld [vmem:[#allocation3 + $0x1e00] sm:$0xff]  ;;  %v15118_v38 = vcombine.high %v4646_v63, %v4650_v31  ;;  %10315 = vmatprep.subr.bf16.mxu1 %v15254_v30  ;;  %v15117_v48 = vcombine.low %v4646_v63, %v4650_v31  ;;  %v14456_v31 = vcombine.high %v3983_v22, %v3987_v23  ;;  %v3823_v23 = vld [vmem:[#allocation3 + $0x48] sm:$0xff] }
 0x3fb   : > { %v4778_v35 = vld [vmem:[#allocation3 + $0x1e20] sm:$0xff]  ;;  %10316 = vmatpush2.bf16.msra.mxu1 %v15253_v37  ;;  %v3975_v37 = vld [vmem:[#allocation3 + $0x508] sm:$0xff] }
 0x3fc   : > { %v15246_v40 = vcombine.high %v4774_v11, %v4778_v35  ;;  %10276 = vmatprep.subr.bf16.mxu0 %v15118_v38  ;;  %v15245_v49 = vcombine.low %v4774_v11, %v4778_v35  ;;  %v3847_v11 = vld [vmem:[#allocation3 + $0x108] sm:$0xff] }
 0x3fd   : > { %10277 = vmatpush2.bf16.msra.mxu0 %v15117_v48  ;;  %v3851_v35 = vld [vmem:[#allocation3 + $0x128] sm:$0xff] }
 0x3fe   : > { %10317 = vmatprep.subr.bf16.mxu1 %v15246_v40  ;;  %10328 = vmatprep.subr.bf16.mxu0 %v14344_v55  ;;  %v3979_v38 = vld [vmem:[#allocation3 + $0x528] sm:$0xff]  ;;  %v14320_v48 = vcombine.high %v3847_v11, %v3851_v35  ;;  %v14319_v13 = vcombine.low %v3847_v11, %v3851_v35 }
 0x3ff   : > { %10318 = vmatpush2.bf16.msra.mxu1 %v15245_v49  ;;  %v14448_v53 = vcombine.high %v3975_v37, %v3979_v38  ;;  %v3839_v55 = vld [vmem:[#allocation3 + $0xc8] sm:$0xff]  ;;  %v14447_v20 = vcombine.low %v3975_v37, %v3979_v38 }
 0x400   : > { %10369 = vmatprep.subr.bf16.mxu1 %v14472_v59  ;;  %v10034_v21 = vpop.f32.mrf.mxu0  ;;  %10279 = vmatmul.mubr.bf16.vlgmr.msra.gmra.mxu0 %v17399_v10  ;;  %v3843_v59 = vld [vmem:[#allocation3 + $0xe8] sm:$0xff] }
 0x401   : > { %v10035_v7 = vadd.f32 %v10034_v21, %v4843_v9  ;;  %10329 = vmatpush1.bf16.msra.mxu0 %v14343_v12  ;;  %10360 = vmatprep.mubr.bf16.mxu0 %v17267_v61  ;;  %v14312_v9 = vcombine.high %v3839_v55, %v3843_v59  ;;  %v14440_v12 = vcombine.high %v3967_v62, %v3971_v2  ;;  %v3943_v11 = vld [vmem:[#allocation3 + $0x408] sm:$0xff] }
 0x402   : > { %v10075_v41 = vpop.f32.mrf.mxu1  ;;  %10320 = vmatmul.mubr.bf16.vlgmr.msra.gmra.mxu1 %v17404_v16  ;;  %v10036_v50 = vpop.f32.mrf.mxu0  ;;  %10330 = vmatprep.subr.bf16.mxu0 %v14336_v15  ;;  %v3835_v15 = vld [vmem:[#allocation3 + $0xa8] sm:$0xff]  ;;  %v14311_v32 = vcombine.low %v3839_v55, %v3843_v59 }
 0x403   : > { %10370 = vmatpush1.bf16.msra.mxu1 %v14471_v14  ;;  %v17409_v5 = vadd.f32 %v10075_v41, %v10035_v7  ;;  %v10037_v30 = vadd.f32 %v10036_v50, %v4847_v60  ;;  %10401 = vmatprep.mubr.bf16.mxu1 %v17278_v28  ;;  %v3831_v14 = vld [vmem:[#allocation3 + $0x88] sm:$0xff] }
 0x404   : > { %v10077_v63 = vpop.f32.mrf.mxu1  ;;  %10371 = vmatprep.subr.bf16.mxu1 %v14464_v39  ;;  %v10038_v36 = vpop.f32.mrf.mxu0  ;;  %v3959_v60 = vld [vmem:[#allocation3 + $0x488] sm:$0xff]  ;;  %v14304_v21 = vcombine.high %v3831_v14, %v3835_v15  ;;  %v14303_v50 = vcombine.low %v3831_v14, %v3835_v15 }
 0x405   : > { %v17413_v40 = vadd.f32 %v10077_v63, %v10037_v30  ;;  %10331 = vmatpush1.bf16.msra.mxu0 %v14335_v3  ;;  %v3963_v39 = vld [vmem:[#allocation3 + $0x4a8] sm:$0xff] }
 0x406   : > { %v10079_v42 = vpop.f32.mrf.mxu1  ;;  %v10039_v45 = vpop.f32.mrf.mxu0  ;;  %10332 = vmatprep.subr.bf16.mxu0 %v14328_v29  ;;  %v14432_v22 = vcombine.high %v3959_v60, %v3963_v39  ;;  %v3827_v7 = vld [vmem:[#allocation3 + $0x68] sm:$0xff] }
 0x407   : > { %10372 = vmatpush1.bf16.msra.mxu1 %v14463_v1  ;;  %v3951_v41 = vld [vmem:[#allocation3 + $0x448] sm:$0xff]  ;;  %v14431_v1 = vcombine.low %v3959_v60, %v3963_v39  ;;  %v14296_v29 = vcombine.high %v3823_v23, %v3827_v7  ;;  %v14295_v36 = vcombine.low %v3823_v23, %v3827_v7 }
 0x408   : > { %v10080_v49 = vpop.f32.mrf.mxu1  ;;  %10373 = vmatprep.subr.bf16.mxu1 %v14456_v31  ;;  %v3955_v3 = vld [vmem:[#allocation3 + $0x468] sm:$0xff] }
 0x409   : > { %10333 = vmatpush1.bf16.msra.mxu0 %v14327_v44  ;;  %v14424_v30 = vcombine.high %v3951_v41, %v3955_v3  ;;  %v3815_v63 = vld [vmem:[#allocation3 + $0x8] sm:$0xff]  ;;  %v14423_v37 = vcombine.low %v3951_v41, %v3955_v3 }
 0x40a   : > { %10334 = vmatprep.subr.bf16.mxu0 %v14320_v48  ;;  %v3819_v31 = vld [vmem:[#allocation3 + $0x28] sm:$0xff] }
 0x40b   : > { %10374 = vmatpush1.bf16.msra.mxu1 %v14455_v43  ;;  %v3947_v35 = vld [vmem:[#allocation3 + $0x428] sm:$0xff]  ;;  %v14288_v38 = vcombine.high %v3815_v63, %v3819_v31  ;;  %v14287_v49 = vcombine.low %v3815_v63, %v3819_v31 }
 0x40c   : > { %10375 = vmatprep.subr.bf16.mxu1 %v14448_v53  ;;  %v14416_v42 = vcombine.high %v3943_v11, %v3947_v35  ;;  %v3935_v44 = vld [vmem:[#allocation3 + $0x3c8] sm:$0xff]  ;;  %v14415_v53 = vcombine.low %v3943_v11, %v3947_v35 }
 0x40d   : > { %10335 = vmatpush1.bf16.msra.mxu0 %v14319_v13  ;;  %v3939_v45 = vld [vmem:[#allocation3 + $0x3e8] sm:$0xff] }
 0x40e   : > { %10336 = vmatprep.subr.bf16.mxu0 %v14312_v9  ;;  %v4063_v43 = vld [vmem:[#allocation3 + $0x7c8] sm:$0xff]  ;;  %v14408_v55 = vcombine.high %v3935_v44, %v3939_v45  ;;  %v14407_v9 = vcombine.low %v3935_v44, %v3939_v45 }
 0x40f   : > { %10376 = vmatpush1.bf16.msra.mxu1 %v14447_v20  ;;  %v4067_v48 = vld [vmem:[#allocation3 + $0x7e8] sm:$0xff] }
 0x410   : > { %10377 = vmatprep.subr.bf16.mxu1 %v14440_v12  ;;  %v14536_v59 = vcombine.high %v4063_v43, %v4067_v48  ;;  %v3927_v62 = vld [vmem:[#allocation3 + $0x388] sm:$0xff]  ;;  %v14535_v12 = vcombine.low %v4063_v43, %v4067_v48 }
 0x411   : > { %10337 = vmatpush1.bf16.msra.mxu0 %v14311_v32  ;;  %v3931_v2 = vld [vmem:[#allocation3 + $0x3a8] sm:$0xff] }
 0x412   : > { %10338 = vmatprep.subr.bf16.mxu0 %v14304_v21  ;;  %v4055_v13 = vld [vmem:[#allocation3 + $0x788] sm:$0xff]  ;;  %v14400_v14 = vcombine.high %v3927_v62, %v3931_v2  ;;  %v14399_v21 = vcombine.low %v3927_v62, %v3931_v2 }
 0x413   : > { %10378 = vmatpush1.bf16.msra.mxu1 %v14439_v18  ;;  %v4059_v20 = vld [vmem:[#allocation3 + $0x7a8] sm:$0xff] }
 0x414   : > { %10379 = vmatprep.subr.bf16.mxu1 %v14432_v22  ;;  %v14528_v15 = vcombine.high %v4055_v13, %v4059_v20  ;;  %v3919_v60 = vld [vmem:[#allocation3 + $0x348] sm:$0xff]  ;;  %v14527_v22 = vcombine.low %v4055_v13, %v4059_v20 }
 0x415   : > { %10339 = vmatpush1.bf16.msra.mxu0 %v14303_v50  ;;  %v3923_v39 = vld [vmem:[#allocation3 + $0x368] sm:$0xff] }
 0x416   : > { %10340 = vmatprep.subr.bf16.mxu0 %v14296_v29  ;;  %v4047_v32 = vld [vmem:[#allocation3 + $0x748] sm:$0xff]  ;;  %v14392_v23 = vcombine.high %v3919_v60, %v3923_v39  ;;  %v14391_v29 = vcombine.low %v3919_v60, %v3923_v39 }
 0x417   : > { %10380 = vmatpush1.bf16.msra.mxu1 %v14431_v1  ;;  %v4051_v18 = vld [vmem:[#allocation3 + $0x768] sm:$0xff] }
 0x418   : > { %10381 = vmatprep.subr.bf16.mxu1 %v14424_v30  ;;  %v14520_v7 = vcombine.high %v4047_v32, %v4051_v18  ;;  %v3911_v41 = vld [vmem:[#allocation3 + $0x308] sm:$0xff]  ;;  %v14519_v30 = vcombine.low %v4047_v32, %v4051_v18 }
 0x419   : > { %10341 = vmatpush1.bf16.msra.mxu0 %v14295_v36  ;;  %v3915_v3 = vld [vmem:[#allocation3 + $0x328] sm:$0xff] }
 0x41a   : > { %10342 = vmatprep.subr.bf16.mxu0 %v14288_v38  ;;  %v4039_v50 = vld [vmem:[#allocation3 + $0x708] sm:$0xff]  ;;  %v14384_v63 = vcombine.high %v3911_v41, %v3915_v3  ;;  %v14383_v38 = vcombine.low %v3911_v41, %v3915_v3 }
 0x41b   : > { %10382 = vmatpush1.bf16.msra.mxu1 %v14423_v37  ;;  %v4043_v1 = vld [vmem:[#allocation3 + $0x728] sm:$0xff] }
 0x41c   : > { %10383 = vmatprep.subr.bf16.mxu1 %v14416_v42  ;;  %v14512_v31 = vcombine.high %v4039_v50, %v4043_v1  ;;  %v3903_v11 = vld [vmem:[#allocation3 + $0x2c8] sm:$0xff]  ;;  %v14511_v42 = vcombine.low %v4039_v50, %v4043_v1 }
 0x41d   : > { %10343 = vmatpush1.bf16.msra.mxu0 %v14287_v49  ;;  %v3907_v35 = vld [vmem:[#allocation3 + $0x2e8] sm:$0xff] }
 0x41e   : > { %10344 = vmatprep.subr.bf16.mxu0 %v14408_v55  ;;  %v4031_v36 = vld [vmem:[#allocation3 + $0x6c8] sm:$0xff]  ;;  %v14376_v44 = vcombine.high %v3903_v11, %v3907_v35  ;;  %v14375_v55 = vcombine.low %v3903_v11, %v3907_v35 }
 0x41f   : > { %10384 = vmatpush1.bf16.msra.mxu1 %v14415_v53  ;;  %v4035_v37 = vld [vmem:[#allocation3 + $0x6e8] sm:$0xff] }
 0x420   : > { %10385 = vmatprep.subr.bf16.mxu1 %v14536_v59  ;;  %v14504_v45 = vcombine.high %v4031_v36, %v4035_v37  ;;  %v3895_v43 = vld [vmem:[#allocation3 + $0x288] sm:$0xff]  ;;  %v14503_v59 = vcombine.low %v4031_v36, %v4035_v37 }
 0x421   : > { %10345 = vmatpush2.bf16.msra.mxu0 %v14407_v9  ;;  %v3899_v48 = vld [vmem:[#allocation3 + $0x2a8] sm:$0xff] }
 0x422   : > { %10346 = vmatprep.subr.bf16.mxu0 %v14400_v14  ;;  %v4023_v49 = vld [vmem:[#allocation3 + $0x688] sm:$0xff]  ;;  %v14368_v62 = vcombine.high %v3895_v43, %v3899_v48  ;;  %v14367_v14 = vcombine.low %v3895_v43, %v3899_v48 }
 0x423   : > { %10386 = vmatpush2.bf16.msra.mxu1 %v14535_v12  ;;  %v4027_v53 = vld [vmem:[#allocation3 + $0x6a8] sm:$0xff] }
 0x424   : > { %10387 = vmatprep.subr.bf16.mxu1 %v14528_v15  ;;  %v14496_v2 = vcombine.high %v4023_v49, %v4027_v53  ;;  %v3887_v13 = vld [vmem:[#allocation3 + $0x248] sm:$0xff]  ;;  %v14495_v15 = vcombine.low %v4023_v49, %v4027_v53 }
 0x425   : > { %10347 = vmatpush2.bf16.msra.mxu0 %v14399_v21  ;;  %v3891_v20 = vld [vmem:[#allocation3 + $0x268] sm:$0xff] }
 0x426   : > { %10348 = vmatprep.subr.bf16.mxu0 %v14392_v23  ;;  %v4015_v9 = vld [vmem:[#allocation3 + $0x648] sm:$0xff]  ;;  %v14360_v60 = vcombine.high %v3887_v13, %v3891_v20  ;;  %v14359_v23 = vcombine.low %v3887_v13, %v3891_v20 }
 0x427   : > { %10388 = vmatpush2.bf16.msra.mxu1 %v14527_v22  ;;  %v4019_v12 = vld [vmem:[#allocation3 + $0x668] sm:$0xff] }
 0x428   : > { %10389 = vmatprep.subr.bf16.mxu1 %v14520_v7  ;;  %v14488_v39 = vcombine.high %v4015_v9, %v4019_v12  ;;  %v3879_v32 = vld [vmem:[#allocation3 + $0x208] sm:$0xff]  ;;  %v14487_v7 = vcombine.low %v4015_v9, %v4019_v12 }
 0x429   : > { %10349 = vmatpush2.bf16.msra.mxu0 %v14391_v29  ;;  %v3883_v18 = vld [vmem:[#allocation3 + $0x228] sm:$0xff] }
 0x42a   : > { %10350 = vmatprep.subr.bf16.mxu0 %v14384_v63  ;;  %v4007_v21 = vld [vmem:[#allocation3 + $0x608] sm:$0xff]  ;;  %v14352_v41 = vcombine.high %v3879_v32, %v3883_v18  ;;  %v14351_v63 = vcombine.low %v3879_v32, %v3883_v18 }
 0x42b   : > { %10390 = vmatpush2.bf16.msra.mxu1 %v14519_v30  ;;  %v4011_v22 = vld [vmem:[#allocation3 + $0x628] sm:$0xff] }
 0x42c   : > { %10391 = vmatprep.subr.bf16.mxu1 %v14512_v31  ;;  %v14480_v3 = vcombine.high %v4007_v21, %v4011_v22  ;;  %v4127_v50 = vld [vmem:[#allocation3 + $0x9c8] sm:$0xff]  ;;  %v14479_v31 = vcombine.low %v4007_v21, %v4011_v22 }
 0x42d   : > { %10351 = vmatpush2.bf16.msra.mxu0 %v14383_v38  ;;  %v4131_v1 = vld [vmem:[#allocation3 + $0x9e8] sm:$0xff] }
 0x42e   : > { %10352 = vmatprep.subr.bf16.mxu0 %v14376_v44  ;;  %v4255_v29 = vld [vmem:[#allocation3 + $0xdc8] sm:$0xff]  ;;  %v14600_v11 = vcombine.high %v4127_v50, %v4131_v1  ;;  %v14599_v44 = vcombine.low %v4127_v50, %v4131_v1 }
 0x42f   : > { %10392 = vmatpush2.bf16.msra.mxu1 %v14511_v42  ;;  %v4259_v30 = vld [vmem:[#allocation3 + $0xde8] sm:$0xff] }
 0x430   : > { %10393 = vmatprep.subr.bf16.mxu1 %v14504_v45  ;;  %v14728_v35 = vcombine.high %v4255_v29, %v4259_v30  ;;  %v4119_v36 = vld [vmem:[#allocation3 + $0x988] sm:$0xff]  ;;  %v14727_v45 = vcombine.low %v4255_v29, %v4259_v30 }
 0x431   : > { %10353 = vmatpush2.bf16.msra.mxu0 %v14375_v55  ;;  %v4123_v37 = vld [vmem:[#allocation3 + $0x9a8] sm:$0xff] }
 0x432   : > { %10354 = vmatprep.subr.bf16.mxu0 %v14368_v62  ;;  %v4247_v38 = vld [vmem:[#allocation3 + $0xd88] sm:$0xff]  ;;  %v14592_v43 = vcombine.high %v4119_v36, %v4123_v37  ;;  %v14591_v20 = vcombine.low %v4119_v36, %v4123_v37 }
 0x433   : > { %10394 = vmatpush2.bf16.msra.mxu1 %v14503_v59  ;;  %v4251_v42 = vld [vmem:[#allocation3 + $0xda8] sm:$0xff] }
 0x434   : > { %10395 = vmatprep.subr.bf16.mxu1 %v14496_v2  ;;  %v14720_v48 = vcombine.high %v4247_v38, %v4251_v42  ;;  %v4111_v49 = vld [vmem:[#allocation3 + $0x948] sm:$0xff]  ;;  %v14719_v12 = vcombine.low %v4247_v38, %v4251_v42 }
 0x435   : > { %10355 = vmatpush2.bf16.msra.mxu0 %v14367_v14  ;;  %v4115_v53 = vld [vmem:[#allocation3 + $0x968] sm:$0xff] }
 0x436   : > { %10356 = vmatprep.subr.bf16.mxu0 %v14360_v60  ;;  %v4239_v59 = vld [vmem:[#allocation3 + $0xd48] sm:$0xff]  ;;  %v14584_v14 = vcombine.high %v4111_v49, %v4115_v53 }
 0x437   : > { %10396 = vmatpush2.bf16.msra.mxu1 %v14495_v15  ;;  %v4243_v62 = vld [vmem:[#allocation3 + $0xd68] sm:$0xff] }
 0x438   : > { %10397 = vmatprep.subr.bf16.mxu1 %v14488_v39  ;;  %v14712_v32 = vcombine.high %v4239_v59, %v4243_v62  ;;  %v4103_v18 = vld [vmem:[#allocation3 + $0x908] sm:$0xff] }
 0x439   : > { %10357 = vmatpush2.bf16.msra.mxu0 %v14359_v23  ;;  %v4107_v21 = vld [vmem:[#allocation3 + $0x928] sm:$0xff] }
 0x43a   : > { %10358 = vmatprep.subr.bf16.mxu0 %v14352_v41  ;;  %v4231_v22 = vld [vmem:[#allocation3 + $0xd08] sm:$0xff]  ;;  %v14576_v1 = vcombine.high %v4103_v18, %v4107_v21  ;;  %v14575_v36 = vcombine.low %v4103_v18, %v4107_v21 }
 0x43b   : > { %10398 = vmatpush2.bf16.msra.mxu1 %v14487_v7  ;;  %v4235_v23 = vld [vmem:[#allocation3 + $0xd28] sm:$0xff] }
 0x43c   : > { %10399 = vmatprep.subr.bf16.mxu1 %v14480_v3  ;;  %v14583_v3 = vcombine.low %v4111_v49, %v4115_v53  ;;  %v14704_v30 = vcombine.high %v4231_v22, %v4235_v23  ;;  %v14703_v37 = vcombine.low %v4231_v22, %v4235_v23  ;;  %v4199_v18 = vld [vmem:[#allocation3 + $0xc08] sm:$0xff] }
 0x43d   : > { %10359 = vmatpush2.bf16.msra.mxu0 %v14351_v63  ;;  %v4095_v63 = vld [vmem:[#allocation3 + $0x8c8] sm:$0xff] }
 0x43e   : > { %10410 = vmatprep.subr.bf16.mxu0 %v14600_v11  ;;  %v4223_v11 = vld [vmem:[#allocation3 + $0xcc8] sm:$0xff] }
 0x43f   : > { %10400 = vmatpush2.bf16.msra.mxu1 %v14479_v31  ;;  %v4099_v31 = vld [vmem:[#allocation3 + $0x8e8] sm:$0xff] }
 0x440   : > { %10451 = vmatprep.subr.bf16.mxu1 %v14728_v35  ;;  %v10116_v55 = vpop.f32.mrf.mxu0  ;;  %10361 = vmatmul.mubr.bf16.vlgmr.msra.gmra.mxu0 %v17307_v56  ;;  %v4227_v35 = vld [vmem:[#allocation3 + $0xce8] sm:$0xff]  ;;  %v14568_v38 = vcombine.high %v4095_v63, %v4099_v31  ;;  %v14567_v49 = vcombine.low %v4095_v63, %v4099_v31 }
 0x441   : > { %v10117_v2 = vadd.f32 %v10116_v55, %v17409_v5  ;;  %10411 = vmatpush1.bf16.msra.mxu0 %v14599_v44  ;;  %10442 = vmatprep.mubr.bf16.mxu0 %v17315_v25  ;;  %v14696_v42 = vcombine.high %v4223_v11, %v4227_v35  ;;  %v4087_v44 = vld [vmem:[#allocation3 + $0x888] sm:$0xff]  ;;  %v14695_v53 = vcombine.low %v4223_v11, %v4227_v35 }
 0x442   : > { %v10157_v13 = vpop.f32.mrf.mxu1  ;;  %10402 = vmatmul.mubr.bf16.vlgmr.msra.gmra.mxu1 %v17313_v17  ;;  %v10118_v9 = vpop.f32.mrf.mxu0  ;;  %10412 = vmatprep.subr.bf16.mxu0 %v14592_v43  ;;  %v4215_v43 = vld [vmem:[#allocation3 + $0xc88] sm:$0xff] }
 0x443   : > { %10452 = vmatpush1.bf16.msra.mxu1 %v14727_v45  ;;  %v17418_v15 = vadd.f32 %v10157_v13, %v10117_v2  ;;  %v10119_v60 = vadd.f32 %v10118_v9, %v17413_v40  ;;  %10483 = vmatprep.mubr.bf16.mxu1 %v17318_v26  ;;  %v14711_v40 = vcombine.low %v4239_v59, %v4243_v62  ;;  %v4091_v45 = vld [vmem:[#allocation3 + $0x8a8] sm:$0xff] }
 0x444   : > { %v10159_v39 = vpop.f32.mrf.mxu1  ;;  %10453 = vmatprep.subr.bf16.mxu1 %v14720_v48  ;;  %v10120_v5 = vpop.f32.mrf.mxu0  ;;  %v4219_v48 = vld [vmem:[#allocation3 + $0xca8] sm:$0xff]  ;;  %v14560_v55 = vcombine.high %v4087_v44, %v4091_v45  ;;  %v14559_v9 = vcombine.low %v4087_v44, %v4091_v45 }
 0x445   : > { %v17423_v7 = vadd.f32 %v10159_v39, %v10119_v60  ;;  %10413 = vmatpush1.bf16.msra.mxu0 %v14591_v20  ;;  %v14688_v59 = vcombine.high %v4215_v43, %v4219_v48  ;;  %v4079_v62 = vld [vmem:[#allocation3 + $0x848] sm:$0xff] }
 0x446   : > { %v10161_v41 = vpop.f32.mrf.mxu1  ;;  %v10121_v50 = vpop.f32.mrf.mxu0  ;;  %10414 = vmatprep.subr.bf16.mxu0 %v14584_v14  ;;  %v4083_v2 = vld [vmem:[#allocation3 + $0x868] sm:$0xff] }
 0x447   : > { %10454 = vmatpush1.bf16.msra.mxu1 %v14719_v12  ;;  %v4207_v13 = vld [vmem:[#allocation3 + $0xc48] sm:$0xff]  ;;  %v14687_v12 = vcombine.low %v4215_v43, %v4219_v48  ;;  %v14552_v14 = vcombine.high %v4079_v62, %v4083_v2  ;;  %v14551_v5 = vcombine.low %v4079_v62, %v4083_v2 }
 0x448   : > { %v10162_v29 = vpop.f32.mrf.mxu1  ;;  %10455 = vmatprep.subr.bf16.mxu1 %v14712_v32  ;;  %v4211_v20 = vld [vmem:[#allocation3 + $0xc68] sm:$0xff] }
 0x449   : > { %10415 = vmatpush1.bf16.msra.mxu0 %v14583_v3  ;;  %v14680_v60 = vcombine.high %v4207_v13, %v4211_v20  ;;  %v4071_v39 = vld [vmem:[#allocation3 + $0x808] sm:$0xff]  ;;  %v14679_v22 = vcombine.low %v4207_v13, %v4211_v20 }
 0x44a   : > { %10416 = vmatprep.subr.bf16.mxu0 %v14576_v1  ;;  %v4075_v32 = vld [vmem:[#allocation3 + $0x828] sm:$0xff] }
 0x44b   : > { %10456 = vmatpush1.bf16.msra.mxu1 %v14711_v40  ;;  %v4203_v21 = vld [vmem:[#allocation3 + $0xc28] sm:$0xff]  ;;  %v14544_v23 = vcombine.high %v4071_v39, %v4075_v32  ;;  %v14543_v29 = vcombine.low %v4071_v39, %v4075_v32 }
 0x44c   : > { %10457 = vmatprep.subr.bf16.mxu1 %v14704_v30  ;;  %v14672_v41 = vcombine.high %v4199_v18, %v4203_v21  ;;  %v4191_v3 = vld [vmem:[#allocation3 + $0xbc8] sm:$0xff]  ;;  %v14671_v30 = vcombine.low %v4199_v18, %v4203_v21 }
 0x44d   : > { %10417 = vmatpush1.bf16.msra.mxu0 %v14575_v36  ;;  %v4195_v50 = vld [vmem:[#allocation3 + $0xbe8] sm:$0xff] }
 0x44e   : > { %10418 = vmatprep.subr.bf16.mxu0 %v14568_v38  ;;  %v4319_v40 = vld [vmem:[#allocation3 + $0xfc8] sm:$0xff]  ;;  %v14664_v63 = vcombine.high %v4191_v3, %v4195_v50  ;;  %v14663_v38 = vcombine.low %v4191_v3, %v4195_v50 }
 0x44f   : > { %10458 = vmatpush1.bf16.msra.mxu1 %v14703_v37  ;;  %v4323_v1 = vld [vmem:[#allocation3 + $0xfe8] sm:$0xff] }
 0x450   : > { %10459 = vmatprep.subr.bf16.mxu1 %v14696_v42  ;;  %v14792_v31 = vcombine.high %v4319_v40, %v4323_v1  ;;  %v4183_v11 = vld [vmem:[#allocation3 + $0xb88] sm:$0xff]  ;;  %v14791_v42 = vcombine.low %v4319_v40, %v4323_v1 }
 0x451   : > { %10419 = vmatpush1.bf16.msra.mxu0 %v14567_v49  ;;  %v4187_v35 = vld [vmem:[#allocation3 + $0xba8] sm:$0xff] }
 0x452   : > { %10420 = vmatprep.subr.bf16.mxu0 %v14560_v55  ;;  %v4311_v36 = vld [vmem:[#allocation3 + $0xf88] sm:$0xff]  ;;  %v14656_v44 = vcombine.high %v4183_v11, %v4187_v35  ;;  %v14655_v55 = vcombine.low %v4183_v11, %v4187_v35 }
 0x453   : > { %10460 = vmatpush1.bf16.msra.mxu1 %v14695_v53  ;;  %v4315_v37 = vld [vmem:[#allocation3 + $0xfa8] sm:$0xff] }
 0x454   : > { %10461 = vmatprep.subr.bf16.mxu1 %v14688_v59  ;;  %v14784_v45 = vcombine.high %v4311_v36, %v4315_v37  ;;  %v4175_v43 = vld [vmem:[#allocation3 + $0xb48] sm:$0xff]  ;;  %v14783_v59 = vcombine.low %v4311_v36, %v4315_v37 }
 0x455   : > { %10421 = vmatpush1.bf16.msra.mxu0 %v14559_v9  ;;  %v4179_v48 = vld [vmem:[#allocation3 + $0xb68] sm:$0xff] }
 0x456   : > { %10422 = vmatprep.subr.bf16.mxu0 %v14552_v14  ;;  %v4303_v49 = vld [vmem:[#allocation3 + $0xf48] sm:$0xff]  ;;  %v14648_v62 = vcombine.high %v4175_v43, %v4179_v48  ;;  %v14647_v14 = vcombine.low %v4175_v43, %v4179_v48 }
 0x457   : > { %10462 = vmatpush1.bf16.msra.mxu1 %v14687_v12  ;;  %v4307_v53 = vld [vmem:[#allocation3 + $0xf68] sm:$0xff] }
 0x458   : > { %10463 = vmatprep.subr.bf16.mxu1 %v14680_v60  ;;  %v14776_v2 = vcombine.high %v4303_v49, %v4307_v53  ;;  %v4167_v13 = vld [vmem:[#allocation3 + $0xb08] sm:$0xff]  ;;  %v14775_v60 = vcombine.low %v4303_v49, %v4307_v53 }
 0x459   : > { %10423 = vmatpush1.bf16.msra.mxu0 %v14551_v5  ;;  %v4171_v20 = vld [vmem:[#allocation3 + $0xb28] sm:$0xff] }
 0x45a   : > { %10424 = vmatprep.subr.bf16.mxu0 %v14544_v23  ;;  %v4295_v9 = vld [vmem:[#allocation3 + $0xf08] sm:$0xff]  ;;  %v14640_v39 = vcombine.high %v4167_v13, %v4171_v20  ;;  %v14639_v23 = vcombine.low %v4167_v13, %v4171_v20 }
 0x45b   : > { %10464 = vmatpush1.bf16.msra.mxu1 %v14679_v22  ;;  %v4299_v12 = vld [vmem:[#allocation3 + $0xf28] sm:$0xff] }
 0x45c   : > { %10465 = vmatprep.subr.bf16.mxu1 %v14672_v41  ;;  %v14768_v32 = vcombine.high %v4295_v9, %v4299_v12  ;;  %v4159_v18 = vld [vmem:[#allocation3 + $0xac8] sm:$0xff]  ;;  %v14767_v41 = vcombine.low %v4295_v9, %v4299_v12 }
 0x45d   : > { %10425 = vmatpush1.bf16.msra.mxu0 %v14543_v29  ;;  %v4163_v21 = vld [vmem:[#allocation3 + $0xae8] sm:$0xff] }
 0x45e   : > { %10426 = vmatprep.subr.bf16.mxu0 %v14664_v63  ;;  %v4287_v5 = vld [vmem:[#allocation3 + $0xec8] sm:$0xff]  ;;  %v14632_v3 = vcombine.high %v4159_v18, %v4163_v21  ;;  %v14631_v63 = vcombine.low %v4159_v18, %v4163_v21 }
 0x45f   : > { %10466 = vmatpush1.bf16.msra.mxu1 %v14671_v30  ;;  %v4291_v22 = vld [vmem:[#allocation3 + $0xee8] sm:$0xff] }
 0x460   : > { %10467 = vmatprep.subr.bf16.mxu1 %v14792_v31  ;;  %v14760_v50 = vcombine.high %v4287_v5, %v4291_v22  ;;  %v4151_v40 = vld [vmem:[#allocation3 + $0xa88] sm:$0xff]  ;;  %v14759_v31 = vcombine.low %v4287_v5, %v4291_v22 }
 0x461   : > { %10427 = vmatpush2.bf16.msra.mxu0 %v14663_v38  ;;  %v4155_v1 = vld [vmem:[#allocation3 + $0xaa8] sm:$0xff] }
 0x462   : > { %10428 = vmatprep.subr.bf16.mxu0 %v14656_v44  ;;  %v4279_v29 = vld [vmem:[#allocation3 + $0xe88] sm:$0xff]  ;;  %v14624_v11 = vcombine.high %v4151_v40, %v4155_v1  ;;  %v14623_v44 = vcombine.low %v4151_v40, %v4155_v1 }
 0x463   : > { %10468 = vmatpush2.bf16.msra.mxu1 %v14791_v42  ;;  %v4283_v30 = vld [vmem:[#allocation3 + $0xea8] sm:$0xff] }
 0x464   : > { %10469 = vmatprep.subr.bf16.mxu1 %v14784_v45  ;;  %v14752_v35 = vcombine.high %v4279_v29, %v4283_v30  ;;  %v4143_v36 = vld [vmem:[#allocation3 + $0xa48] sm:$0xff]  ;;  %v14751_v45 = vcombine.low %v4279_v29, %v4283_v30 }
 0x465   : > { %10429 = vmatpush2.bf16.msra.mxu0 %v14655_v55  ;;  %v4147_v37 = vld [vmem:[#allocation3 + $0xa68] sm:$0xff] }
 0x466   : > { %10430 = vmatprep.subr.bf16.mxu0 %v14648_v62  ;;  %v4271_v38 = vld [vmem:[#allocation3 + $0xe48] sm:$0xff]  ;;  %v14616_v43 = vcombine.high %v4143_v36, %v4147_v37  ;;  %v14615_v62 = vcombine.low %v4143_v36, %v4147_v37 }
 0x467   : > { %10470 = vmatpush2.bf16.msra.mxu1 %v14783_v59  ;;  %v4275_v42 = vld [vmem:[#allocation3 + $0xe68] sm:$0xff] }
 0x468   : > { %10471 = vmatprep.subr.bf16.mxu1 %v14776_v2  ;;  %v14744_v48 = vcombine.high %v4271_v38, %v4275_v42  ;;  %v4135_v49 = vld [vmem:[#allocation3 + $0xa08] sm:$0xff]  ;;  %v14743_v2 = vcombine.low %v4271_v38, %v4275_v42 }
 0x469   : > { %10431 = vmatpush2.bf16.msra.mxu0 %v14647_v14  ;;  %v4139_v53 = vld [vmem:[#allocation3 + $0xa28] sm:$0xff] }
 0x46a   : > { %10432 = vmatprep.subr.bf16.mxu0 %v14640_v39  ;;  %v4263_v55 = vld [vmem:[#allocation3 + $0xe08] sm:$0xff]  ;;  %v14608_v13 = vcombine.high %v4135_v49, %v4139_v53  ;;  %v14607_v39 = vcombine.low %v4135_v49, %v4139_v53 }
 0x46b   : > { %10472 = vmatpush2.bf16.msra.mxu1 %v14775_v60  ;;  %v4267_v59 = vld [vmem:[#allocation3 + $0xe28] sm:$0xff] }
 0x46c   : > { %10473 = vmatprep.subr.bf16.mxu1 %v14768_v32  ;;  %v14736_v20 = vcombine.high %v4263_v55, %v4267_v59  ;;  %v4383_v9 = vld [vmem:[#allocation3 + $0x11c8] sm:$0xff]  ;;  %v14735_v32 = vcombine.low %v4263_v55, %v4267_v59 }
 0x46d   : > { %10433 = vmatpush2.bf16.msra.mxu0 %v14639_v23  ;;  %v4387_v12 = vld [vmem:[#allocation3 + $0x11e8] sm:$0xff] }
 0x46e   : > { %10434 = vmatprep.subr.bf16.mxu0 %v14632_v3  ;;  %v4511_v14 = vld [vmem:[#allocation3 + $0x15c8] sm:$0xff]  ;;  %v14856_v18 = vcombine.high %v4383_v9, %v4387_v12  ;;  %v14855_v3 = vcombine.low %v4383_v9, %v4387_v12 }
 0x46f   : > { %10474 = vmatpush2.bf16.msra.mxu1 %v14767_v41  ;;  %v4515_v60 = vld [vmem:[#allocation3 + $0x15e8] sm:$0xff] }
 0x470   : > { %10475 = vmatprep.subr.bf16.mxu1 %v14760_v50  ;;  %v14984_v21 = vcombine.high %v4511_v14, %v4515_v60  ;;  %v4375_v5 = vld [vmem:[#allocation3 + $0x1188] sm:$0xff]  ;;  %v14983_v50 = vcombine.low %v4511_v14, %v4515_v60 }
 0x471   : > { %10435 = vmatpush2.bf16.msra.mxu0 %v14631_v63  ;;  %v4379_v22 = vld [vmem:[#allocation3 + $0x11a8] sm:$0xff] }
 0x472   : > { %10436 = vmatprep.subr.bf16.mxu0 %v14624_v11  ;;  %v4503_v23 = vld [vmem:[#allocation3 + $0x1588] sm:$0xff]  ;;  %v14848_v40 = vcombine.high %v4375_v5, %v4379_v22  ;;  %v14847_v37 = vcombine.low %v4375_v5, %v4379_v22 }
 0x473   : > { %10476 = vmatpush2.bf16.msra.mxu1 %v14759_v31  ;;  %v4507_v41 = vld [vmem:[#allocation3 + $0x15a8] sm:$0xff] }
 0x474   : > { %10477 = vmatprep.subr.bf16.mxu1 %v14752_v35  ;;  %v14976_v1 = vcombine.high %v4503_v23, %v4507_v41  ;;  %v4367_v29 = vld [vmem:[#allocation3 + $0x1148] sm:$0xff]  ;;  %v14975_v42 = vcombine.low %v4503_v23, %v4507_v41 }
 0x475   : > { %10437 = vmatpush2.bf16.msra.mxu0 %v14623_v44  ;;  %v4371_v30 = vld [vmem:[#allocation3 + $0x1168] sm:$0xff] }
 0x476   : > { %10438 = vmatprep.subr.bf16.mxu0 %v14616_v43  ;;  %v4495_v31 = vld [vmem:[#allocation3 + $0x1548] sm:$0xff]  ;;  %v14840_v44 = vcombine.high %v4367_v29, %v4371_v30 }
 0x477   : > { %10478 = vmatpush2.bf16.msra.mxu1 %v14751_v45  ;;  %v4499_v11 = vld [vmem:[#allocation3 + $0x1568] sm:$0xff] }
 0x478   : > { %10479 = vmatprep.subr.bf16.mxu1 %v14744_v48  ;;  %v14968_v49 = vcombine.high %v4495_v31, %v4499_v11  ;;  %v4359_v53 = vld [vmem:[#allocation3 + $0x1108] sm:$0xff] }
 0x479   : > { %10439 = vmatpush2.bf16.msra.mxu0 %v14615_v62  ;;  %v4363_v55 = vld [vmem:[#allocation3 + $0x1128] sm:$0xff] }
 0x47a   : > { %10440 = vmatprep.subr.bf16.mxu0 %v14608_v13  ;;  %v4487_v59 = vld [vmem:[#allocation3 + $0x1508] sm:$0xff]  ;;  %v14832_v12 = vcombine.high %v4359_v53, %v4363_v55  ;;  %v14831_v5 = vcombine.low %v4359_v53, %v4363_v55 }
 0x47b   : > { %10480 = vmatpush2.bf16.msra.mxu1 %v14743_v2  ;;  %v4491_v62 = vld [vmem:[#allocation3 + $0x1528] sm:$0xff] }
 0x47c   : > { %10481 = vmatprep.subr.bf16.mxu1 %v14736_v20  ;;  %v14839_v20 = vcombine.low %v4367_v29, %v4371_v30  ;;  %v14960_v60 = vcombine.high %v4487_v59, %v4491_v62  ;;  %v14959_v22 = vcombine.low %v4487_v59, %v4491_v62  ;;  %v4455_v53 = vld [vmem:[#allocation3 + $0x1408] sm:$0xff] }
 0x47d   : > { %10441 = vmatpush2.bf16.msra.mxu0 %v14607_v39  ;;  %v4351_v39 = vld [vmem:[#allocation3 + $0x10c8] sm:$0xff] }
 0x47e   : > { %10492 = vmatprep.subr.bf16.mxu0 %v14856_v18  ;;  %v4479_v18 = vld [vmem:[#allocation3 + $0x14c8] sm:$0xff] }
 0x47f   : > { %10482 = vmatpush2.bf16.msra.mxu1 %v14735_v32  ;;  %v4355_v32 = vld [vmem:[#allocation3 + $0x10e8] sm:$0xff] }
 0x480   : > { %10533 = vmatprep.subr.bf16.mxu1 %v14984_v21  ;;  %v10198_v63 = vpop.f32.mrf.mxu0  ;;  %10443 = vmatmul.mubr.bf16.vlgmr.msra.gmra.mxu0 %v17345_v8  ;;  %v4483_v21 = vld [vmem:[#allocation3 + $0x14e8] sm:$0xff]  ;;  %v14824_v23 = vcombine.high %v4351_v39, %v4355_v32  ;;  %v14823_v29 = vcombine.low %v4351_v39, %v4355_v32 }
 0x481   : > { %v10199_v35 = vadd.f32 %v10198_v63, %v17418_v15  ;;  %10493 = vmatpush1.bf16.msra.mxu0 %v14855_v3  ;;  %10524 = vmatprep.mubr.bf16.mxu0 %v17353_v33  ;;  %v14952_v41 = vcombine.high %v4479_v18, %v4483_v21  ;;  %v4343_v3 = vld [vmem:[#allocation3 + $0x1088] sm:$0xff]  ;;  %v14951_v30 = vcombine.low %v4479_v18, %v4483_v21 }
 0x482   : > { %v10239_v36 = vpop.f32.mrf.mxu1  ;;  %10484 = vmatmul.mubr.bf16.vlgmr.msra.gmra.mxu1 %v17351_v27  ;;  %v10200_v38 = vpop.f32.mrf.mxu0  ;;  %10494 = vmatprep.subr.bf16.mxu0 %v14848_v40  ;;  %v4471_v40 = vld [vmem:[#allocation3 + $0x1488] sm:$0xff] }
 0x483   : > { %10534 = vmatpush1.bf16.msra.mxu1 %v14983_v50  ;;  %v17428_v45 = vadd.f32 %v10239_v36, %v10199_v35  ;;  %v10201_v43 = vadd.f32 %v10200_v38, %v17423_v7  ;;  %10565 = vmatprep.mubr.bf16.mxu1 %v17356_v34  ;;  %v14967_v7 = vcombine.low %v4495_v31, %v4499_v11  ;;  %v4347_v50 = vld [vmem:[#allocation3 + $0x10a8] sm:$0xff] }
 0x484   : > { %v10241_v48 = vpop.f32.mrf.mxu1  ;;  %10535 = vmatprep.subr.bf16.mxu1 %v14976_v1  ;;  %v10202_v15 = vpop.f32.mrf.mxu0  ;;  %v4475_v1 = vld [vmem:[#allocation3 + $0x14a8] sm:$0xff]  ;;  %v14816_v63 = vcombine.high %v4343_v3, %v4347_v50  ;;  %v14815_v38 = vcombine.low %v4343_v3, %v4347_v50 }
 0x485   : > { %v17433_v2 = vadd.f32 %v10241_v48, %v10201_v43  ;;  %10495 = vmatpush1.bf16.msra.mxu0 %v14847_v37  ;;  %v14944_v31 = vcombine.high %v4471_v40, %v4475_v1  ;;  %v4335_v11 = vld [vmem:[#allocation3 + $0x1048] sm:$0xff] }
 0x486   : > { %v10243_v13 = vpop.f32.mrf.mxu1  ;;  %v10203_v9 = vpop.f32.mrf.mxu0  ;;  %10496 = vmatprep.subr.bf16.mxu0 %v14840_v44  ;;  %v4339_v35 = vld [vmem:[#allocation3 + $0x1068] sm:$0xff] }
 0x487   : > { %10536 = vmatpush1.bf16.msra.mxu1 %v14975_v42  ;;  %v4463_v36 = vld [vmem:[#allocation3 + $0x1448] sm:$0xff]  ;;  %v14943_v42 = vcombine.low %v4471_v40, %v4475_v1  ;;  %v14808_v44 = vcombine.high %v4335_v11, %v4339_v35  ;;  %v14807_v15 = vcombine.low %v4335_v11, %v4339_v35 }
 0x488   : > { %v10244_v14 = vpop.f32.mrf.mxu1  ;;  %10537 = vmatprep.subr.bf16.mxu1 %v14968_v49  ;;  %v4467_v37 = vld [vmem:[#allocation3 + $0x1468] sm:$0xff] }
 0x489   : > { %10497 = vmatpush1.bf16.msra.mxu0 %v14839_v20  ;;  %v14936_v43 = vcombine.high %v4463_v36, %v4467_v37  ;;  %v4327_v48 = vld [vmem:[#allocation3 + $0x1008] sm:$0xff]  ;;  %v14935_v59 = vcombine.low %v4463_v36, %v4467_v37 }
 0x48a   : > { %10498 = vmatprep.subr.bf16.mxu0 %v14832_v12  ;;  %v4331_v49 = vld [vmem:[#allocation3 + $0x1028] sm:$0xff] }
 0x48b   : > { %10538 = vmatpush1.bf16.msra.mxu1 %v14967_v7  ;;  %v4459_v55 = vld [vmem:[#allocation3 + $0x1428] sm:$0xff]  ;;  %v14800_v62 = vcombine.high %v4327_v48, %v4331_v49  ;;  %v14799_v14 = vcombine.low %v4327_v48, %v4331_v49 }
 0x48c   : > { %10539 = vmatprep.subr.bf16.mxu1 %v14960_v60  ;;  %v14928_v13 = vcombine.high %v4455_v53, %v4459_v55  ;;  %v4447_v20 = vld [vmem:[#allocation3 + $0x13c8] sm:$0xff]  ;;  %v14927_v60 = vcombine.low %v4455_v53, %v4459_v55 }
 0x48d   : > { %10499 = vmatpush1.bf16.msra.mxu0 %v14831_v5  ;;  %v4451_v9 = vld [vmem:[#allocation3 + $0x13e8] sm:$0xff] }
 0x48e   : > { %10500 = vmatprep.subr.bf16.mxu0 %v14824_v23  ;;  %v4575_v7 = vld [vmem:[#allocation3 + $0x17c8] sm:$0xff]  ;;  %v14920_v39 = vcombine.high %v4447_v20, %v4451_v9  ;;  %v14919_v23 = vcombine.low %v4447_v20, %v4451_v9 }
 0x48f   : > { %10540 = vmatpush1.bf16.msra.mxu1 %v14959_v22  ;;  %v4579_v12 = vld [vmem:[#allocation3 + $0x17e8] sm:$0xff] }
 0x490   : > { %10541 = vmatprep.subr.bf16.mxu1 %v14952_v41  ;;  %v15048_v32 = vcombine.high %v4575_v7, %v4579_v12  ;;  %v4439_v18 = vld [vmem:[#allocation3 + $0x1388] sm:$0xff]  ;;  %v15047_v41 = vcombine.low %v4575_v7, %v4579_v12 }
 0x491   : > { %10501 = vmatpush1.bf16.msra.mxu0 %v14823_v29  ;;  %v4443_v21 = vld [vmem:[#allocation3 + $0x13a8] sm:$0xff] }
 0x492   : > { %10502 = vmatprep.subr.bf16.mxu0 %v14816_v63  ;;  %v4567_v5 = vld [vmem:[#allocation3 + $0x1788] sm:$0xff]  ;;  %v14912_v3 = vcombine.high %v4439_v18, %v4443_v21  ;;  %v14911_v63 = vcombine.low %v4439_v18, %v4443_v21 }
 0x493   : > { %10542 = vmatpush1.bf16.msra.mxu1 %v14951_v30  ;;  %v4571_v22 = vld [vmem:[#allocation3 + $0x17a8] sm:$0xff] }
 0x494   : > { %10543 = vmatprep.subr.bf16.mxu1 %v14944_v31  ;;  %v15040_v50 = vcombine.high %v4567_v5, %v4571_v22  ;;  %v4431_v40 = vld [vmem:[#allocation3 + $0x1348] sm:$0xff]  ;;  %v15039_v31 = vcombine.low %v4567_v5, %v4571_v22 }
 0x495   : > { %10503 = vmatpush1.bf16.msra.mxu0 %v14815_v38  ;;  %v4435_v1 = vld [vmem:[#allocation3 + $0x1368] sm:$0xff] }
 0x496   : > { %10504 = vmatprep.subr.bf16.mxu0 %v14808_v44  ;;  %v4559_v29 = vld [vmem:[#allocation3 + $0x1748] sm:$0xff]  ;;  %v14904_v11 = vcombine.high %v4431_v40, %v4435_v1  ;;  %v14903_v44 = vcombine.low %v4431_v40, %v4435_v1 }
 0x497   : > { %10544 = vmatpush1.bf16.msra.mxu1 %v14943_v42  ;;  %v4563_v30 = vld [vmem:[#allocation3 + $0x1768] sm:$0xff] }
 0x498   : > { %10545 = vmatprep.subr.bf16.mxu1 %v14936_v43  ;;  %v15032_v35 = vcombine.high %v4559_v29, %v4563_v30  ;;  %v4423_v36 = vld [vmem:[#allocation3 + $0x1308] sm:$0xff]  ;;  %v15031_v43 = vcombine.low %v4559_v29, %v4563_v30 }
 0x499   : > { %10505 = vmatpush1.bf16.msra.mxu0 %v14807_v15  ;;  %v4427_v37 = vld [vmem:[#allocation3 + $0x1328] sm:$0xff] }
 0x49a   : > { %10506 = vmatprep.subr.bf16.mxu0 %v14800_v62  ;;  %v4551_v38 = vld [vmem:[#allocation3 + $0x1708] sm:$0xff]  ;;  %v14896_v48 = vcombine.high %v4423_v36, %v4427_v37  ;;  %v14895_v62 = vcombine.low %v4423_v36, %v4427_v37 }
 0x49b   : > { %10546 = vmatpush1.bf16.msra.mxu1 %v14935_v59  ;;  %v4555_v42 = vld [vmem:[#allocation3 + $0x1728] sm:$0xff] }
 0x49c   : > { %10547 = vmatprep.subr.bf16.mxu1 %v14928_v13  ;;  %v15024_v49 = vcombine.high %v4551_v38, %v4555_v42  ;;  %v4415_v53 = vld [vmem:[#allocation3 + $0x12c8] sm:$0xff]  ;;  %v15023_v13 = vcombine.low %v4551_v38, %v4555_v42 }
 0x49d   : > { %10507 = vmatpush1.bf16.msra.mxu0 %v14799_v14  ;;  %v4419_v55 = vld [vmem:[#allocation3 + $0x12e8] sm:$0xff] }
 0x49e   : > { %10508 = vmatprep.subr.bf16.mxu0 %v14920_v39  ;;  %v4543_v15 = vld [vmem:[#allocation3 + $0x16c8] sm:$0xff]  ;;  %v14888_v20 = vcombine.high %v4415_v53, %v4419_v55  ;;  %v14887_v39 = vcombine.low %v4415_v53, %v4419_v55 }
 0x49f   : > { %10548 = vmatpush1.bf16.msra.mxu1 %v14927_v60  ;;  %v4547_v59 = vld [vmem:[#allocation3 + $0x16e8] sm:$0xff] }
 0x4a0   : > { %10549 = vmatprep.subr.bf16.mxu1 %v15048_v32  ;;  %v15016_v9 = vcombine.high %v4543_v15, %v4547_v59  ;;  %v4407_v7 = vld [vmem:[#allocation3 + $0x1288] sm:$0xff]  ;;  %v15015_v32 = vcombine.low %v4543_v15, %v4547_v59 }
 0x4a1   : > { %10509 = vmatpush2.bf16.msra.mxu0 %v14919_v23  ;;  %v4411_v12 = vld [vmem:[#allocation3 + $0x12a8] sm:$0xff] }
 0x4a2   : > { %10510 = vmatprep.subr.bf16.mxu0 %v14912_v3  ;;  %v4535_v14 = vld [vmem:[#allocation3 + $0x1688] sm:$0xff]  ;;  %v14880_v18 = vcombine.high %v4407_v7, %v4411_v12  ;;  %v14879_v3 = vcombine.low %v4407_v7, %v4411_v12 }
 0x4a3   : > { %10550 = vmatpush2.bf16.msra.mxu1 %v15047_v41  ;;  %v4539_v60 = vld [vmem:[#allocation3 + $0x16a8] sm:$0xff] }
 0x4a4   : > { %10551 = vmatprep.subr.bf16.mxu1 %v15040_v50  ;;  %v15008_v21 = vcombine.high %v4535_v14, %v4539_v60  ;;  %v4399_v5 = vld [vmem:[#allocation3 + $0x1248] sm:$0xff]  ;;  %v15007_v50 = vcombine.low %v4535_v14, %v4539_v60 }
 0x4a5   : > { %10511 = vmatpush2.bf16.msra.mxu0 %v14911_v63  ;;  %v4403_v22 = vld [vmem:[#allocation3 + $0x1268] sm:$0xff] }
 0x4a6   : > { %10512 = vmatprep.subr.bf16.mxu0 %v14904_v11  ;;  %v4527_v23 = vld [vmem:[#allocation3 + $0x1648] sm:$0xff]  ;;  %v14872_v40 = vcombine.high %v4399_v5, %v4403_v22  ;;  %v14871_v11 = vcombine.low %v4399_v5, %v4403_v22 }
 0x4a7   : > { %10552 = vmatpush2.bf16.msra.mxu1 %v15039_v31  ;;  %v4531_v41 = vld [vmem:[#allocation3 + $0x1668] sm:$0xff] }
 0x4a8   : > { %10553 = vmatprep.subr.bf16.mxu1 %v15032_v35  ;;  %v15000_v1 = vcombine.high %v4527_v23, %v4531_v41  ;;  %v4391_v29 = vld [vmem:[#allocation3 + $0x1208] sm:$0xff]  ;;  %v14999_v35 = vcombine.low %v4527_v23, %v4531_v41 }
 0x4a9   : > { %10513 = vmatpush2.bf16.msra.mxu0 %v14903_v44  ;;  %v4395_v30 = vld [vmem:[#allocation3 + $0x1228] sm:$0xff] }
 0x4aa   : > { %10514 = vmatprep.subr.bf16.mxu0 %v14896_v48  ;;  %v4519_v63 = vld [vmem:[#allocation3 + $0x1608] sm:$0xff]  ;;  %v14864_v36 = vcombine.high %v4391_v29, %v4395_v30  ;;  %v14863_v48 = vcombine.low %v4391_v29, %v4395_v30 }
 0x4ab   : > { %10554 = vmatpush2.bf16.msra.mxu1 %v15031_v43  ;;  %v4523_v31 = vld [vmem:[#allocation3 + $0x1628] sm:$0xff] }
 0x4ac   : > { %10555 = vmatprep.subr.bf16.mxu1 %v15024_v49  ;;  %v14992_v37 = vcombine.high %v4519_v63, %v4523_v31  ;;  %v4639_v38 = vld [vmem:[#allocation3 + $0x19c8] sm:$0xff]  ;;  %v14991_v49 = vcombine.low %v4519_v63, %v4523_v31 }
 0x4ad   : > { %10515 = vmatpush2.bf16.msra.mxu0 %v14895_v62  ;;  %v4643_v42 = vld [vmem:[#allocation3 + $0x19e8] sm:$0xff] }
 0x4ae   : > { %10516 = vmatprep.subr.bf16.mxu0 %v14888_v20  ;;  %v4767_v44 = vld [vmem:[#allocation3 + $0x1dc8] sm:$0xff]  ;;  %v15112_v53 = vcombine.high %v4639_v38, %v4643_v42  ;;  %v15111_v20 = vcombine.low %v4639_v38, %v4643_v42 }
 0x4af   : > { %10556 = vmatpush2.bf16.msra.mxu1 %v15023_v13  ;;  %v4771_v43 = vld [vmem:[#allocation3 + $0x1de8] sm:$0xff] }
 0x4b0   : > { %10557 = vmatprep.subr.bf16.mxu1 %v15016_v9  ;;  %v15240_v55 = vcombine.high %v4767_v44, %v4771_v43  ;;  %v4631_v15 = vld [vmem:[#allocation3 + $0x1988] sm:$0xff]  ;;  %v15239_v9 = vcombine.low %v4767_v44, %v4771_v43 }
 0x4b1   : > { %10517 = vmatpush2.bf16.msra.mxu0 %v14887_v39  ;;  %v4635_v59 = vld [vmem:[#allocation3 + $0x19a8] sm:$0xff] }
 0x4b2   : > { %10518 = vmatprep.subr.bf16.mxu0 %v14880_v18  ;;  %v4759_v62 = vld [vmem:[#allocation3 + $0x1d88] sm:$0xff]  ;;  %v15104_v7 = vcombine.high %v4631_v15, %v4635_v59  ;;  %v15103_v22 = vcombine.low %v4631_v15, %v4635_v59 }
 0x4b3   : > { %10558 = vmatpush2.bf16.msra.mxu1 %v15015_v32  ;;  %v4763_v13 = vld [vmem:[#allocation3 + $0x1da8] sm:$0xff] }
 0x4b4   : > { %10559 = vmatprep.subr.bf16.mxu1 %v15008_v21  ;;  %v15232_v12 = vcombine.high %v4759_v62, %v4763_v13  ;;  %v4623_v14 = vld [vmem:[#allocation3 + $0x1948] sm:$0xff]  ;;  %v15231_v41 = vcombine.low %v4759_v62, %v4763_v13 }
 0x4b5   : > { %10519 = vmatpush2.bf16.msra.mxu0 %v14879_v3  ;;  %v4627_v60 = vld [vmem:[#allocation3 + $0x1968] sm:$0xff] }
 0x4b6   : > { %10520 = vmatprep.subr.bf16.mxu0 %v14872_v40  ;;  %v4751_v32 = vld [vmem:[#allocation3 + $0x1d48] sm:$0xff]  ;;  %v15096_v3 = vcombine.high %v4623_v14, %v4627_v60 }
 0x4b7   : > { %10560 = vmatpush2.bf16.msra.mxu1 %v15007_v50  ;;  %v4755_v18 = vld [vmem:[#allocation3 + $0x1d68] sm:$0xff] }
 0x4b8   : > { %10561 = vmatprep.subr.bf16.mxu1 %v15000_v1  ;;  %v15224_v29 = vcombine.high %v4751_v32, %v4755_v18  ;;  %v4615_v30 = vld [vmem:[#allocation3 + $0x1908] sm:$0xff] }
 0x4b9   : > { %10521 = vmatpush2.bf16.msra.mxu0 %v14871_v11  ;;  %v4619_v63 = vld [vmem:[#allocation3 + $0x1928] sm:$0xff] }
 0x4ba   : > { %10522 = vmatprep.subr.bf16.mxu0 %v14864_v36  ;;  %v4743_v31 = vld [vmem:[#allocation3 + $0x1d08] sm:$0xff]  ;;  %v15088_v42 = vcombine.high %v4615_v30, %v4619_v63  ;;  %v15087_v15 = vcombine.low %v4615_v30, %v4619_v63 }
 0x4bb   : > { %10562 = vmatpush2.bf16.msra.mxu1 %v14999_v35  ;;  %v4747_v11 = vld [vmem:[#allocation3 + $0x1d28] sm:$0xff] }
 0x4bc   : > { %10563 = vmatprep.subr.bf16.mxu1 %v14992_v37  ;;  %v15095_v37 = vcombine.low %v4623_v14, %v4627_v60  ;;  %v15216_v43 = vcombine.high %v4743_v31, %v4747_v11  ;;  %v15215_v59 = vcombine.low %v4743_v31, %v4747_v11  ;;  %v4711_v30 = vld [vmem:[#allocation3 + $0x1c08] sm:$0xff] }
 0x4bd   : > { %10523 = vmatpush2.bf16.msra.mxu0 %v14863_v48  ;;  %v4607_v48 = vld [vmem:[#allocation3 + $0x18c8] sm:$0xff] }
 0x4be   : > { %10574 = vmatprep.subr.bf16.mxu0 %v15112_v53  ;;  %v4735_v53 = vld [vmem:[#allocation3 + $0x1cc8] sm:$0xff] }
 0x4bf   : > { %10564 = vmatpush2.bf16.msra.mxu1 %v14991_v49  ;;  %v4611_v49 = vld [vmem:[#allocation3 + $0x18e8] sm:$0xff] }
 0x4c0   : > { %10615 = vmatprep.subr.bf16.mxu1 %v15240_v55  ;;  %v10280_v39 = vpop.f32.mrf.mxu0  ;;  %10525 = vmatmul.mubr.bf16.vlgmr.msra.gmra.mxu0 %v17381_v46  ;;  %v4739_v55 = vld [vmem:[#allocation3 + $0x1ce8] sm:$0xff]  ;;  %v15080_v62 = vcombine.high %v4607_v48, %v4611_v49  ;;  %v15079_v14 = vcombine.low %v4607_v48, %v4611_v49 }
 0x4c1   : > { %v10281_v21 = vadd.f32 %v10280_v39, %v17428_v45  ;;  %10575 = vmatpush1.bf16.msra.mxu0 %v15111_v20  ;;  %10606 = vmatprep.mubr.bf16.mxu0 %v17389_v6  ;;  %v15208_v13 = vcombine.high %v4735_v53, %v4739_v55  ;;  %v4599_v20 = vld [vmem:[#allocation3 + $0x1888] sm:$0xff]  ;;  %v15207_v60 = vcombine.low %v4735_v53, %v4739_v55 }
 0x4c2   : > { %v10321_v5 = vpop.f32.mrf.mxu1  ;;  %10566 = vmatmul.mubr.bf16.vlgmr.msra.gmra.mxu1 %v17387_v47  ;;  %v10282_v23 = vpop.f32.mrf.mxu0  ;;  %10576 = vmatprep.subr.bf16.mxu0 %v15104_v7  ;;  %v4727_v7 = vld [vmem:[#allocation3 + $0x1c88] sm:$0xff] }
 0x4c3   : > { %10616 = vmatpush1.bf16.msra.mxu1 %v15239_v9  ;;  %v17438_v50 = vadd.f32 %v10321_v5, %v10281_v21  ;;  %v10283_v40 = vadd.f32 %v10282_v23, %v17433_v2  ;;  %10647 = vmatprep.mubr.bf16.mxu1 %v17392_v19  ;;  %v15223_v2 = vcombine.low %v4751_v32, %v4755_v18  ;;  %v4603_v9 = vld [vmem:[#allocation3 + $0x18a8] sm:$0xff] }
 0x4c4   : > { %v10323_v1 = vpop.f32.mrf.mxu1  ;;  %10617 = vmatprep.subr.bf16.mxu1 %v15232_v12  ;;  %v10284_v45 = vpop.f32.mrf.mxu0  ;;  %v4731_v12 = vld [vmem:[#allocation3 + $0x1ca8] sm:$0xff]  ;;  %v15072_v39 = vcombine.high %v4599_v20, %v4603_v9  ;;  %v15071_v23 = vcombine.low %v4599_v20, %v4603_v9 }
 0x4c5   : > { %v17443_v35 = vadd.f32 %v10323_v1, %v10283_v40  ;;  %10577 = vmatpush1.bf16.msra.mxu0 %v15103_v22  ;;  %v15200_v32 = vcombine.high %v4727_v7, %v4731_v12  ;;  %v4591_v18 = vld [vmem:[#allocation3 + $0x1848] sm:$0xff]  ;;  %vm11312_vm6 = vcmp.gt.f32.partialorder %v17438_v50, 0.0 }
 0x4c6   : > { %v10325_v36 = vpop.f32.mrf.mxu1  ;;  %v10285_v38 = vpop.f32.mrf.mxu0  ;;  %10578 = vmatprep.subr.bf16.mxu0 %v15096_v3  ;;  %v4595_v21 = vld [vmem:[#allocation3 + $0x1868] sm:$0xff] }
 0x4c7   : > { %10618 = vmatpush1.bf16.msra.mxu1 %v15231_v41  ;;  %v4719_v5 = vld [vmem:[#allocation3 + $0x1c48] sm:$0xff]  ;;  %v15199_v41 = vcombine.low %v4727_v7, %v4731_v12  ;;  %v15064_v3 = vcombine.high %v4591_v18, %v4595_v21  ;;  %v15063_v45 = vcombine.low %v4591_v18, %v4595_v21  ;;  %vm11313_vm4 = vcmp.gt.f32.partialorder %v17443_v35, 0.0 }
 0x4c8   : > { %v10326_v44 = vpop.f32.mrf.mxu1  ;;  %10619 = vmatprep.subr.bf16.mxu1 %v15224_v29  ;;  %v4723_v22 = vld [vmem:[#allocation3 + $0x1c68] sm:$0xff] }
 0x4c9   : > { %10579 = vmatpush1.bf16.msra.mxu0 %v15095_v37  ;;  %v15192_v40 = vcombine.high %v4719_v5, %v4723_v22  ;;  %v4583_v1 = vld [vmem:[#allocation3 + $0x1808] sm:$0xff]  ;;  %v15191_v31 = vcombine.low %v4719_v5, %v4723_v22 }
 0x4ca   : > { %10580 = vmatprep.subr.bf16.mxu0 %v15088_v42  ;;  %v4587_v29 = vld [vmem:[#allocation3 + $0x1828] sm:$0xff] }
 0x4cb   : > { %10620 = vmatpush1.bf16.msra.mxu1 %v15223_v2  ;;  %v4715_v63 = vld [vmem:[#allocation3 + $0x1c28] sm:$0xff]  ;;  %v15056_v11 = vcombine.high %v4583_v1, %v4587_v29  ;;  %v15055_v44 = vcombine.low %v4583_v1, %v4587_v29 }
 0x4cc   : > { %10621 = vmatprep.subr.bf16.mxu1 %v15216_v43  ;;  %v15184_v36 = vcombine.high %v4711_v30, %v4715_v63  ;;  %v4703_v37 = vld [vmem:[#allocation3 + $0x1bc8] sm:$0xff]  ;;  %v15183_v43 = vcombine.low %v4711_v30, %v4715_v63 }
 0x4cd   : > { %10581 = vmatpush1.bf16.msra.mxu0 %v15087_v15  ;;  %v4707_v38 = vld [vmem:[#allocation3 + $0x1be8] sm:$0xff] }
 0x4ce   : > { %10582 = vmatprep.subr.bf16.mxu0 %v15080_v62  ;;  %v4831_v2 = vld [vmem:[#allocation3 + $0x1fc8] sm:$0xff]  ;;  %v15176_v48 = vcombine.high %v4703_v37, %v4707_v38  ;;  %v15175_v62 = vcombine.low %v4703_v37, %v4707_v38 }
 0x4cf   : > { %10622 = vmatpush1.bf16.msra.mxu1 %v15215_v59  ;;  %v4835_v42 = vld [vmem:[#allocation3 + $0x1fe8] sm:$0xff] }
 0x4d0   : > { %10623 = vmatprep.subr.bf16.mxu1 %v15208_v13  ;;  %v15304_v49 = vcombine.high %v4831_v2, %v4835_v42  ;;  %v4695_v53 = vld [vmem:[#allocation3 + $0x1b88] sm:$0xff]  ;;  %v15303_v13 = vcombine.low %v4831_v2, %v4835_v42 }
 0x4d1   : > { %10583 = vmatpush1.bf16.msra.mxu0 %v15079_v14  ;;  %v4699_v55 = vld [vmem:[#allocation3 + $0x1ba8] sm:$0xff] }
 0x4d2   : > { %10584 = vmatprep.subr.bf16.mxu0 %v15072_v39  ;;  %v4823_v15 = vld [vmem:[#allocation3 + $0x1f88] sm:$0xff]  ;;  %v15168_v20 = vcombine.high %v4695_v53, %v4699_v55  ;;  %v15167_v39 = vcombine.low %v4695_v53, %v4699_v55 }
 0x4d3   : > { %10624 = vmatpush1.bf16.msra.mxu1 %v15207_v60  ;;  %v4827_v59 = vld [vmem:[#allocation3 + $0x1fa8] sm:$0xff] }
 0x4d4   : > { %10625 = vmatprep.subr.bf16.mxu1 %v15200_v32  ;;  %v15296_v9 = vcombine.high %v4823_v15, %v4827_v59  ;;  %v4687_v7 = vld [vmem:[#allocation3 + $0x1b48] sm:$0xff]  ;;  %v15295_v32 = vcombine.low %v4823_v15, %v4827_v59 }
 0x4d5   : > { %10585 = vmatpush1.bf16.msra.mxu0 %v15071_v23  ;;  %v4691_v12 = vld [vmem:[#allocation3 + $0x1b68] sm:$0xff] }
 0x4d6   : > { %10586 = vmatprep.subr.bf16.mxu0 %v15064_v3  ;;  %v4815_v14 = vld [vmem:[#allocation3 + $0x1f48] sm:$0xff]  ;;  %v15160_v18 = vcombine.high %v4687_v7, %v4691_v12  ;;  %v15159_v3 = vcombine.low %v4687_v7, %v4691_v12 }
 0x4d7   : > { %10626 = vmatpush1.bf16.msra.mxu1 %v15199_v41  ;;  %v4819_v60 = vld [vmem:[#allocation3 + $0x1f68] sm:$0xff] }
 0x4d8   : > { %10627 = vmatprep.subr.bf16.mxu1 %v15192_v40  ;;  %v15288_v21 = vcombine.high %v4815_v14, %v4819_v60  ;;  %v4679_v5 = vld [vmem:[#allocation3 + $0x1b08] sm:$0xff]  ;;  %v15287_v40 = vcombine.low %v4815_v14, %v4819_v60 }
 0x4d9   : > { %10587 = vmatpush1.bf16.msra.mxu0 %v15063_v45  ;;  %v4683_v22 = vld [vmem:[#allocation3 + $0x1b28] sm:$0xff] }
 0x4da   : > { %10588 = vmatprep.subr.bf16.mxu0 %v15056_v11  ;;  %v4807_v23 = vld [vmem:[#allocation3 + $0x1f08] sm:$0xff]  ;;  %v15152_v1 = vcombine.high %v4679_v5, %v4683_v22  ;;  %v15151_v11 = vcombine.low %v4679_v5, %v4683_v22 }
 0x4db   : > { %10628 = vmatpush1.bf16.msra.mxu1 %v15191_v31  ;;  %v4811_v41 = vld [vmem:[#allocation3 + $0x1f28] sm:$0xff] }
 0x4dc   : > { %10629 = vmatprep.subr.bf16.mxu1 %v15184_v36  ;;  %v15280_v29 = vcombine.high %v4807_v23, %v4811_v41  ;;  %v4671_v30 = vld [vmem:[#allocation3 + $0x1ac8] sm:$0xff]  ;;  %v15279_v36 = vcombine.low %v4807_v23, %v4811_v41  ;;  %v3872_v23 = vld [vmem:[#allocation3 + $0x1d0] sm:$0xff] }
 0x4dd   : > { %10589 = vmatpush1.bf16.msra.mxu0 %v15055_v44  ;;  %v4675_v63 = vld [vmem:[#allocation3 + $0x1ae8] sm:$0xff]  ;;  %v3876_v41 = vld [vmem:[#allocation3 + $0x1f0] sm:$0xff] }
 0x4de   : > { %10590 = vmatprep.subr.bf16.mxu0 %v15176_v48  ;;  %v4799_v45 = vld [vmem:[#allocation3 + $0x1ec8] sm:$0xff]  ;;  %v15144_v37 = vcombine.high %v4671_v30, %v4675_v63  ;;  %v15143_v48 = vcombine.low %v4671_v30, %v4675_v63  ;;  %v14346_v30 = vcombine.high %v3872_v23, %v3876_v41 }
 0x4df   : > { %10630 = vmatpush1.bf16.msra.mxu1 %v15183_v43  ;;  %v4803_v31 = vld [vmem:[#allocation3 + $0x1ee8] sm:$0xff] }
 0x4e0   : > { %10631 = vmatprep.subr.bf16.mxu1 %v15304_v49  ;;  %v15272_v38 = vcombine.high %v4799_v45, %v4803_v31  ;;  %v4663_v2 = vld [vmem:[#allocation3 + $0x1a88] sm:$0xff]  ;;  %v15271_v49 = vcombine.low %v4799_v45, %v4803_v31  ;;  %v3864_v45 = vld [vmem:[#allocation3 + $0x190] sm:$0xff] }
 0x4e1   : > { %10591 = vmatpush2.bf16.msra.mxu0 %v15175_v62  ;;  %v4667_v42 = vld [vmem:[#allocation3 + $0x1aa8] sm:$0xff]  ;;  %v3868_v31 = vld [vmem:[#allocation3 + $0x1b0] sm:$0xff] }
 0x4e2   : > { %10592 = vmatprep.subr.bf16.mxu0 %v15168_v20  ;;  %v4791_v44 = vld [vmem:[#allocation3 + $0x1e88] sm:$0xff]  ;;  %v15136_v53 = vcombine.high %v4663_v2, %v4667_v42  ;;  %v15135_v20 = vcombine.low %v4663_v2, %v4667_v42  ;;  %v14345_v2 = vcombine.low %v3872_v23, %v3876_v41  ;;  %v3980_v23 = vld [vmem:[#allocation3 + $0x530] sm:$0xff] }
 0x4e3   : > { %10632 = vmatpush2.bf16.msra.mxu1 %v15303_v13  ;;  %v4795_v43 = vld [vmem:[#allocation3 + $0x1ea8] sm:$0xff] }
 0x4e4   : > { %10633 = vmatprep.subr.bf16.mxu1 %v15296_v9  ;;  %v15264_v55 = vcombine.high %v4791_v44, %v4795_v43  ;;  %v4655_v15 = vld [vmem:[#allocation3 + $0x1a48] sm:$0xff]  ;;  %v15263_v9 = vcombine.low %v4791_v44, %v4795_v43  ;;  %v14338_v44 = vcombine.high %v3864_v45, %v3868_v31 }
 0x4e5   : > { %10593 = vmatpush2.bf16.msra.mxu0 %v15167_v39  ;;  %v4659_v59 = vld [vmem:[#allocation3 + $0x1a68] sm:$0xff] }
 0x4e6   : > { %10594 = vmatprep.subr.bf16.mxu0 %v15160_v18  ;;  %v4783_v62 = vld [vmem:[#allocation3 + $0x1e48] sm:$0xff]  ;;  %v15128_v7 = vcombine.high %v4655_v15, %v4659_v59  ;;  %v15127_v18 = vcombine.low %v4655_v15, %v4659_v59  ;;  %v3984_v15 = vld [vmem:[#allocation3 + $0x550] sm:$0xff] }
 0x4e7   : > { %10634 = vmatpush2.bf16.msra.mxu1 %v15295_v32  ;;  %v4787_v13 = vld [vmem:[#allocation3 + $0x1e68] sm:$0xff]  ;;  %v3988_v59 = vld [vmem:[#allocation3 + $0x570] sm:$0xff] }
 0x4e8   : > { %10635 = vmatprep.subr.bf16.mxu1 %v15288_v21  ;;  %v15256_v12 = vcombine.high %v4783_v62, %v4787_v13  ;;  %v4647_v14 = vld [vmem:[#allocation3 + $0x1a08] sm:$0xff]  ;;  %v15255_v21 = vcombine.low %v4783_v62, %v4787_v13 }
 0x4e9   : > { %10595 = vmatpush2.bf16.msra.mxu0 %v15159_v3  ;;  %v4651_v60 = vld [vmem:[#allocation3 + $0x1a28] sm:$0xff]  ;;  %v4000_v3 = vld [vmem:[#allocation3 + $0x5d0] sm:$0xff] }
 0x4ea   : > { %10596 = vmatprep.subr.bf16.mxu0 %v15152_v1  ;;  %v4775_v39 = vld [vmem:[#allocation3 + $0x1e08] sm:$0xff]  ;;  %v15120_v5 = vcombine.high %v4647_v14, %v4651_v60  ;;  %v15119_v1 = vcombine.low %v4647_v14, %v4651_v60 }
 0x4eb   : > { %10636 = vmatpush2.bf16.msra.mxu1 %v15287_v40  ;;  %v4779_v32 = vld [vmem:[#allocation3 + $0x1e28] sm:$0xff]  ;;  %v4004_v40 = vld [vmem:[#allocation3 + $0x5f0] sm:$0xff] }
 0x4ec   : > { %10637 = vmatprep.subr.bf16.mxu1 %v15280_v29  ;;  %v15248_v22 = vcombine.high %v4775_v39, %v4779_v32  ;;  %v15247_v29 = vcombine.low %v4775_v39, %v4779_v32  ;;  %v14474_v63 = vcombine.high %v4000_v3, %v4004_v40  ;;  %v14473_v42 = vcombine.low %v4000_v3, %v4004_v40 }
 0x4ed   : > { %10597 = vmatpush2.bf16.msra.mxu0 %v15151_v11  ;;  %v3992_v11 = vld [vmem:[#allocation3 + $0x590] sm:$0xff]  ;;  %v14458_v32 = vcombine.high %v3984_v15, %v3988_v59 }
 0x4ee   : > { %10598 = vmatprep.subr.bf16.mxu0 %v15144_v37  ;;  %v16224_v37 = vld [vmem:[#allocation12] sm:$0xff] }
 0x4ef   : > { %10638 = vmatpush2.bf16.msra.mxu1 %v15279_v36  ;;  %v3996_v36 = vld [vmem:[#allocation3 + $0x5b0] sm:$0xff]  ;;  %v4855_v43 = vrot.slane %v16224_v37, %v17245_v58 }
 0x4f0   : > { %10639 = vmatprep.subr.bf16.mxu1 %v15272_v38  ;;  %v4851_v38 = vrot.slane %v16224_v37, %v17242_v57  ;;  %v3972_v37 = vld [vmem:[#allocation3 + $0x4f0] sm:$0xff] }
 0x4f1   : > { %10599 = vmatpush2.bf16.msra.mxu0 %v15143_v48  ;;  %v14466_v48 = vcombine.high %v3992_v11, %v3996_v36 }
 0x4f2   : > { %10600 = vmatprep.subr.bf16.mxu0 %v15136_v53  ;;  %v3860_v53 = vld [vmem:[#allocation3 + $0x170] sm:$0xff] }
 0x4f3   : > { %10640 = vmatpush2.bf16.msra.mxu1 %v15271_v49  ;;  %v3856_v49 = vld [vmem:[#allocation3 + $0x150] sm:$0xff] }
 0x4f4   : > { %10641 = vmatprep.subr.bf16.mxu1 %v15264_v55  ;;  %v14329_v40 = vcombine.low %v3856_v49, %v3860_v53 }
 0x4f5   : > { %10601 = vmatpush2.bf16.msra.mxu0 %v15135_v20  ;;  %v14337_v20 = vcombine.low %v3864_v45, %v3868_v31  ;;  %v3840_v31 = vld [vmem:[#allocation3 + $0xd0] sm:$0xff] }
 0x4f6   : > { %10602 = vmatprep.subr.bf16.mxu0 %v15128_v7  ;;  %v14465_v7 = vcombine.low %v3992_v11, %v3996_v36  ;;  %v3844_v11 = vld [vmem:[#allocation3 + $0xf0] sm:$0xff] }
 0x4f7   : > { %10642 = vmatpush2.bf16.msra.mxu1 %v15263_v9  ;;  %v3968_v36 = vld [vmem:[#allocation3 + $0x4d0] sm:$0xff] }
 0x4f8   : > { %10643 = vmatprep.subr.bf16.mxu1 %v15256_v12  ;;  %v14330_v12 = vcombine.high %v3856_v49, %v3860_v53  ;;  %v3960_v49 = vld [vmem:[#allocation3 + $0x490] sm:$0xff] }
 0x4f9   : > { %10603 = vmatpush2.bf16.msra.mxu0 %v15127_v18  ;;  %v3848_v18 = vld [vmem:[#allocation3 + $0x110] sm:$0xff] }
 0x4fa   : > { %10604 = vmatprep.subr.bf16.mxu0 %v15120_v5  ;;  %v3964_v53 = vld [vmem:[#allocation3 + $0x4b0] sm:$0xff] }
 0x4fb   : > { %10644 = vmatpush2.bf16.msra.mxu1 %v15255_v21  ;;  %v3852_v21 = vld [vmem:[#allocation3 + $0x130] sm:$0xff] }
 0x4fc   : > { %10645 = vmatprep.subr.bf16.mxu1 %v15248_v22  ;;  %v3976_v22 = vld [vmem:[#allocation3 + $0x510] sm:$0xff] }
 0x4fd   : > { %10605 = vmatpush2.bf16.msra.mxu0 %v15119_v1  ;;  %v14450_v45 = vcombine.high %v3976_v22, %v3980_v23 }
 0x4fe   : > { %10656 = vmatprep.subr.bf16.mxu0 %v14346_v30  ;;  %v14322_v30 = vcombine.high %v3848_v18, %v3852_v21 }
 0x4ff   : > { %10646 = vmatpush2.bf16.msra.mxu1 %v15247_v29  ;;  %v14457_v29 = vcombine.low %v3984_v15, %v3988_v59  ;;  %v14441_v15 = vcombine.low %v3968_v36, %v3972_v37 }
 0x500   : > { %10697 = vmatprep.subr.bf16.mxu1 %v14474_v63  ;;  %v10362_v55 = vpop.f32.mrf.mxu0  ;;  %10607 = vmatmul.mubr.bf16.vlgmr.msra.gmra.mxu0 %v17399_v10 }
 0x501   : > { %v10363_v62 = vadd.f32 %v10362_v55, %v4851_v38  ;;  %10657 = vmatpush1.bf16.msra.mxu0 %v14345_v2  ;;  %10688 = vmatprep.mubr.bf16.mxu0 %v17267_v61  ;;  %v14321_v38 = vcombine.low %v3848_v18, %v3852_v21  ;;  %v14449_v2 = vcombine.low %v3976_v22, %v3980_v23  ;;  %v3816_v18 = vld [vmem:[#allocation3 + $0x10] sm:$0xff] }
 0x502   : > { %v10403_v13 = vpop.f32.mrf.mxu1  ;;  %10648 = vmatmul.mubr.bf16.vlgmr.msra.gmra.mxu1 %v17404_v16  ;;  %v10364_v9 = vpop.f32.mrf.mxu0  ;;  %10658 = vmatprep.subr.bf16.mxu0 %v14338_v44  ;;  %v14442_v44 = vcombine.high %v3968_v36, %v3972_v37  ;;  %v14313_v55 = vcombine.low %v3840_v31, %v3844_v11  ;;  %v3820_v21 = vld [vmem:[#allocation3 + $0x30] sm:$0xff] }
 0x503   : > { %10698 = vmatpush1.bf16.msra.mxu1 %v14473_v42  ;;  %v17449_v14 = vadd.f32 %v10403_v13, %v10363_v62  ;;  %v10365_v60 = vadd.f32 %v10364_v9, %v4855_v43  ;;  %10729 = vmatprep.mubr.bf16.mxu1 %v17278_v28  ;;  %v14314_v42 = vcombine.high %v3840_v31, %v3844_v11  ;;  %v3832_v43 = vld [vmem:[#allocation3 + $0x90] sm:$0xff] }
 0x504   : > { %v10405_v39 = vpop.f32.mrf.mxu1  ;;  %10699 = vmatprep.subr.bf16.mxu1 %v14466_v48  ;;  %v10366_v5 = vpop.f32.mrf.mxu0  ;;  %v3836_v48 = vld [vmem:[#allocation3 + $0xb0] sm:$0xff]  ;;  %v14434_v62 = vcombine.high %v3960_v49, %v3964_v53  ;;  %v14289_v31 = vcombine.low %v3816_v18, %v3820_v21 }
 0x505   : > { %v17453_v41 = vadd.f32 %v10405_v39, %v10365_v60  ;;  %10659 = vmatpush1.bf16.msra.mxu0 %v14337_v20  ;;  %v14306_v59 = vcombine.high %v3832_v43, %v3836_v48  ;;  %v3824_v13 = vld [vmem:[#allocation3 + $0x50] sm:$0xff]  ;;  %v14433_v60 = vcombine.low %v3960_v49, %v3964_v53 }
 0x506   : > { %v10407_v3 = vpop.f32.mrf.mxu1  ;;  %v10367_v1 = vpop.f32.mrf.mxu0  ;;  %10660 = vmatprep.subr.bf16.mxu0 %v14330_v12  ;;  %v3828_v20 = vld [vmem:[#allocation3 + $0x70] sm:$0xff]  ;;  %v14305_v12 = vcombine.low %v3832_v43, %v3836_v48 }
 0x507   : > { %10700 = vmatpush1.bf16.msra.mxu1 %v14465_v7  ;;  %v3952_v9 = vld [vmem:[#allocation3 + $0x450] sm:$0xff]  ;;  %v14298_v39 = vcombine.high %v3824_v13, %v3828_v20  ;;  %v14297_v23 = vcombine.low %v3824_v13, %v3828_v20 }
 0x508   : > { %v10408_v63 = vpop.f32.mrf.mxu1  ;;  %10701 = vmatprep.subr.bf16.mxu1 %v14458_v32  ;;  %v3956_v7 = vld [vmem:[#allocation3 + $0x470] sm:$0xff] }
 0x509   : > { %10661 = vmatpush1.bf16.msra.mxu0 %v14329_v40  ;;  %v14426_v32 = vcombine.high %v3952_v9, %v3956_v7  ;;  %v3944_v5 = vld [vmem:[#allocation3 + $0x410] sm:$0xff]  ;;  %v14425_v3 = vcombine.low %v3952_v9, %v3956_v7  ;;  %v14290_v40 = vcombine.high %v3816_v18, %v3820_v21 }
 0x50a   : > { %10662 = vmatprep.subr.bf16.mxu0 %v14322_v30  ;;  %v3948_v22 = vld [vmem:[#allocation3 + $0x430] sm:$0xff] }
 0x50b   : > { %10702 = vmatpush1.bf16.msra.mxu1 %v14457_v29  ;;  %v14418_v1 = vcombine.high %v3944_v5, %v3948_v22  ;;  %v3936_v29 = vld [vmem:[#allocation3 + $0x3d0] sm:$0xff]  ;;  %v14417_v11 = vcombine.low %v3944_v5, %v3948_v22 }
 0x50c   : > { %10703 = vmatprep.subr.bf16.mxu1 %v14450_v45  ;;  %v3940_v30 = vld [vmem:[#allocation3 + $0x3f0] sm:$0xff] }
 0x50d   : > { %10663 = vmatpush1.bf16.msra.mxu0 %v14321_v38  ;;  %v4064_v63 = vld [vmem:[#allocation3 + $0x7d0] sm:$0xff]  ;;  %v14410_v36 = vcombine.high %v3936_v29, %v3940_v30  ;;  %v14409_v43 = vcombine.low %v3936_v29, %v3940_v30 }
 0x50e   : > { %10664 = vmatprep.subr.bf16.mxu0 %v14314_v42  ;;  %v4068_v45 = vld [vmem:[#allocation3 + $0x7f0] sm:$0xff] }
 0x50f   : > { %10704 = vmatpush1.bf16.msra.mxu1 %v14449_v2  ;;  %v14538_v37 = vcombine.high %v4064_v63, %v4068_v45  ;;  %v3928_v38 = vld [vmem:[#allocation3 + $0x390] sm:$0xff]  ;;  %v14537_v48 = vcombine.low %v4064_v63, %v4068_v45 }
 0x510   : > { %10705 = vmatprep.subr.bf16.mxu1 %v14442_v44  ;;  %v3932_v2 = vld [vmem:[#allocation3 + $0x3b0] sm:$0xff] }
 0x511   : > { %10665 = vmatpush1.bf16.msra.mxu0 %v14313_v55  ;;  %v4056_v42 = vld [vmem:[#allocation3 + $0x790] sm:$0xff]  ;;  %v14402_v49 = vcombine.high %v3928_v38, %v3932_v2  ;;  %v14401_v13 = vcombine.low %v3928_v38, %v3932_v2 }
 0x512   : > { %10666 = vmatprep.subr.bf16.mxu0 %v14306_v59  ;;  %v4060_v44 = vld [vmem:[#allocation3 + $0x7b0] sm:$0xff] }
 0x513   : > { %10706 = vmatpush1.bf16.msra.mxu1 %v14441_v15  ;;  %v14530_v53 = vcombine.high %v4056_v42, %v4060_v44  ;;  %v3920_v55 = vld [vmem:[#allocation3 + $0x350] sm:$0xff]  ;;  %v14529_v20 = vcombine.low %v4056_v42, %v4060_v44 }
 0x514   : > { %10707 = vmatprep.subr.bf16.mxu1 %v14434_v62  ;;  %v3924_v15 = vld [vmem:[#allocation3 + $0x370] sm:$0xff] }
 0x515   : > { %10667 = vmatpush1.bf16.msra.mxu0 %v14305_v12  ;;  %v4048_v59 = vld [vmem:[#allocation3 + $0x750] sm:$0xff]  ;;  %v14394_v9 = vcombine.high %v3920_v55, %v3924_v15  ;;  %v14393_v18 = vcombine.low %v3920_v55, %v3924_v15 }
 0x516   : > { %10668 = vmatprep.subr.bf16.mxu0 %v14298_v39  ;;  %v4052_v62 = vld [vmem:[#allocation3 + $0x770] sm:$0xff] }
 0x517   : > { %10708 = vmatpush1.bf16.msra.mxu1 %v14433_v60  ;;  %v14522_v7 = vcombine.high %v4048_v59, %v4052_v62  ;;  %v3912_v12 = vld [vmem:[#allocation3 + $0x310] sm:$0xff]  ;;  %v14521_v21 = vcombine.low %v4048_v59, %v4052_v62 }
 0x518   : > { %10709 = vmatprep.subr.bf16.mxu1 %v14426_v32  ;;  %v3916_v60 = vld [vmem:[#allocation3 + $0x330] sm:$0xff] }
 0x519   : > { %10669 = vmatpush1.bf16.msra.mxu0 %v14297_v23  ;;  %v4040_v39 = vld [vmem:[#allocation3 + $0x710] sm:$0xff]  ;;  %v14386_v5 = vcombine.high %v3912_v12, %v3916_v60  ;;  %v14385_v29 = vcombine.low %v3912_v12, %v3916_v60 }
 0x51a   : > { %10670 = vmatprep.subr.bf16.mxu0 %v14290_v40  ;;  %v4044_v32 = vld [vmem:[#allocation3 + $0x730] sm:$0xff] }
 0x51b   : > { %10710 = vmatpush1.bf16.msra.mxu1 %v14425_v3  ;;  %v14514_v22 = vcombine.high %v4040_v39, %v4044_v32  ;;  %v3904_v23 = vld [vmem:[#allocation3 + $0x2d0] sm:$0xff]  ;;  %v14513_v30 = vcombine.low %v4040_v39, %v4044_v32 }
 0x51c   : > { %10711 = vmatprep.subr.bf16.mxu1 %v14418_v1  ;;  %v3908_v3 = vld [vmem:[#allocation3 + $0x2f0] sm:$0xff] }
 0x51d   : > { %10671 = vmatpush1.bf16.msra.mxu0 %v14289_v31  ;;  %v4032_v40 = vld [vmem:[#allocation3 + $0x6d0] sm:$0xff]  ;;  %v14378_v63 = vcombine.high %v3904_v23, %v3908_v3  ;;  %v14377_v38 = vcombine.low %v3904_v23, %v3908_v3 }
 0x51e   : > { %10672 = vmatprep.subr.bf16.mxu0 %v14410_v36  ;;  %v4036_v1 = vld [vmem:[#allocation3 + $0x6f0] sm:$0xff] }
 0x51f   : > { %10712 = vmatpush1.bf16.msra.mxu1 %v14417_v11  ;;  %v14506_v45 = vcombine.high %v4032_v40, %v4036_v1  ;;  %v3896_v31 = vld [vmem:[#allocation3 + $0x290] sm:$0xff]  ;;  %v14505_v2 = vcombine.low %v4032_v40, %v4036_v1 }
 0x520   : > { %10713 = vmatprep.subr.bf16.mxu1 %v14538_v37  ;;  %v3900_v11 = vld [vmem:[#allocation3 + $0x2b0] sm:$0xff] }
 0x521   : > { %10673 = vmatpush2.bf16.msra.mxu0 %v14409_v43  ;;  %v4024_v36 = vld [vmem:[#allocation3 + $0x690] sm:$0xff]  ;;  %v14370_v42 = vcombine.high %v3896_v31, %v3900_v11  ;;  %v14369_v55 = vcombine.low %v3896_v31, %v3900_v11 }
 0x522   : > { %10674 = vmatprep.subr.bf16.mxu0 %v14402_v49  ;;  %v4028_v37 = vld [vmem:[#allocation3 + $0x6b0] sm:$0xff] }
 0x523   : > { %10714 = vmatpush2.bf16.msra.mxu1 %v14537_v48  ;;  %v14498_v44 = vcombine.high %v4024_v36, %v4028_v37  ;;  %v3888_v43 = vld [vmem:[#allocation3 + $0x250] sm:$0xff]  ;;  %v14497_v15 = vcombine.low %v4024_v36, %v4028_v37 }
 0x524   : > { %10715 = vmatprep.subr.bf16.mxu1 %v14530_v53  ;;  %v3892_v48 = vld [vmem:[#allocation3 + $0x270] sm:$0xff] }
 0x525   : > { %10675 = vmatpush2.bf16.msra.mxu0 %v14401_v13  ;;  %v4016_v49 = vld [vmem:[#allocation3 + $0x650] sm:$0xff]  ;;  %v14362_v59 = vcombine.high %v3888_v43, %v3892_v48  ;;  %v14361_v12 = vcombine.low %v3888_v43, %v3892_v48 }
 0x526   : > { %10676 = vmatprep.subr.bf16.mxu0 %v14394_v9  ;;  %v4020_v53 = vld [vmem:[#allocation3 + $0x670] sm:$0xff] }
 0x527   : > { %10716 = vmatpush2.bf16.msra.mxu1 %v14529_v20  ;;  %v14490_v62 = vcombine.high %v4016_v49, %v4020_v53  ;;  %v3880_v13 = vld [vmem:[#allocation3 + $0x210] sm:$0xff]  ;;  %v14489_v60 = vcombine.low %v4016_v49, %v4020_v53 }
 0x528   : > { %10717 = vmatprep.subr.bf16.mxu1 %v14522_v7  ;;  %v3884_v20 = vld [vmem:[#allocation3 + $0x230] sm:$0xff] }
 0x529   : > { %10677 = vmatpush2.bf16.msra.mxu0 %v14393_v18  ;;  %v4008_v9 = vld [vmem:[#allocation3 + $0x610] sm:$0xff]  ;;  %v14354_v39 = vcombine.high %v3880_v13, %v3884_v20  ;;  %v14353_v23 = vcombine.low %v3880_v13, %v3884_v20 }
 0x52a   : > { %10678 = vmatprep.subr.bf16.mxu0 %v14386_v5  ;;  %v4012_v7 = vld [vmem:[#allocation3 + $0x630] sm:$0xff] }
 0x52b   : > { %10718 = vmatpush2.bf16.msra.mxu1 %v14521_v21  ;;  %v14482_v32 = vcombine.high %v4008_v9, %v4012_v7  ;;  %v4128_v18 = vld [vmem:[#allocation3 + $0x9d0] sm:$0xff]  ;;  %v14481_v3 = vcombine.low %v4008_v9, %v4012_v7 }
 0x52c   : > { %10719 = vmatprep.subr.bf16.mxu1 %v14514_v22  ;;  %v4132_v21 = vld [vmem:[#allocation3 + $0x9f0] sm:$0xff] }
 0x52d   : > { %10679 = vmatpush2.bf16.msra.mxu0 %v14385_v29  ;;  %v4256_v5 = vld [vmem:[#allocation3 + $0xdd0] sm:$0xff]  ;;  %v14602_v40 = vcombine.high %v4128_v18, %v4132_v21  ;;  %v14601_v31 = vcombine.low %v4128_v18, %v4132_v21 }
 0x52e   : > { %10680 = vmatprep.subr.bf16.mxu0 %v14378_v63  ;;  %v4260_v22 = vld [vmem:[#allocation3 + $0xdf0] sm:$0xff] }
 0x52f   : > { %10720 = vmatpush2.bf16.msra.mxu1 %v14513_v30  ;;  %v14730_v1 = vcombine.high %v4256_v5, %v4260_v22  ;;  %v4120_v29 = vld [vmem:[#allocation3 + $0x990] sm:$0xff]  ;;  %v14729_v11 = vcombine.low %v4256_v5, %v4260_v22 }
 0x530   : > { %10721 = vmatprep.subr.bf16.mxu1 %v14506_v45  ;;  %v4124_v30 = vld [vmem:[#allocation3 + $0x9b0] sm:$0xff] }
 0x531   : > { %10681 = vmatpush2.bf16.msra.mxu0 %v14377_v38  ;;  %v4248_v63 = vld [vmem:[#allocation3 + $0xd90] sm:$0xff]  ;;  %v14594_v36 = vcombine.high %v4120_v29, %v4124_v30  ;;  %v14593_v53 = vcombine.low %v4120_v29, %v4124_v30 }
 0x532   : > { %10682 = vmatprep.subr.bf16.mxu0 %v14370_v42  ;;  %v4252_v45 = vld [vmem:[#allocation3 + $0xdb0] sm:$0xff] }
 0x533   : > { %10722 = vmatpush2.bf16.msra.mxu1 %v14505_v2  ;;  %v14722_v37 = vcombine.high %v4248_v63, %v4252_v45  ;;  %v4112_v38 = vld [vmem:[#allocation3 + $0x950] sm:$0xff] }
 0x534   : > { %10723 = vmatprep.subr.bf16.mxu1 %v14498_v44  ;;  %v4116_v2 = vld [vmem:[#allocation3 + $0x970] sm:$0xff] }
 0x535   : > { %10683 = vmatpush2.bf16.msra.mxu0 %v14369_v55  ;;  %v4240_v44 = vld [vmem:[#allocation3 + $0xd50] sm:$0xff]  ;;  %v14585_v21 = vcombine.low %v4112_v38, %v4116_v2 }
 0x536   : > { %10684 = vmatprep.subr.bf16.mxu0 %v14362_v59  ;;  %v4244_v43 = vld [vmem:[#allocation3 + $0xd70] sm:$0xff]  ;;  %v14586_v59 = vcombine.high %v4112_v38, %v4116_v2 }
 0x537   : > { %10724 = vmatpush2.bf16.msra.mxu1 %v14497_v15  ;;  %v14721_v15 = vcombine.low %v4248_v63, %v4252_v45  ;;  %v14714_v9 = vcombine.high %v4240_v44, %v4244_v43  ;;  %v4104_v7 = vld [vmem:[#allocation3 + $0x910] sm:$0xff] }
 0x538   : > { %10725 = vmatprep.subr.bf16.mxu1 %v14490_v62  ;;  %v4224_v29 = vld [vmem:[#allocation3 + $0xcd0] sm:$0xff] }
 0x539   : > { %10685 = vmatpush2.bf16.msra.mxu0 %v14361_v12  ;;  %v4108_v12 = vld [vmem:[#allocation3 + $0x930] sm:$0xff] }
 0x53a   : > { %10686 = vmatprep.subr.bf16.mxu0 %v14354_v39  ;;  %v4236_v39 = vld [vmem:[#allocation3 + $0xd30] sm:$0xff]  ;;  %v14578_v22 = vcombine.high %v4104_v7, %v4108_v12  ;;  %v14577_v63 = vcombine.low %v4104_v7, %v4108_v12 }
 0x53b   : > { %10726 = vmatpush2.bf16.msra.mxu1 %v14489_v60  ;;  %v4232_v60 = vld [vmem:[#allocation3 + $0xd10] sm:$0xff] }
 0x53c   : > { %10727 = vmatprep.subr.bf16.mxu1 %v14482_v32  ;;  %v4228_v30 = vld [vmem:[#allocation3 + $0xcf0] sm:$0xff]  ;;  %v14705_v45 = vcombine.low %v4232_v60, %v4236_v39 }
 0x53d   : > { %10687 = vmatpush2.bf16.msra.mxu0 %v14353_v23  ;;  %v4216_v38 = vld [vmem:[#allocation3 + $0xc90] sm:$0xff] }
 0x53e   : > { %10738 = vmatprep.subr.bf16.mxu0 %v14602_v40  ;;  %v4096_v40 = vld [vmem:[#allocation3 + $0x8d0] sm:$0xff] }
 0x53f   : > { %10728 = vmatpush2.bf16.msra.mxu1 %v14481_v3  ;;  %v14706_v3 = vcombine.high %v4232_v60, %v4236_v39  ;;  %v4220_v2 = vld [vmem:[#allocation3 + $0xcb0] sm:$0xff] }
 0x540   : > { %10779 = vmatprep.subr.bf16.mxu1 %v14730_v1  ;;  %v10444_v42 = vpop.f32.mrf.mxu0  ;;  %10689 = vmatmul.mubr.bf16.vlgmr.msra.gmra.mxu0 %v17307_v56  ;;  %v4100_v1 = vld [vmem:[#allocation3 + $0x8f0] sm:$0xff] }
 0x541   : > { %v10445_v48 = vadd.f32 %v10444_v42, %v17449_v14  ;;  %10739 = vmatpush1.bf16.msra.mxu0 %v14601_v31  ;;  %10770 = vmatprep.mubr.bf16.mxu0 %v17315_v25  ;;  %v14570_v31 = vcombine.high %v4096_v40, %v4100_v1  ;;  %v14569_v42 = vcombine.low %v4096_v40, %v4100_v1  ;;  %v4072_v7 = vld [vmem:[#allocation3 + $0x810] sm:$0xff] }
 0x542   : > { %v10485_v49 = vpop.f32.mrf.mxu1  ;;  %10730 = vmatmul.mubr.bf16.vlgmr.msra.gmra.mxu1 %v17313_v17  ;;  %v10446_v55 = vpop.f32.mrf.mxu0  ;;  %10740 = vmatprep.subr.bf16.mxu0 %v14594_v36  ;;  %v4088_v36 = vld [vmem:[#allocation3 + $0x890] sm:$0xff] }
 0x543   : > { %10780 = vmatpush1.bf16.msra.mxu1 %v14729_v11  ;;  %v17458_v62 = vadd.f32 %v10485_v49, %v10445_v48  ;;  %v10447_v13 = vadd.f32 %v10446_v55, %v17453_v41  ;;  %10811 = vmatprep.mubr.bf16.mxu1 %v17318_v26  ;;  %v14713_v41 = vcombine.low %v4240_v44, %v4244_v43  ;;  %v4080_v49 = vld [vmem:[#allocation3 + $0x850] sm:$0xff] }
 0x544   : > { %v10487_v20 = vpop.f32.mrf.mxu1  ;;  %10781 = vmatprep.subr.bf16.mxu1 %v14722_v37  ;;  %v10448_v14 = vpop.f32.mrf.mxu0  ;;  %v14698_v11 = vcombine.high %v4224_v29, %v4228_v30  ;;  %v4092_v37 = vld [vmem:[#allocation3 + $0x8b0] sm:$0xff]  ;;  %v14697_v44 = vcombine.low %v4224_v29, %v4228_v30  ;;  %v14690_v48 = vcombine.high %v4216_v38, %v4220_v2 }
 0x545   : > { %v17463_v32 = vadd.f32 %v10487_v20, %v10447_v13  ;;  %10741 = vmatpush1.bf16.msra.mxu0 %v14593_v53  ;;  %v14562_v43 = vcombine.high %v4088_v36, %v4092_v37  ;;  %v4084_v53 = vld [vmem:[#allocation3 + $0x870] sm:$0xff]  ;;  %v14689_v13 = vcombine.low %v4216_v38, %v4220_v2 }
 0x546   : > { %v10489_v18 = vpop.f32.mrf.mxu1  ;;  %v10449_v5 = vpop.f32.mrf.mxu0  ;;  %10742 = vmatprep.subr.bf16.mxu0 %v14586_v59  ;;  %v4208_v55 = vld [vmem:[#allocation3 + $0xc50] sm:$0xff]  ;;  %v14561_v59 = vcombine.low %v4088_v36, %v4092_v37  ;;  %v14554_v20 = vcombine.high %v4080_v49, %v4084_v53  ;;  %v14553_v39 = vcombine.low %v4080_v49, %v4084_v53 }
 0x547   : > { %10782 = vmatpush1.bf16.msra.mxu1 %v14721_v15  ;;  %v4212_v15 = vld [vmem:[#allocation3 + $0xc70] sm:$0xff] }
 0x548   : > { %v10490_v23 = vpop.f32.mrf.mxu1  ;;  %10783 = vmatprep.subr.bf16.mxu1 %v14714_v9  ;;  %v14682_v9 = vcombine.high %v4208_v55, %v4212_v15  ;;  %v4076_v12 = vld [vmem:[#allocation3 + $0x830] sm:$0xff]  ;;  %v14681_v18 = vcombine.low %v4208_v55, %v4212_v15 }
 0x549   : > { %10743 = vmatpush1.bf16.msra.mxu0 %v14585_v21  ;;  %v4200_v14 = vld [vmem:[#allocation3 + $0xc10] sm:$0xff]  ;;  %v14546_v21 = vcombine.high %v4072_v7, %v4076_v12  ;;  %v14545_v40 = vcombine.low %v4072_v7, %v4076_v12 }
 0x54a   : > { %10744 = vmatprep.subr.bf16.mxu0 %v14578_v22  ;;  %v4204_v60 = vld [vmem:[#allocation3 + $0xc30] sm:$0xff] }
 0x54b   : > { %10784 = vmatpush1.bf16.msra.mxu1 %v14713_v41  ;;  %v14674_v5 = vcombine.high %v4200_v14, %v4204_v60  ;;  %v4192_v41 = vld [vmem:[#allocation3 + $0xbd0] sm:$0xff]  ;;  %v14673_v1 = vcombine.low %v4200_v14, %v4204_v60 }
 0x54c   : > { %10785 = vmatprep.subr.bf16.mxu1 %v14706_v3  ;;  %v4196_v22 = vld [vmem:[#allocation3 + $0xbf0] sm:$0xff] }
 0x54d   : > { %10745 = vmatpush1.bf16.msra.mxu0 %v14577_v63  ;;  %v4320_v23 = vld [vmem:[#allocation3 + $0xfd0] sm:$0xff]  ;;  %v14666_v29 = vcombine.high %v4192_v41, %v4196_v22  ;;  %v14665_v36 = vcombine.low %v4192_v41, %v4196_v22 }
 0x54e   : > { %10746 = vmatprep.subr.bf16.mxu0 %v14570_v31  ;;  %v4324_v3 = vld [vmem:[#allocation3 + $0xff0] sm:$0xff] }
 0x54f   : > { %10786 = vmatpush1.bf16.msra.mxu1 %v14705_v45  ;;  %v14794_v30 = vcombine.high %v4320_v23, %v4324_v3  ;;  %v4184_v63 = vld [vmem:[#allocation3 + $0xb90] sm:$0xff]  ;;  %v14793_v37 = vcombine.low %v4320_v23, %v4324_v3 }
 0x550   : > { %10787 = vmatprep.subr.bf16.mxu1 %v14698_v11  ;;  %v4188_v45 = vld [vmem:[#allocation3 + $0xbb0] sm:$0xff] }
 0x551   : > { %10747 = vmatpush1.bf16.msra.mxu0 %v14569_v42  ;;  %v4312_v31 = vld [vmem:[#allocation3 + $0xf90] sm:$0xff]  ;;  %v14658_v38 = vcombine.high %v4184_v63, %v4188_v45  ;;  %v14657_v49 = vcombine.low %v4184_v63, %v4188_v45 }
 0x552   : > { %10748 = vmatprep.subr.bf16.mxu0 %v14562_v43  ;;  %v4316_v11 = vld [vmem:[#allocation3 + $0xfb0] sm:$0xff] }
 0x553   : > { %10788 = vmatpush1.bf16.msra.mxu1 %v14697_v44  ;;  %v14786_v2 = vcombine.high %v4312_v31, %v4316_v11  ;;  %v4176_v42 = vld [vmem:[#allocation3 + $0xb50] sm:$0xff]  ;;  %v14785_v53 = vcombine.low %v4312_v31, %v4316_v11 }
 0x554   : > { %10789 = vmatprep.subr.bf16.mxu1 %v14690_v48  ;;  %v4180_v44 = vld [vmem:[#allocation3 + $0xb70] sm:$0xff] }
 0x555   : > { %10749 = vmatpush1.bf16.msra.mxu0 %v14561_v59  ;;  %v4304_v43 = vld [vmem:[#allocation3 + $0xf50] sm:$0xff]  ;;  %v14650_v55 = vcombine.high %v4176_v42, %v4180_v44  ;;  %v14649_v7 = vcombine.low %v4176_v42, %v4180_v44 }
 0x556   : > { %10750 = vmatprep.subr.bf16.mxu0 %v14554_v20  ;;  %v4308_v48 = vld [vmem:[#allocation3 + $0xf70] sm:$0xff] }
 0x557   : > { %10790 = vmatpush1.bf16.msra.mxu1 %v14689_v13  ;;  %v14778_v15 = vcombine.high %v4304_v43, %v4308_v48  ;;  %v4168_v59 = vld [vmem:[#allocation3 + $0xb10] sm:$0xff]  ;;  %v14777_v12 = vcombine.low %v4304_v43, %v4308_v48 }
 0x558   : > { %10791 = vmatprep.subr.bf16.mxu1 %v14682_v9  ;;  %v4172_v13 = vld [vmem:[#allocation3 + $0xb30] sm:$0xff] }
 0x559   : > { %10751 = vmatpush1.bf16.msra.mxu0 %v14553_v39  ;;  %v4296_v20 = vld [vmem:[#allocation3 + $0xf10] sm:$0xff]  ;;  %v14642_v14 = vcombine.high %v4168_v59, %v4172_v13  ;;  %v14641_v41 = vcombine.low %v4168_v59, %v4172_v13 }
 0x55a   : > { %10752 = vmatprep.subr.bf16.mxu0 %v14546_v21  ;;  %v4300_v9 = vld [vmem:[#allocation3 + $0xf30] sm:$0xff] }
 0x55b   : > { %10792 = vmatpush1.bf16.msra.mxu1 %v14681_v18  ;;  %v14770_v60 = vcombine.high %v4296_v20, %v4300_v9  ;;  %v4160_v39 = vld [vmem:[#allocation3 + $0xad0] sm:$0xff]  ;;  %v14769_v22 = vcombine.low %v4296_v20, %v4300_v9 }
 0x55c   : > { %10793 = vmatprep.subr.bf16.mxu1 %v14674_v5  ;;  %v4164_v18 = vld [vmem:[#allocation3 + $0xaf0] sm:$0xff] }
 0x55d   : > { %10753 = vmatpush1.bf16.msra.mxu0 %v14545_v40  ;;  %v4288_v21 = vld [vmem:[#allocation3 + $0xed0] sm:$0xff]  ;;  %v14634_v23 = vcombine.high %v4160_v39, %v4164_v18  ;;  %v14633_v63 = vcombine.low %v4160_v39, %v4164_v18 }
 0x55e   : > { %10754 = vmatprep.subr.bf16.mxu0 %v14666_v29  ;;  %v4292_v5 = vld [vmem:[#allocation3 + $0xef0] sm:$0xff] }
 0x55f   : > { %10794 = vmatpush1.bf16.msra.mxu1 %v14673_v1  ;;  %v14762_v3 = vcombine.high %v4288_v21, %v4292_v5  ;;  %v4152_v40 = vld [vmem:[#allocation3 + $0xa90] sm:$0xff]  ;;  %v14761_v45 = vcombine.low %v4288_v21, %v4292_v5 }
 0x560   : > { %10795 = vmatprep.subr.bf16.mxu1 %v14794_v30  ;;  %v4156_v1 = vld [vmem:[#allocation3 + $0xab0] sm:$0xff] }
 0x561   : > { %10755 = vmatpush2.bf16.msra.mxu0 %v14665_v36  ;;  %v4280_v29 = vld [vmem:[#allocation3 + $0xe90] sm:$0xff]  ;;  %v14626_v31 = vcombine.high %v4152_v40, %v4156_v1  ;;  %v14625_v42 = vcombine.low %v4152_v40, %v4156_v1 }
 0x562   : > { %10756 = vmatprep.subr.bf16.mxu0 %v14658_v38  ;;  %v4284_v30 = vld [vmem:[#allocation3 + $0xeb0] sm:$0xff] }
 0x563   : > { %10796 = vmatpush2.bf16.msra.mxu1 %v14793_v37  ;;  %v14754_v11 = vcombine.high %v4280_v29, %v4284_v30  ;;  %v4144_v36 = vld [vmem:[#allocation3 + $0xa50] sm:$0xff]  ;;  %v14753_v44 = vcombine.low %v4280_v29, %v4284_v30 }
 0x564   : > { %10797 = vmatprep.subr.bf16.mxu1 %v14786_v2  ;;  %v4148_v37 = vld [vmem:[#allocation3 + $0xa70] sm:$0xff] }
 0x565   : > { %10757 = vmatpush2.bf16.msra.mxu0 %v14657_v49  ;;  %v4272_v38 = vld [vmem:[#allocation3 + $0xe50] sm:$0xff]  ;;  %v14618_v43 = vcombine.high %v4144_v36, %v4148_v37  ;;  %v14617_v59 = vcombine.low %v4144_v36, %v4148_v37 }
 0x566   : > { %10758 = vmatprep.subr.bf16.mxu0 %v14650_v55  ;;  %v4276_v2 = vld [vmem:[#allocation3 + $0xe70] sm:$0xff] }
 0x567   : > { %10798 = vmatpush2.bf16.msra.mxu1 %v14785_v53  ;;  %v14746_v48 = vcombine.high %v4272_v38, %v4276_v2  ;;  %v4136_v49 = vld [vmem:[#allocation3 + $0xa10] sm:$0xff]  ;;  %v14745_v13 = vcombine.low %v4272_v38, %v4276_v2 }
 0x568   : > { %10799 = vmatprep.subr.bf16.mxu1 %v14778_v15  ;;  %v4140_v53 = vld [vmem:[#allocation3 + $0xa30] sm:$0xff] }
 0x569   : > { %10759 = vmatpush2.bf16.msra.mxu0 %v14649_v7  ;;  %v4264_v55 = vld [vmem:[#allocation3 + $0xe10] sm:$0xff]  ;;  %v14610_v20 = vcombine.high %v4136_v49, %v4140_v53  ;;  %v14609_v39 = vcombine.low %v4136_v49, %v4140_v53 }
 0x56a   : > { %10760 = vmatprep.subr.bf16.mxu0 %v14642_v14  ;;  %v4268_v15 = vld [vmem:[#allocation3 + $0xe30] sm:$0xff] }
 0x56b   : > { %10800 = vmatpush2.bf16.msra.mxu1 %v14777_v12  ;;  %v14738_v9 = vcombine.high %v4264_v55, %v4268_v15  ;;  %v4384_v7 = vld [vmem:[#allocation3 + $0x11d0] sm:$0xff]  ;;  %v14737_v18 = vcombine.low %v4264_v55, %v4268_v15 }
 0x56c   : > { %10801 = vmatprep.subr.bf16.mxu1 %v14770_v60  ;;  %v4388_v12 = vld [vmem:[#allocation3 + $0x11f0] sm:$0xff] }
 0x56d   : > { %10761 = vmatpush2.bf16.msra.mxu0 %v14641_v41  ;;  %v4512_v14 = vld [vmem:[#allocation3 + $0x15d0] sm:$0xff]  ;;  %v14858_v21 = vcombine.high %v4384_v7, %v4388_v12  ;;  %v14857_v40 = vcombine.low %v4384_v7, %v4388_v12 }
 0x56e   : > { %10762 = vmatprep.subr.bf16.mxu0 %v14634_v23  ;;  %v4516_v60 = vld [vmem:[#allocation3 + $0x15f0] sm:$0xff] }
 0x56f   : > { %10802 = vmatpush2.bf16.msra.mxu1 %v14769_v22  ;;  %v14986_v5 = vcombine.high %v4512_v14, %v4516_v60  ;;  %v4376_v41 = vld [vmem:[#allocation3 + $0x1190] sm:$0xff]  ;;  %v14985_v1 = vcombine.low %v4512_v14, %v4516_v60 }
 0x570   : > { %10803 = vmatprep.subr.bf16.mxu1 %v14762_v3  ;;  %v4380_v22 = vld [vmem:[#allocation3 + $0x11b0] sm:$0xff] }
 0x571   : > { %10763 = vmatpush2.bf16.msra.mxu0 %v14633_v63  ;;  %v4504_v23 = vld [vmem:[#allocation3 + $0x1590] sm:$0xff]  ;;  %v14850_v29 = vcombine.high %v4376_v41, %v4380_v22  ;;  %v14849_v2 = vcombine.low %v4376_v41, %v4380_v22 }
 0x572   : > { %10764 = vmatprep.subr.bf16.mxu0 %v14626_v31  ;;  %v4508_v3 = vld [vmem:[#allocation3 + $0x15b0] sm:$0xff] }
 0x573   : > { %10804 = vmatpush2.bf16.msra.mxu1 %v14761_v45  ;;  %v14978_v30 = vcombine.high %v4504_v23, %v4508_v3  ;;  %v4368_v63 = vld [vmem:[#allocation3 + $0x1150] sm:$0xff] }
 0x574   : > { %10805 = vmatprep.subr.bf16.mxu1 %v14754_v11  ;;  %v4372_v45 = vld [vmem:[#allocation3 + $0x1170] sm:$0xff] }
 0x575   : > { %10765 = vmatpush2.bf16.msra.mxu0 %v14625_v42  ;;  %v4496_v11 = vld [vmem:[#allocation3 + $0x1550] sm:$0xff]  ;;  %v14841_v12 = vcombine.low %v4368_v63, %v4372_v45 }
 0x576   : > { %10766 = vmatprep.subr.bf16.mxu0 %v14618_v43  ;;  %v4500_v36 = vld [vmem:[#allocation3 + $0x1570] sm:$0xff]  ;;  %v14842_v43 = vcombine.high %v4368_v63, %v4372_v45 }
 0x577   : > { %10806 = vmatpush2.bf16.msra.mxu1 %v14753_v44  ;;  %v14977_v44 = vcombine.low %v4504_v23, %v4508_v3  ;;  %v14970_v55 = vcombine.high %v4496_v11, %v4500_v36  ;;  %v4360_v15 = vld [vmem:[#allocation3 + $0x1110] sm:$0xff] }
 0x578   : > { %10807 = vmatprep.subr.bf16.mxu1 %v14746_v48  ;;  %v4480_v41 = vld [vmem:[#allocation3 + $0x14d0] sm:$0xff] }
 0x579   : > { %10767 = vmatpush2.bf16.msra.mxu0 %v14617_v59  ;;  %v4364_v59 = vld [vmem:[#allocation3 + $0x1130] sm:$0xff] }
 0x57a   : > { %10768 = vmatprep.subr.bf16.mxu0 %v14610_v20  ;;  %v4492_v20 = vld [vmem:[#allocation3 + $0x1530] sm:$0xff]  ;;  %v14834_v60 = vcombine.high %v4360_v15, %v4364_v59  ;;  %v14833_v23 = vcombine.low %v4360_v15, %v4364_v59 }
 0x57b   : > { %10808 = vmatpush2.bf16.msra.mxu1 %v14745_v13  ;;  %v4488_v13 = vld [vmem:[#allocation3 + $0x1510] sm:$0xff] }
 0x57c   : > { %10809 = vmatprep.subr.bf16.mxu1 %v14738_v9  ;;  %v4484_v22 = vld [vmem:[#allocation3 + $0x14f0] sm:$0xff]  ;;  %v14961_v3 = vcombine.low %v4488_v13, %v4492_v20 }
 0x57d   : > { %10769 = vmatpush2.bf16.msra.mxu0 %v14609_v39  ;;  %v4472_v63 = vld [vmem:[#allocation3 + $0x1490] sm:$0xff] }
 0x57e   : > { %10820 = vmatprep.subr.bf16.mxu0 %v14858_v21  ;;  %v4352_v21 = vld [vmem:[#allocation3 + $0x10d0] sm:$0xff] }
 0x57f   : > { %10810 = vmatpush2.bf16.msra.mxu1 %v14737_v18  ;;  %v14962_v18 = vcombine.high %v4488_v13, %v4492_v20  ;;  %v4476_v45 = vld [vmem:[#allocation3 + $0x14b0] sm:$0xff] }
 0x580   : > { %10861 = vmatprep.subr.bf16.mxu1 %v14986_v5  ;;  %v10526_v31 = vpop.f32.mrf.mxu0  ;;  %10771 = vmatmul.mubr.bf16.vlgmr.msra.gmra.mxu0 %v17345_v8  ;;  %v4356_v5 = vld [vmem:[#allocation3 + $0x10f0] sm:$0xff] }
 0x581   : > { %v10527_v37 = vadd.f32 %v10526_v31, %v17458_v62  ;;  %10821 = vmatpush1.bf16.msra.mxu0 %v14857_v40  ;;  %10852 = vmatprep.mubr.bf16.mxu0 %v17353_v33  ;;  %v14826_v40 = vcombine.high %v4352_v21, %v4356_v5  ;;  %v14825_v31 = vcombine.low %v4352_v21, %v4356_v5  ;;  %v4328_v15 = vld [vmem:[#allocation3 + $0x1010] sm:$0xff] }
 0x582   : > { %v10567_v38 = vpop.f32.mrf.mxu1  ;;  %10812 = vmatmul.mubr.bf16.vlgmr.msra.gmra.mxu1 %v17351_v27  ;;  %v10528_v42 = vpop.f32.mrf.mxu0  ;;  %10822 = vmatprep.subr.bf16.mxu0 %v14850_v29  ;;  %v4344_v29 = vld [vmem:[#allocation3 + $0x1090] sm:$0xff] }
 0x583   : > { %10862 = vmatpush1.bf16.msra.mxu1 %v14985_v1  ;;  %v17468_v48 = vadd.f32 %v10567_v38, %v10527_v37  ;;  %v10529_v49 = vadd.f32 %v10528_v42, %v17463_v32  ;;  %10893 = vmatprep.mubr.bf16.mxu1 %v17356_v34  ;;  %v14969_v32 = vcombine.low %v4496_v11, %v4500_v36  ;;  %v4336_v38 = vld [vmem:[#allocation3 + $0x1050] sm:$0xff] }
 0x584   : > { %v10569_v53 = vpop.f32.mrf.mxu1  ;;  %10863 = vmatprep.subr.bf16.mxu1 %v14978_v30  ;;  %v10530_v62 = vpop.f32.mrf.mxu0  ;;  %v14954_v1 = vcombine.high %v4480_v41, %v4484_v22  ;;  %v4348_v30 = vld [vmem:[#allocation3 + $0x10b0] sm:$0xff]  ;;  %v14953_v11 = vcombine.low %v4480_v41, %v4484_v22  ;;  %v14946_v37 = vcombine.high %v4472_v63, %v4476_v45 }
 0x585   : > { %v17473_v9 = vadd.f32 %v10569_v53, %v10529_v49  ;;  %10823 = vmatpush1.bf16.msra.mxu0 %v14849_v2  ;;  %v14818_v36 = vcombine.high %v4344_v29, %v4348_v30  ;;  %v4340_v2 = vld [vmem:[#allocation3 + $0x1070] sm:$0xff]  ;;  %v14945_v49 = vcombine.low %v4472_v63, %v4476_v45 }
 0x586   : > { %v10571_v7 = vpop.f32.mrf.mxu1  ;;  %v10531_v14 = vpop.f32.mrf.mxu0  ;;  %10824 = vmatprep.subr.bf16.mxu0 %v14842_v43  ;;  %v4464_v42 = vld [vmem:[#allocation3 + $0x1450] sm:$0xff]  ;;  %v14817_v43 = vcombine.low %v4344_v29, %v4348_v30  ;;  %v14810_v53 = vcombine.high %v4336_v38, %v4340_v2  ;;  %v14809_v20 = vcombine.low %v4336_v38, %v4340_v2 }
 0x587   : > { %10864 = vmatpush1.bf16.msra.mxu1 %v14977_v44  ;;  %v4468_v44 = vld [vmem:[#allocation3 + $0x1470] sm:$0xff] }
 0x588   : > { %v10572_v39 = vpop.f32.mrf.mxu1  ;;  %10865 = vmatprep.subr.bf16.mxu1 %v14970_v55  ;;  %v14938_v55 = vcombine.high %v4464_v42, %v4468_v44  ;;  %v4332_v59 = vld [vmem:[#allocation3 + $0x1030] sm:$0xff]  ;;  %v14937_v7 = vcombine.low %v4464_v42, %v4468_v44 }
 0x589   : > { %10825 = vmatpush1.bf16.msra.mxu0 %v14841_v12  ;;  %v4456_v62 = vld [vmem:[#allocation3 + $0x1410] sm:$0xff]  ;;  %v14802_v12 = vcombine.high %v4328_v15, %v4332_v59  ;;  %v14801_v21 = vcombine.low %v4328_v15, %v4332_v59 }
 0x58a   : > { %10826 = vmatprep.subr.bf16.mxu0 %v14834_v60  ;;  %v4460_v13 = vld [vmem:[#allocation3 + $0x1430] sm:$0xff] }
 0x58b   : > { %10866 = vmatpush1.bf16.msra.mxu1 %v14969_v32  ;;  %v14930_v14 = vcombine.high %v4456_v62, %v4460_v13  ;;  %v4448_v32 = vld [vmem:[#allocation3 + $0x13d0] sm:$0xff]  ;;  %v14929_v5 = vcombine.low %v4456_v62, %v4460_v13 }
 0x58c   : > { %10867 = vmatprep.subr.bf16.mxu1 %v14962_v18  ;;  %v4452_v60 = vld [vmem:[#allocation3 + $0x13f0] sm:$0xff] }
 0x58d   : > { %10827 = vmatpush1.bf16.msra.mxu0 %v14833_v23  ;;  %v4576_v39 = vld [vmem:[#allocation3 + $0x17d0] sm:$0xff]  ;;  %v14922_v41 = vcombine.high %v4448_v32, %v4452_v60  ;;  %v14921_v29 = vcombine.low %v4448_v32, %v4452_v60 }
 0x58e   : > { %10828 = vmatprep.subr.bf16.mxu0 %v14826_v40  ;;  %v4580_v18 = vld [vmem:[#allocation3 + $0x17f0] sm:$0xff] }
 0x58f   : > { %10868 = vmatpush1.bf16.msra.mxu1 %v14961_v3  ;;  %v15050_v22 = vcombine.high %v4576_v39, %v4580_v18  ;;  %v4440_v23 = vld [vmem:[#allocation3 + $0x1390] sm:$0xff]  ;;  %v15049_v30 = vcombine.low %v4576_v39, %v4580_v18 }
 0x590   : > { %10869 = vmatprep.subr.bf16.mxu1 %v14954_v1  ;;  %v4444_v3 = vld [vmem:[#allocation3 + $0x13b0] sm:$0xff] }
 0x591   : > { %10829 = vmatpush1.bf16.msra.mxu0 %v14825_v31  ;;  %v4568_v40 = vld [vmem:[#allocation3 + $0x1790] sm:$0xff]  ;;  %v14914_v63 = vcombine.high %v4440_v23, %v4444_v3  ;;  %v14913_v38 = vcombine.low %v4440_v23, %v4444_v3 }
 0x592   : > { %10830 = vmatprep.subr.bf16.mxu0 %v14818_v36  ;;  %v4572_v1 = vld [vmem:[#allocation3 + $0x17b0] sm:$0xff] }
 0x593   : > { %10870 = vmatpush1.bf16.msra.mxu1 %v14953_v11  ;;  %v15042_v45 = vcombine.high %v4568_v40, %v4572_v1  ;;  %v4432_v31 = vld [vmem:[#allocation3 + $0x1350] sm:$0xff]  ;;  %v15041_v2 = vcombine.low %v4568_v40, %v4572_v1 }
 0x594   : > { %10871 = vmatprep.subr.bf16.mxu1 %v14946_v37  ;;  %v4436_v11 = vld [vmem:[#allocation3 + $0x1370] sm:$0xff] }
 0x595   : > { %10831 = vmatpush1.bf16.msra.mxu0 %v14817_v43  ;;  %v4560_v36 = vld [vmem:[#allocation3 + $0x1750] sm:$0xff]  ;;  %v14906_v42 = vcombine.high %v4432_v31, %v4436_v11  ;;  %v14905_v15 = vcombine.low %v4432_v31, %v4436_v11 }
 0x596   : > { %10832 = vmatprep.subr.bf16.mxu0 %v14810_v53  ;;  %v4564_v37 = vld [vmem:[#allocation3 + $0x1770] sm:$0xff] }
 0x597   : > { %10872 = vmatpush1.bf16.msra.mxu1 %v14945_v49  ;;  %v15034_v44 = vcombine.high %v4560_v36, %v4564_v37  ;;  %v4424_v43 = vld [vmem:[#allocation3 + $0x1310] sm:$0xff]  ;;  %v15033_v59 = vcombine.low %v4560_v36, %v4564_v37 }
 0x598   : > { %10873 = vmatprep.subr.bf16.mxu1 %v14938_v55  ;;  %v4428_v49 = vld [vmem:[#allocation3 + $0x1330] sm:$0xff] }
 0x599   : > { %10833 = vmatpush1.bf16.msra.mxu0 %v14809_v20  ;;  %v4552_v53 = vld [vmem:[#allocation3 + $0x1710] sm:$0xff]  ;;  %v14898_v62 = vcombine.high %v4424_v43, %v4428_v49  ;;  %v14897_v32 = vcombine.low %v4424_v43, %v4428_v49 }
 0x59a   : > { %10834 = vmatprep.subr.bf16.mxu0 %v14802_v12  ;;  %v4556_v55 = vld [vmem:[#allocation3 + $0x1730] sm:$0xff] }
 0x59b   : > { %10874 = vmatpush1.bf16.msra.mxu1 %v14937_v7  ;;  %v15026_v13 = vcombine.high %v4552_v53, %v4556_v55  ;;  %v4416_v20 = vld [vmem:[#allocation3 + $0x12d0] sm:$0xff]  ;;  %v15025_v60 = vcombine.low %v4552_v53, %v4556_v55 }
 0x59c   : > { %10875 = vmatprep.subr.bf16.mxu1 %v14930_v14  ;;  %v4420_v7 = vld [vmem:[#allocation3 + $0x12f0] sm:$0xff] }
 0x59d   : > { %10835 = vmatpush1.bf16.msra.mxu0 %v14801_v21  ;;  %v4544_v12 = vld [vmem:[#allocation3 + $0x16d0] sm:$0xff]  ;;  %v14890_v39 = vcombine.high %v4416_v20, %v4420_v7  ;;  %v14889_v23 = vcombine.low %v4416_v20, %v4420_v7 }
 0x59e   : > { %10836 = vmatprep.subr.bf16.mxu0 %v14922_v41  ;;  %v4548_v14 = vld [vmem:[#allocation3 + $0x16f0] sm:$0xff] }
 0x59f   : > { %10876 = vmatpush1.bf16.msra.mxu1 %v14929_v5  ;;  %v15018_v18 = vcombine.high %v4544_v12, %v4548_v14  ;;  %v4408_v21 = vld [vmem:[#allocation3 + $0x1290] sm:$0xff]  ;;  %v15017_v3 = vcombine.low %v4544_v12, %v4548_v14 }
 0x5a0   : > { %10877 = vmatprep.subr.bf16.mxu1 %v15050_v22  ;;  %v4412_v5 = vld [vmem:[#allocation3 + $0x12b0] sm:$0xff] }
 0x5a1   : > { %10837 = vmatpush2.bf16.msra.mxu0 %v14921_v29  ;;  %v4536_v41 = vld [vmem:[#allocation3 + $0x1690] sm:$0xff]  ;;  %v14882_v40 = vcombine.high %v4408_v21, %v4412_v5  ;;  %v14881_v31 = vcombine.low %v4408_v21, %v4412_v5 }
 0x5a2   : > { %10838 = vmatprep.subr.bf16.mxu0 %v14914_v63  ;;  %v4540_v22 = vld [vmem:[#allocation3 + $0x16b0] sm:$0xff] }
 0x5a3   : > { %10878 = vmatpush2.bf16.msra.mxu1 %v15049_v30  ;;  %v15010_v1 = vcombine.high %v4536_v41, %v4540_v22  ;;  %v4400_v29 = vld [vmem:[#allocation3 + $0x1250] sm:$0xff]  ;;  %v15009_v11 = vcombine.low %v4536_v41, %v4540_v22 }
 0x5a4   : > { %10879 = vmatprep.subr.bf16.mxu1 %v15042_v45  ;;  %v4404_v30 = vld [vmem:[#allocation3 + $0x1270] sm:$0xff] }
 0x5a5   : > { %10839 = vmatpush2.bf16.msra.mxu0 %v14913_v38  ;;  %v4528_v63 = vld [vmem:[#allocation3 + $0x1650] sm:$0xff]  ;;  %v14874_v36 = vcombine.high %v4400_v29, %v4404_v30  ;;  %v14873_v43 = vcombine.low %v4400_v29, %v4404_v30 }
 0x5a6   : > { %10840 = vmatprep.subr.bf16.mxu0 %v14906_v42  ;;  %v4532_v45 = vld [vmem:[#allocation3 + $0x1670] sm:$0xff] }
 0x5a7   : > { %10880 = vmatpush2.bf16.msra.mxu1 %v15041_v2  ;;  %v15002_v37 = vcombine.high %v4528_v63, %v4532_v45  ;;  %v4392_v38 = vld [vmem:[#allocation3 + $0x1210] sm:$0xff]  ;;  %v15001_v49 = vcombine.low %v4528_v63, %v4532_v45 }
 0x5a8   : > { %10881 = vmatprep.subr.bf16.mxu1 %v15034_v44  ;;  %v4396_v2 = vld [vmem:[#allocation3 + $0x1230] sm:$0xff] }
 0x5a9   : > { %10841 = vmatpush2.bf16.msra.mxu0 %v14905_v15  ;;  %v4520_v42 = vld [vmem:[#allocation3 + $0x1610] sm:$0xff]  ;;  %v14866_v53 = vcombine.high %v4392_v38, %v4396_v2  ;;  %v14865_v20 = vcombine.low %v4392_v38, %v4396_v2 }
 0x5aa   : > { %10842 = vmatprep.subr.bf16.mxu0 %v14898_v62  ;;  %v4524_v44 = vld [vmem:[#allocation3 + $0x1630] sm:$0xff] }
 0x5ab   : > { %10882 = vmatpush2.bf16.msra.mxu1 %v15033_v59  ;;  %v14994_v55 = vcombine.high %v4520_v42, %v4524_v44  ;;  %v4640_v15 = vld [vmem:[#allocation3 + $0x19d0] sm:$0xff]  ;;  %v14993_v7 = vcombine.low %v4520_v42, %v4524_v44 }
 0x5ac   : > { %10883 = vmatprep.subr.bf16.mxu1 %v15026_v13  ;;  %v4644_v59 = vld [vmem:[#allocation3 + $0x19f0] sm:$0xff] }
 0x5ad   : > { %10843 = vmatpush2.bf16.msra.mxu0 %v14897_v32  ;;  %v4768_v62 = vld [vmem:[#allocation3 + $0x1dd0] sm:$0xff]  ;;  %v15114_v12 = vcombine.high %v4640_v15, %v4644_v59  ;;  %v15113_v21 = vcombine.low %v4640_v15, %v4644_v59 }
 0x5ae   : > { %10844 = vmatprep.subr.bf16.mxu0 %v14890_v39  ;;  %v4772_v13 = vld [vmem:[#allocation3 + $0x1df0] sm:$0xff] }
 0x5af   : > { %10884 = vmatpush2.bf16.msra.mxu1 %v15025_v60  ;;  %v15242_v14 = vcombine.high %v4768_v62, %v4772_v13  ;;  %v4632_v32 = vld [vmem:[#allocation3 + $0x1990] sm:$0xff]  ;;  %v15241_v5 = vcombine.low %v4768_v62, %v4772_v13 }
 0x5b0   : > { %10885 = vmatprep.subr.bf16.mxu1 %v15018_v18  ;;  %v4636_v60 = vld [vmem:[#allocation3 + $0x19b0] sm:$0xff] }
 0x5b1   : > { %10845 = vmatpush2.bf16.msra.mxu0 %v14889_v23  ;;  %v4760_v39 = vld [vmem:[#allocation3 + $0x1d90] sm:$0xff]  ;;  %v15106_v41 = vcombine.high %v4632_v32, %v4636_v60  ;;  %v15105_v45 = vcombine.low %v4632_v32, %v4636_v60 }
 0x5b2   : > { %10846 = vmatprep.subr.bf16.mxu0 %v14882_v40  ;;  %v4764_v18 = vld [vmem:[#allocation3 + $0x1db0] sm:$0xff] }
 0x5b3   : > { %10886 = vmatpush2.bf16.msra.mxu1 %v15017_v3  ;;  %v15234_v22 = vcombine.high %v4760_v39, %v4764_v18  ;;  %v4624_v23 = vld [vmem:[#allocation3 + $0x1950] sm:$0xff] }
 0x5b4   : > { %10887 = vmatprep.subr.bf16.mxu1 %v15010_v1  ;;  %v4628_v3 = vld [vmem:[#allocation3 + $0x1970] sm:$0xff] }
 0x5b5   : > { %10847 = vmatpush2.bf16.msra.mxu0 %v14881_v31  ;;  %v4752_v1 = vld [vmem:[#allocation3 + $0x1d50] sm:$0xff]  ;;  %v15097_v59 = vcombine.low %v4624_v23, %v4628_v3 }
 0x5b6   : > { %10848 = vmatprep.subr.bf16.mxu0 %v14874_v36  ;;  %v4756_v29 = vld [vmem:[#allocation3 + $0x1d70] sm:$0xff]  ;;  %v15098_v36 = vcombine.high %v4624_v23, %v4628_v3 }
 0x5b7   : > { %10888 = vmatpush2.bf16.msra.mxu1 %v15009_v11  ;;  %v15233_v11 = vcombine.low %v4760_v39, %v4764_v18  ;;  %v15226_v42 = vcombine.high %v4752_v1, %v4756_v29  ;;  %v4616_v44 = vld [vmem:[#allocation3 + $0x1910] sm:$0xff] }
 0x5b8   : > { %10889 = vmatprep.subr.bf16.mxu1 %v15002_v37  ;;  %v4736_v32 = vld [vmem:[#allocation3 + $0x1cd0] sm:$0xff] }
 0x5b9   : > { %10849 = vmatpush2.bf16.msra.mxu0 %v14873_v43  ;;  %v4620_v43 = vld [vmem:[#allocation3 + $0x1930] sm:$0xff] }
 0x5ba   : > { %10850 = vmatprep.subr.bf16.mxu0 %v14866_v53  ;;  %v4748_v53 = vld [vmem:[#allocation3 + $0x1d30] sm:$0xff]  ;;  %v15090_v13 = vcombine.high %v4616_v44, %v4620_v43  ;;  %v15089_v39 = vcombine.low %v4616_v44, %v4620_v43 }
 0x5bb   : > { %10890 = vmatpush2.bf16.msra.mxu1 %v15001_v49  ;;  %v4744_v49 = vld [vmem:[#allocation3 + $0x1d10] sm:$0xff] }
 0x5bc   : > { %10891 = vmatprep.subr.bf16.mxu1 %v14994_v55  ;;  %v4740_v60 = vld [vmem:[#allocation3 + $0x1cf0] sm:$0xff]  ;;  %v15217_v18 = vcombine.low %v4744_v49, %v4748_v53 }
 0x5bd   : > { %10851 = vmatpush2.bf16.msra.mxu0 %v14865_v20  ;;  %v4728_v23 = vld [vmem:[#allocation3 + $0x1c90] sm:$0xff] }
 0x5be   : > { %10902 = vmatprep.subr.bf16.mxu0 %v15114_v12  ;;  %v4608_v12 = vld [vmem:[#allocation3 + $0x18d0] sm:$0xff] }
 0x5bf   : > { %10892 = vmatpush2.bf16.msra.mxu1 %v14993_v7  ;;  %v15218_v7 = vcombine.high %v4744_v49, %v4748_v53  ;;  %v4732_v3 = vld [vmem:[#allocation3 + $0x1cb0] sm:$0xff] }
 0x5c0   : > { %10943 = vmatprep.subr.bf16.mxu1 %v15242_v14  ;;  %v10608_v40 = vpop.f32.mrf.mxu0  ;;  %10853 = vmatmul.mubr.bf16.vlgmr.msra.gmra.mxu0 %v17381_v46  ;;  %v4612_v14 = vld [vmem:[#allocation3 + $0x18f0] sm:$0xff] }
 0x5c1   : > { %v10609_v30 = vadd.f32 %v10608_v40, %v17468_v48  ;;  %10903 = vmatpush1.bf16.msra.mxu0 %v15113_v21  ;;  %10934 = vmatprep.mubr.bf16.mxu0 %v17389_v6  ;;  %v15082_v21 = vcombine.high %v4608_v12, %v4612_v14  ;;  %v15081_v40 = vcombine.low %v4608_v12, %v4612_v14  ;;  %v4584_v44 = vld [vmem:[#allocation3 + $0x1810] sm:$0xff] }
 0x5c2   : > { %v10649_v63 = vpop.f32.mrf.mxu1  ;;  %10894 = vmatmul.mubr.bf16.vlgmr.msra.gmra.mxu1 %v17387_v47  ;;  %v10610_v31 = vpop.f32.mrf.mxu0  ;;  %10904 = vmatprep.subr.bf16.mxu0 %v15106_v41  ;;  %v4600_v41 = vld [vmem:[#allocation3 + $0x1890] sm:$0xff] }
 0x5c3   : > { %10944 = vmatpush1.bf16.msra.mxu1 %v15241_v5  ;;  %v17478_v37 = vadd.f32 %v10649_v63, %v10609_v30  ;;  %v10611_v38 = vadd.f32 %v10610_v31, %v17473_v9  ;;  %10975 = vmatprep.mubr.bf16.mxu1 %v17392_v19  ;;  %v15225_v9 = vcombine.low %v4752_v1, %v4756_v29  ;;  %v4592_v63 = vld [vmem:[#allocation3 + $0x1850] sm:$0xff] }
 0x5c4   : > { %v10651_v2 = vpop.f32.mrf.mxu1  ;;  %10945 = vmatprep.subr.bf16.mxu1 %v15234_v22  ;;  %v10612_v48 = vpop.f32.mrf.mxu0  ;;  %v15210_v5 = vcombine.high %v4736_v32, %v4740_v60  ;;  %v4604_v22 = vld [vmem:[#allocation3 + $0x18b0] sm:$0xff]  ;;  %v15209_v1 = vcombine.low %v4736_v32, %v4740_v60  ;;  %v15202_v30 = vcombine.high %v4728_v23, %v4732_v3 }
 0x5c5   : > { %v17483_v55 = vadd.f32 %v10651_v2, %v10611_v38  ;;  %10905 = vmatpush1.bf16.msra.mxu0 %v15105_v45  ;;  %v15074_v29 = vcombine.high %v4600_v41, %v4604_v22  ;;  %v4596_v45 = vld [vmem:[#allocation3 + $0x1870] sm:$0xff]  ;;  %v15201_v38 = vcombine.low %v4728_v23, %v4732_v3  ;;  %vm11314_vm7 = vcmp.gt.f32.partialorder %v17478_v37, 0.0 }
 0x5c6   : > { %v10653_v15 = vpop.f32.mrf.mxu1  ;;  %v10613_v62 = vpop.f32.mrf.mxu0  ;;  %10906 = vmatprep.subr.bf16.mxu0 %v15098_v36  ;;  %v4720_v31 = vld [vmem:[#allocation3 + $0x1c50] sm:$0xff]  ;;  %v15073_v36 = vcombine.low %v4600_v41, %v4604_v22  ;;  %v15066_v2 = vcombine.high %v4592_v63, %v4596_v45  ;;  %v15065_v53 = vcombine.low %v4592_v63, %v4596_v45 }
 0x5c7   : > { %10946 = vmatpush1.bf16.msra.mxu1 %v15233_v11  ;;  %v4724_v11 = vld [vmem:[#allocation3 + $0x1c70] sm:$0xff]  ;;  %vm11315_vm5 = vcmp.gt.f32.partialorder %v17483_v55, 0.0 }
 0x5c8   : > { %v10654_v20 = vpop.f32.mrf.mxu1  ;;  %10947 = vmatprep.subr.bf16.mxu1 %v15226_v42  ;;  %v15194_v42 = vcombine.high %v4720_v31, %v4724_v11  ;;  %v4588_v43 = vld [vmem:[#allocation3 + $0x1830] sm:$0xff]  ;;  %v15193_v15 = vcombine.low %v4720_v31, %v4724_v11 }
 0x5c9   : > { %10907 = vmatpush1.bf16.msra.mxu0 %v15097_v59  ;;  %v4712_v48 = vld [vmem:[#allocation3 + $0x1c10] sm:$0xff]  ;;  %v15058_v59 = vcombine.high %v4584_v44, %v4588_v43  ;;  %v15057_v12 = vcombine.low %v4584_v44, %v4588_v43 }
 0x5ca   : > { %10908 = vmatprep.subr.bf16.mxu0 %v15090_v13  ;;  %v4716_v49 = vld [vmem:[#allocation3 + $0x1c30] sm:$0xff] }
 0x5cb   : > { %10948 = vmatpush1.bf16.msra.mxu1 %v15225_v9  ;;  %v15186_v62 = vcombine.high %v4712_v48, %v4716_v49  ;;  %v4704_v9 = vld [vmem:[#allocation3 + $0x1bd0] sm:$0xff]  ;;  %v15185_v14 = vcombine.low %v4712_v48, %v4716_v49 }
 0x5cc   : > { %10949 = vmatprep.subr.bf16.mxu1 %v15218_v7  ;;  %v4708_v13 = vld [vmem:[#allocation3 + $0x1bf0] sm:$0xff] }
 0x5cd   : > { %10909 = vmatpush1.bf16.msra.mxu0 %v15089_v39  ;;  %v4832_v20 = vld [vmem:[#allocation3 + $0x1fd0] sm:$0xff]  ;;  %v15178_v32 = vcombine.high %v4704_v9, %v4708_v13  ;;  %v15177_v41 = vcombine.low %v4704_v9, %v4708_v13 }
 0x5ce   : > { %10910 = vmatprep.subr.bf16.mxu0 %v15082_v21  ;;  %v4836_v7 = vld [vmem:[#allocation3 + $0x1ff0] sm:$0xff] }
 0x5cf   : > { %10950 = vmatpush1.bf16.msra.mxu1 %v15217_v18  ;;  %v15306_v60 = vcombine.high %v4832_v20, %v4836_v7  ;;  %v4696_v39 = vld [vmem:[#allocation3 + $0x1b90] sm:$0xff]  ;;  %v15305_v22 = vcombine.low %v4832_v20, %v4836_v7 }
 0x5d0   : > { %10951 = vmatprep.subr.bf16.mxu1 %v15210_v5  ;;  %v4700_v18 = vld [vmem:[#allocation3 + $0x1bb0] sm:$0xff] }
 0x5d1   : > { %10911 = vmatpush1.bf16.msra.mxu0 %v15081_v40  ;;  %v4824_v21 = vld [vmem:[#allocation3 + $0x1f90] sm:$0xff]  ;;  %v15170_v23 = vcombine.high %v4696_v39, %v4700_v18  ;;  %v15169_v63 = vcombine.low %v4696_v39, %v4700_v18 }
 0x5d2   : > { %10912 = vmatprep.subr.bf16.mxu0 %v15074_v29  ;;  %v4828_v5 = vld [vmem:[#allocation3 + $0x1fb0] sm:$0xff] }
 0x5d3   : > { %10952 = vmatpush1.bf16.msra.mxu1 %v15209_v1  ;;  %v15298_v3 = vcombine.high %v4824_v21, %v4828_v5  ;;  %v4688_v40 = vld [vmem:[#allocation3 + $0x1b50] sm:$0xff]  ;;  %v15297_v45 = vcombine.low %v4824_v21, %v4828_v5 }
 0x5d4   : > { %10953 = vmatprep.subr.bf16.mxu1 %v15202_v30  ;;  %v4692_v1 = vld [vmem:[#allocation3 + $0x1b70] sm:$0xff] }
 0x5d5   : > { %10913 = vmatpush1.bf16.msra.mxu0 %v15073_v36  ;;  %v4816_v29 = vld [vmem:[#allocation3 + $0x1f50] sm:$0xff]  ;;  %v15162_v31 = vcombine.high %v4688_v40, %v4692_v1  ;;  %v15161_v44 = vcombine.low %v4688_v40, %v4692_v1 }
 0x5d6   : > { %10914 = vmatprep.subr.bf16.mxu0 %v15066_v2  ;;  %v4820_v30 = vld [vmem:[#allocation3 + $0x1f70] sm:$0xff] }
 0x5d7   : > { %10954 = vmatpush1.bf16.msra.mxu1 %v15201_v38  ;;  %v15290_v11 = vcombine.high %v4816_v29, %v4820_v30  ;;  %v4680_v36 = vld [vmem:[#allocation3 + $0x1b10] sm:$0xff]  ;;  %v15289_v43 = vcombine.low %v4816_v29, %v4820_v30 }
 0x5d8   : > { %10955 = vmatprep.subr.bf16.mxu1 %v15194_v42  ;;  %v4684_v38 = vld [vmem:[#allocation3 + $0x1b30] sm:$0xff] }
 0x5d9   : > { %10915 = vmatpush1.bf16.msra.mxu0 %v15065_v53  ;;  %v4808_v2 = vld [vmem:[#allocation3 + $0x1f10] sm:$0xff]  ;;  %v15154_v48 = vcombine.high %v4680_v36, %v4684_v38  ;;  %v15153_v9 = vcombine.low %v4680_v36, %v4684_v38 }
 0x5da   : > { %10916 = vmatprep.subr.bf16.mxu0 %v15058_v59  ;;  %v4812_v42 = vld [vmem:[#allocation3 + $0x1f30] sm:$0xff] }
 0x5db   : > { %10956 = vmatpush1.bf16.msra.mxu1 %v15193_v15  ;;  %v15282_v49 = vcombine.high %v4808_v2, %v4812_v42  ;;  %v4672_v53 = vld [vmem:[#allocation3 + $0x1ad0] sm:$0xff]  ;;  %v15281_v13 = vcombine.low %v4808_v2, %v4812_v42 }
 0x5dc   : > { %10957 = vmatprep.subr.bf16.mxu1 %v15186_v62  ;;  %v4676_v15 = vld [vmem:[#allocation3 + $0x1af0] sm:$0xff] }
 0x5dd   : > { %10917 = vmatpush1.bf16.msra.mxu0 %v15057_v12  ;;  %v4800_v59 = vld [vmem:[#allocation3 + $0x1ed0] sm:$0xff]  ;;  %v15146_v20 = vcombine.high %v4672_v53, %v4676_v15  ;;  %v15145_v39 = vcombine.low %v4672_v53, %v4676_v15 }
 0x5de   : > { %10918 = vmatprep.subr.bf16.mxu0 %v15178_v32  ;;  %v4804_v62 = vld [vmem:[#allocation3 + $0x1ef0] sm:$0xff] }
 0x5df   : > { %10958 = vmatpush1.bf16.msra.mxu1 %v15185_v14  ;;  %v15274_v7 = vcombine.high %v4800_v59, %v4804_v62  ;;  %v4664_v12 = vld [vmem:[#allocation3 + $0x1a90] sm:$0xff]  ;;  %v15273_v18 = vcombine.low %v4800_v59, %v4804_v62 }
 0x5e0   : > { %10959 = vmatprep.subr.bf16.mxu1 %v15306_v60  ;;  %v4668_v14 = vld [vmem:[#allocation3 + $0x1ab0] sm:$0xff] }
 0x5e1   : > { %10919 = vmatpush2.bf16.msra.mxu0 %v15177_v41  ;;  %v4792_v32 = vld [vmem:[#allocation3 + $0x1e90] sm:$0xff]  ;;  %v15138_v21 = vcombine.high %v4664_v12, %v4668_v14  ;;  %v15137_v40 = vcombine.low %v4664_v12, %v4668_v14 }
 0x5e2   : > { %10920 = vmatprep.subr.bf16.mxu0 %v15170_v23  ;;  %v4796_v60 = vld [vmem:[#allocation3 + $0x1eb0] sm:$0xff] }
 0x5e3   : > { %10960 = vmatpush2.bf16.msra.mxu1 %v15305_v22  ;;  %v15266_v5 = vcombine.high %v4792_v32, %v4796_v60  ;;  %v4656_v41 = vld [vmem:[#allocation3 + $0x1a50] sm:$0xff]  ;;  %v15265_v1 = vcombine.low %v4792_v32, %v4796_v60 }
 0x5e4   : > { %10961 = vmatprep.subr.bf16.mxu1 %v15298_v3  ;;  %v4660_v22 = vld [vmem:[#allocation3 + $0x1a70] sm:$0xff] }
 0x5e5   : > { %10921 = vmatpush2.bf16.msra.mxu0 %v15169_v63  ;;  %v4784_v23 = vld [vmem:[#allocation3 + $0x1e50] sm:$0xff]  ;;  %v15130_v29 = vcombine.high %v4656_v41, %v4660_v22  ;;  %v15129_v36 = vcombine.low %v4656_v41, %v4660_v22  ;;  %v3861_v41 = vld [vmem:[#allocation3 + $0x178] sm:$0xff] }
 0x5e6   : > { %10922 = vmatprep.subr.bf16.mxu0 %v15162_v31  ;;  %v4788_v3 = vld [vmem:[#allocation3 + $0x1e70] sm:$0xff] }
 0x5e7   : > { %10962 = vmatpush2.bf16.msra.mxu1 %v15297_v45  ;;  %v15258_v30 = vcombine.high %v4784_v23, %v4788_v3  ;;  %v4648_v63 = vld [vmem:[#allocation3 + $0x1a10] sm:$0xff]  ;;  %v15257_v38 = vcombine.low %v4784_v23, %v4788_v3  ;;  %v3985_v23 = vld [vmem:[#allocation3 + $0x558] sm:$0xff] }
 0x5e8   : > { %10963 = vmatprep.subr.bf16.mxu1 %v15290_v11  ;;  %v4652_v45 = vld [vmem:[#allocation3 + $0x1a30] sm:$0xff]  ;;  %v3989_v3 = vld [vmem:[#allocation3 + $0x578] sm:$0xff] }
 0x5e9   : > { %10923 = vmatpush2.bf16.msra.mxu0 %v15161_v44  ;;  %v4776_v31 = vld [vmem:[#allocation3 + $0x1e10] sm:$0xff]  ;;  %v15122_v2 = vcombine.high %v4648_v63, %v4652_v45  ;;  %v3873_v44 = vld [vmem:[#allocation3 + $0x1d8] sm:$0xff]  ;;  %v15121_v53 = vcombine.low %v4648_v63, %v4652_v45 }
 0x5ea   : > { %10924 = vmatprep.subr.bf16.mxu0 %v15154_v48  ;;  %v4780_v11 = vld [vmem:[#allocation3 + $0x1e30] sm:$0xff]  ;;  %v4001_v48 = vld [vmem:[#allocation3 + $0x5d8] sm:$0xff] }
 0x5eb   : > { %10964 = vmatpush2.bf16.msra.mxu1 %v15289_v43  ;;  %v15250_v42 = vcombine.high %v4776_v31, %v4780_v11  ;;  %v3877_v43 = vld [vmem:[#allocation3 + $0x1f8] sm:$0xff]  ;;  %v15249_v15 = vcombine.low %v4776_v31, %v4780_v11  ;;  %v14460_v11 = vcombine.high %v3985_v23, %v3989_v3 }
 0x5ec   : > { %10965 = vmatprep.subr.bf16.mxu1 %v15282_v49  ;;  %v4005_v49 = vld [vmem:[#allocation3 + $0x5f8] sm:$0xff]  ;;  %v14348_v59 = vcombine.high %v3873_v44, %v3877_v43  ;;  %v14347_v32 = vcombine.low %v3873_v44, %v3877_v43 }
 0x5ed   : > { %10925 = vmatpush2.bf16.msra.mxu0 %v15153_v9  ;;  %v14476_v62 = vcombine.high %v4001_v48, %v4005_v49  ;;  %v3865_v9 = vld [vmem:[#allocation3 + $0x198] sm:$0xff]  ;;  %v14475_v60 = vcombine.low %v4001_v48, %v4005_v49 }
 0x5ee   : > { %10926 = vmatprep.subr.bf16.mxu0 %v15146_v20  ;;  %v3993_v20 = vld [vmem:[#allocation3 + $0x598] sm:$0xff] }
 0x5ef   : > { %10966 = vmatpush2.bf16.msra.mxu1 %v15281_v13  ;;  %v3869_v13 = vld [vmem:[#allocation3 + $0x1b8] sm:$0xff] }
 0x5f0   : > { %10967 = vmatprep.subr.bf16.mxu1 %v15274_v7  ;;  %v3997_v7 = vld [vmem:[#allocation3 + $0x5b8] sm:$0xff] }
 0x5f1   : > { %10927 = vmatpush2.bf16.msra.mxu0 %v15145_v39  ;;  %v16225_v12 = vld [vmem:[#allocation12] sm:$0xff]  ;;  %v14340_v39 = vcombine.high %v3865_v9, %v3869_v13 }
 0x5f2   : > { %10928 = vmatprep.subr.bf16.mxu0 %v15138_v21  ;;  %v4859_v14 = vrot.slane %v16225_v12, %v17272_v0  ;;  %v14468_v21 = vcombine.high %v3993_v20, %v3997_v7  ;;  %v14339_v0 = vcombine.low %v3865_v9, %v3869_v13  ;;  %v3981_v44 = vld [vmem:[#allocation3 + $0x538] sm:$0xff] }
 0x5f3   : > { %10968 = vmatpush2.bf16.msra.mxu1 %v15273_v18  ;;  %v4863_v18 = vrot.slane %v16225_v12, %v17275_v4  ;;  %v3841_v13 = vld [vmem:[#allocation3 + $0xd8] sm:$0xff] }
 0x5f4   : > { %10969 = vmatprep.subr.bf16.mxu1 %v15266_v5  ;;  %v3857_v5 = vld [vmem:[#allocation3 + $0x158] sm:$0xff] }
 0x5f5   : > { %10929 = vmatpush2.bf16.msra.mxu0 %v15137_v40  ;;  %v14332_v63 = vcombine.high %v3857_v5, %v3861_v41  ;;  %v14331_v49 = vcombine.low %v3857_v5, %v3861_v41 }
 0x5f6   : > { %10930 = vmatprep.subr.bf16.mxu0 %v15130_v29 }
 0x5f7   : > { %10970 = vmatpush2.bf16.msra.mxu1 %v15265_v1 }
 0x5f8   : > { %10971 = vmatprep.subr.bf16.mxu1 %v15258_v30  ;;  %v14467_v30 = vcombine.low %v3993_v20, %v3997_v7  ;;  %v3969_v20 = vld [vmem:[#allocation3 + $0x4d8] sm:$0xff] }
 0x5f9   : > { %10931 = vmatpush2.bf16.msra.mxu0 %v15129_v36  ;;  %v3849_v36 = vld [vmem:[#allocation3 + $0x118] sm:$0xff] }
 0x5fa   : > { %10932 = vmatprep.subr.bf16.mxu0 %v15122_v2  ;;  %v3973_v7 = vld [vmem:[#allocation3 + $0x4f8] sm:$0xff] }
 0x5fb   : > { %10972 = vmatpush2.bf16.msra.mxu1 %v15257_v38  ;;  %v3853_v38 = vld [vmem:[#allocation3 + $0x138] sm:$0xff]  ;;  %v14443_v41 = vcombine.low %v3969_v20, %v3973_v7 }
 0x5fc   : > { %10973 = vmatprep.subr.bf16.mxu1 %v15250_v42  ;;  %v3977_v42 = vld [vmem:[#allocation3 + $0x518] sm:$0xff]  ;;  %v14323_v12 = vcombine.low %v3849_v36, %v3853_v38 }
 0x5fd   : > { %10933 = vmatpush2.bf16.msra.mxu0 %v15121_v53  ;;  %v14452_v9 = vcombine.high %v3977_v42, %v3981_v44 }
 0x5fe   : > { %10984 = vmatprep.subr.bf16.mxu0 %v14348_v59  ;;  %v14324_v59 = vcombine.high %v3849_v36, %v3853_v38  ;;  %v3945_v36 = vld [vmem:[#allocation3 + $0x418] sm:$0xff] }
 0x5ff   : > { %10974 = vmatpush2.bf16.msra.mxu1 %v15249_v15  ;;  %v14459_v15 = vcombine.low %v3985_v23, %v3989_v3  ;;  %v3825_v3 = vld [vmem:[#allocation3 + $0x58] sm:$0xff] }
 0x600   : > { %11025 = vmatprep.subr.bf16.mxu1 %v14476_v62  ;;  %v10690_v22 = vpop.f32.mrf.mxu0  ;;  %10935 = vmatmul.mubr.bf16.vlgmr.msra.gmra.mxu0 %v17399_v10  ;;  %v3949_v38 = vld [vmem:[#allocation3 + $0x438] sm:$0xff] }
 0x601   : > { %v10691_v40 = vadd.f32 %v10690_v22, %v4859_v14  ;;  %10985 = vmatpush1.bf16.msra.mxu0 %v14347_v32  ;;  %11016 = vmatprep.mubr.bf16.mxu0 %v17267_v61  ;;  %v3845_v61 = vld [vmem:[#allocation3 + $0xf8] sm:$0xff]  ;;  %v14444_v32 = vcombine.high %v3969_v20, %v3973_v7 }
 0x602   : > { %v10731_v1 = vpop.f32.mrf.mxu1  ;;  %10976 = vmatmul.mubr.bf16.vlgmr.msra.gmra.mxu1 %v17404_v16  ;;  %v10692_v29 = vpop.f32.mrf.mxu0  ;;  %10986 = vmatprep.subr.bf16.mxu0 %v14340_v39  ;;  %v14316_v14 = vcombine.high %v3841_v13, %v3845_v61  ;;  %v3837_v39 = vld [vmem:[#allocation3 + $0xb8] sm:$0xff]  ;;  %v14315_v5 = vcombine.low %v3841_v13, %v3845_v61 }
 0x603   : > { %11026 = vmatpush1.bf16.msra.mxu1 %v14475_v60  ;;  %v17489_v4 = vadd.f32 %v10731_v1, %v10691_v40  ;;  %v10693_v45 = vadd.f32 %v10692_v29, %v4863_v18  ;;  %11057 = vmatprep.mubr.bf16.mxu1 %v17278_v28  ;;  %v14451_v28 = vcombine.low %v3977_v42, %v3981_v44  ;;  %v3833_v60 = vld [vmem:[#allocation3 + $0x98] sm:$0xff] }
 0x604   : > { %v10733_v31 = vpop.f32.mrf.mxu1  ;;  %11027 = vmatprep.subr.bf16.mxu1 %v14468_v21  ;;  %v10694_v2 = vpop.f32.mrf.mxu0  ;;  %v3961_v18 = vld [vmem:[#allocation3 + $0x498] sm:$0xff]  ;;  %v14308_v22 = vcombine.high %v3833_v60, %v3837_v39  ;;  %v14307_v29 = vcombine.low %v3833_v60, %v3837_v39 }
 0x605   : > { %v17493_v43 = vadd.f32 %v10733_v31, %v10693_v45  ;;  %10987 = vmatpush1.bf16.msra.mxu0 %v14339_v0  ;;  %v3965_v21 = vld [vmem:[#allocation3 + $0x4b8] sm:$0xff] }
 0x606   : > { %v10735_v48 = vpop.f32.mrf.mxu1  ;;  %v10695_v53 = vpop.f32.mrf.mxu0  ;;  %10988 = vmatprep.subr.bf16.mxu0 %v14332_v63  ;;  %v14436_v23 = vcombine.high %v3961_v18, %v3965_v21  ;;  %v3829_v40 = vld [vmem:[#allocation3 + $0x78] sm:$0xff] }
 0x607   : > { %11028 = vmatpush1.bf16.msra.mxu1 %v14467_v30  ;;  %v3953_v1 = vld [vmem:[#allocation3 + $0x458] sm:$0xff]  ;;  %v14435_v30 = vcombine.low %v3961_v18, %v3965_v21  ;;  %v14300_v63 = vcombine.high %v3825_v3, %v3829_v40  ;;  %v14299_v2 = vcombine.low %v3825_v3, %v3829_v40  ;;  %v14420_v48 = vcombine.high %v3945_v36, %v3949_v38 }
 0x608   : > { %v10736_v62 = vpop.f32.mrf.mxu1  ;;  %11029 = vmatprep.subr.bf16.mxu1 %v14460_v11  ;;  %v3957_v0 = vld [vmem:[#allocation3 + $0x478] sm:$0xff] }
 0x609   : > { %10989 = vmatpush1.bf16.msra.mxu0 %v14331_v49  ;;  %v14428_v45 = vcombine.high %v3953_v1, %v3957_v0  ;;  %v3817_v31 = vld [vmem:[#allocation3 + $0x18] sm:$0xff]  ;;  %v14427_v42 = vcombine.low %v3953_v1, %v3957_v0 }
 0x60a   : > { %10990 = vmatprep.subr.bf16.mxu0 %v14324_v59  ;;  %v3821_v11 = vld [vmem:[#allocation3 + $0x38] sm:$0xff] }
 0x60b   : > { %11030 = vmatpush1.bf16.msra.mxu1 %v14459_v15  ;;  %v14292_v44 = vcombine.high %v3817_v31, %v3821_v11  ;;  %v3937_v49 = vld [vmem:[#allocation3 + $0x3d8] sm:$0xff]  ;;  %v14291_v62 = vcombine.low %v3817_v31, %v3821_v11 }
 0x60c   : > { %11031 = vmatprep.subr.bf16.mxu1 %v14452_v9  ;;  %v3941_v53 = vld [vmem:[#allocation3 + $0x3f8] sm:$0xff]  ;;  %v14419_v9 = vcombine.low %v3945_v36, %v3949_v38 }
 0x60d   : > { %10991 = vmatpush1.bf16.msra.mxu0 %v14323_v12  ;;  %v4065_v15 = vld [vmem:[#allocation3 + $0x7d8] sm:$0xff]  ;;  %v14412_v13 = vcombine.high %v3937_v49, %v3941_v53 }
 0x60e   : > { %10992 = vmatprep.subr.bf16.mxu0 %v14316_v14  ;;  %v4069_v59 = vld [vmem:[#allocation3 + $0x7f8] sm:$0xff]  ;;  %v14411_v14 = vcombine.low %v3937_v49, %v3941_v53 }
 0x60f   : > { %11032 = vmatpush1.bf16.msra.mxu1 %v14451_v28  ;;  %v14540_v61 = vcombine.high %v4065_v15, %v4069_v59  ;;  %v3929_v20 = vld [vmem:[#allocation3 + $0x398] sm:$0xff] }
 0x610   : > { %11033 = vmatprep.subr.bf16.mxu1 %v14444_v32  ;;  %v3933_v7 = vld [vmem:[#allocation3 + $0x3b8] sm:$0xff]  ;;  %v14539_v32 = vcombine.low %v4065_v15, %v4069_v59 }
 0x611   : > { %10993 = vmatpush1.bf16.msra.mxu0 %v14315_v5  ;;  %v4057_v12 = vld [vmem:[#allocation3 + $0x798] sm:$0xff]  ;;  %v14404_v60 = vcombine.high %v3929_v20, %v3933_v7 }
 0x612   : > { %10994 = vmatprep.subr.bf16.mxu0 %v14308_v22  ;;  %v4061_v28 = vld [vmem:[#allocation3 + $0x7b8] sm:$0xff]  ;;  %v14403_v22 = vcombine.low %v3929_v20, %v3933_v7 }
 0x613   : > { %11034 = vmatpush1.bf16.msra.mxu1 %v14443_v41  ;;  %v14532_v39 = vcombine.high %v4057_v12, %v4061_v28  ;;  %v3921_v18 = vld [vmem:[#allocation3 + $0x358] sm:$0xff] }
 0x614   : > { %11035 = vmatprep.subr.bf16.mxu1 %v14436_v23  ;;  %v3925_v21 = vld [vmem:[#allocation3 + $0x378] sm:$0xff]  ;;  %v14531_v23 = vcombine.low %v4057_v12, %v4061_v28 }
 0x615   : > { %10995 = vmatpush1.bf16.msra.mxu0 %v14307_v29  ;;  %v4049_v5 = vld [vmem:[#allocation3 + $0x758] sm:$0xff]  ;;  %v14396_v3 = vcombine.high %v3921_v18, %v3925_v21 }
 0x616   : > { %10996 = vmatprep.subr.bf16.mxu0 %v14300_v63  ;;  %v4053_v41 = vld [vmem:[#allocation3 + $0x778] sm:$0xff]  ;;  %v14395_v63 = vcombine.low %v3921_v18, %v3925_v21 }
 0x617   : > { %11036 = vmatpush1.bf16.msra.mxu1 %v14435_v30  ;;  %v14524_v40 = vcombine.high %v4049_v5, %v4053_v41  ;;  %v3913_v1 = vld [vmem:[#allocation3 + $0x318] sm:$0xff] }
 0x618   : > { %11037 = vmatprep.subr.bf16.mxu1 %v14428_v45  ;;  %v3917_v0 = vld [vmem:[#allocation3 + $0x338] sm:$0xff]  ;;  %v14523_v45 = vcombine.low %v4049_v5, %v4053_v41 }
 0x619   : > { %10997 = vmatpush1.bf16.msra.mxu0 %v14299_v2  ;;  %v4041_v29 = vld [vmem:[#allocation3 + $0x718] sm:$0xff]  ;;  %v14388_v31 = vcombine.high %v3913_v1, %v3917_v0 }
 0x61a   : > { %10998 = vmatprep.subr.bf16.mxu0 %v14292_v44  ;;  %v4045_v30 = vld [vmem:[#allocation3 + $0x738] sm:$0xff]  ;;  %v14387_v44 = vcombine.low %v3913_v1, %v3917_v0 }
 0x61b   : > { %11038 = vmatpush1.bf16.msra.mxu1 %v14427_v42  ;;  %v14516_v11 = vcombine.high %v4041_v29, %v4045_v30  ;;  %v3905_v36 = vld [vmem:[#allocation3 + $0x2d8] sm:$0xff] }
 0x61c   : > { %11039 = vmatprep.subr.bf16.mxu1 %v14420_v48  ;;  %v3909_v38 = vld [vmem:[#allocation3 + $0x2f8] sm:$0xff]  ;;  %v14515_v48 = vcombine.low %v4041_v29, %v4045_v30 }
 0x61d   : > { %10999 = vmatpush1.bf16.msra.mxu0 %v14291_v62  ;;  %v4033_v2 = vld [vmem:[#allocation3 + $0x6d8] sm:$0xff]  ;;  %v14380_v49 = vcombine.high %v3905_v36, %v3909_v38 }
 0x61e   : > { %11000 = vmatprep.subr.bf16.mxu0 %v14412_v13  ;;  %v4037_v42 = vld [vmem:[#allocation3 + $0x6f8] sm:$0xff]  ;;  %v14379_v13 = vcombine.low %v3905_v36, %v3909_v38 }
 0x61f   : > { %11040 = vmatpush1.bf16.msra.mxu1 %v14419_v9  ;;  %v14508_v53 = vcombine.high %v4033_v2, %v4037_v42  ;;  %v3897_v15 = vld [vmem:[#allocation3 + $0x298] sm:$0xff] }
 0x620   : > { %11041 = vmatprep.subr.bf16.mxu1 %v14540_v61  ;;  %v3901_v59 = vld [vmem:[#allocation3 + $0x2b8] sm:$0xff]  ;;  %v14507_v61 = vcombine.low %v4033_v2, %v4037_v42 }
 0x621   : > { %11001 = vmatpush2.bf16.msra.mxu0 %v14411_v14  ;;  %v4025_v62 = vld [vmem:[#allocation3 + $0x698] sm:$0xff]  ;;  %v14372_v20 = vcombine.high %v3897_v15, %v3901_v59 }
 0x622   : > { %11002 = vmatprep.subr.bf16.mxu0 %v14404_v60  ;;  %v4029_v9 = vld [vmem:[#allocation3 + $0x6b8] sm:$0xff]  ;;  %v14371_v60 = vcombine.low %v3897_v15, %v3901_v59 }
 0x623   : > { %11042 = vmatpush2.bf16.msra.mxu1 %v14539_v32  ;;  %v14500_v7 = vcombine.high %v4025_v62, %v4029_v9  ;;  %v3889_v12 = vld [vmem:[#allocation3 + $0x258] sm:$0xff] }
 0x624   : > { %11043 = vmatprep.subr.bf16.mxu1 %v14532_v39  ;;  %v3893_v28 = vld [vmem:[#allocation3 + $0x278] sm:$0xff]  ;;  %v14499_v39 = vcombine.low %v4025_v62, %v4029_v9 }
 0x625   : > { %11003 = vmatpush2.bf16.msra.mxu0 %v14403_v22  ;;  %v4017_v14 = vld [vmem:[#allocation3 + $0x658] sm:$0xff]  ;;  %v14364_v18 = vcombine.high %v3889_v12, %v3893_v28 }
 0x626   : > { %11004 = vmatprep.subr.bf16.mxu0 %v14396_v3  ;;  %v4021_v32 = vld [vmem:[#allocation3 + $0x678] sm:$0xff]  ;;  %v14363_v3 = vcombine.low %v3889_v12, %v3893_v28 }
 0x627   : > { %11044 = vmatpush2.bf16.msra.mxu1 %v14531_v23  ;;  %v14492_v21 = vcombine.high %v4017_v14, %v4021_v32  ;;  %v3881_v5 = vld [vmem:[#allocation3 + $0x218] sm:$0xff] }
 0x628   : > { %11045 = vmatprep.subr.bf16.mxu1 %v14524_v40  ;;  %v3885_v41 = vld [vmem:[#allocation3 + $0x238] sm:$0xff]  ;;  %v14491_v40 = vcombine.low %v4017_v14, %v4021_v32 }
 0x629   : > { %11005 = vmatpush2.bf16.msra.mxu0 %v14395_v63  ;;  %v4009_v22 = vld [vmem:[#allocation3 + $0x618] sm:$0xff]  ;;  %v14356_v1 = vcombine.high %v3881_v5, %v3885_v41 }
 0x62a   : > { %11006 = vmatprep.subr.bf16.mxu0 %v14388_v31  ;;  %v4013_v23 = vld [vmem:[#allocation3 + $0x638] sm:$0xff]  ;;  %v14355_v31 = vcombine.low %v3881_v5, %v3885_v41 }
 0x62b   : > { %11046 = vmatpush2.bf16.msra.mxu1 %v14523_v45  ;;  %v14484_v0 = vcombine.high %v4009_v22, %v4013_v23  ;;  %v4129_v29 = vld [vmem:[#allocation3 + $0x9d8] sm:$0xff] }
 0x62c   : > { %11047 = vmatprep.subr.bf16.mxu1 %v14516_v11  ;;  %v4133_v30 = vld [vmem:[#allocation3 + $0x9f8] sm:$0xff]  ;;  %v14483_v11 = vcombine.low %v4009_v22, %v4013_v23 }
 0x62d   : > { %11007 = vmatpush2.bf16.msra.mxu0 %v14387_v44  ;;  %v4257_v63 = vld [vmem:[#allocation3 + $0xdd8] sm:$0xff]  ;;  %v14604_v36 = vcombine.high %v4129_v29, %v4133_v30 }
 0x62e   : > { %11008 = vmatprep.subr.bf16.mxu0 %v14380_v49  ;;  %v4261_v45 = vld [vmem:[#allocation3 + $0xdf8] sm:$0xff]  ;;  %v14603_v49 = vcombine.low %v4129_v29, %v4133_v30 }
 0x62f   : > { %11048 = vmatpush2.bf16.msra.mxu1 %v14515_v48  ;;  %v14732_v38 = vcombine.high %v4257_v63, %v4261_v45  ;;  %v4121_v2 = vld [vmem:[#allocation3 + $0x998] sm:$0xff] }
 0x630   : > { %11049 = vmatprep.subr.bf16.mxu1 %v14508_v53  ;;  %v4125_v42 = vld [vmem:[#allocation3 + $0x9b8] sm:$0xff]  ;;  %v14731_v53 = vcombine.low %v4257_v63, %v4261_v45 }
 0x631   : > { %11009 = vmatpush2.bf16.msra.mxu0 %v14379_v13  ;;  %v4249_v44 = vld [vmem:[#allocation3 + $0xd98] sm:$0xff]  ;;  %v14596_v15 = vcombine.high %v4121_v2, %v4125_v42  ;;  %v14595_v28 = vcombine.low %v4121_v2, %v4125_v42 }
 0x632   : > { %11010 = vmatprep.subr.bf16.mxu0 %v14372_v20  ;;  %v4253_v48 = vld [vmem:[#allocation3 + $0xdb8] sm:$0xff] }
 0x633   : > { %11050 = vmatpush2.bf16.msra.mxu1 %v14507_v61  ;;  %v14724_v59 = vcombine.high %v4249_v44, %v4253_v48  ;;  %v4113_v62 = vld [vmem:[#allocation3 + $0x958] sm:$0xff]  ;;  %v14723_v32 = vcombine.low %v4249_v44, %v4253_v48 }
 0x634   : > { %11051 = vmatprep.subr.bf16.mxu1 %v14500_v7  ;;  %v4117_v9 = vld [vmem:[#allocation3 + $0x978] sm:$0xff] }
 0x635   : > { %11011 = vmatpush2.bf16.msra.mxu0 %v14371_v60  ;;  %v4241_v61 = vld [vmem:[#allocation3 + $0xd58] sm:$0xff]  ;;  %v14588_v60 = vcombine.high %v4113_v62, %v4117_v9 }
 0x636   : > { %11012 = vmatprep.subr.bf16.mxu0 %v14364_v18  ;;  %v4245_v20 = vld [vmem:[#allocation3 + $0xd78] sm:$0xff] }
 0x637   : > { %11052 = vmatpush2.bf16.msra.mxu1 %v14499_v39  ;;  %v4105_v5 = vld [vmem:[#allocation3 + $0x918] sm:$0xff] }
 0x638   : > { %11053 = vmatprep.subr.bf16.mxu1 %v14492_v21  ;;  %v4109_v41 = vld [vmem:[#allocation3 + $0x938] sm:$0xff] }
 0x639   : > { %11013 = vmatpush2.bf16.msra.mxu0 %v14363_v3  ;;  %v4237_v22 = vld [vmem:[#allocation3 + $0xd38] sm:$0xff] }
 0x63a   : > { %11014 = vmatprep.subr.bf16.mxu0 %v14356_v1  ;;  %v4097_v63 = vld [vmem:[#allocation3 + $0x8d8] sm:$0xff] }
 0x63b   : > { %11054 = vmatpush2.bf16.msra.mxu1 %v14491_v40  ;;  %v14587_v40 = vcombine.low %v4113_v62, %v4117_v9  ;;  %v4225_v45 = vld [vmem:[#allocation3 + $0xcd8] sm:$0xff] }
 0x63c   : > { %11055 = vmatprep.subr.bf16.mxu1 %v14484_v0  ;;  %v14580_v0 = vcombine.high %v4105_v5, %v4109_v41  ;;  %v4089_v2 = vld [vmem:[#allocation3 + $0x898] sm:$0xff] }
 0x63d   : > { %11015 = vmatpush2.bf16.msra.mxu0 %v14355_v31  ;;  %v4229_v31 = vld [vmem:[#allocation3 + $0xcf8] sm:$0xff] }
 0x63e   : > { %11066 = vmatprep.subr.bf16.mxu0 %v14604_v36  ;;  %v4093_v42 = vld [vmem:[#allocation3 + $0x8b8] sm:$0xff] }
 0x63f   : > { %11056 = vmatpush2.bf16.msra.mxu1 %v14483_v11  ;;  %v14579_v11 = vcombine.low %v4105_v5, %v4109_v41  ;;  %v4217_v44 = vld [vmem:[#allocation3 + $0xc98] sm:$0xff] }
 0x640   : > { %11107 = vmatprep.subr.bf16.mxu1 %v14732_v38  ;;  %v10772_v13 = vpop.f32.mrf.mxu0  ;;  %11017 = vmatmul.mubr.bf16.vlgmr.msra.gmra.mxu0 %v17307_v56  ;;  %v14716_v56 = vcombine.high %v4241_v61, %v4245_v20  ;;  %v14700_v38 = vcombine.high %v4225_v45, %v4229_v31  ;;  %v4221_v48 = vld [vmem:[#allocation3 + $0xcb8] sm:$0xff] }
 0x641   : > { %v10773_v7 = vadd.f32 %v10772_v13, %v17489_v4  ;;  %11067 = vmatpush1.bf16.msra.mxu0 %v14603_v49  ;;  %11098 = vmatprep.mubr.bf16.mxu0 %v17315_v25  ;;  %v4101_v25 = vld [vmem:[#allocation3 + $0x8f8] sm:$0xff] }
 0x642   : > { %v10813_v12 = vpop.f32.mrf.mxu1  ;;  %11058 = vmatmul.mubr.bf16.vlgmr.msra.gmra.mxu1 %v17313_v17  ;;  %v10774_v14 = vpop.f32.mrf.mxu0  ;;  %11068 = vmatprep.subr.bf16.mxu0 %v14596_v15  ;;  %v4233_v17 = vld [vmem:[#allocation3 + $0xd18] sm:$0xff]  ;;  %v14572_v36 = vcombine.high %v4097_v63, %v4101_v25  ;;  %v14571_v49 = vcombine.low %v4097_v63, %v4101_v25  ;;  %v14564_v15 = vcombine.high %v4089_v2, %v4093_v42 }
 0x643   : > { %11108 = vmatpush1.bf16.msra.mxu1 %v14731_v53  ;;  %v17498_v39 = vadd.f32 %v10813_v12, %v10773_v7  ;;  %v10775_v18 = vadd.f32 %v10774_v14, %v17493_v43  ;;  %11139 = vmatprep.mubr.bf16.mxu1 %v17318_v26  ;;  %v14715_v43 = vcombine.low %v4241_v61, %v4245_v20  ;;  %v4081_v62 = vld [vmem:[#allocation3 + $0x858] sm:$0xff] }
 0x644   : > { %v10815_v21 = vpop.f32.mrf.mxu1  ;;  %11109 = vmatprep.subr.bf16.mxu1 %v14724_v59  ;;  %v10776_v4 = vpop.f32.mrf.mxu0  ;;  %v14708_v30 = vcombine.high %v4233_v17, %v4237_v22  ;;  %v14707_v26 = vcombine.low %v4233_v17, %v4237_v22  ;;  %v14699_v53 = vcombine.low %v4225_v45, %v4229_v31  ;;  %v14692_v59 = vcombine.high %v4217_v44, %v4221_v48  ;;  %v4085_v9 = vld [vmem:[#allocation3 + $0x878] sm:$0xff] }
 0x645   : > { %v17503_v23 = vadd.f32 %v10815_v21, %v10775_v18  ;;  %11069 = vmatpush1.bf16.msra.mxu0 %v14595_v28  ;;  %v4209_v13 = vld [vmem:[#allocation3 + $0xc58] sm:$0xff]  ;;  %v14563_v20 = vcombine.low %v4089_v2, %v4093_v42  ;;  %v14691_v7 = vcombine.low %v4217_v44, %v4221_v48  ;;  %v14556_v12 = vcombine.high %v4081_v62, %v4085_v9 }
 0x646   : > { %v10817_v3 = vpop.f32.mrf.mxu1  ;;  %v10777_v1 = vpop.f32.mrf.mxu0  ;;  %11070 = vmatprep.subr.bf16.mxu0 %v14588_v60  ;;  %v4213_v61 = vld [vmem:[#allocation3 + $0xc78] sm:$0xff]  ;;  %v14555_v21 = vcombine.low %v4081_v62, %v4085_v9 }
 0x647   : > { %11110 = vmatpush1.bf16.msra.mxu1 %v14723_v32  ;;  %v14684_v28 = vcombine.high %v4209_v13, %v4213_v61  ;;  %v4073_v14 = vld [vmem:[#allocation3 + $0x818] sm:$0xff] }
 0x648   : > { %v10818_v29 = vpop.f32.mrf.mxu1  ;;  %11111 = vmatprep.subr.bf16.mxu1 %v14716_v56  ;;  %v4077_v32 = vld [vmem:[#allocation3 + $0x838] sm:$0xff]  ;;  %v14683_v56 = vcombine.low %v4209_v13, %v4213_v61 }
 0x649   : > { %11071 = vmatpush1.bf16.msra.mxu0 %v14587_v40  ;;  %v4201_v60 = vld [vmem:[#allocation3 + $0xc18] sm:$0xff]  ;;  %v14548_v5 = vcombine.high %v4073_v14, %v4077_v32  ;;  %v14547_v40 = vcombine.low %v4073_v14, %v4077_v32 }
 0x64a   : > { %11072 = vmatprep.subr.bf16.mxu0 %v14580_v0  ;;  %v4205_v18 = vld [vmem:[#allocation3 + $0xc38] sm:$0xff] }
 0x64b   : > { %11112 = vmatpush1.bf16.msra.mxu1 %v14715_v43  ;;  %v14676_v41 = vcombine.high %v4201_v60, %v4205_v18  ;;  %v4193_v4 = vld [vmem:[#allocation3 + $0xbd8] sm:$0xff]  ;;  %v14675_v1 = vcombine.low %v4201_v60, %v4205_v18 }
 0x64c   : > { %11113 = vmatprep.subr.bf16.mxu1 %v14708_v30  ;;  %v4197_v17 = vld [vmem:[#allocation3 + $0xbf8] sm:$0xff] }
 0x64d   : > { %11073 = vmatpush1.bf16.msra.mxu0 %v14579_v11  ;;  %v4321_v22 = vld [vmem:[#allocation3 + $0xfd8] sm:$0xff]  ;;  %v14668_v43 = vcombine.high %v4193_v4, %v4197_v17  ;;  %v14667_v45 = vcombine.low %v4193_v4, %v4197_v17 }
 0x64e   : > { %11074 = vmatprep.subr.bf16.mxu0 %v14572_v36  ;;  %v4325_v3 = vld [vmem:[#allocation3 + $0xff8] sm:$0xff] }
 0x64f   : > { %11114 = vmatpush1.bf16.msra.mxu1 %v14707_v26  ;;  %v14796_v0 = vcombine.high %v4321_v22, %v4325_v3  ;;  %v4185_v29 = vld [vmem:[#allocation3 + $0xb98] sm:$0xff]  ;;  %v14795_v31 = vcombine.low %v4321_v22, %v4325_v3 }
 0x650   : > { %11115 = vmatprep.subr.bf16.mxu1 %v14700_v38  ;;  %v4189_v30 = vld [vmem:[#allocation3 + $0xbb8] sm:$0xff] }
 0x651   : > { %11075 = vmatpush1.bf16.msra.mxu0 %v14571_v49  ;;  %v4313_v63 = vld [vmem:[#allocation3 + $0xf98] sm:$0xff]  ;;  %v14660_v11 = vcombine.high %v4185_v29, %v4189_v30  ;;  %v14659_v44 = vcombine.low %v4185_v29, %v4189_v30 }
 0x652   : > { %11076 = vmatprep.subr.bf16.mxu0 %v14564_v15  ;;  %v4317_v25 = vld [vmem:[#allocation3 + $0xfb8] sm:$0xff] }
 0x653   : > { %11116 = vmatpush1.bf16.msra.mxu1 %v14699_v53  ;;  %v14788_v26 = vcombine.high %v4313_v63, %v4317_v25  ;;  %v4177_v36 = vld [vmem:[#allocation3 + $0xb58] sm:$0xff]  ;;  %v14787_v48 = vcombine.low %v4313_v63, %v4317_v25 }
 0x654   : > { %11117 = vmatprep.subr.bf16.mxu1 %v14692_v59  ;;  %v4181_v38 = vld [vmem:[#allocation3 + $0xb78] sm:$0xff] }
 0x655   : > { %11077 = vmatpush1.bf16.msra.mxu0 %v14563_v20  ;;  %v4305_v2 = vld [vmem:[#allocation3 + $0xf58] sm:$0xff]  ;;  %v14652_v49 = vcombine.high %v4177_v36, %v4181_v38  ;;  %v14651_v13 = vcombine.low %v4177_v36, %v4181_v38 }
 0x656   : > { %11078 = vmatprep.subr.bf16.mxu0 %v14556_v12  ;;  %v4309_v42 = vld [vmem:[#allocation3 + $0xf78] sm:$0xff] }
 0x657   : > { %11118 = vmatpush1.bf16.msra.mxu1 %v14691_v7  ;;  %v14780_v53 = vcombine.high %v4305_v2, %v4309_v42  ;;  %v4169_v15 = vld [vmem:[#allocation3 + $0xb18] sm:$0xff]  ;;  %v14779_v61 = vcombine.low %v4305_v2, %v4309_v42 }
 0x658   : > { %11119 = vmatprep.subr.bf16.mxu1 %v14684_v28  ;;  %v4173_v59 = vld [vmem:[#allocation3 + $0xb38] sm:$0xff] }
 0x659   : > { %11079 = vmatpush1.bf16.msra.mxu0 %v14555_v21  ;;  %v4297_v62 = vld [vmem:[#allocation3 + $0xf18] sm:$0xff]  ;;  %v14644_v20 = vcombine.high %v4169_v15, %v4173_v59  ;;  %v14643_v60 = vcombine.low %v4169_v15, %v4173_v59 }
 0x65a   : > { %11080 = vmatprep.subr.bf16.mxu0 %v14548_v5  ;;  %v4301_v9 = vld [vmem:[#allocation3 + $0xf38] sm:$0xff] }
 0x65b   : > { %11120 = vmatpush1.bf16.msra.mxu1 %v14683_v56  ;;  %v14772_v7 = vcombine.high %v4297_v62, %v4301_v9  ;;  %v4161_v12 = vld [vmem:[#allocation3 + $0xad8] sm:$0xff]  ;;  %v14771_v18 = vcombine.low %v4297_v62, %v4301_v9 }
 0x65c   : > { %11121 = vmatprep.subr.bf16.mxu1 %v14676_v41  ;;  %v4165_v28 = vld [vmem:[#allocation3 + $0xaf8] sm:$0xff] }
 0x65d   : > { %11081 = vmatpush1.bf16.msra.mxu0 %v14547_v40  ;;  %v4289_v14 = vld [vmem:[#allocation3 + $0xed8] sm:$0xff]  ;;  %v14636_v21 = vcombine.high %v4161_v12, %v4165_v28  ;;  %v14635_v22 = vcombine.low %v4161_v12, %v4165_v28 }
 0x65e   : > { %11082 = vmatprep.subr.bf16.mxu0 %v14668_v43  ;;  %v4293_v32 = vld [vmem:[#allocation3 + $0xef8] sm:$0xff] }
 0x65f   : > { %11122 = vmatpush1.bf16.msra.mxu1 %v14675_v1  ;;  %v14764_v56 = vcombine.high %v4289_v14, %v4293_v32  ;;  %v4153_v5 = vld [vmem:[#allocation3 + $0xa98] sm:$0xff]  ;;  %v14763_v3 = vcombine.low %v4289_v14, %v4293_v32 }
 0x660   : > { %11123 = vmatprep.subr.bf16.mxu1 %v14796_v0  ;;  %v4157_v41 = vld [vmem:[#allocation3 + $0xab8] sm:$0xff] }
 0x661   : > { %11083 = vmatpush2.bf16.msra.mxu0 %v14667_v45  ;;  %v4281_v4 = vld [vmem:[#allocation3 + $0xe98] sm:$0xff]  ;;  %v14628_v40 = vcombine.high %v4153_v5, %v4157_v41  ;;  %v14627_v63 = vcombine.low %v4153_v5, %v4157_v41 }
 0x662   : > { %11084 = vmatprep.subr.bf16.mxu0 %v14660_v11  ;;  %v4285_v17 = vld [vmem:[#allocation3 + $0xeb8] sm:$0xff] }
 0x663   : > { %11124 = vmatpush2.bf16.msra.mxu1 %v14795_v31  ;;  %v14756_v1 = vcombine.high %v4281_v4, %v4285_v17  ;;  %v4145_v43 = vld [vmem:[#allocation3 + $0xa58] sm:$0xff]  ;;  %v14755_v25 = vcombine.low %v4281_v4, %v4285_v17 }
 0x664   : > { %11125 = vmatprep.subr.bf16.mxu1 %v14788_v26  ;;  %v4149_v0 = vld [vmem:[#allocation3 + $0xa78] sm:$0xff] }
 0x665   : > { %11085 = vmatpush2.bf16.msra.mxu0 %v14659_v44  ;;  %v4273_v29 = vld [vmem:[#allocation3 + $0xe58] sm:$0xff]  ;;  %v14620_v45 = vcombine.high %v4145_v43, %v4149_v0  ;;  %v14619_v2 = vcombine.low %v4145_v43, %v4149_v0 }
 0x666   : > { %11086 = vmatprep.subr.bf16.mxu0 %v14652_v49  ;;  %v4277_v30 = vld [vmem:[#allocation3 + $0xe78] sm:$0xff] }
 0x667   : > { %11126 = vmatpush2.bf16.msra.mxu1 %v14787_v48  ;;  %v14748_v31 = vcombine.high %v4273_v29, %v4277_v30  ;;  %v4137_v11 = vld [vmem:[#allocation3 + $0xa18] sm:$0xff]  ;;  %v14747_v42 = vcombine.low %v4273_v29, %v4277_v30 }
 0x668   : > { %11127 = vmatprep.subr.bf16.mxu1 %v14780_v53  ;;  %v4141_v26 = vld [vmem:[#allocation3 + $0xa38] sm:$0xff] }
 0x669   : > { %11087 = vmatpush2.bf16.msra.mxu0 %v14651_v13  ;;  %v4265_v36 = vld [vmem:[#allocation3 + $0xe18] sm:$0xff]  ;;  %v14612_v44 = vcombine.high %v4137_v11, %v4141_v26  ;;  %v14611_v62 = vcombine.low %v4137_v11, %v4141_v26 }
 0x66a   : > { %11088 = vmatprep.subr.bf16.mxu0 %v14644_v20  ;;  %v4269_v38 = vld [vmem:[#allocation3 + $0xe38] sm:$0xff] }
 0x66b   : > { %11128 = vmatpush2.bf16.msra.mxu1 %v14779_v61  ;;  %v14740_v48 = vcombine.high %v4265_v36, %v4269_v38  ;;  %v4385_v49 = vld [vmem:[#allocation3 + $0x11d8] sm:$0xff]  ;;  %v14739_v9 = vcombine.low %v4265_v36, %v4269_v38 }
 0x66c   : > { %11129 = vmatprep.subr.bf16.mxu1 %v14772_v7  ;;  %v4389_v53 = vld [vmem:[#allocation3 + $0x11f8] sm:$0xff] }
 0x66d   : > { %11089 = vmatpush2.bf16.msra.mxu0 %v14643_v60  ;;  %v4513_v15 = vld [vmem:[#allocation3 + $0x15d8] sm:$0xff]  ;;  %v14860_v13 = vcombine.high %v4385_v49, %v4389_v53  ;;  %v14859_v14 = vcombine.low %v4385_v49, %v4389_v53 }
 0x66e   : > { %11090 = vmatprep.subr.bf16.mxu0 %v14636_v21  ;;  %v4517_v59 = vld [vmem:[#allocation3 + $0x15f8] sm:$0xff] }
 0x66f   : > { %11130 = vmatpush2.bf16.msra.mxu1 %v14771_v18  ;;  %v14988_v61 = vcombine.high %v4513_v15, %v4517_v59  ;;  %v4377_v20 = vld [vmem:[#allocation3 + $0x1198] sm:$0xff]  ;;  %v14987_v32 = vcombine.low %v4513_v15, %v4517_v59 }
 0x670   : > { %11131 = vmatprep.subr.bf16.mxu1 %v14764_v56  ;;  %v4381_v7 = vld [vmem:[#allocation3 + $0x11b8] sm:$0xff] }
 0x671   : > { %11091 = vmatpush2.bf16.msra.mxu0 %v14635_v22  ;;  %v4505_v12 = vld [vmem:[#allocation3 + $0x1598] sm:$0xff]  ;;  %v14852_v60 = vcombine.high %v4377_v20, %v4381_v7 }
 0x672   : > { %11092 = vmatprep.subr.bf16.mxu0 %v14628_v40  ;;  %v4509_v28 = vld [vmem:[#allocation3 + $0x15b8] sm:$0xff] }
 0x673   : > { %11132 = vmatpush2.bf16.msra.mxu1 %v14763_v3  ;;  %v14980_v18 = vcombine.high %v4505_v12, %v4509_v28  ;;  %v4369_v21 = vld [vmem:[#allocation3 + $0x1158] sm:$0xff]  ;;  %v14851_v3 = vcombine.low %v4377_v20, %v4381_v7 }
 0x674   : > { %11133 = vmatprep.subr.bf16.mxu1 %v14756_v1  ;;  %v4373_v56 = vld [vmem:[#allocation3 + $0x1178] sm:$0xff]  ;;  %v14979_v1 = vcombine.low %v4505_v12, %v4509_v28 }
 0x675   : > { %11093 = vmatpush2.bf16.msra.mxu0 %v14627_v63  ;;  %v4497_v41 = vld [vmem:[#allocation3 + $0x1558] sm:$0xff]  ;;  %v14844_v43 = vcombine.high %v4369_v21, %v4373_v56  ;;  %v14843_v26 = vcombine.low %v4369_v21, %v4373_v56 }
 0x676   : > { %11094 = vmatprep.subr.bf16.mxu0 %v14620_v45  ;;  %v4501_v4 = vld [vmem:[#allocation3 + $0x1578] sm:$0xff] }
 0x677   : > { %11134 = vmatpush2.bf16.msra.mxu1 %v14755_v25  ;;  %v4361_v63 = vld [vmem:[#allocation3 + $0x1118] sm:$0xff] }
 0x678   : > { %11135 = vmatprep.subr.bf16.mxu1 %v14748_v31  ;;  %v4365_v25 = vld [vmem:[#allocation3 + $0x1138] sm:$0xff] }
 0x679   : > { %11095 = vmatpush2.bf16.msra.mxu0 %v14619_v2  ;;  %v4493_v45 = vld [vmem:[#allocation3 + $0x1538] sm:$0xff]  ;;  %v14836_v38 = vcombine.high %v4361_v63, %v4365_v25  ;;  %v14835_v53 = vcombine.low %v4361_v63, %v4365_v25 }
 0x67a   : > { %11096 = vmatprep.subr.bf16.mxu0 %v14612_v44  ;;  %v4353_v44 = vld [vmem:[#allocation3 + $0x10d8] sm:$0xff] }
 0x67b   : > { %11136 = vmatpush2.bf16.msra.mxu1 %v14747_v42  ;;  %v4485_v49 = vld [vmem:[#allocation3 + $0x14f8] sm:$0xff] }
 0x67c   : > { %11137 = vmatprep.subr.bf16.mxu1 %v14740_v48  ;;  %v4481_v48 = vld [vmem:[#allocation3 + $0x14d8] sm:$0xff] }
 0x67d   : > { %11097 = vmatpush2.bf16.msra.mxu0 %v14611_v62  ;;  %v14956_v59 = vcombine.high %v4481_v48, %v4485_v49  ;;  %v4345_v62 = vld [vmem:[#allocation3 + $0x1098] sm:$0xff]  ;;  %v14955_v7 = vcombine.low %v4481_v48, %v4485_v49 }
 0x67e   : > { %11148 = vmatprep.subr.bf16.mxu0 %v14860_v13  ;;  %v4473_v13 = vld [vmem:[#allocation3 + $0x1498] sm:$0xff] }
 0x67f   : > { %11138 = vmatpush2.bf16.msra.mxu1 %v14739_v9  ;;  %v4349_v9 = vld [vmem:[#allocation3 + $0x10b8] sm:$0xff] }
 0x680   : > { %11189 = vmatprep.subr.bf16.mxu1 %v14988_v61  ;;  %v10854_v5 = vpop.f32.mrf.mxu0  ;;  %11099 = vmatmul.mubr.bf16.vlgmr.msra.gmra.mxu0 %v17345_v8  ;;  %v14972_v8 = vcombine.high %v4497_v41, %v4501_v4  ;;  %v4477_v61 = vld [vmem:[#allocation3 + $0x14b8] sm:$0xff]  ;;  %v14820_v12 = vcombine.high %v4345_v62, %v4349_v9  ;;  %v14819_v21 = vcombine.low %v4345_v62, %v4349_v9 }
 0x681   : > { %v10855_v17 = vadd.f32 %v10854_v5, %v17498_v39  ;;  %11149 = vmatpush1.bf16.msra.mxu0 %v14859_v14  ;;  %11180 = vmatprep.mubr.bf16.mxu0 %v17353_v33  ;;  %v4357_v33 = vld [vmem:[#allocation3 + $0x10f8] sm:$0xff]  ;;  %v14948_v28 = vcombine.high %v4473_v13, %v4477_v61  ;;  %v14947_v56 = vcombine.low %v4473_v13, %v4477_v61 }
 0x682   : > { %v10895_v22 = vpop.f32.mrf.mxu1  ;;  %11140 = vmatmul.mubr.bf16.vlgmr.msra.gmra.mxu1 %v17351_v27  ;;  %v10856_v40 = vpop.f32.mrf.mxu0  ;;  %11150 = vmatprep.subr.bf16.mxu0 %v14852_v60  ;;  %v4489_v27 = vld [vmem:[#allocation3 + $0x1518] sm:$0xff]  ;;  %v14828_v15 = vcombine.high %v4353_v44, %v4357_v33  ;;  %v14827_v20 = vcombine.low %v4353_v44, %v4357_v33 }
 0x683   : > { %11190 = vmatpush1.bf16.msra.mxu1 %v14987_v32  ;;  %v17508_v0 = vadd.f32 %v10895_v22, %v10855_v17  ;;  %v10857_v29 = vadd.f32 %v10856_v40, %v17503_v23  ;;  %11221 = vmatprep.mubr.bf16.mxu1 %v17356_v34  ;;  %v14971_v23 = vcombine.low %v4497_v41, %v4501_v4  ;;  %v4337_v14 = vld [vmem:[#allocation3 + $0x1058] sm:$0xff] }
 0x684   : > { %v10897_v30 = vpop.f32.mrf.mxu1  ;;  %11191 = vmatprep.subr.bf16.mxu1 %v14980_v18  ;;  %v10858_v39 = vpop.f32.mrf.mxu0  ;;  %v14964_v42 = vcombine.high %v4489_v27, %v4493_v45  ;;  %v14963_v34 = vcombine.low %v4489_v27, %v4493_v45  ;;  %v4341_v32 = vld [vmem:[#allocation3 + $0x1078] sm:$0xff] }
 0x685   : > { %v17513_v31 = vadd.f32 %v10897_v30, %v10857_v29  ;;  %11151 = vmatpush1.bf16.msra.mxu0 %v14851_v3  ;;  %v4465_v60 = vld [vmem:[#allocation3 + $0x1458] sm:$0xff]  ;;  %v14812_v5 = vcombine.high %v4337_v14, %v4341_v32  ;;  %v14811_v40 = vcombine.low %v4337_v14, %v4341_v32 }
 0x686   : > { %v10899_v11 = vpop.f32.mrf.mxu1  ;;  %v10859_v36 = vpop.f32.mrf.mxu0  ;;  %11152 = vmatprep.subr.bf16.mxu0 %v14844_v43  ;;  %v4469_v18 = vld [vmem:[#allocation3 + $0x1478] sm:$0xff] }
 0x687   : > { %11192 = vmatpush1.bf16.msra.mxu1 %v14979_v1  ;;  %v14940_v41 = vcombine.high %v4465_v60, %v4469_v18  ;;  %v4329_v4 = vld [vmem:[#allocation3 + $0x1018] sm:$0xff]  ;;  %v14939_v1 = vcombine.low %v4465_v60, %v4469_v18 }
 0x688   : > { %v10900_v2 = vpop.f32.mrf.mxu1  ;;  %11193 = vmatprep.subr.bf16.mxu1 %v14972_v8  ;;  %v4333_v17 = vld [vmem:[#allocation3 + $0x1038] sm:$0xff] }
 0x689   : > { %11153 = vmatpush1.bf16.msra.mxu0 %v14843_v26  ;;  %v4457_v22 = vld [vmem:[#allocation3 + $0x1418] sm:$0xff]  ;;  %v14804_v43 = vcombine.high %v4329_v4, %v4333_v17  ;;  %v14803_v39 = vcombine.low %v4329_v4, %v4333_v17 }
 0x68a   : > { %11154 = vmatprep.subr.bf16.mxu0 %v14836_v38  ;;  %v4461_v3 = vld [vmem:[#allocation3 + $0x1438] sm:$0xff] }
 0x68b   : > { %11194 = vmatpush1.bf16.msra.mxu1 %v14971_v23  ;;  %v14932_v29 = vcombine.high %v4457_v22, %v4461_v3  ;;  %v4449_v30 = vld [vmem:[#allocation3 + $0x13d8] sm:$0xff]  ;;  %v14931_v27 = vcombine.low %v4457_v22, %v4461_v3 }
 0x68c   : > { %11195 = vmatprep.subr.bf16.mxu1 %v14964_v42  ;;  %v4453_v8 = vld [vmem:[#allocation3 + $0x13f8] sm:$0xff] }
 0x68d   : > { %11155 = vmatpush1.bf16.msra.mxu0 %v14835_v53  ;;  %v4577_v63 = vld [vmem:[#allocation3 + $0x17d8] sm:$0xff]  ;;  %v14924_v45 = vcombine.high %v4449_v30, %v4453_v8  ;;  %v14923_v2 = vcombine.low %v4449_v30, %v4453_v8 }
 0x68e   : > { %11156 = vmatprep.subr.bf16.mxu0 %v14828_v15  ;;  %v4581_v25 = vld [vmem:[#allocation3 + $0x17f8] sm:$0xff] }
 0x68f   : > { %11196 = vmatpush1.bf16.msra.mxu1 %v14963_v34  ;;  %v15052_v11 = vcombine.high %v4577_v63, %v4581_v25  ;;  %v4441_v26 = vld [vmem:[#allocation3 + $0x1398] sm:$0xff]  ;;  %v15051_v42 = vcombine.low %v4577_v63, %v4581_v25 }
 0x690   : > { %11197 = vmatprep.subr.bf16.mxu1 %v14956_v59  ;;  %v4445_v36 = vld [vmem:[#allocation3 + $0x13b8] sm:$0xff] }
 0x691   : > { %11157 = vmatpush1.bf16.msra.mxu0 %v14827_v20  ;;  %v4569_v23 = vld [vmem:[#allocation3 + $0x1798] sm:$0xff]  ;;  %v14916_v44 = vcombine.high %v4441_v26, %v4445_v36  ;;  %v14915_v15 = vcombine.low %v4441_v26, %v4445_v36 }
 0x692   : > { %11158 = vmatprep.subr.bf16.mxu0 %v14820_v12  ;;  %v4573_v38 = vld [vmem:[#allocation3 + $0x17b8] sm:$0xff] }
 0x693   : > { %11198 = vmatpush1.bf16.msra.mxu1 %v14955_v7  ;;  %v15044_v33 = vcombine.high %v4569_v23, %v4573_v38  ;;  %v4433_v48 = vld [vmem:[#allocation3 + $0x1358] sm:$0xff]  ;;  %v15043_v59 = vcombine.low %v4569_v23, %v4573_v38 }
 0x694   : > { %11199 = vmatprep.subr.bf16.mxu1 %v14948_v28  ;;  %v4437_v49 = vld [vmem:[#allocation3 + $0x1378] sm:$0xff] }
 0x695   : > { %11159 = vmatpush1.bf16.msra.mxu0 %v14819_v21  ;;  %v4561_v53 = vld [vmem:[#allocation3 + $0x1758] sm:$0xff]  ;;  %v14908_v62 = vcombine.high %v4433_v48, %v4437_v49  ;;  %v14907_v12 = vcombine.low %v4433_v48, %v4437_v49 }
 0x696   : > { %11160 = vmatprep.subr.bf16.mxu0 %v14812_v5  ;;  %v4565_v34 = vld [vmem:[#allocation3 + $0x1778] sm:$0xff] }
 0x697   : > { %11200 = vmatpush1.bf16.msra.mxu1 %v14947_v56  ;;  %v15036_v9 = vcombine.high %v4561_v53, %v4565_v34  ;;  %v4425_v13 = vld [vmem:[#allocation3 + $0x1318] sm:$0xff]  ;;  %v15035_v28 = vcombine.low %v4561_v53, %v4565_v34 }
 0x698   : > { %11201 = vmatprep.subr.bf16.mxu1 %v14940_v41  ;;  %v4429_v61 = vld [vmem:[#allocation3 + $0x1338] sm:$0xff] }
 0x699   : > { %11161 = vmatpush1.bf16.msra.mxu0 %v14811_v40  ;;  %v4553_v20 = vld [vmem:[#allocation3 + $0x1718] sm:$0xff]  ;;  %v14900_v14 = vcombine.high %v4425_v13, %v4429_v61  ;;  %v14899_v5 = vcombine.low %v4425_v13, %v4429_v61 }
 0x69a   : > { %11162 = vmatprep.subr.bf16.mxu0 %v14804_v43  ;;  %v4557_v7 = vld [vmem:[#allocation3 + $0x1738] sm:$0xff] }
 0x69b   : > { %11202 = vmatpush1.bf16.msra.mxu1 %v14939_v1  ;;  %v15028_v32 = vcombine.high %v4553_v20, %v4557_v7  ;;  %v4417_v60 = vld [vmem:[#allocation3 + $0x12d8] sm:$0xff]  ;;  %v15027_v41 = vcombine.low %v4553_v20, %v4557_v7 }
 0x69c   : > { %11203 = vmatprep.subr.bf16.mxu1 %v14932_v29  ;;  %v4421_v18 = vld [vmem:[#allocation3 + $0x12f8] sm:$0xff] }
 0x69d   : > { %11163 = vmatpush1.bf16.msra.mxu0 %v14803_v39  ;;  %v4545_v21 = vld [vmem:[#allocation3 + $0x16d8] sm:$0xff]  ;;  %v14892_v4 = vcombine.high %v4417_v60, %v4421_v18  ;;  %v14891_v43 = vcombine.low %v4417_v60, %v4421_v18 }
 0x69e   : > { %11164 = vmatprep.subr.bf16.mxu0 %v14924_v45  ;;  %v4549_v56 = vld [vmem:[#allocation3 + $0x16f8] sm:$0xff] }
 0x69f   : > { %11204 = vmatpush1.bf16.msra.mxu1 %v14931_v27  ;;  %v15020_v17 = vcombine.high %v4545_v21, %v4549_v56  ;;  %v4409_v22 = vld [vmem:[#allocation3 + $0x1298] sm:$0xff]  ;;  %v15019_v29 = vcombine.low %v4545_v21, %v4549_v56 }
 0x6a0   : > { %11205 = vmatprep.subr.bf16.mxu1 %v15052_v11  ;;  %v4413_v3 = vld [vmem:[#allocation3 + $0x12b8] sm:$0xff] }
 0x6a1   : > { %11165 = vmatpush2.bf16.msra.mxu0 %v14923_v2  ;;  %v4537_v40 = vld [vmem:[#allocation3 + $0x1698] sm:$0xff]  ;;  %v14884_v30 = vcombine.high %v4409_v22, %v4413_v3  ;;  %v14883_v45 = vcombine.low %v4409_v22, %v4413_v3 }
 0x6a2   : > { %11166 = vmatprep.subr.bf16.mxu0 %v14916_v44  ;;  %v4541_v1 = vld [vmem:[#allocation3 + $0x16b8] sm:$0xff] }
 0x6a3   : > { %11206 = vmatpush2.bf16.msra.mxu1 %v15051_v42  ;;  %v15012_v8 = vcombine.high %v4537_v40, %v4541_v1  ;;  %v4401_v63 = vld [vmem:[#allocation3 + $0x1258] sm:$0xff]  ;;  %v15011_v11 = vcombine.low %v4537_v40, %v4541_v1 }
 0x6a4   : > { %11207 = vmatprep.subr.bf16.mxu1 %v15044_v33  ;;  %v4405_v25 = vld [vmem:[#allocation3 + $0x1278] sm:$0xff] }
 0x6a5   : > { %11167 = vmatpush2.bf16.msra.mxu0 %v14915_v15  ;;  %v4529_v39 = vld [vmem:[#allocation3 + $0x1658] sm:$0xff]  ;;  %v14876_v26 = vcombine.high %v4401_v63, %v4405_v25  ;;  %v14875_v44 = vcombine.low %v4401_v63, %v4405_v25 }
 0x6a6   : > { %11168 = vmatprep.subr.bf16.mxu0 %v14908_v62  ;;  %v4533_v27 = vld [vmem:[#allocation3 + $0x1678] sm:$0xff] }
 0x6a7   : > { %11208 = vmatpush2.bf16.msra.mxu1 %v15043_v59  ;;  %v15004_v36 = vcombine.high %v4529_v39, %v4533_v27  ;;  %v4393_v23 = vld [vmem:[#allocation3 + $0x1218] sm:$0xff]  ;;  %v15003_v33 = vcombine.low %v4529_v39, %v4533_v27 }
 0x6a8   : > { %11209 = vmatprep.subr.bf16.mxu1 %v15036_v9  ;;  %v4397_v38 = vld [vmem:[#allocation3 + $0x1238] sm:$0xff] }
 0x6a9   : > { %11169 = vmatpush2.bf16.msra.mxu0 %v14907_v12  ;;  %v4521_v2 = vld [vmem:[#allocation3 + $0x1618] sm:$0xff]  ;;  %v14868_v48 = vcombine.high %v4393_v23, %v4397_v38  ;;  %v14867_v62 = vcombine.low %v4393_v23, %v4397_v38 }
 0x6aa   : > { %11170 = vmatprep.subr.bf16.mxu0 %v14900_v14  ;;  %v4525_v42 = vld [vmem:[#allocation3 + $0x1638] sm:$0xff] }
 0x6ab   : > { %11210 = vmatpush2.bf16.msra.mxu1 %v15035_v28  ;;  %v14996_v49 = vcombine.high %v4521_v2, %v4525_v42  ;;  %v4641_v53 = vld [vmem:[#allocation3 + $0x19d8] sm:$0xff]  ;;  %v14995_v9 = vcombine.low %v4521_v2, %v4525_v42 }
 0x6ac   : > { %11211 = vmatprep.subr.bf16.mxu1 %v15028_v32  ;;  %v4645_v34 = vld [vmem:[#allocation3 + $0x19f8] sm:$0xff] }
 0x6ad   : > { %11171 = vmatpush2.bf16.msra.mxu0 %v14899_v5  ;;  %v4769_v15 = vld [vmem:[#allocation3 + $0x1dd8] sm:$0xff]  ;;  %v15116_v13 = vcombine.high %v4641_v53, %v4645_v34  ;;  %v15115_v14 = vcombine.low %v4641_v53, %v4645_v34 }
 0x6ae   : > { %11172 = vmatprep.subr.bf16.mxu0 %v14892_v4  ;;  %v4773_v59 = vld [vmem:[#allocation3 + $0x1df8] sm:$0xff] }
 0x6af   : > { %11212 = vmatpush2.bf16.msra.mxu1 %v15027_v41  ;;  %v15244_v61 = vcombine.high %v4769_v15, %v4773_v59  ;;  %v4633_v20 = vld [vmem:[#allocation3 + $0x1998] sm:$0xff]  ;;  %v15243_v32 = vcombine.low %v4769_v15, %v4773_v59 }
 0x6b0   : > { %11213 = vmatprep.subr.bf16.mxu1 %v15020_v17  ;;  %v4637_v7 = vld [vmem:[#allocation3 + $0x19b8] sm:$0xff] }
 0x6b1   : > { %11173 = vmatpush2.bf16.msra.mxu0 %v14891_v43  ;;  %v4761_v12 = vld [vmem:[#allocation3 + $0x1d98] sm:$0xff]  ;;  %v15108_v60 = vcombine.high %v4633_v20, %v4637_v7  ;;  %v15107_v3 = vcombine.low %v4633_v20, %v4637_v7 }
 0x6b2   : > { %11174 = vmatprep.subr.bf16.mxu0 %v14884_v30  ;;  %v4765_v28 = vld [vmem:[#allocation3 + $0x1db8] sm:$0xff] }
 0x6b3   : > { %11214 = vmatpush2.bf16.msra.mxu1 %v15019_v29  ;;  %v15236_v18 = vcombine.high %v4761_v12, %v4765_v28  ;;  %v4625_v21 = vld [vmem:[#allocation3 + $0x1958] sm:$0xff]  ;;  %v15235_v1 = vcombine.low %v4761_v12, %v4765_v28 }
 0x6b4   : > { %11215 = vmatprep.subr.bf16.mxu1 %v15012_v8  ;;  %v4629_v56 = vld [vmem:[#allocation3 + $0x1978] sm:$0xff] }
 0x6b5   : > { %11175 = vmatpush2.bf16.msra.mxu0 %v14883_v45  ;;  %v4753_v41 = vld [vmem:[#allocation3 + $0x1d58] sm:$0xff]  ;;  %v15100_v43 = vcombine.high %v4625_v21, %v4629_v56 }
 0x6b6   : > { %11176 = vmatprep.subr.bf16.mxu0 %v14876_v26  ;;  %v4757_v4 = vld [vmem:[#allocation3 + $0x1d78] sm:$0xff] }
 0x6b7   : > { %11216 = vmatpush2.bf16.msra.mxu1 %v15011_v11  ;;  %v4617_v63 = vld [vmem:[#allocation3 + $0x1918] sm:$0xff]  ;;  %v15099_v11 = vcombine.low %v4625_v21, %v4629_v56 }
 0x6b8   : > { %11217 = vmatprep.subr.bf16.mxu1 %v15004_v36  ;;  %v4621_v25 = vld [vmem:[#allocation3 + $0x1938] sm:$0xff] }
 0x6b9   : > { %11177 = vmatpush2.bf16.msra.mxu0 %v14875_v44  ;;  %v4749_v39 = vld [vmem:[#allocation3 + $0x1d38] sm:$0xff]  ;;  %v15092_v36 = vcombine.high %v4617_v63, %v4621_v25 }
 0x6ba   : > { %11178 = vmatprep.subr.bf16.mxu0 %v14868_v48  ;;  %v4609_v2 = vld [vmem:[#allocation3 + $0x18d8] sm:$0xff] }
 0x6bb   : > { %11218 = vmatpush2.bf16.msra.mxu1 %v15003_v33  ;;  %v4737_v42 = vld [vmem:[#allocation3 + $0x1cd8] sm:$0xff]  ;;  %v15091_v33 = vcombine.low %v4617_v63, %v4621_v25 }
 0x6bc   : > { %11219 = vmatprep.subr.bf16.mxu1 %v14996_v49  ;;  %v4741_v44 = vld [vmem:[#allocation3 + $0x1cf8] sm:$0xff] }
 0x6bd   : > { %11179 = vmatpush2.bf16.msra.mxu0 %v14867_v62  ;;  %v15212_v49 = vcombine.high %v4737_v42, %v4741_v44  ;;  %v4601_v53 = vld [vmem:[#allocation3 + $0x1898] sm:$0xff] }
 0x6be   : > { %11230 = vmatprep.subr.bf16.mxu0 %v15116_v13  ;;  %v4605_v34 = vld [vmem:[#allocation3 + $0x18b8] sm:$0xff] }
 0x6bf   : > { %11220 = vmatpush2.bf16.msra.mxu1 %v14995_v9  ;;  %v4729_v15 = vld [vmem:[#allocation3 + $0x1c98] sm:$0xff]  ;;  %v15211_v9 = vcombine.low %v4737_v42, %v4741_v44  ;;  %v15076_v13 = vcombine.high %v4601_v53, %v4605_v34 }
 0x6c0   : > { %11271 = vmatprep.subr.bf16.mxu1 %v15244_v61  ;;  %v10936_v5 = vpop.f32.mrf.mxu0  ;;  %11181 = vmatmul.mubr.bf16.vlgmr.msra.gmra.mxu0 %v17381_v46  ;;  %v15228_v46 = vcombine.high %v4753_v41, %v4757_v4  ;;  %v4733_v59 = vld [vmem:[#allocation3 + $0x1cb8] sm:$0xff] }
 0x6c1   : > { %v10937_v17 = vadd.f32 %v10936_v5, %v17508_v0  ;;  %11231 = vmatpush1.bf16.msra.mxu0 %v15115_v14  ;;  %11262 = vmatprep.mubr.bf16.mxu0 %v17389_v6  ;;  %v4613_v6 = vld [vmem:[#allocation3 + $0x18f8] sm:$0xff]  ;;  %v15204_v61 = vcombine.high %v4729_v15, %v4733_v59  ;;  %v15075_v14 = vcombine.low %v4601_v53, %v4605_v34 }
 0x6c2   : > { %v10977_v22 = vpop.f32.mrf.mxu1  ;;  %11222 = vmatmul.mubr.bf16.vlgmr.msra.gmra.mxu1 %v17387_v47  ;;  %v10938_v40 = vpop.f32.mrf.mxu0  ;;  %11232 = vmatprep.subr.bf16.mxu0 %v15108_v60  ;;  %v4745_v47 = vld [vmem:[#allocation3 + $0x1d18] sm:$0xff]  ;;  %v15084_v48 = vcombine.high %v4609_v2, %v4613_v6  ;;  %v15083_v62 = vcombine.low %v4609_v2, %v4613_v6 }
 0x6c3   : > { %11272 = vmatpush1.bf16.msra.mxu1 %v15243_v32  ;;  %v17518_v29 = vadd.f32 %v10977_v22, %v10937_v17  ;;  %v10939_v30 = vadd.f32 %v10938_v40, %v17513_v31  ;;  %11303 = vmatprep.mubr.bf16.mxu1 %v17392_v19  ;;  %v15227_v31 = vcombine.low %v4753_v41, %v4757_v4  ;;  %v4593_v20 = vld [vmem:[#allocation3 + $0x1858] sm:$0xff] }
 0x6c4   : > { %v10979_v8 = vpop.f32.mrf.mxu1  ;;  %11273 = vmatprep.subr.bf16.mxu1 %v15236_v18  ;;  %v10940_v0 = vpop.f32.mrf.mxu0  ;;  %v15220_v38 = vcombine.high %v4745_v47, %v4749_v39  ;;  %v15219_v19 = vcombine.low %v4745_v47, %v4749_v39  ;;  %v4597_v7 = vld [vmem:[#allocation3 + $0x1878] sm:$0xff]  ;;  %v15203_v32 = vcombine.low %v4729_v15, %v4733_v59 }
 0x6c5   : > { %v17523_v27 = vadd.f32 %v10979_v8, %v10939_v30  ;;  %11233 = vmatpush1.bf16.msra.mxu0 %v15107_v3  ;;  %v4721_v12 = vld [vmem:[#allocation3 + $0x1c58] sm:$0xff]  ;;  %v15068_v60 = vcombine.high %v4593_v20, %v4597_v7  ;;  %v15067_v4 = vcombine.low %v4593_v20, %v4597_v7  ;;  %vm11316_vm9 = vcmp.gt.f32.partialorder %v17518_v29, 0.0 }
 0x6c6   : > { %v10981_v45 = vpop.f32.mrf.mxu1  ;;  %v10941_v26 = vpop.f32.mrf.mxu0  ;;  %11234 = vmatprep.subr.bf16.mxu0 %v15100_v43  ;;  %v4725_v28 = vld [vmem:[#allocation3 + $0x1c78] sm:$0xff] }
 0x6c7   : > { %11274 = vmatpush1.bf16.msra.mxu1 %v15235_v1  ;;  %v15196_v18 = vcombine.high %v4721_v12, %v4725_v28  ;;  %v4585_v21 = vld [vmem:[#allocation3 + $0x1818] sm:$0xff]  ;;  %v15195_v17 = vcombine.low %v4721_v12, %v4725_v28  ;;  %vm11317_vm8 = vcmp.gt.f32.partialorder %v17523_v27, 0.0 }
 0x6c8   : > { %v10982_v23 = vpop.f32.mrf.mxu1  ;;  %11275 = vmatprep.subr.bf16.mxu1 %v15228_v46  ;;  %v4589_v56 = vld [vmem:[#allocation3 + $0x1838] sm:$0xff] }
 0x6c9   : > { %11235 = vmatpush1.bf16.msra.mxu0 %v15099_v11  ;;  %v4713_v5 = vld [vmem:[#allocation3 + $0x1c18] sm:$0xff]  ;;  %v15060_v22 = vcombine.high %v4585_v21, %v4589_v56  ;;  %v15059_v8 = vcombine.low %v4585_v21, %v4589_v56 }
 0x6ca   : > { %11236 = vmatprep.subr.bf16.mxu0 %v15092_v36  ;;  %v4717_v41 = vld [vmem:[#allocation3 + $0x1c38] sm:$0xff] }
 0x6cb   : > { %11276 = vmatpush1.bf16.msra.mxu1 %v15227_v31  ;;  %v15188_v3 = vcombine.high %v4713_v5, %v4717_v41  ;;  %v4705_v40 = vld [vmem:[#allocation3 + $0x1bd8] sm:$0xff]  ;;  %v15187_v46 = vcombine.low %v4713_v5, %v4717_v41 }
 0x6cc   : > { %11277 = vmatprep.subr.bf16.mxu1 %v15220_v38  ;;  %v4709_v1 = vld [vmem:[#allocation3 + $0x1bf8] sm:$0xff] }
 0x6cd   : > { %11237 = vmatpush1.bf16.msra.mxu0 %v15091_v33  ;;  %v4833_v43 = vld [vmem:[#allocation3 + $0x1fd8] sm:$0xff]  ;;  %v15180_v63 = vcombine.high %v4705_v40, %v4709_v1  ;;  %v15179_v11 = vcombine.low %v4705_v40, %v4709_v1 }
 0x6ce   : > { %11238 = vmatprep.subr.bf16.mxu0 %v15084_v48  ;;  %v4837_v30 = vld [vmem:[#allocation3 + $0x1ff8] sm:$0xff] }
 0x6cf   : > { %11278 = vmatpush1.bf16.msra.mxu1 %v15219_v19  ;;  %v15308_v25 = vcombine.high %v4833_v43, %v4837_v30  ;;  %v4697_v0 = vld [vmem:[#allocation3 + $0x1b98] sm:$0xff]  ;;  %v15307_v26 = vcombine.low %v4833_v43, %v4837_v30 }
 0x6d0   : > { %11279 = vmatprep.subr.bf16.mxu1 %v15212_v49  ;;  %v4701_v47 = vld [vmem:[#allocation3 + $0x1bb8] sm:$0xff] }
 0x6d1   : > { %11239 = vmatpush1.bf16.msra.mxu0 %v15083_v62  ;;  %v4825_v39 = vld [vmem:[#allocation3 + $0x1f98] sm:$0xff]  ;;  %v15172_v31 = vcombine.high %v4697_v0, %v4701_v47  ;;  %v15171_v42 = vcombine.low %v4697_v0, %v4701_v47 }
 0x6d2   : > { %11240 = vmatprep.subr.bf16.mxu0 %v15076_v13  ;;  %v4829_v45 = vld [vmem:[#allocation3 + $0x1fb8] sm:$0xff] }
 0x6d3   : > { %11280 = vmatpush1.bf16.msra.mxu1 %v15211_v9  ;;  %v15300_v36 = vcombine.high %v4825_v39, %v4829_v45  ;;  %v4689_v23 = vld [vmem:[#allocation3 + $0x1b58] sm:$0xff]  ;;  %v15299_v44 = vcombine.low %v4825_v39, %v4829_v45 }
 0x6d4   : > { %11281 = vmatprep.subr.bf16.mxu1 %v15204_v61  ;;  %v4693_v38 = vld [vmem:[#allocation3 + $0x1b78] sm:$0xff] }
 0x6d5   : > { %11241 = vmatpush1.bf16.msra.mxu0 %v15075_v14  ;;  %v4817_v2 = vld [vmem:[#allocation3 + $0x1f58] sm:$0xff]  ;;  %v15164_v33 = vcombine.high %v4689_v23, %v4693_v38  ;;  %v15163_v15 = vcombine.low %v4689_v23, %v4693_v38  ;;  %v11323_v23 = vmul.f32 0.2, %v17483_v55 }
 0x6d6   : > { %11242 = vmatprep.subr.bf16.mxu0 %v15068_v60  ;;  %v4821_v6 = vld [vmem:[#allocation3 + $0x1f78] sm:$0xff] }
 0x6d7   : > { %11282 = vmatpush1.bf16.msra.mxu1 %v15203_v32  ;;  %v15292_v19 = vcombine.high %v4817_v2, %v4821_v6  ;;  %v4681_v48 = vld [vmem:[#allocation3 + $0x1b18] sm:$0xff]  ;;  %v15291_v59 = vcombine.low %v4817_v2, %v4821_v6  ;;  %v15742_v2 = vld [vmem:[#allocation4 + $0xe4] ss:$16 sps:$4 sm:$0xff]  }
 0x6d8   : > { %11283 = vmatprep.subr.bf16.mxu1 %v15196_v18  ;;  %v4685_v49 = vld [vmem:[#allocation3 + $0x1b38] sm:$0xff]  ;;  %v15745_v6 = vld [vmem:[#allocation4 + $0x2e4] ss:$16 sps:$4 sm:$0xff]  }
 0x6d9   : > { %11243 = vmatpush1.bf16.msra.mxu0 %v15067_v4  ;;  %v4809_v53 = vld [vmem:[#allocation3 + $0x1f18] sm:$0xff]  ;;  %v15156_v62 = vcombine.high %v4681_v48, %v4685_v49  ;;  %v15155_v12 = vcombine.low %v4681_v48, %v4685_v49  ;;  %v15743_v48 = vld [vmem:[#allocation4 + $0x2e0] ss:$16 sps:$4 sm:$0xff]   ;;  %v11331_v49 = vsel %vm11315_vm5, %v17483_v55, %v11323_v23 }
 0x6da   : > { %11244 = vmatprep.subr.bf16.mxu0 %v15060_v22  ;;  %v4813_v34 = vld [vmem:[#allocation3 + $0x1f38] sm:$0xff]  ;;  %v15791_v23 = vld [vmem:[#allocation4 + $0x3e0] ss:$16 sps:$4 sm:$0xff]  }
 0x6db   : > { %11284 = vmatpush1.bf16.msra.mxu1 %v15195_v17  ;;  %v15284_v9 = vcombine.high %v4809_v53, %v4813_v34  ;;  %v4673_v13 = vld [vmem:[#allocation3 + $0x1ad8] sm:$0xff]  ;;  %v15283_v28 = vcombine.low %v4809_v53, %v4813_v34  ;;  %v15748_v34 = vld [vmem:[#allocation4 + $0xc4] ss:$16 sps:$4 sm:$0xff]  }
 0x6dc   : > { %11285 = vmatprep.subr.bf16.mxu1 %v15188_v3  ;;  %v4677_v61 = vld [vmem:[#allocation3 + $0x1af8] sm:$0xff] }
 0x6dd   : > { %11245 = vmatpush1.bf16.msra.mxu0 %v15059_v8  ;;  %v4801_v20 = vld [vmem:[#allocation3 + $0x1ed8] sm:$0xff]  ;;  %v15148_v14 = vcombine.high %v4673_v13, %v4677_v61  ;;  %v15147_v5 = vcombine.low %v4673_v13, %v4677_v61  ;;  %v15746_v13 = vld [vmem:[#allocation4 + $0xc0] ss:$16 sps:$4 sm:$0xff]   ;;  %v15754_v61 = vld [vmem:[#allocation4 + $0xa4] ss:$16 sps:$4 sm:$0xff]  }
 0x6de   : > { %11246 = vmatprep.subr.bf16.mxu0 %v15180_v63  ;;  %v4805_v7 = vld [vmem:[#allocation3 + $0x1ef8] sm:$0xff] }
 0x6df   : > { %11286 = vmatpush1.bf16.msra.mxu1 %v15187_v46  ;;  %v15276_v32 = vcombine.high %v4801_v20, %v4805_v7  ;;  %v4665_v60 = vld [vmem:[#allocation3 + $0x1a98] sm:$0xff]  ;;  %v15275_v41 = vcombine.low %v4801_v20, %v4805_v7 }
 0x6e0   : > { %11287 = vmatprep.subr.bf16.mxu1 %v15308_v25  ;;  %v4669_v18 = vld [vmem:[#allocation3 + $0x1ab8] sm:$0xff] }
 0x6e1   : > { %11247 = vmatpush2.bf16.msra.mxu0 %v15179_v11  ;;  %v4793_v21 = vld [vmem:[#allocation3 + $0x1e98] sm:$0xff]  ;;  %v15140_v4 = vcombine.high %v4665_v60, %v4669_v18  ;;  %v15139_v43 = vcombine.low %v4665_v60, %v4669_v18  ;;  %v15755_v18 = vld [vmem:[#allocation4 + $0x2a0] ss:$16 sps:$4 sm:$0xff]  }
 0x6e2   : > { %11248 = vmatprep.subr.bf16.mxu0 %v15172_v31  ;;  %v4797_v56 = vld [vmem:[#allocation3 + $0x1eb8] sm:$0xff]  ;;  %v11321_v31 = vmul.f32 0.2, %v17443_v35 }
 0x6e3   : > { %11288 = vmatpush2.bf16.msra.mxu1 %v15307_v26  ;;  %v15268_v17 = vcombine.high %v4793_v21, %v4797_v56  ;;  %v4657_v22 = vld [vmem:[#allocation3 + $0x1a58] sm:$0xff]  ;;  %v15267_v30 = vcombine.low %v4793_v21, %v4797_v56  ;;  %v15760_v21 = vld [vmem:[#allocation4 + $0x84] ss:$16 sps:$4 sm:$0xff]  }
 0x6e4   : > { %11289 = vmatprep.subr.bf16.mxu1 %v15300_v36  ;;  %v4661_v3 = vld [vmem:[#allocation3 + $0x1a78] sm:$0xff] }
 0x6e5   : > { %11249 = vmatpush2.bf16.msra.mxu0 %v15171_v42  ;;  %v4785_v40 = vld [vmem:[#allocation3 + $0x1e58] sm:$0xff]  ;;  %v15132_v8 = vcombine.high %v4657_v22, %v4661_v3  ;;  %v15131_v39 = vcombine.low %v4657_v22, %v4661_v3  ;;  %v15769_v22 = vld [vmem:[#allocation4 + $0x264] ss:$16 sps:$4 sm:$0xff]   ;;  %v15764_v3 = vld [vmem:[#allocation4 + $0x60] ss:$16 sps:$4 sm:$0xff]  }
 0x6e6   : > { %11250 = vmatprep.subr.bf16.mxu0 %v15164_v33  ;;  %v4789_v1 = vld [vmem:[#allocation3 + $0x1e78] sm:$0xff]  ;;  %v15740_v33 = vld [vmem:[#allocation4 + $0xe0] ss:$16 sps:$4 sm:$0xff]  }
 0x6e7   : > { %11290 = vmatpush2.bf16.msra.mxu1 %v15299_v44  ;;  %v15260_v46 = vcombine.high %v4785_v40, %v4789_v1  ;;  %v4649_v63 = vld [vmem:[#allocation3 + $0x1a18] sm:$0xff]  ;;  %v15259_v45 = vcombine.low %v4785_v40, %v4789_v1  ;;  %v15767_v40 = vld [vmem:[#allocation4 + $0x260] ss:$16 sps:$4 sm:$0xff]   ;;  %v15772_v1 = vld [vmem:[#allocation4 + $0x44] ss:$16 sps:$4 sm:$0xff]  }
 0x6e8   : > { %11291 = vmatprep.subr.bf16.mxu1 %v15292_v19  ;;  %v4653_v25 = vld [vmem:[#allocation3 + $0x1a38] sm:$0xff]  ;;  %v11329_v19 = vsel %vm11313_vm4, %v17443_v35, %v11321_v31  ;;  %v17537_v35 = vpack.c.bf16 %v11331_v49, %v11331_v49  ;;  %v15793_v31 = vld [vmem:[#allocation4 + $0x3e4] ss:$16 sps:$4 sm:$0xff]  }
 0x6e9   : > { %11251 = vmatpush2.bf16.msra.mxu0 %v15163_v15  ;;  %v4777_v0 = vld [vmem:[#allocation3 + $0x1e18] sm:$0xff]  ;;  %v15124_v11 = vcombine.high %v4649_v63, %v4653_v25  ;;  %v15123_v36 = vcombine.low %v4649_v63, %v4653_v25  ;;  %v15781_v63 = vld [vmem:[#allocation4 + $0x224] ss:$16 sps:$4 sm:$0xff]   ;;  %v15776_v25 = vld [vmem:[#allocation4 + $0x20] ss:$16 sps:$4 sm:$0xff]  }
 0x6ea   : > { %11252 = vmatprep.subr.bf16.mxu0 %v15156_v62  ;;  %v4781_v47 = vld [vmem:[#allocation3 + $0x1e38] sm:$0xff]  ;;  %v15751_v62 = vld [vmem:[#allocation4 + $0x2c4] ss:$16 sps:$4 sm:$0xff]  }
 0x6eb   : > { %11292 = vmatpush2.bf16.msra.mxu1 %v15291_v59  ;;  %v15252_v26 = vcombine.high %v4777_v0, %v4781_v47  ;;  %v15251_v38 = vcombine.low %v4777_v0, %v4781_v47  ;;  %v16226_v42 = vld [vmem:[#allocation12] sm:$0xff]  ;;  %v17534_v59 = vpack.c.bf16 %v11329_v19, %v11329_v19 }
 0x6ec   : > { %11293 = vmatprep.subr.bf16.mxu1 %v15284_v9  ;;  %v4867_v44 = vrot.slane %v16226_v42, %v17281_v54  ;;  %v4871_v53 = vrot.slane %v16226_v42, %v17284_v24  ;;  %v15749_v24 = vld [vmem:[#allocation4 + $0x2c0] ss:$16 sps:$4 sm:$0xff]   ;;  %v15784_v47 = vld [vmem:[#allocation4 + $0x4] ss:$16 sps:$4 sm:$0xff]  }
 0x6ed   : > { %11253 = vmatpush2.bf16.msra.mxu0 %v15155_v12  ;;  %v15757_v12 = vld [vmem:[#allocation4 + $0x2a4] ss:$16 sps:$4 sm:$0xff]   ;;  %v15779_v0 = vld [vmem:[#allocation4 + $0x220] ss:$16 sps:$4 sm:$0xff]  }
 0x6ee   : > { %11254 = vmatprep.subr.bf16.mxu0 %v15148_v14  ;;  %v15797_v42 = vld [vmem:[#allocation4 + $0x3c0] ss:$16 sps:$4 sm:$0xff]   ;;  %v15808_v49 = vld [vmem:[#allocation4 + $0x184] ss:$16 sps:$4 sm:$0xff]  }
 0x6ef   : > { %11294 = vmatpush2.bf16.msra.mxu1 %v15283_v28  ;;  %v15800_v19 = vld [vmem:[#allocation4 + $0x1a0] ss:$16 sps:$4 sm:$0xff]  }
 0x6f0   : > { %11295 = vmatprep.subr.bf16.mxu1 %v15276_v32  ;;  %v15752_v32 = vld [vmem:[#allocation4 + $0xa0] ss:$16 sps:$4 sm:$0xff]  }
 0x6f1   : > { %11255 = vmatpush2.bf16.msra.mxu0 %v15147_v5  ;;  %v15763_v5 = vld [vmem:[#allocation4 + $0x284] ss:$16 sps:$4 sm:$0xff]  }
 0x6f2   : > { %11256 = vmatprep.subr.bf16.mxu0 %v15140_v4  ;;  %v15761_v4 = vld [vmem:[#allocation4 + $0x280] ss:$16 sps:$4 sm:$0xff]  }
 0x6f3   : > { %11296 = vmatpush2.bf16.msra.mxu1 %v15275_v41  ;;  %v15758_v41 = vld [vmem:[#allocation4 + $0x80] ss:$16 sps:$4 sm:$0xff]  }
 0x6f4   : > { %11297 = vmatprep.subr.bf16.mxu1 %v15268_v17  ;;  %v15766_v17 = vld [vmem:[#allocation4 + $0x64] ss:$16 sps:$4 sm:$0xff]  }
 0x6f5   : > { %11257 = vmatpush2.bf16.msra.mxu0 %v15139_v43  ;;  %v15775_v43 = vld [vmem:[#allocation4 + $0x244] ss:$16 sps:$4 sm:$0xff]  }
 0x6f6   : > { %11258 = vmatprep.subr.bf16.mxu0 %v15132_v8  ;;  %v15773_v8 = vld [vmem:[#allocation4 + $0x240] ss:$16 sps:$4 sm:$0xff]  }
 0x6f7   : > { %11298 = vmatpush2.bf16.msra.mxu1 %v15267_v30  ;;  %v15770_v30 = vld [vmem:[#allocation4 + $0x40] ss:$16 sps:$4 sm:$0xff]  }
 0x6f8   : > { %11299 = vmatprep.subr.bf16.mxu1 %v15260_v46  ;;  %v15778_v46 = vld [vmem:[#allocation4 + $0x24] ss:$16 sps:$4 sm:$0xff]  }
 0x6f9   : > { %11259 = vmatpush2.bf16.msra.mxu0 %v15131_v39  ;;  %v15787_v39 = vld [vmem:[#allocation4 + $0x204] ss:$16 sps:$4 sm:$0xff]  }
 0x6fa   : > { %11260 = vmatprep.subr.bf16.mxu0 %v15124_v11  ;;  %v15785_v11 = vld [vmem:[#allocation4 + $0x200] ss:$16 sps:$4 sm:$0xff]  }
 0x6fb   : > { %11300 = vmatpush2.bf16.msra.mxu1 %v15259_v45  ;;  %v15782_v45 = vld [vmem:[#allocation4] ss:$16 sps:$4 sm:$0xff]  }
 0x6fc   : > { %11301 = vmatprep.subr.bf16.mxu1 %v15252_v26  ;;  %v15790_v26 = vld [vmem:[#allocation4 + $0x1e4] ss:$16 sps:$4 sm:$0xff]  }
 0x6fd   : > { %11261 = vmatpush2.bf16.msra.mxu0 %v15123_v36  ;;  %v15788_v36 = vld [vmem:[#allocation4 + $0x1e0] ss:$16 sps:$4 sm:$0xff]  }
 0x6fe   : > { %12902 = vmatprep.subr.bf16.mxu0 %v15742_v2  ;;  %v15799_v2 = vld [vmem:[#allocation4 + $0x3c4] ss:$16 sps:$4 sm:$0xff]  }
 0x6ff   : > { %11302 = vmatpush2.bf16.msra.mxu1 %v15251_v38  ;;  %v15796_v38 = vld [vmem:[#allocation4 + $0x1c4] ss:$16 sps:$4 sm:$0xff]  }
 0x700   : > { %12943 = vmatprep.subr.bf16.mxu1 %v15745_v6  ;;  %v11018_v15 = vpop.f32.mrf.mxu0  ;;  %11263 = vmatmul.mubr.bf16.vlgmr.msra.gmra.mxu0 %v17399_v10  ;;  %v15794_v6 = vld [vmem:[#allocation4 + $0x1c0] ss:$16 sps:$4 sm:$0xff]  }
 0x701   : > { %v11019_v9 = vadd.f32 %v11018_v15, %v4867_v44  ;;  %12903 = vmatpush1.bf16.msra.mxu0 %v15740_v33  ;;  %12934 = vmatprep.mubr.bf16.mxu0 %v17534_v59  ;;  %v15802_v44 = vld [vmem:[#allocation4 + $0x1a4] ss:$16 sps:$4 sm:$0xff]   ;;  %v15809_v15 = vld [vmem:[#allocation4 + $0x380] ss:$16 sps:$4 sm:$0xff]  }
 0x702   : > { %v11059_v54 = vpop.f32.mrf.mxu1  ;;  %11304 = vmatmul.mubr.bf16.vlgmr.msra.gmra.mxu1 %v17404_v16  ;;  %v11020_v55 = vpop.f32.mrf.mxu0  ;;  %12904 = vmatprep.subr.bf16.mxu0 %v15748_v34  ;;  %v15805_v33 = vld [vmem:[#allocation4 + $0x3a4] ss:$16 sps:$4 sm:$0xff]   ;;  %v15806_v34 = vld [vmem:[#allocation4 + $0x180] ss:$16 sps:$4 sm:$0xff]  }
 0x703   : > { %12944 = vmatpush1.bf16.msra.mxu1 %v15743_v48  ;;  %v17540_v20 = vadd.f32 %v11059_v54, %v11019_v9  ;;  %12975 = vmatprep.mubr.bf16.mxu1 %v17537_v35  ;;  %v11021_v10 = vadd.f32 %v11020_v55, %v4871_v53  ;;  %v15803_v48 = vld [vmem:[#allocation4 + $0x3a0] ss:$16 sps:$4 sm:$0xff]   ;;  %v15811_v53 = vld [vmem:[#allocation4 + $0x384] ss:$16 sps:$4 sm:$0xff]  }
 0x704   : > { %v11061_v7 = vpop.f32.mrf.mxu1  ;;  %v11022_v28 = vpop.f32.mrf.mxu0  ;;  %12945 = vmatprep.subr.bf16.mxu1 %v15751_v62  ;;  %v15814_v62 = vld [vmem:[#allocation4 + $0x164] ss:$16 sps:$4 sm:$0xff]   ;;  %v15812_v54 = vld [vmem:[#allocation4 + $0x160] ss:$16 sps:$4 sm:$0xff]  }
 0x705   : > { %v17543_v16 = vadd.f32 %v11061_v7, %v11021_v10  ;;  %12905 = vmatpush1.bf16.msra.mxu0 %v15746_v13  ;;  %v15817_v9 = vld [vmem:[#allocation4 + $0x364] ss:$16 sps:$4 sm:$0xff]   ;;  %v15815_v13 = vld [vmem:[#allocation4 + $0x360] ss:$16 sps:$4 sm:$0xff]  }
 0x706   : > { %v11063_v14 = vpop.f32.mrf.mxu1  ;;  %v11023_v60 = vpop.f32.mrf.mxu0  ;;  %12906 = vmatprep.subr.bf16.mxu0 %v15754_v61  ;;  %v15820_v55 = vld [vmem:[#allocation4 + $0x144] ss:$16 sps:$4 sm:$0xff]   ;;  %v15818_v61 = vld [vmem:[#allocation4 + $0x140] ss:$16 sps:$4 sm:$0xff]  }
 0x707   : > { %12946 = vmatpush1.bf16.msra.mxu1 %v15749_v24  ;;  %v15823_v24 = vld [vmem:[#allocation4 + $0x344] ss:$16 sps:$4 sm:$0xff]   ;;  %v15821_v10 = vld [vmem:[#allocation4 + $0x340] ss:$16 sps:$4 sm:$0xff]   ;;  %v11320_v60 = vmul.f32 0.2, %v17438_v50 }
 0x708   : > { %v11064_v56 = vpop.f32.mrf.mxu1  ;;  %12947 = vmatprep.subr.bf16.mxu1 %v15757_v12  ;;  %v15826_v7 = vld [vmem:[#allocation4 + $0x124] ss:$16 sps:$4 sm:$0xff]   ;;  %v15824_v28 = vld [vmem:[#allocation4 + $0x120] ss:$16 sps:$4 sm:$0xff]  }
 0x709   : > { %12907 = vmatpush1.bf16.msra.mxu0 %v15752_v32  ;;  %v15829_v12 = vld [vmem:[#allocation4 + $0x324] ss:$16 sps:$4 sm:$0xff]   ;;  %v15827_v14 = vld [vmem:[#allocation4 + $0x320] ss:$16 sps:$4 sm:$0xff]   ;;  %v11325_v56 = vmul.f32 0.2, %v17523_v27 }
 0x70a   : > { %12908 = vmatprep.subr.bf16.mxu0 %v15760_v21  ;;  %v15832_v32 = vld [vmem:[#allocation4 + $0x104] ss:$16 sps:$4 sm:$0xff]   ;;  %v11322_v21 = vmul.f32 0.2, %v17478_v37 }
 0x70b   : > { %12948 = vmatpush1.bf16.msra.mxu1 %v15755_v18  ;;  %v15835_v18 = vld [vmem:[#allocation4 + $0x304] ss:$16 sps:$4 sm:$0xff]  }
 0x70c   : > { %12949 = vmatprep.subr.bf16.mxu1 %v15763_v5  ;;  %v15830_v5 = vld [vmem:[#allocation4 + $0x100] ss:$16 sps:$4 sm:$0xff]  }
 0x70d   : > { %12909 = vmatpush1.bf16.msra.mxu0 %v15758_v41  ;;  %v15833_v41 = vld [vmem:[#allocation4 + $0x300] ss:$16 sps:$4 sm:$0xff]  }
 0x70e   : > { %12910 = vmatprep.subr.bf16.mxu0 %v15766_v17  ;;  %v11328_v17 = vsel %vm11312_vm6, %v17438_v50, %v11320_v60  ;;  %v15943_v60 = vld [vmem:[#allocation4 + $0x7e4] ss:$16 sps:$4 sm:$0xff]  }
 0x70f   : > { %12950 = vmatpush1.bf16.msra.mxu1 %v15761_v4  ;;  %v15838_v4 = vld [vmem:[#allocation4 + $0x4e4] ss:$16 sps:$4 sm:$0xff]  }
 0x710   : > { %12951 = vmatprep.subr.bf16.mxu1 %v15769_v22  ;;  %v15895_v22 = vld [vmem:[#allocation4 + $0x6e4] ss:$16 sps:$4 sm:$0xff]  }
 0x711   : > { %12911 = vmatpush1.bf16.msra.mxu0 %v15764_v3  ;;  %v11330_v3 = vsel %vm11314_vm7, %v17478_v37, %v11322_v21  ;;  %v15865_v21 = vld [vmem:[#allocation4 + $0x5c4] ss:$16 sps:$4 sm:$0xff]  }
 0x712   : > { %12912 = vmatprep.subr.bf16.mxu0 %v15772_v1  ;;  %v11333_v1 = vsel %vm11317_vm8, %v17523_v27, %v11325_v56  ;;  %v15839_v27 = vld [vmem:[#allocation4 + $0x4c0] ss:$16 sps:$4 sm:$0xff]  }
 0x713   : > { %12952 = vmatpush1.bf16.msra.mxu1 %v15767_v40  ;;  %v15836_v40 = vld [vmem:[#allocation4 + $0x4e0] ss:$16 sps:$4 sm:$0xff]   ;;  %v17559_v50 = vpack.c.bf16 %v11333_v1, %v11333_v1 }
 0x714   : > { %12953 = vmatprep.subr.bf16.mxu1 %v15775_v43  ;;  %v17554_v43 = vpack.c.bf16 %v11328_v17, %v11328_v17  ;;  %v15941_v56 = vld [vmem:[#allocation4 + $0x7e0] ss:$16 sps:$4 sm:$0xff]  }
 0x715   : > { %12913 = vmatpush1.bf16.msra.mxu0 %v15770_v30  ;;  %v15841_v30 = vld [vmem:[#allocation4 + $0x4c4] ss:$16 sps:$4 sm:$0xff]   ;;  %v15947_v17 = vld [vmem:[#allocation4 + $0x7c0] ss:$16 sps:$4 sm:$0xff]  }
 0x716   : > { %12914 = vmatprep.subr.bf16.mxu0 %v15778_v46  ;;  %v15893_v46 = vld [vmem:[#allocation4 + $0x6e0] ss:$16 sps:$4 sm:$0xff]  }
 0x717   : > { %12954 = vmatpush1.bf16.msra.mxu1 %v15773_v8  ;;  %v17556_v8 = vpack.c.bf16 %v11330_v3, %v11330_v3  ;;  %v15866_v3 = vld [vmem:[#allocation4 + $0x5a0] ss:$16 sps:$4 sm:$0xff]  }
 0x718   : > { %12955 = vmatprep.subr.bf16.mxu1 %v15781_v63  ;;  %v15953_v1 = vld [vmem:[#allocation4 + $0x7a0] ss:$16 sps:$4 sm:$0xff]  }
 0x719   : > { %12915 = vmatpush1.bf16.msra.mxu0 %v15776_v25  ;;  %v15901_v25 = vld [vmem:[#allocation4 + $0x6c4] ss:$16 sps:$4 sm:$0xff]  }
 0x71a   : > { %12916 = vmatprep.subr.bf16.mxu0 %v15784_v47 }
 0x71b   : > { %12956 = vmatpush1.bf16.msra.mxu1 %v15779_v0 }
 0x71c   : > { %12957 = vmatprep.subr.bf16.mxu1 %v15787_v39  ;;  %v15844_v39 = vld [vmem:[#allocation4 + $0x4a4] ss:$16 sps:$4 sm:$0xff]  }
 0x71d   : > { %12917 = vmatpush1.bf16.msra.mxu0 %v15782_v45 }
 0x71e   : > { %12918 = vmatprep.subr.bf16.mxu0 %v15790_v26 }
 0x71f   : > { %12958 = vmatpush1.bf16.msra.mxu1 %v15785_v11 }
 0x720   : > { %12959 = vmatprep.subr.bf16.mxu1 %v15793_v31  ;;  %v15899_v31 = vld [vmem:[#allocation4 + $0x6c0] ss:$16 sps:$4 sm:$0xff]  }
 0x721   : > { %12919 = vmatpush2.bf16.msra.mxu0 %v15788_v36 }
 0x722   : > { %12920 = vmatprep.subr.bf16.mxu0 %v15796_v38 }
 0x723   : > { %12960 = vmatpush2.bf16.msra.mxu1 %v15791_v23 }
 0x724   : > { %12961 = vmatprep.subr.bf16.mxu1 %v15799_v2  ;;  %v15842_v2 = vld [vmem:[#allocation4 + $0x4a0] ss:$16 sps:$4 sm:$0xff]  }
 0x725   : > { %12921 = vmatpush2.bf16.msra.mxu0 %v15794_v6 }
 0x726   : > { %12922 = vmatprep.subr.bf16.mxu0 %v15802_v44 }
 0x727   : > { %12962 = vmatpush2.bf16.msra.mxu1 %v15797_v42  ;;  %v15847_v42 = vld [vmem:[#allocation4 + $0x484] ss:$16 sps:$4 sm:$0xff]  }
 0x728   : > { %12963 = vmatprep.subr.bf16.mxu1 %v15805_v33  ;;  %v15905_v33 = vld [vmem:[#allocation4 + $0x6a0] ss:$16 sps:$4 sm:$0xff]  }
 0x729   : > { %12923 = vmatpush2.bf16.msra.mxu0 %v15800_v19  ;;  %v15913_v19 = vld [vmem:[#allocation4 + $0x684] ss:$16 sps:$4 sm:$0xff]  }
 0x72a   : > { %12924 = vmatprep.subr.bf16.mxu0 %v15808_v49  ;;  %v15911_v49 = vld [vmem:[#allocation4 + $0x680] ss:$16 sps:$4 sm:$0xff]  }
 0x72b   : > { %12964 = vmatpush2.bf16.msra.mxu1 %v15803_v48  ;;  %v15850_v48 = vld [vmem:[#allocation4 + $0x464] ss:$16 sps:$4 sm:$0xff]  }
 0x72c   : > { %12965 = vmatprep.subr.bf16.mxu1 %v15811_v53  ;;  %v15919_v53 = vld [vmem:[#allocation4 + $0x664] ss:$16 sps:$4 sm:$0xff]  }
 0x72d   : > { %12925 = vmatpush2.bf16.msra.mxu0 %v15806_v34  ;;  %v15848_v34 = vld [vmem:[#allocation4 + $0x460] ss:$16 sps:$4 sm:$0xff]  }
 0x72e   : > { %12926 = vmatprep.subr.bf16.mxu0 %v15814_v62  ;;  %v15917_v62 = vld [vmem:[#allocation4 + $0x660] ss:$16 sps:$4 sm:$0xff]  }
 0x72f   : > { %12966 = vmatpush2.bf16.msra.mxu1 %v15809_v15  ;;  %v15853_v15 = vld [vmem:[#allocation4 + $0x444] ss:$16 sps:$4 sm:$0xff]  }
 0x730   : > { %12967 = vmatprep.subr.bf16.mxu1 %v15817_v9  ;;  %v15925_v9 = vld [vmem:[#allocation4 + $0x644] ss:$16 sps:$4 sm:$0xff]  }
 0x731   : > { %12927 = vmatpush2.bf16.msra.mxu0 %v15812_v54  ;;  %v15851_v54 = vld [vmem:[#allocation4 + $0x440] ss:$16 sps:$4 sm:$0xff]  }
 0x732   : > { %12928 = vmatprep.subr.bf16.mxu0 %v15820_v55  ;;  %v15923_v55 = vld [vmem:[#allocation4 + $0x640] ss:$16 sps:$4 sm:$0xff]  }
 0x733   : > { %12968 = vmatpush2.bf16.msra.mxu1 %v15815_v13  ;;  %v15856_v13 = vld [vmem:[#allocation4 + $0x424] ss:$16 sps:$4 sm:$0xff]  }
 0x734   : > { %12969 = vmatprep.subr.bf16.mxu1 %v15823_v24  ;;  %v15931_v24 = vld [vmem:[#allocation4 + $0x624] ss:$16 sps:$4 sm:$0xff]  }
 0x735   : > { %12929 = vmatpush2.bf16.msra.mxu0 %v15818_v61  ;;  %v15854_v61 = vld [vmem:[#allocation4 + $0x420] ss:$16 sps:$4 sm:$0xff]  }
 0x736   : > { %12930 = vmatprep.subr.bf16.mxu0 %v15826_v7  ;;  %v15929_v7 = vld [vmem:[#allocation4 + $0x620] ss:$16 sps:$4 sm:$0xff]  }
 0x737   : > { %12970 = vmatpush2.bf16.msra.mxu1 %v15821_v10  ;;  %v15859_v10 = vld [vmem:[#allocation4 + $0x404] ss:$16 sps:$4 sm:$0xff]  }
 0x738   : > { %12971 = vmatprep.subr.bf16.mxu1 %v15829_v12  ;;  %v15937_v12 = vld [vmem:[#allocation4 + $0x604] ss:$16 sps:$4 sm:$0xff]  }
 0x739   : > { %12931 = vmatpush2.bf16.msra.mxu0 %v15824_v28  ;;  %v15857_v28 = vld [vmem:[#allocation4 + $0x400] ss:$16 sps:$4 sm:$0xff]  }
 0x73a   : > { %12932 = vmatprep.subr.bf16.mxu0 %v15832_v32  ;;  %v15935_v32 = vld [vmem:[#allocation4 + $0x600] ss:$16 sps:$4 sm:$0xff]  }
 0x73b   : > { %12972 = vmatpush2.bf16.msra.mxu1 %v15827_v14  ;;  %v15862_v14 = vld [vmem:[#allocation4 + $0x5e4] ss:$16 sps:$4 sm:$0xff]  }
 0x73c   : > { %12973 = vmatprep.subr.bf16.mxu1 %v15835_v18  ;;  %v15860_v18 = vld [vmem:[#allocation4 + $0x5e0] ss:$16 sps:$4 sm:$0xff]  }
 0x73d   : > { %12933 = vmatpush2.bf16.msra.mxu0 %v15830_v5  ;;  %v15949_v5 = vld [vmem:[#allocation4 + $0x7c4] ss:$16 sps:$4 sm:$0xff]  }
 0x73e   : > { %12984 = vmatprep.subr.bf16.mxu0 %v15838_v4  ;;  %v15868_v4 = vld [vmem:[#allocation4 + $0x5a4] ss:$16 sps:$4 sm:$0xff]  }
 0x73f   : > { %12974 = vmatpush2.bf16.msra.mxu1 %v15833_v41  ;;  %v15863_v41 = vld [vmem:[#allocation4 + $0x5c0] ss:$16 sps:$4 sm:$0xff]  }
 0x740   : > { %13025 = vmatprep.subr.bf16.mxu1 %v15895_v22  ;;  %v11100_v63 = vpop.f32.mrf.mxu0  ;;  %12935 = vmatmul.mubr.bf16.vlgmr.msra.gmra.mxu0 %v17554_v43  ;;  %v15955_v22 = vld [vmem:[#allocation4 + $0x7a4] ss:$16 sps:$4 sm:$0xff]  }
 0x741   : > { %v11101_v37 = vadd.f32 %v11100_v63, %v17540_v20  ;;  %12985 = vmatpush1.bf16.msra.mxu0 %v15836_v40  ;;  %13016 = vmatprep.mubr.bf16.mxu0 %v17559_v50  ;;  %v15907_v20 = vld [vmem:[#allocation4 + $0x6a4] ss:$16 sps:$4 sm:$0xff]  }
 0x742   : > { %v11141_v0 = vpop.f32.mrf.mxu1  ;;  %12976 = vmatmul.mubr.bf16.vlgmr.msra.gmra.mxu1 %v17556_v8  ;;  %v11102_v47 = vpop.f32.mrf.mxu0  ;;  %12986 = vmatprep.subr.bf16.mxu0 %v15841_v30  ;;  %v15871_v40 = vld [vmem:[#allocation4 + $0x584] ss:$16 sps:$4 sm:$0xff]  }
 0x743   : > { %v17564_v45 = vadd.f32 %v11141_v0, %v11101_v37  ;;  %v11103_v11 = vadd.f32 %v11102_v47, %v17543_v16  ;;  %13026 = vmatpush1.bf16.msra.mxu1 %v15893_v46  ;;  %v15845_v16 = vld [vmem:[#allocation4 + $0x480] ss:$16 sps:$4 sm:$0xff]   ;;  %v15961_v30 = vld [vmem:[#allocation4 + $0x784] ss:$16 sps:$4 sm:$0xff]  }
 0x744   : > { %v11143_v26 = vpop.f32.mrf.mxu1  ;;  %v11104_v36 = vpop.f32.mrf.mxu0  ;;  %13027 = vmatprep.subr.bf16.mxu1 %v15901_v25  ;;  %v15869_v46 = vld [vmem:[#allocation4 + $0x580] ss:$16 sps:$4 sm:$0xff]   ;;  %v15874_v63 = vld [vmem:[#allocation4 + $0x564] ss:$16 sps:$4 sm:$0xff]  }
 0x745   : > { %v17567_v23 = vadd.f32 %v11143_v26, %v11103_v11  ;;  %12987 = vmatpush1.bf16.msra.mxu0 %v15839_v27  ;;  %v15959_v25 = vld [vmem:[#allocation4 + $0x780] ss:$16 sps:$4 sm:$0xff]   ;;  %v15967_v37 = vld [vmem:[#allocation4 + $0x764] ss:$16 sps:$4 sm:$0xff]  }
 0x746   : > { %v11145_v38 = vpop.f32.mrf.mxu1  ;;  %v11105_v6 = vpop.f32.mrf.mxu0  ;;  %12988 = vmatprep.subr.bf16.mxu0 %v15844_v39  ;;  %v15872_v0 = vld [vmem:[#allocation4 + $0x560] ss:$16 sps:$4 sm:$0xff]   ;;  %v15877_v27 = vld [vmem:[#allocation4 + $0x544] ss:$16 sps:$4 sm:$0xff]  }
 0x747   : > { %13028 = vmatpush1.bf16.msra.mxu1 %v15899_v31  ;;  %v15965_v47 = vld [vmem:[#allocation4 + $0x760] ss:$16 sps:$4 sm:$0xff]   ;;  %v15973_v39 = vld [vmem:[#allocation4 + $0x744] ss:$16 sps:$4 sm:$0xff]  }
 0x748   : > { %v11146_v44 = vpop.f32.mrf.mxu1  ;;  %13029 = vmatprep.subr.bf16.mxu1 %v15907_v20  ;;  %v15875_v11 = vld [vmem:[#allocation4 + $0x540] ss:$16 sps:$4 sm:$0xff]   ;;  %v15880_v26 = vld [vmem:[#allocation4 + $0x524] ss:$16 sps:$4 sm:$0xff]  }
 0x749   : > { %12989 = vmatpush1.bf16.msra.mxu0 %v15842_v2  ;;  %v15971_v31 = vld [vmem:[#allocation4 + $0x740] ss:$16 sps:$4 sm:$0xff]   ;;  %v15979_v36 = vld [vmem:[#allocation4 + $0x724] ss:$16 sps:$4 sm:$0xff]   ;;  %v11324_v2 = vmul.f32 0.2, %v17518_v29 }
 0x74a   : > { %12990 = vmatprep.subr.bf16.mxu0 %v15847_v42  ;;  %v15878_v20 = vld [vmem:[#allocation4 + $0x520] ss:$16 sps:$4 sm:$0xff]   ;;  %v15883_v38 = vld [vmem:[#allocation4 + $0x504] ss:$16 sps:$4 sm:$0xff]  }
 0x74b   : > { %13030 = vmatpush1.bf16.msra.mxu1 %v15905_v33  ;;  %v15977_v6 = vld [vmem:[#allocation4 + $0x720] ss:$16 sps:$4 sm:$0xff]   ;;  %v15985_v42 = vld [vmem:[#allocation4 + $0x704] ss:$16 sps:$4 sm:$0xff]   ;;  %v15886_v33 = vld [vmem:[#allocation4 + $0xec] ss:$16 sps:$4 sm:$0xff]  }
 0x74c   : > { %13031 = vmatprep.subr.bf16.mxu1 %v15913_v19  ;;  %v15881_v44 = vld [vmem:[#allocation4 + $0x500] ss:$16 sps:$4 sm:$0xff]   ;;  %v11332_v19 = vsel %vm11316_vm9, %v17518_v29, %v11324_v2  ;;  %v15887_v29 = vld [vmem:[#allocation4 + $0xc8] ss:$16 sps:$4 sm:$0xff]  }
 0x74d   : > { %12991 = vmatpush1.bf16.msra.mxu0 %v15845_v16  ;;  %v15983_v16 = vld [vmem:[#allocation4 + $0x700] ss:$16 sps:$4 sm:$0xff]  }
 0x74e   : > { %12992 = vmatprep.subr.bf16.mxu0 %v15850_v48  ;;  %v15991_v48 = vld [vmem:[#allocation4 + $0x2ec] ss:$16 sps:$4 sm:$0xff]  }
 0x74f   : > { %13032 = vmatpush1.bf16.msra.mxu1 %v15911_v49  ;;  %v15884_v49 = vld [vmem:[#allocation4 + $0xe8] ss:$16 sps:$4 sm:$0xff]  }
 0x750   : > { %13033 = vmatprep.subr.bf16.mxu1 %v15919_v53  ;;  %v17572_v53 = vpack.c.bf16 %v11332_v19, %v11332_v19  ;;  %v15988_v19 = vld [vmem:[#allocation4 + $0x4ac] ss:$16 sps:$4 sm:$0xff]  }
 0x751   : > { %12993 = vmatpush1.bf16.msra.mxu0 %v15848_v34  ;;  %v15889_v34 = vld [vmem:[#allocation4 + $0xcc] ss:$16 sps:$4 sm:$0xff]  }
 0x752   : > { %12994 = vmatprep.subr.bf16.mxu0 %v15853_v15 }
 0x753   : > { %13034 = vmatpush1.bf16.msra.mxu1 %v15917_v62 }
 0x754   : > { %13035 = vmatprep.subr.bf16.mxu1 %v15925_v9 }
 0x755   : > { %12995 = vmatpush1.bf16.msra.mxu0 %v15851_v54 }
 0x756   : > { %12996 = vmatprep.subr.bf16.mxu0 %v15856_v13  ;;  %v15892_v13 = vld [vmem:[#allocation4 + $0xac] ss:$16 sps:$4 sm:$0xff]  }
 0x757   : > { %13036 = vmatpush1.bf16.msra.mxu1 %v15923_v55 }
 0x758   : > { %13037 = vmatprep.subr.bf16.mxu1 %v15931_v24 }
 0x759   : > { %12997 = vmatpush1.bf16.msra.mxu0 %v15854_v61 }
 0x75a   : > { %12998 = vmatprep.subr.bf16.mxu0 %v15859_v10 }
 0x75b   : > { %13038 = vmatpush1.bf16.msra.mxu1 %v15929_v7  ;;  %v15890_v7 = vld [vmem:[#allocation4 + $0xa8] ss:$16 sps:$4 sm:$0xff]  }
 0x75c   : > { %13039 = vmatprep.subr.bf16.mxu1 %v15937_v12 }
 0x75d   : > { %12999 = vmatpush1.bf16.msra.mxu0 %v15857_v28 }
 0x75e   : > { %13000 = vmatprep.subr.bf16.mxu0 %v15862_v14  ;;  %v15896_v14 = vld [vmem:[#allocation4 + $0x88] ss:$16 sps:$4 sm:$0xff]  }
 0x75f   : > { %13040 = vmatpush1.bf16.msra.mxu1 %v15935_v32  ;;  %v15902_v32 = vld [vmem:[#allocation4 + $0x68] ss:$16 sps:$4 sm:$0xff]  }
 0x760   : > { %13041 = vmatprep.subr.bf16.mxu1 %v15943_v60  ;;  %v15910_v60 = vld [vmem:[#allocation4 + $0x4c] ss:$16 sps:$4 sm:$0xff]  }
 0x761   : > { %13001 = vmatpush2.bf16.msra.mxu0 %v15860_v18  ;;  %v15908_v18 = vld [vmem:[#allocation4 + $0x48] ss:$16 sps:$4 sm:$0xff]  }
 0x762   : > { %13002 = vmatprep.subr.bf16.mxu0 %v15865_v21  ;;  %v15916_v21 = vld [vmem:[#allocation4 + $0x2c] ss:$16 sps:$4 sm:$0xff]  }
 0x763   : > { %13042 = vmatpush2.bf16.msra.mxu1 %v15941_v56  ;;  %v15914_v56 = vld [vmem:[#allocation4 + $0x28] ss:$16 sps:$4 sm:$0xff]  }
 0x764   : > { %13043 = vmatprep.subr.bf16.mxu1 %v15949_v5  ;;  %v15922_v5 = vld [vmem:[#allocation4 + $0xc] ss:$16 sps:$4 sm:$0xff]  }
 0x765   : > { %13003 = vmatpush2.bf16.msra.mxu0 %v15863_v41  ;;  %v15920_v41 = vld [vmem:[#allocation4 + $0x8] ss:$16 sps:$4 sm:$0xff]  }
 0x766   : > { %13004 = vmatprep.subr.bf16.mxu0 %v15868_v4  ;;  %v15928_v4 = vld [vmem:[#allocation4 + $0x1ec] ss:$16 sps:$4 sm:$0xff]  }
 0x767   : > { %13044 = vmatpush2.bf16.msra.mxu1 %v15947_v17  ;;  %v15926_v17 = vld [vmem:[#allocation4 + $0x1e8] ss:$16 sps:$4 sm:$0xff]  }
 0x768   : > { %13045 = vmatprep.subr.bf16.mxu1 %v15955_v22  ;;  %v15934_v22 = vld [vmem:[#allocation4 + $0x1cc] ss:$16 sps:$4 sm:$0xff]  }
 0x769   : > { %13005 = vmatpush2.bf16.msra.mxu0 %v15866_v3  ;;  %v15932_v3 = vld [vmem:[#allocation4 + $0x1c8] ss:$16 sps:$4 sm:$0xff]  }
 0x76a   : > { %13006 = vmatprep.subr.bf16.mxu0 %v15871_v40  ;;  %v15940_v40 = vld [vmem:[#allocation4 + $0x1ac] ss:$16 sps:$4 sm:$0xff]  }
 0x76b   : > { %13046 = vmatpush2.bf16.msra.mxu1 %v15953_v1  ;;  %v15938_v1 = vld [vmem:[#allocation4 + $0x1a8] ss:$16 sps:$4 sm:$0xff]  }
 0x76c   : > { %13047 = vmatprep.subr.bf16.mxu1 %v15961_v30  ;;  %v15946_v30 = vld [vmem:[#allocation4 + $0x18c] ss:$16 sps:$4 sm:$0xff]  }
 0x76d   : > { %13007 = vmatpush2.bf16.msra.mxu0 %v15869_v46  ;;  %v15944_v46 = vld [vmem:[#allocation4 + $0x188] ss:$16 sps:$4 sm:$0xff]  }
 0x76e   : > { %13008 = vmatprep.subr.bf16.mxu0 %v15874_v63  ;;  %v15952_v63 = vld [vmem:[#allocation4 + $0x16c] ss:$16 sps:$4 sm:$0xff]  }
 0x76f   : > { %13048 = vmatpush2.bf16.msra.mxu1 %v15959_v25  ;;  %v15950_v25 = vld [vmem:[#allocation4 + $0x168] ss:$16 sps:$4 sm:$0xff]  }
 0x770   : > { %13049 = vmatprep.subr.bf16.mxu1 %v15967_v37  ;;  %v15958_v37 = vld [vmem:[#allocation4 + $0x14c] ss:$16 sps:$4 sm:$0xff]  }
 0x771   : > { %13009 = vmatpush2.bf16.msra.mxu0 %v15872_v0  ;;  %v15956_v0 = vld [vmem:[#allocation4 + $0x148] ss:$16 sps:$4 sm:$0xff]  }
 0x772   : > { %13010 = vmatprep.subr.bf16.mxu0 %v15877_v27  ;;  %v15964_v27 = vld [vmem:[#allocation4 + $0x12c] ss:$16 sps:$4 sm:$0xff]  }
 0x773   : > { %13050 = vmatpush2.bf16.msra.mxu1 %v15965_v47  ;;  %v15962_v47 = vld [vmem:[#allocation4 + $0x128] ss:$16 sps:$4 sm:$0xff]  }
 0x774   : > { %13051 = vmatprep.subr.bf16.mxu1 %v15973_v39  ;;  %v15970_v39 = vld [vmem:[#allocation4 + $0x10c] ss:$16 sps:$4 sm:$0xff]  }
 0x775   : > { %13011 = vmatpush2.bf16.msra.mxu0 %v15875_v11  ;;  %v15968_v11 = vld [vmem:[#allocation4 + $0x108] ss:$16 sps:$4 sm:$0xff]  }
 0x776   : > { %13012 = vmatprep.subr.bf16.mxu0 %v15880_v26  ;;  %v15976_v26 = vld [vmem:[#allocation4 + $0x4ec] ss:$16 sps:$4 sm:$0xff]  }
 0x777   : > { %13052 = vmatpush2.bf16.msra.mxu1 %v15971_v31 }
 0x778   : > { %13053 = vmatprep.subr.bf16.mxu1 %v15979_v36  ;;  %v15974_v36 = vld [vmem:[#allocation4 + $0x4e8] ss:$16 sps:$4 sm:$0xff]  }
 0x779   : > { %13013 = vmatpush2.bf16.msra.mxu0 %v15878_v20  ;;  %v15982_v20 = vld [vmem:[#allocation4 + $0x4cc] ss:$16 sps:$4 sm:$0xff]  }
 0x77a   : > { %13014 = vmatprep.subr.bf16.mxu0 %v15883_v38 }
 0x77b   : > { %13054 = vmatpush2.bf16.msra.mxu1 %v15977_v6 }
 0x77c   : > { %13055 = vmatprep.subr.bf16.mxu1 %v15985_v42 }
 0x77d   : > { %13015 = vmatpush2.bf16.msra.mxu0 %v15881_v44  ;;  %v15980_v44 = vld [vmem:[#allocation4 + $0x4c8] ss:$16 sps:$4 sm:$0xff]  }
 0x77e   : > { %13066 = vmatprep.subr.bf16.mxu0 %v15886_v33 }
 0x77f   : > { %13056 = vmatpush2.bf16.msra.mxu1 %v15983_v16 }
 0x780   : > { %v11182_v15 = vpop.f32.mrf.mxu0  ;;  %13017 = vmatmul.mubr.bf16.vlgmr.msra.gmra.mxu0 %v17572_v53  ;;  %13107 = vmatprep.subr.bf16.mxu1 %v15991_v48 }
 0x781   : > { %v11183_v62 = vadd.f32 %v11182_v15, %v17564_v45  ;;  %13067 = vmatpush1.bf16.msra.mxu0 %v15884_v49  ;;  %13098 = vmatprep.mubr.bf16.mxu0 %v17534_v59  ;;  %v15898_v45 = vld [vmem:[#allocation4 + $0x8c] ss:$16 sps:$4 sm:$0xff]  }
 0x782   : > { %v11223_v9 = vpop.f32.mrf.mxu1  ;;  %v17577_v54 = vpop.f32.mrf.mxu0  ;;  %13068 = vmatprep.subr.bf16.mxu0 %v15889_v34  ;;  %v15904_v59 = vld [vmem:[#allocation4 + $0x6c] ss:$16 sps:$4 sm:$0xff]  }
 0x783   : > { %v17579_v55 = vadd.f32 %v11223_v9, %v11183_v62  ;;  %v11185_v31 = vadd.f32 %v17577_v54, %v17567_v23  ;;  %v15986_v62 = vld [vmem:[#allocation4 + $0x4a8] ss:$16 sps:$4 sm:$0xff]  }
 0x784   : > { %v17581_v24 = vpop.f32.mrf.mxu1  ;;  %v11186_v61 = vpop.f32.mrf.mxu0 }
 0x785   : > { %13069 = vmatpush1.bf16.msra.mxu0 %v15887_v29  ;;  %v11226_v2 = vadd.f32 %v17581_v24, %v11185_v31  ;;  %v15994_v29 = vld [vmem:[#allocation4 + $0x48c] ss:$16 sps:$4 sm:$0xff]   ;;  %v15992_v24 = vld [vmem:[#allocation4 + $0x488] ss:$16 sps:$4 sm:$0xff]  }
 0x786   : > { %v11227_v10 = vpop.f32.mrf.mxu1  ;;  %v11187_v12 = vpop.f32.mrf.mxu0  ;;  %13070 = vmatprep.subr.bf16.mxu0 %v15892_v13  ;;  %v16040_v31 = vld [vmem:[#allocation4 + $0x588] ss:$16 sps:$4 sm:$0xff]  }
 0x787   : > { %v15989_v10 = vld [vmem:[#allocation4 + $0x2e8] ss:$16 sps:$4 sm:$0xff]   ;;  %v15997_v12 = vld [vmem:[#allocation4 + $0x2cc] ss:$16 sps:$4 sm:$0xff]  }
 0x788   : > { %v11228_v28 = vpop.f32.mrf.mxu1 }
 0x789   : > { %13071 = vmatpush1.bf16.msra.mxu0 %v15890_v7  ;;  %v15998_v28 = vld [vmem:[#allocation4 + $0x468] ss:$16 sps:$4 sm:$0xff]  }
 0x78a   : > { %13072 = vmatprep.subr.bf16.mxu0 %v15898_v45  ;;  %v16000_v45 = vld [vmem:[#allocation4 + $0x46c] ss:$16 sps:$4 sm:$0xff]  }
 0x78d   : > { %13073 = vmatpush1.bf16.msra.mxu0 %v15896_v14  ;;  %v15995_v14 = vld [vmem:[#allocation4 + $0x2c8] ss:$16 sps:$4 sm:$0xff]  }
 0x78e   : > { %13074 = vmatprep.subr.bf16.mxu0 %v15904_v59  ;;  %v16006_v59 = vld [vmem:[#allocation4 + $0x44c] ss:$16 sps:$4 sm:$0xff]  }
 0x791   : > { %13075 = vmatpush1.bf16.msra.mxu0 %v15902_v32  ;;  %v16003_v32 = vld [vmem:[#allocation4 + $0x2ac] ss:$16 sps:$4 sm:$0xff]  }
 0x792   : > { %13076 = vmatprep.subr.bf16.mxu0 %v15910_v60  ;;  %v16004_v60 = vld [vmem:[#allocation4 + $0x448] ss:$16 sps:$4 sm:$0xff]  }
 0x795   : > { %13077 = vmatpush1.bf16.msra.mxu0 %v15908_v18  ;;  %v16001_v18 = vld [vmem:[#allocation4 + $0x2a8] ss:$16 sps:$4 sm:$0xff]  }
 0x796   : > { %13078 = vmatprep.subr.bf16.mxu0 %v15916_v21  ;;  %v16012_v21 = vld [vmem:[#allocation4 + $0x42c] ss:$16 sps:$4 sm:$0xff]  }
 0x799   : > { %13079 = vmatpush1.bf16.msra.mxu0 %v15914_v56  ;;  %v16009_v56 = vld [vmem:[#allocation4 + $0x28c] ss:$16 sps:$4 sm:$0xff]  }
 0x79a   : > { %13080 = vmatprep.subr.bf16.mxu0 %v15922_v5  ;;  %v16010_v5 = vld [vmem:[#allocation4 + $0x428] ss:$16 sps:$4 sm:$0xff]  }
 0x79d   : > { %13081 = vmatpush1.bf16.msra.mxu0 %v15920_v41  ;;  %v16007_v41 = vld [vmem:[#allocation4 + $0x288] ss:$16 sps:$4 sm:$0xff]  }
 0x79e   : > { %13082 = vmatprep.subr.bf16.mxu0 %v15928_v4  ;;  %v16018_v4 = vld [vmem:[#allocation4 + $0x40c] ss:$16 sps:$4 sm:$0xff]  }
 0x7a1   : > { %13083 = vmatpush2.bf16.msra.mxu0 %v15926_v17  ;;  %v16016_v17 = vld [vmem:[#allocation4 + $0x408] ss:$16 sps:$4 sm:$0xff]  }
 0x7a2   : > { %13084 = vmatprep.subr.bf16.mxu0 %v15934_v22  ;;  %v16013_v22 = vld [vmem:[#allocation4 + $0x268] ss:$16 sps:$4 sm:$0xff]  }
 0x7a5   : > { %13085 = vmatpush2.bf16.msra.mxu0 %v15932_v3  ;;  %v16024_v3 = vld [vmem:[#allocation4 + $0x5ec] ss:$16 sps:$4 sm:$0xff]  }
 0x7a6   : > { %13086 = vmatprep.subr.bf16.mxu0 %v15940_v40  ;;  %v16021_v40 = vld [vmem:[#allocation4 + $0x24c] ss:$16 sps:$4 sm:$0xff]  }
 0x7a9   : > { %13087 = vmatpush2.bf16.msra.mxu0 %v15938_v1  ;;  %v16022_v1 = vld [vmem:[#allocation4 + $0x5e8] ss:$16 sps:$4 sm:$0xff]  }
 0x7aa   : > { %13088 = vmatprep.subr.bf16.mxu0 %v15946_v30  ;;  %v16019_v30 = vld [vmem:[#allocation4 + $0x248] ss:$16 sps:$4 sm:$0xff]  }
 0x7ad   : > { %13089 = vmatpush2.bf16.msra.mxu0 %v15944_v46  ;;  %v16030_v46 = vld [vmem:[#allocation4 + $0x5cc] ss:$16 sps:$4 sm:$0xff]  }
 0x7ae   : > { %13090 = vmatprep.subr.bf16.mxu0 %v15952_v63  ;;  %v16027_v63 = vld [vmem:[#allocation4 + $0x22c] ss:$16 sps:$4 sm:$0xff]  }
 0x7b1   : > { %13091 = vmatpush2.bf16.msra.mxu0 %v15950_v25  ;;  %v16028_v25 = vld [vmem:[#allocation4 + $0x5c8] ss:$16 sps:$4 sm:$0xff]  }
 0x7b2   : > { %13092 = vmatprep.subr.bf16.mxu0 %v15958_v37  ;;  %v16025_v37 = vld [vmem:[#allocation4 + $0x228] ss:$16 sps:$4 sm:$0xff]  }
 0x7b5   : > { %13093 = vmatpush2.bf16.msra.mxu0 %v15956_v0  ;;  %v16036_v0 = vld [vmem:[#allocation4 + $0x5ac] ss:$16 sps:$4 sm:$0xff]  }
 0x7b6   : > { %13094 = vmatprep.subr.bf16.mxu0 %v15964_v27  ;;  %v16033_v27 = vld [vmem:[#allocation4 + $0x20c] ss:$16 sps:$4 sm:$0xff]  }
 0x7b9   : > { %13095 = vmatpush2.bf16.msra.mxu0 %v15962_v47  ;;  %v16034_v47 = vld [vmem:[#allocation4 + $0x5a8] ss:$16 sps:$4 sm:$0xff]  }
 0x7ba   : > { %13096 = vmatprep.subr.bf16.mxu0 %v15970_v39  ;;  %v16031_v39 = vld [vmem:[#allocation4 + $0x208] ss:$16 sps:$4 sm:$0xff]  }
 0x7bd   : > { %13097 = vmatpush2.bf16.msra.mxu0 %v15968_v11  ;;  %v16042_v11 = vld [vmem:[#allocation4 + $0x58c] ss:$16 sps:$4 sm:$0xff]  }
 0x7be   : > { %13148 = vmatprep.subr.bf16.mxu0 %v15976_v26  ;;  %v16039_v26 = vld [vmem:[#allocation4 + $0x3ec] ss:$16 sps:$4 sm:$0xff]  }
 0x7c0   : > { %v11264_v38 = vpop.f32.mrf.mxu0  ;;  %13099 = vmatmul.mubr.bf16.vlgmr.msra.gmra.mxu0 %v17554_v43 }
 0x7c1   : > { %v11265_v6 = vadd.f32 %v11264_v38, %v17579_v55  ;;  %13149 = vmatpush1.bf16.msra.mxu0 %v15974_v36  ;;  %13180 = vmatprep.mubr.bf16.mxu0 %v17559_v50  ;;  %v16037_v36 = vld [vmem:[#allocation4 + $0x3e8] ss:$16 sps:$4 sm:$0xff]   ;;  %v16045_v38 = vld [vmem:[#allocation4 + $0x3cc] ss:$16 sps:$4 sm:$0xff]  }
 0x7c2   : > { %v11305_v42 = vpop.f32.mrf.mxu1  ;;  %v11266_v33 = vpop.f32.mrf.mxu0  ;;  %13150 = vmatprep.subr.bf16.mxu0 %v15982_v20  ;;  %v16048_v20 = vld [vmem:[#allocation4 + $0x56c] ss:$16 sps:$4 sm:$0xff]  }
 0x7c3   : > { %v11306_v23 = vadd.f32 %v11305_v42, %v11265_v6  ;;  %v11267_v16 = vadd.f32 %v11266_v33, %v11226_v2  ;;  %v16046_v2 = vld [vmem:[#allocation4 + $0x568] ss:$16 sps:$4 sm:$0xff]   ;;  %v16054_v42 = vld [vmem:[#allocation4 + $0x54c] ss:$16 sps:$4 sm:$0xff]  }
 0x7c4   : > { %v11307_v48 = vpop.f32.mrf.mxu1  ;;  %v11268_v49 = vpop.f32.mrf.mxu0  ;;  %v16043_v6 = vld [vmem:[#allocation4 + $0x3c8] ss:$16 sps:$4 sm:$0xff]  }
 0x7c5   : > { %vm11318_vm10 = vcmp.gt.f32.partialorder %v11306_v23, 0.0  ;;  %v11326_v34 = vmul.f32 0.2, %v11306_v23  ;;  %v11308_v15 = vadd.f32 %v11307_v48, %v11267_v16  ;;  %13151 = vmatpush1.bf16.msra.mxu0 %v15980_v44  ;;  %v16051_v44 = vld [vmem:[#allocation4 + $0x3ac] ss:$16 sps:$4 sm:$0xff]  }
 0x7c6   : > { %v11309_v43 = vpop.f32.mrf.mxu1  ;;  %v11269_v9 = vpop.f32.mrf.mxu0  ;;  %13152 = vmatprep.subr.bf16.mxu0 %v15988_v19  ;;  %v16052_v33 = vld [vmem:[#allocation4 + $0x548] ss:$16 sps:$4 sm:$0xff]   ;;  %v16057_v16 = vld [vmem:[#allocation4 + $0x38c] ss:$16 sps:$4 sm:$0xff]  }
 0x7c7   : > { %vm11319_vm11 = vcmp.gt.f32.partialorder %v11308_v15, 0.0  ;;  %v11327_v54 = vmul.f32 0.2, %v11308_v15  ;;  %v11334_v13 = vsel %vm11318_vm10, %v11306_v23, %v11326_v34  ;;  %v16049_v19 = vld [vmem:[#allocation4 + $0x3a8] ss:$16 sps:$4 sm:$0xff]  }
 0x7c8   : > { %v11310_v50 = vpop.f32.mrf.mxu1  ;;  %v17591_v7 = vpack.c.bf16 %v11334_v13, %v11334_v13  ;;  %v16060_v23 = vld [vmem:[#allocation4 + $0x52c] ss:$16 sps:$4 sm:$0xff]   ;;  %v16058_v48 = vld [vmem:[#allocation4 + $0x528] ss:$16 sps:$4 sm:$0xff]  }
 0x7c9   : > { %13153 = vmatpush1.bf16.msra.mxu0 %v15986_v62  ;;  %v11335_v55 = vsel %vm11319_vm11, %v11308_v15, %v11327_v54  ;;  %v16055_v49 = vld [vmem:[#allocation4 + $0x388] ss:$16 sps:$4 sm:$0xff]   ;;  %v16066_v34 = vld [vmem:[#allocation4 + $0x50c] ss:$16 sps:$4 sm:$0xff]  }
 0x7ca   : > { %v17589_v61 = vpack.c.bf16 %v11335_v55, %v11335_v55  ;;  %13154 = vmatprep.subr.bf16.mxu0 %v15994_v29  ;;  %v16063_v15 = vld [vmem:[#allocation4 + $0x36c] ss:$16 sps:$4 sm:$0xff]   ;;  %v16064_v43 = vld [vmem:[#allocation4 + $0x508] ss:$16 sps:$4 sm:$0xff]  }
 0x7cb   : > { %v16061_v62 = vld [vmem:[#allocation4 + $0x368] ss:$16 sps:$4 sm:$0xff]   ;;  %v16126_v29 = vld [vmem:[#allocation5 + $0x74] ss:$8 sps:$4 sm:$0xff]  }
 0x7cc   : > { %13057 = vmatprep.mubr.bf16.mxu1 %v17589_v61  ;;  %v17596_v9 = vld [vmem:[#allocation13] sm:$0xf] }
 0x7cd   : > { %13058 = vmatmul.mubr.bf16.vlgmr.msra.gmra.mxu1 %v17591_v7  ;;  %13155 = vmatpush1.bf16.msra.mxu0 %v15992_v24  ;;  %v16069_v54 = vld [vmem:[#allocation4 + $0x34c] ss:$16 sps:$4 sm:$0xff]   ;;  %v11605_v50 = vrot.slane %v17596_v9, %v17236_v51  ;;  %v16124_v13 = vld [vmem:[#allocation5 + $0x70] ss:$8 sps:$4 sm:$0xff]  }
 0x7ce   : > { %13108 = vmatpush1.bf16.msra.mxu1 %v15989_v10  ;;  %13139 = vmatprep.mubr.bf16.mxu1 %v17537_v35  ;;  %v16015_v35 = vld [vmem:[#allocation4 + $0x26c] ss:$16 sps:$4 sm:$0xff]   ;;  %v16067_v55 = vld [vmem:[#allocation4 + $0x348] ss:$16 sps:$4 sm:$0xff]   ;;  %v11609_v10 = vrot.slane %v17596_v9, %v17239_v52 }
 0x7cf   : > { %13109 = vmatprep.subr.bf16.mxu1 %v15997_v12  ;;  %13156 = vmatprep.subr.bf16.mxu0 %v16000_v45  ;;  %v16129_v24 = vld [vmem:[#allocation5 + $0x64] ss:$8 sps:$4 sm:$0xff]  }
 0x7d0   : > { %v16072_v12 = vld [vmem:[#allocation4 + $0x32c] ss:$16 sps:$4 sm:$0xff]  }
 0x7d1   : > { %13157 = vmatpush1.bf16.msra.mxu0 %v15998_v28 }
 0x7d2   : > { %13110 = vmatpush1.bf16.msra.mxu1 %v15995_v14  ;;  %13158 = vmatprep.subr.bf16.mxu0 %v16006_v59  ;;  %v16127_v59 = vld [vmem:[#allocation5 + $0x60] ss:$8 sps:$4 sm:$0xff]  }
 0x7d3   : > { %13111 = vmatprep.subr.bf16.mxu1 %v16003_v32 }
 0x7d5   : > { %13159 = vmatpush1.bf16.msra.mxu0 %v16004_v60  ;;  %v16070_v60 = vld [vmem:[#allocation4 + $0x328] ss:$16 sps:$4 sm:$0xff]  }
 0x7d6   : > { %13112 = vmatpush1.bf16.msra.mxu1 %v16001_v18  ;;  %13160 = vmatprep.subr.bf16.mxu0 %v16012_v21  ;;  %v16132_v18 = vld [vmem:[#allocation5 + $0x54] ss:$8 sps:$4 sm:$0xff]  }
 0x7d7   : > { %13113 = vmatprep.subr.bf16.mxu1 %v16009_v56 }
 0x7d9   : > { %13161 = vmatpush1.bf16.msra.mxu0 %v16010_v5 }
 0x7da   : > { %13114 = vmatpush1.bf16.msra.mxu1 %v16007_v41  ;;  %13162 = vmatprep.subr.bf16.mxu0 %v16018_v4  ;;  %v16075_v41 = vld [vmem:[#allocation4 + $0x30c] ss:$16 sps:$4 sm:$0xff]  }
 0x7db   : > { %13115 = vmatprep.subr.bf16.mxu1 %v16015_v35 }
 0x7dd   : > { %13163 = vmatpush1.bf16.msra.mxu0 %v16016_v17 }
 0x7de   : > { %13116 = vmatpush1.bf16.msra.mxu1 %v16013_v22  ;;  %13164 = vmatprep.subr.bf16.mxu0 %v16024_v3  ;;  %v16073_v3 = vld [vmem:[#allocation4 + $0x308] ss:$16 sps:$4 sm:$0xff]  }
 0x7df   : > { %13117 = vmatprep.subr.bf16.mxu1 %v16021_v40  ;;  %v16135_v40 = vld [vmem:[#allocation5 + $0x44] ss:$8 sps:$4 sm:$0xff]  }
 0x7e1   : > { %13165 = vmatpush2.bf16.msra.mxu0 %v16022_v1 }
 0x7e2   : > { %13118 = vmatpush1.bf16.msra.mxu1 %v16019_v30  ;;  %13166 = vmatprep.subr.bf16.mxu0 %v16030_v46  ;;  %v16078_v30 = vld [vmem:[#allocation4 + $0x6ec] ss:$16 sps:$4 sm:$0xff]   ;;  %v16133_v46 = vld [vmem:[#allocation5 + $0x40] ss:$8 sps:$4 sm:$0xff]  }
 0x7e3   : > { %13119 = vmatprep.subr.bf16.mxu1 %v16027_v63  ;;  %v16076_v63 = vld [vmem:[#allocation4 + $0x6e8] ss:$16 sps:$4 sm:$0xff]  }
 0x7e5   : > { %13167 = vmatpush2.bf16.msra.mxu0 %v16028_v25  ;;  %v16081_v25 = vld [vmem:[#allocation4 + $0x6cc] ss:$16 sps:$4 sm:$0xff]  }
 0x7e6   : > { %13120 = vmatpush1.bf16.msra.mxu1 %v16025_v37  ;;  %13168 = vmatprep.subr.bf16.mxu0 %v16036_v0  ;;  %v16138_v37 = vld [vmem:[#allocation5 + $0x34] ss:$8 sps:$4 sm:$0xff]   ;;  %v16136_v0 = vld [vmem:[#allocation5 + $0x30] ss:$8 sps:$4 sm:$0xff]  }
 0x7e7   : > { %13121 = vmatprep.subr.bf16.mxu1 %v16033_v27  ;;  %v16079_v27 = vld [vmem:[#allocation4 + $0x6c8] ss:$16 sps:$4 sm:$0xff]  }
 0x7e9   : > { %13169 = vmatpush2.bf16.msra.mxu0 %v16034_v47  ;;  %v16141_v47 = vld [vmem:[#allocation5 + $0x24] ss:$8 sps:$4 sm:$0xff]  }
 0x7ea   : > { %13122 = vmatpush1.bf16.msra.mxu1 %v16031_v39  ;;  %13170 = vmatprep.subr.bf16.mxu0 %v16042_v11  ;;  %v16084_v39 = vld [vmem:[#allocation4 + $0x6ac] ss:$16 sps:$4 sm:$0xff]   ;;  %v16139_v11 = vld [vmem:[#allocation5 + $0x20] ss:$8 sps:$4 sm:$0xff]  }
 0x7eb   : > { %13123 = vmatprep.subr.bf16.mxu1 %v16039_v26  ;;  %v16082_v26 = vld [vmem:[#allocation4 + $0x6a8] ss:$16 sps:$4 sm:$0xff]  }
 0x7ed   : > { %13171 = vmatpush2.bf16.msra.mxu0 %v16040_v31  ;;  %v16144_v31 = vld [vmem:[#allocation5 + $0x14] ss:$8 sps:$4 sm:$0xff]  }
 0x7ee   : > { %13124 = vmatpush2.bf16.msra.mxu1 %v16037_v36  ;;  %13172 = vmatprep.subr.bf16.mxu0 %v16048_v20  ;;  %v16087_v36 = vld [vmem:[#allocation4 + $0x68c] ss:$16 sps:$4 sm:$0xff]   ;;  %v16085_v20 = vld [vmem:[#allocation4 + $0x688] ss:$16 sps:$4 sm:$0xff]  }
 0x7ef   : > { %13125 = vmatprep.subr.bf16.mxu1 %v16045_v38  ;;  %v16147_v38 = vld [vmem:[#allocation5 + $0x4] ss:$8 sps:$4 sm:$0xff]  }
 0x7f1   : > { %13173 = vmatpush2.bf16.msra.mxu0 %v16046_v2  ;;  %v16145_v2 = vld [vmem:[#allocation5] ss:$8 sps:$4 sm:$0xff]  }
 0x7f2   : > { %13126 = vmatpush2.bf16.msra.mxu1 %v16043_v6  ;;  %13174 = vmatprep.subr.bf16.mxu0 %v16054_v42  ;;  %v16088_v6 = vld [vmem:[#allocation4 + $0x668] ss:$16 sps:$4 sm:$0xff]   ;;  %v16150_v42 = vld [vmem:[#allocation5 + $0xf4] ss:$8 sps:$4 sm:$0xff]  }
 0x7f3   : > { %13127 = vmatprep.subr.bf16.mxu1 %v16051_v44  ;;  %v16093_v44 = vld [vmem:[#allocation4 + $0x64c] ss:$16 sps:$4 sm:$0xff]  }
 0x7f5   : > { %13175 = vmatpush2.bf16.msra.mxu0 %v16052_v33  ;;  %v16148_v33 = vld [vmem:[#allocation5 + $0xf0] ss:$8 sps:$4 sm:$0xff]  }
 0x7f6   : > { %13128 = vmatpush2.bf16.msra.mxu1 %v16049_v19  ;;  %13176 = vmatprep.subr.bf16.mxu0 %v16060_v23  ;;  %v16091_v19 = vld [vmem:[#allocation4 + $0x648] ss:$16 sps:$4 sm:$0xff]   ;;  %v16153_v23 = vld [vmem:[#allocation5 + $0xe4] ss:$8 sps:$4 sm:$0xff]  }
 0x7f7   : > { %13129 = vmatprep.subr.bf16.mxu1 %v16057_v16  ;;  %v16096_v16 = vld [vmem:[#allocation4 + $0x62c] ss:$16 sps:$4 sm:$0xff]  }
 0x7f9   : > { %13177 = vmatpush2.bf16.msra.mxu0 %v16058_v48  ;;  %v16151_v48 = vld [vmem:[#allocation5 + $0xe0] ss:$8 sps:$4 sm:$0xff]  }
 0x7fa   : > { %13130 = vmatpush2.bf16.msra.mxu1 %v16055_v49  ;;  %13178 = vmatprep.subr.bf16.mxu0 %v16066_v34  ;;  %v16094_v49 = vld [vmem:[#allocation4 + $0x628] ss:$16 sps:$4 sm:$0xff]   ;;  %v16156_v34 = vld [vmem:[#allocation5 + $0xd4] ss:$8 sps:$4 sm:$0xff]  }
 0x7fb   : > { %13131 = vmatprep.subr.bf16.mxu1 %v16063_v15  ;;  %v16099_v15 = vld [vmem:[#allocation4 + $0x60c] ss:$16 sps:$4 sm:$0xff]  }
 0x7fd   : > { %13179 = vmatpush2.bf16.msra.mxu0 %v16064_v43  ;;  %v16154_v43 = vld [vmem:[#allocation5 + $0xd0] ss:$8 sps:$4 sm:$0xff]  }
 0x7fe   : > { %13132 = vmatpush2.bf16.msra.mxu1 %v16061_v62  ;;  %13642 = vmatprep.subr.bf16.mxu0 %v16126_v29  ;;  %v16097_v62 = vld [vmem:[#allocation4 + $0x608] ss:$16 sps:$4 sm:$0xff]   ;;  %v16159_v29 = vld [vmem:[#allocation5 + $0xc4] ss:$8 sps:$4 sm:$0xff]  }
 0x7ff   : > { %13133 = vmatprep.subr.bf16.mxu1 %v16069_v54  ;;  %v16102_v54 = vld [vmem:[#allocation4 + $0x7ec] ss:$16 sps:$4 sm:$0xff]  }
 0x800   : > { %v12936_v45 = vpop.f32.mrf.mxu0  ;;  %13181 = vmatmul.mubr.bf16.vlgmr.msra.gmra.mxu0 %v17572_v53  ;;  %v16130_v53 = vld [vmem:[#allocation5 + $0x50] ss:$8 sps:$4 sm:$0xff]  }
 0x801   : > { %v12937_v28 = vadd.f32 %v12936_v45, %v11605_v50  ;;  %13643 = vmatpush1.bf16.msra.mxu0 %v16124_v13  ;;  %v16157_v50 = vld [vmem:[#allocation5 + $0xc0] ss:$8 sps:$4 sm:$0xff]   ;;  %v16165_v45 = vld [vmem:[#allocation5 + $0xa4] ss:$8 sps:$4 sm:$0xff]  }
 0x802   : > { %v12977_v14 = vpop.f32.mrf.mxu1  ;;  %13134 = vmatpush2.bf16.msra.mxu1 %v16067_v55  ;;  %v12938_v32 = vpop.f32.mrf.mxu0  ;;  %13644 = vmatprep.subr.bf16.mxu0 %v16129_v24  ;;  %v16100_v13 = vld [vmem:[#allocation4 + $0x7e8] ss:$16 sps:$4 sm:$0xff]   ;;  %v16162_v55 = vld [vmem:[#allocation5 + $0xb4] ss:$8 sps:$4 sm:$0xff]  }
 0x803   : > { %v17603_v21 = vadd.f32 %v12977_v14, %v12937_v28  ;;  %v12939_v56 = vadd.f32 %v12938_v32, %v11609_v10  ;;  %13135 = vmatprep.subr.bf16.mxu1 %v16072_v12  ;;  %v16105_v24 = vld [vmem:[#allocation4 + $0x7cc] ss:$16 sps:$4 sm:$0xff]   ;;  %v16160_v10 = vld [vmem:[#allocation5 + $0xb0] ss:$8 sps:$4 sm:$0xff]   ;;  %v16163_v14 = vld [vmem:[#allocation5 + $0xa0] ss:$8 sps:$4 sm:$0xff]  }
 0x804   : > { %v12979_v5 = vpop.f32.mrf.mxu1  ;;  %v12940_v4 = vpop.f32.mrf.mxu0  ;;  %v16103_v12 = vld [vmem:[#allocation4 + $0x7c8] ss:$16 sps:$4 sm:$0xff]   ;;  %v16108_v28 = vld [vmem:[#allocation4 + $0x7ac] ss:$16 sps:$4 sm:$0xff]  }
 0x805   : > { %v17605_v35 = vadd.f32 %v12979_v5, %v12939_v56  ;;  %13645 = vmatpush1.bf16.msra.mxu0 %v16127_v59  ;;  %v16106_v59 = vld [vmem:[#allocation4 + $0x7a8] ss:$16 sps:$4 sm:$0xff]   ;;  %v16168_v32 = vld [vmem:[#allocation5 + $0x94] ss:$8 sps:$4 sm:$0xff]   ;;  %v16171_v5 = vld [vmem:[#allocation5 + $0x84] ss:$8 sps:$4 sm:$0xff]  }
 0x806   : > { %v12981_v17 = vpop.f32.mrf.mxu1  ;;  %13136 = vmatpush2.bf16.msra.mxu1 %v16070_v60  ;;  %v12941_v22 = vpop.f32.mrf.mxu0  ;;  %13646 = vmatprep.subr.bf16.mxu0 %v16132_v18  ;;  %v16111_v60 = vld [vmem:[#allocation4 + $0x78c] ss:$16 sps:$4 sm:$0xff]   ;;  %v16166_v18 = vld [vmem:[#allocation5 + $0x90] ss:$8 sps:$4 sm:$0xff]   ;;  %v16169_v4 = vld [vmem:[#allocation5 + $0x80] ss:$8 sps:$4 sm:$0xff]  }
 0x807   : > { %13137 = vmatprep.subr.bf16.mxu1 %v16075_v41  ;;  %v16109_v56 = vld [vmem:[#allocation4 + $0x788] ss:$16 sps:$4 sm:$0xff]   ;;  %v16114_v41 = vld [vmem:[#allocation4 + $0x76c] ss:$16 sps:$4 sm:$0xff]  }
 0x808   : > { %v12982_v1 = vpop.f32.mrf.mxu1  ;;  %v16112_v17 = vld [vmem:[#allocation4 + $0x768] ss:$16 sps:$4 sm:$0xff]  }
 0x809   : > { %13647 = vmatpush1.bf16.msra.mxu0 %v16130_v53  ;;  %v16117_v53 = vld [vmem:[#allocation4 + $0x74c] ss:$16 sps:$4 sm:$0xff]   ;;  %v16115_v22 = vld [vmem:[#allocation4 + $0x748] ss:$16 sps:$4 sm:$0xff]  }
 0x80a   : > { %13138 = vmatpush2.bf16.msra.mxu1 %v16073_v3  ;;  %13648 = vmatprep.subr.bf16.mxu0 %v16135_v40  ;;  %v16120_v3 = vld [vmem:[#allocation4 + $0x72c] ss:$16 sps:$4 sm:$0xff]  }
 0x80b   : > { %13189 = vmatprep.subr.bf16.mxu1 %v16078_v30 }
 0x80d   : > { %13140 = vmatmul.mubr.bf16.vlgmr.msra.gmra.mxu1 %v17556_v8  ;;  %13649 = vmatpush1.bf16.msra.mxu0 %v16133_v46  ;;  %v16142_v8 = vld [vmem:[#allocation5 + $0x10] ss:$8 sps:$4 sm:$0xff]  }
 0x80e   : > { %13190 = vmatpush1.bf16.msra.mxu1 %v16076_v63  ;;  %13221 = vmatprep.mubr.bf16.mxu1 %v17589_v61  ;;  %v16090_v61 = vld [vmem:[#allocation4 + $0x66c] ss:$16 sps:$4 sm:$0xff]   ;;  %v16118_v46 = vld [vmem:[#allocation4 + $0x728] ss:$16 sps:$4 sm:$0xff]  }
 0x80f   : > { %13191 = vmatprep.subr.bf16.mxu1 %v16081_v25  ;;  %13650 = vmatprep.subr.bf16.mxu0 %v16138_v37  ;;  %v16123_v25 = vld [vmem:[#allocation4 + $0x70c] ss:$16 sps:$4 sm:$0xff]  }
 0x811   : > { %13651 = vmatpush1.bf16.msra.mxu0 %v16136_v0 }
 0x812   : > { %13192 = vmatpush1.bf16.msra.mxu1 %v16079_v27  ;;  %13652 = vmatprep.subr.bf16.mxu0 %v16141_v47  ;;  %v16121_v27 = vld [vmem:[#allocation4 + $0x708] ss:$16 sps:$4 sm:$0xff]  }
 0x813   : > { %13193 = vmatprep.subr.bf16.mxu1 %v16084_v39  ;;  %v16172_v47 = vld [vmem:[#allocation5 + $0x170] ss:$8 sps:$4 sm:$0xff]   ;;  %v16174_v39 = vld [vmem:[#allocation5 + $0x174] ss:$8 sps:$4 sm:$0xff]  }
 0x815   : > { %13653 = vmatpush1.bf16.msra.mxu0 %v16139_v11  ;;  %v16175_v11 = vld [vmem:[#allocation5 + $0x160] ss:$8 sps:$4 sm:$0xff]  }
 0x816   : > { %13194 = vmatpush1.bf16.msra.mxu1 %v16082_v26  ;;  %13654 = vmatprep.subr.bf16.mxu0 %v16144_v31  ;;  %v16180_v26 = vld [vmem:[#allocation5 + $0x154] ss:$8 sps:$4 sm:$0xff]   ;;  %v16183_v31 = vld [vmem:[#allocation5 + $0x144] ss:$8 sps:$4 sm:$0xff]  }
 0x817   : > { %13195 = vmatprep.subr.bf16.mxu1 %v16087_v36  ;;  %v16181_v36 = vld [vmem:[#allocation5 + $0x140] ss:$8 sps:$4 sm:$0xff]  }
 0x819   : > { %13655 = vmatpush1.bf16.msra.mxu0 %v16142_v8  ;;  %v16186_v8 = vld [vmem:[#allocation5 + $0x134] ss:$8 sps:$4 sm:$0xff]  }
 0x81a   : > { %13196 = vmatpush1.bf16.msra.mxu1 %v16085_v20  ;;  %13656 = vmatprep.subr.bf16.mxu0 %v16147_v38  ;;  %v16184_v20 = vld [vmem:[#allocation5 + $0x130] ss:$8 sps:$4 sm:$0xff]   ;;  %v16187_v38 = vld [vmem:[#allocation5 + $0x120] ss:$8 sps:$4 sm:$0xff]  }
 0x81b   : > { %13197 = vmatprep.subr.bf16.mxu1 %v16090_v61  ;;  %v16192_v61 = vld [vmem:[#allocation5 + $0x114] ss:$8 sps:$4 sm:$0xff]  }
 0x81d   : > { %13657 = vmatpush1.bf16.msra.mxu0 %v16145_v2  ;;  %v16190_v2 = vld [vmem:[#allocation5 + $0x110] ss:$8 sps:$4 sm:$0xff]  }
 0x81e   : > { %13198 = vmatpush1.bf16.msra.mxu1 %v16088_v6  ;;  %13658 = vmatprep.subr.bf16.mxu0 %v16150_v42  ;;  %v16195_v6 = vld [vmem:[#allocation5 + $0x104] ss:$8 sps:$4 sm:$0xff]   ;;  %v16193_v42 = vld [vmem:[#allocation5 + $0x100] ss:$8 sps:$4 sm:$0xff]  }
 0x81f   : > { %13199 = vmatprep.subr.bf16.mxu1 %v16093_v44  ;;  %v16198_v44 = vld [vmem:[#allocation5 + $0x1f4] ss:$8 sps:$4 sm:$0xff]  }
 0x821   : > { %13659 = vmatpush2.bf16.msra.mxu0 %v16148_v33  ;;  %v16196_v33 = vld [vmem:[#allocation5 + $0x1f0] ss:$8 sps:$4 sm:$0xff]  }
 0x822   : > { %13200 = vmatpush1.bf16.msra.mxu1 %v16091_v19  ;;  %13660 = vmatprep.subr.bf16.mxu0 %v16153_v23  ;;  %v16201_v19 = vld [vmem:[#allocation5 + $0x1e4] ss:$8 sps:$4 sm:$0xff]   ;;  %v16199_v23 = vld [vmem:[#allocation5 + $0x1e0] ss:$8 sps:$4 sm:$0xff]  }
 0x823   : > { %13201 = vmatprep.subr.bf16.mxu1 %v16096_v16  ;;  %v16204_v16 = vld [vmem:[#allocation5 + $0x1d4] ss:$8 sps:$4 sm:$0xff]  }
 0x825   : > { %13661 = vmatpush2.bf16.msra.mxu0 %v16151_v48  ;;  %v16202_v48 = vld [vmem:[#allocation5 + $0x1d0] ss:$8 sps:$4 sm:$0xff]  }
 0x826   : > { %13202 = vmatpush1.bf16.msra.mxu1 %v16094_v49  ;;  %13662 = vmatprep.subr.bf16.mxu0 %v16156_v34  ;;  %v16207_v49 = vld [vmem:[#allocation5 + $0x1c4] ss:$8 sps:$4 sm:$0xff]   ;;  %v16205_v34 = vld [vmem:[#allocation5 + $0x1c0] ss:$8 sps:$4 sm:$0xff]  }
 0x827   : > { %13203 = vmatprep.subr.bf16.mxu1 %v16099_v15  ;;  %v16210_v15 = vld [vmem:[#allocation5 + $0x1b4] ss:$8 sps:$4 sm:$0xff]  }
 0x829   : > { %13663 = vmatpush2.bf16.msra.mxu0 %v16154_v43 }
 0x82a   : > { %13204 = vmatpush1.bf16.msra.mxu1 %v16097_v62  ;;  %13664 = vmatprep.subr.bf16.mxu0 %v16159_v29  ;;  %v16208_v29 = vld [vmem:[#allocation5 + $0x1b0] ss:$8 sps:$4 sm:$0xff]  }
 0x82b   : > { %13205 = vmatprep.subr.bf16.mxu1 %v16102_v54  ;;  %v16213_v54 = vld [vmem:[#allocation5 + $0x1a4] ss:$8 sps:$4 sm:$0xff]  }
 0x82d   : > { %13665 = vmatpush2.bf16.msra.mxu0 %v16157_v50 }
 0x82e   : > { %13206 = vmatpush2.bf16.msra.mxu1 %v16100_v13  ;;  %13666 = vmatprep.subr.bf16.mxu0 %v16162_v55  ;;  %v16211_v55 = vld [vmem:[#allocation5 + $0x1a0] ss:$8 sps:$4 sm:$0xff]  }
 0x82f   : > { %13207 = vmatprep.subr.bf16.mxu1 %v16105_v24 }
 0x831   : > { %13667 = vmatpush2.bf16.msra.mxu0 %v16160_v10 }
 0x832   : > { %13208 = vmatpush2.bf16.msra.mxu1 %v16103_v12  ;;  %13668 = vmatprep.subr.bf16.mxu0 %v16165_v45  ;;  %v16216_v45 = vld [vmem:[#allocation5 + $0x194] ss:$8 sps:$4 sm:$0xff]  }
 0x833   : > { %13209 = vmatprep.subr.bf16.mxu1 %v16108_v28 }
 0x835   : > { %13669 = vmatpush2.bf16.msra.mxu0 %v16163_v14 }
 0x836   : > { %13210 = vmatpush2.bf16.msra.mxu1 %v16106_v59  ;;  %13670 = vmatprep.subr.bf16.mxu0 %v16168_v32  ;;  %v16214_v59 = vld [vmem:[#allocation5 + $0x190] ss:$8 sps:$4 sm:$0xff]  }
 0x837   : > { %13211 = vmatprep.subr.bf16.mxu1 %v16111_v60 }
 0x839   : > { %13671 = vmatpush2.bf16.msra.mxu0 %v16166_v18 }
 0x83a   : > { %13212 = vmatpush2.bf16.msra.mxu1 %v16109_v56  ;;  %13672 = vmatprep.subr.bf16.mxu0 %v16171_v5  ;;  %v16217_v5 = vld [vmem:[#allocation5 + $0x180] ss:$8 sps:$4 sm:$0xff]  }
 0x83b   : > { %13213 = vmatprep.subr.bf16.mxu1 %v16114_v41  ;;  %v16219_v41 = vld [vmem:[#allocation5 + $0x184] ss:$8 sps:$4 sm:$0xff]  }
 0x83d   : > { %13673 = vmatpush2.bf16.msra.mxu0 %v16169_v4 }
 0x83e   : > { %13214 = vmatpush2.bf16.msra.mxu1 %v16112_v17 }
 0x83f   : > { %13215 = vmatprep.subr.bf16.mxu1 %v16117_v53 }
 0x840   : > { %v13018_v40 = vpop.f32.mrf.mxu0 }
 0x841   : > { %v17610_v1 = vadd.f32 %v13018_v40, %v17603_v21  ;;  %v16177_v21 = vld [vmem:[#allocation5 + $0x164] ss:$8 sps:$4 sm:$0xff]  }
 0x842   : > { %13216 = vmatpush2.bf16.msra.mxu1 %v16115_v22  ;;  %v13020_v30 = vpop.f32.mrf.mxu0 }
 0x843   : > { %v17613_v63 = vadd.f32 %v13020_v30, %v17605_v35  ;;  %13217 = vmatprep.subr.bf16.mxu1 %v16120_v3  ;;  %v16178_v35 = vld [vmem:[#allocation5 + $0x150] ss:$8 sps:$4 sm:$0xff]   ;;  %v11613_v30 = vrot.slane %v17596_v9, %v17242_v57 }
 0x844   : > { %v13022_v37 = vpop.f32.mrf.mxu0 }
 0x846   : > { %13218 = vmatpush2.bf16.msra.mxu1 %v16118_v46  ;;  %v13023_v0 = vpop.f32.mrf.mxu0  ;;  %v11617_v46 = vrot.slane %v17596_v9, %v17245_v58 }
 0x847   : > { %13219 = vmatprep.subr.bf16.mxu1 %v16123_v25 }
 0x84a   : > { %13220 = vmatpush2.bf16.msra.mxu1 %v16121_v27 }
 0x84b   : > { %13683 = vmatprep.subr.bf16.mxu1 %v16174_v39 }
 0x84d   : > { %13222 = vmatmul.mubr.bf16.vlgmr.msra.gmra.mxu1 %v17591_v7  ;;  %v16189_v7 = vld [vmem:[#allocation5 + $0x124] ss:$8 sps:$4 sm:$0xff]  }
 0x84e   : > { %13684 = vmatpush1.bf16.msra.mxu1 %v16172_v47 }
 0x84f   : > { %13685 = vmatprep.subr.bf16.mxu1 %v16177_v21 }
 0x852   : > { %13686 = vmatpush1.bf16.msra.mxu1 %v16175_v11 }
 0x853   : > { %13687 = vmatprep.subr.bf16.mxu1 %v16180_v26 }
 0x856   : > { %13688 = vmatpush1.bf16.msra.mxu1 %v16178_v35 }
 0x857   : > { %13689 = vmatprep.subr.bf16.mxu1 %v16183_v31 }
 0x85a   : > { %13690 = vmatpush1.bf16.msra.mxu1 %v16181_v36 }
 0x85b   : > { %13691 = vmatprep.subr.bf16.mxu1 %v16186_v8 }
 0x85e   : > { %13692 = vmatpush1.bf16.msra.mxu1 %v16184_v20 }
 0x85f   : > { %13693 = vmatprep.subr.bf16.mxu1 %v16189_v7 }
 0x862   : > { %13694 = vmatpush1.bf16.msra.mxu1 %v16187_v38 }
 0x863   : > { %13695 = vmatprep.subr.bf16.mxu1 %v16192_v61 }
 0x866   : > { %13696 = vmatpush1.bf16.msra.mxu1 %v16190_v2 }
 0x867   : > { %13697 = vmatprep.subr.bf16.mxu1 %v16195_v6 }
 0x86a   : > { %13698 = vmatpush1.bf16.msra.mxu1 %v16193_v42 }
 0x86b   : > { %13699 = vmatprep.subr.bf16.mxu1 %v16198_v44 }
 0x86e   : > { %13700 = vmatpush2.bf16.msra.mxu1 %v16196_v33 }
 0x86f   : > { %13701 = vmatprep.subr.bf16.mxu1 %v16201_v19  ;;  %v13310_v19 = vld [vmem:[#allocation15] sm:$0x3] }
 0x872   : > { %13702 = vmatpush2.bf16.msra.mxu1 %v16199_v23  ;;  %v13315_v23 = vrot.slane %v13310_v19, %v17236_v51 }
 0x873   : > { %13703 = vmatprep.subr.bf16.mxu1 %v16204_v16  ;;  %v13319_v16 = vrot.slane %v13310_v19, %v17239_v52 }
 0x876   : > { %13704 = vmatpush2.bf16.msra.mxu1 %v16202_v48 }
 0x877   : > { %13705 = vmatprep.subr.bf16.mxu1 %v16207_v49  ;;  %v13730_v49 = vld [vmem:[#allocation16] sm:$0x3] }
 0x87a   : > { %13706 = vmatpush2.bf16.msra.mxu1 %v16205_v34 }
 0x87b   : > { %13707 = vmatprep.subr.bf16.mxu1 %v16210_v15 }
 0x87e   : > { %13708 = vmatpush2.bf16.msra.mxu1 %v16208_v29  ;;  %v13735_v29 = vrot.slane %v13730_v49, %v17236_v51 }
 0x87f   : > { %13709 = vmatprep.subr.bf16.mxu1 %v16213_v54 }
 0x880   : > { %v13100_v43 = vpop.f32.mrf.mxu0 }
 0x882   : > { %v13102_v62 = vpop.f32.mrf.mxu0  ;;  %13710 = vmatpush2.bf16.msra.mxu1 %v16211_v55  ;;  %v13739_v55 = vrot.slane %v13730_v49, %v17239_v52 }
 0x883   : > { %13711 = vmatprep.subr.bf16.mxu1 %v16216_v45  ;;  %v13103_v37 = vadd.f32 %v13102_v62, %v11617_v46 }
 0x884   : > { %v13104_v50 = vpop.f32.mrf.mxu0 }
 0x886   : > { %v13105_v13 = vpop.f32.mrf.mxu0  ;;  %13712 = vmatpush2.bf16.msra.mxu1 %v16214_v59 }
 0x887   : > { %13713 = vmatprep.subr.bf16.mxu1 %v16219_v41 }
 0x88a   : > { %13714 = vmatpush2.bf16.msra.mxu1 %v16217_v5 }
 0x88d   : > { %v13059_v24 = vpop.f32.mrf.mxu1 }
 0x88e   : > { %v13060_v10 = vadd.f32 %v13059_v24, %v17610_v1 }
 0x88f   : > { %v13061_v12 = vpop.f32.mrf.mxu1 }
 0x890   : > { %vm13230_vm12 = vcmp.gt.f32.partialorder %v13060_v10, 0.0  ;;  %v13234_v28 = vmul.f32 0.2, %v13060_v10  ;;  %v13062_v14 = vadd.f32 %v13061_v12, %v17613_v63  ;;  %v13101_v63 = vadd.f32 %v13100_v43, %v11613_v30 }
 0x891   : > { %v13063_v32 = vpop.f32.mrf.mxu1 }
 0x892   : > { %vm13231_vm13 = vcmp.gt.f32.partialorder %v13062_v14, 0.0  ;;  %v13235_v60 = vmul.f32 0.2, %v13062_v14  ;;  %v13238_v18 = vsel %vm13230_vm12, %v13060_v10, %v13234_v28 }
 0x893   : > { %v13064_v56 = vpop.f32.mrf.mxu1  ;;  %v13242_v53 = vpack.c.bf16 %v13238_v18, %v13238_v18  ;;  %v15629_v18 = vld [vmem:[#allocation7] ss:$0 sm:$0xff] }
 0x894   : > { %v13239_v4 = vsel %vm13231_vm13, %v13062_v14, %v13235_v60 }
 0x895   : > { %v13243_v17 = vpack.c.bf16 %v13239_v4, %v13239_v4 }
 0x897   : > { %13674 = vmatprep.mubr.bf16.mxu0 %v13243_v17 }
 0x898   : > { %13675 = vmatmul.mubr.bf16.vlgmr.msra.gmra.mxu0 %v13242_v53 }
 0x8c0   : > { %v13182_v22 = vpop.f32.mrf.mxu0 }
 0x8c2   : > { %v13184_v3 = vpop.f32.mrf.mxu0 }
 0x8c4   : > { %v13186_v40 = vpop.f32.mrf.mxu0 }
 0x8c6   : > { %v13187_v1 = vpop.f32.mrf.mxu0 }
 0x8cd   : > { %v13141_v25 = vpop.f32.mrf.mxu1 }
 0x8ce   : > { %v13142_v0 = vadd.f32 %v13141_v25, %v13101_v63 }
 0x8cf   : > { %v13143_v27 = vpop.f32.mrf.mxu1 }
 0x8d0   : > { %v13144_v47 = vadd.f32 %v13143_v27, %v13103_v37  ;;  %v13183_v39 = vadd.f32 %v13182_v22, %v13142_v0 }
 0x8d1   : > { %v13145_v21 = vpop.f32.mrf.mxu1 }
 0x8d2   : > { %v13185_v11 = vadd.f32 %v13184_v3, %v13144_v47 }
 0x8d3   : > { %v13146_v26 = vpop.f32.mrf.mxu1 }
 0x90d   : > { %v13223_v35 = vpop.f32.mrf.mxu1 }
 0x90e   : > { %v13224_v31 = vadd.f32 %v13223_v35, %v13183_v39 }
 0x90f   : > { %v13225_v36 = vpop.f32.mrf.mxu1 }
 0x910   : > { %vm13232_vm14 = vcmp.gt.f32.partialorder %v13224_v31, 0.0  ;;  %v13236_v8 = vmul.f32 0.2, %v13224_v31  ;;  %v13226_v20 = vadd.f32 %v13225_v36, %v13185_v11 }
 0x911   : > { %v13227_v57 = vpop.f32.mrf.mxu1 }
 0x912   : > { %vm13233_vm15 = vcmp.gt.f32.partialorder %v13226_v20, 0.0  ;;  %v13237_v7 = vmul.f32 0.2, %v13226_v20  ;;  %v13240_v58 = vsel %vm13232_vm14, %v13224_v31, %v13236_v8 }
 0x913   : > { %v13228_v9 = vpop.f32.mrf.mxu1  ;;  %v13244_v2 = vpack.c.bf16 %v13240_v58, %v13240_v58 }
 0x914   : > { %v13241_v38 = vsel %vm13233_vm15, %v13226_v20, %v13237_v7 }
 0x915   : > { %v13245_v61 = vpack.c.bf16 %v13241_v38, %v13241_v38 }
 0x917   : > { %13715 = vmatprep.mubr.bf16.mxu1 %v13245_v61 }
 0x918   : > { %13716 = vmatmul.mubr.bf16.vlgmr.msra.gmra.mxu1 %v13244_v2 }
 0x958   : > { %v13676_v6 = vpop.f32.mrf.mxu0 }
 0x959   : > { %v13677_v48 = vadd.f32 %v13676_v6, %v13315_v23 }
 0x95a   : > { %v13678_v42 = vpop.f32.mrf.mxu0 }
 0x95b   : > { %v13679_v15 = vadd.f32 %v13678_v42, %v13319_v16 }
 0x95c   : > { %v13680_v44 = vpop.f32.mrf.mxu0 }
 0x95e   : > { %v13681_v33 = vpop.f32.mrf.mxu0 }
 0x9d8   : > { %v13717_v34 = vpop.f32.mrf.mxu1 }
 0x9d9   : > { %v13718_v43 = vadd.f32 %v13717_v34, %v13677_v48 }
 0x9da   : > { %v13719_v62 = vpop.f32.mrf.mxu1 }
 0x9db   : > { %vm13724_vm0 = vcmp.gt.f32.partialorder %v13718_v43, 0.0  ;;  %v13726_v54 = vmul.f32 0.2, %v13718_v43  ;;  %v13720_v50 = vadd.f32 %v13719_v62, %v13679_v15 }
 0x9dc   : > { %v13721_v13 = vpop.f32.mrf.mxu1 }
 0x9dd   : > { %vm13725_vm1 = vcmp.gt.f32.partialorder %v13720_v50, 0.0  ;;  %v13727_v24 = vmul.f32 0.2, %v13720_v50  ;;  %v13728_v10 = vsel %vm13724_vm0, %v13718_v43, %v13726_v54 }
 0x9de   : > { %v13722_v12 = vpop.f32.mrf.mxu1  ;;  %v13742_v45 = vmul.f32 %v13735_v29, %v13728_v10 }
 0x9df   : > { %v13729_v28 = vsel %vm13725_vm1, %v13720_v50, %v13727_v24 }
 0x9e0   : > { %v13743_v14 = vmul.f32 %v13739_v55, %v13729_v28  ;;  %v13745_v59 = vsel %vm13744_vm2, %v13742_v45, 0.0 }
 0x9e2   : > { %v13746_v32 = vsel %vm13744_vm2, %v13743_v14, 0.0 }
 0x9e3   : > { %v13747_v60 = vadd.f32 %v13746_v32, %v13745_v59 }
 0x9e5   : > { %13748 = vadd.xlane.f32.xlu0 %v13747_v60 }
 0xa6e   : > { %v13749_v51 = vpop.xlane.xlu0 %13748 }
 0xa6f   : > { %v13757_v56 = vadd.f32 %v15629_v18, %v13749_v51 }
 0xa71   : > { %v15630_v5 = vmul.f32 -1.442695, %v13757_v56 }
 0xa73   : > { %16220 = vpow2.f32 %v15630_v5 }
 0xa80   : > { %v16221_v41 = vpop.eup %16220 }
 0xa81   : > { %v13761_v4 = vadd.f32 1.0, %v16221_v41 }
 0xa83   : > { %16222 = vrcp.f32 %v13761_v4 }
 0xa90   : > { %v16223_v52 = vpop.eup %16222 }
 0xa91   : > { %13765 = vst.msk [vmem:[%s17653_s11] sm:$0x3] %vm13764_vm3, %v16223_v52 }
 0xa92 PF: > { %p26_p1 = scmp.ge.s32.totalorder %s16668_s13, 4   ;;  %s17672_s19 = smov %s16489_s20 }
 0xa93   : > { %s17673_s20 = smov %s16493_s21  ;;  %s17674_s21 = smov %s16679_s23 }
 0xa94   : > { %s17675_s22 = smov %s16668_s13  ;;  %28 = sbr.rel (!%p26_p1) target bundleno = 9 (0x9), region = 137 }
 0xa99   :  { %13777 = vsyncpa [#allocation9], 1 }
 0xa9a   :  { %13779 = vsyncpa [#allocation9 + $0x1], 1 }
 0xa9b   :  { %13780 = vsyncpa [#allocation11], 1 }
 0xa9c   :  { %13781 = vsyncpa [#allocation14], 1 }
 0xa9d   :  { %13782 = vsyncpa [#allocation17], 1 }
 0xa9e   :  { %13783 = vsyncmov [#allocation6] }
 0xaa1   :  { %s13784_s25 = vpop.sfrf %13783 }
 0xaa2   :  { %p15633_p4 = scmp.ne.s32.totalorder %s13784_s25, 0 }
 0xaa4   :  { %13788 = shalt.err (%p15633_p4)  }
 0xaa5   :  { %13790 = vsyncmov [#allocation6 + $0x1] }
 0xaa8   :  { %s13791_s22 = vpop.sfrf %13790 }
 0xaa9   :  { %p15634_p3 = scmp.ne.s32.totalorder %s13791_s22, 0 }
 0xaab   :  { %13795 = shalt.err (%p15634_p3)  }
 0xaac   :  { %13797 = vsyncmov [#allocation6 + $0x2] }
 0xaaf   :  { %s13798_s14 = vpop.sfrf %13797 }
 0xab0   :  { %p15635_p0 = scmp.ne.s32.totalorder %s13798_s14, 0 }
 0xab2   :  { %13802 = shalt.err (%p15635_p0)  }

</bundles_post_ra>
